<compile_context>
chip_gen: v7x
topology: tpu7x:2x2x1
jax: 0.10.0
libtpu: 0.0.40
codegen_flags: <defaults>
</compile_context>

<pallas_src>
import jax
import jax.numpy as jnp
import numpy as np
from jax import lax
from jax.experimental import pallas as pl
from jax.experimental.pallas import tpu as pltpu


# ----------------------------- Pallas kernels ------------------------------ #

def _conv_block_kernel(xp_ref, w1_ref, b1_ref, w2_ref, b2_ref, o_ref,
                       y1_ref, p1_ref, pb_ref, y2_ref):
    """Fused conv1+ReLU+pool1+conv2+ReLU+pool2 for one image, all VMEM-resident.

    xp_ref: (1, 3, 34*32, 3) bf16  kw-shifted, row-flattened padded-image panels
    w1_ref: (9, 3, 16)       bf16  conv1 taps, indexed [kh*3+kw] -> (cin, cout)
    b1_ref: (1, 16)          f32
    w2_ref: (9, 16, 32)      bf16  conv2 taps
    b2_ref: (1, 32)          f32
    o_ref : (1, 8, 8, 32)    bf16  pooled conv2 features (NHWC)
    scratch: y1_ref (32,32,16) f32, p1_ref (18,18,16) f32,
             pb_ref (3, 18*16, 16) bf16, y2_ref (16,16,32) f32
    """
    # ---- conv1 (3x3, pad=1) + bias + ReLU: 9 aligned-panel matmuls ----
    acc1 = None
    for kh in range(3):
        for kw in range(3):
            patch = xp_ref[0, kw, pl.ds(kh * 32, 1024), :]        # (1024, 3) bf16
            part = jnp.dot(patch, w1_ref[kh * 3 + kw],
                           preferred_element_type=jnp.float32)
            acc1 = part if acc1 is None else acc1 + part
    y1 = jnp.maximum(acc1 + b1_ref[...], 0.0)                     # (1024, 16) f32
    y1_ref[...] = y1.reshape(32, 32, 16)

    # ---- maxpool 2x2 stride 2, written into zero-padded conv2 input ----
    p1_ref[...] = jnp.zeros_like(p1_ref)
    p00 = y1_ref[pl.ds(0, 16, 2), pl.ds(0, 16, 2), :]
    p01 = y1_ref[pl.ds(0, 16, 2), pl.ds(1, 16, 2), :]
    p10 = y1_ref[pl.ds(1, 16, 2), pl.ds(0, 16, 2), :]
    p11 = y1_ref[pl.ds(1, 16, 2), pl.ds(1, 16, 2), :]
    p1_ref[1:17, 1:17, :] = jnp.maximum(jnp.maximum(p00, p01),
                                        jnp.maximum(p10, p11))

    # ---- stage conv2 kw-shifted bf16 panels once (casts hoisted out of taps) ----
    for kw in range(3):
        band = p1_ref[:, kw:kw + 16, :]                           # (18, 16, 16) f32
        pb_ref[kw] = band.reshape(18 * 16, 16).astype(pb_ref.dtype)

    # ---- conv2 (3x3, pad=1) + bias + ReLU: 9 aligned-panel matmuls ----
    acc2 = None
    for kh in range(3):
        for kw in range(3):
            patch = pb_ref[kw, pl.ds(kh * 16, 256), :]            # (256, 16) bf16
            part = jnp.dot(patch, w2_ref[kh * 3 + kw],
                           preferred_element_type=jnp.float32)
            acc2 = part if acc2 is None else acc2 + part
    y2 = jnp.maximum(acc2 + b2_ref[...], 0.0)                     # (256, 32) f32
    y2_ref[...] = y2.reshape(16, 16, 32)

    # ---- maxpool 2x2 stride 2 -> (8, 8, 32) features ----
    q00 = y2_ref[pl.ds(0, 8, 2), pl.ds(0, 8, 2), :]
    q01 = y2_ref[pl.ds(0, 8, 2), pl.ds(1, 8, 2), :]
    q10 = y2_ref[pl.ds(1, 8, 2), pl.ds(0, 8, 2), :]
    q11 = y2_ref[pl.ds(1, 8, 2), pl.ds(1, 8, 2), :]
    feat = jnp.maximum(jnp.maximum(q00, q01), jnp.maximum(q10, q11))
    o_ref[0] = feat.astype(o_ref.dtype)


def _fc_kernel(x_ref, w3_ref, b3_ref, w4_ref, b4_ref, o_ref):
    """Fused fc1 + bias + ReLU + fc2 + bias over the whole batch."""
    h = jnp.dot(x_ref[...], w3_ref[...], preferred_element_type=jnp.float32)
    h = jnp.maximum(h + b3_ref[...], 0.0)
    out = jnp.dot(h.astype(w4_ref.dtype), w4_ref[...],
                  preferred_element_type=jnp.float32)
    o_ref[...] = (out + b4_ref[...]).astype(o_ref.dtype)


# ------------------------------- Wrappers ---------------------------------- #

def conv_features(x_panels, kp):
    """x_panels: (B, 3, 34*32, 3) bf16 -> (B, 8, 8, 32) bf16 pooled conv2 features."""
    B = x_panels.shape[0]
    return pl.pallas_call(
        _conv_block_kernel,
        out_shape=jax.ShapeDtypeStruct((B, 8, 8, 32), jnp.bfloat16),
        grid_spec=pltpu.PrefetchScalarGridSpec(
            num_scalar_prefetch=0,
            grid=(B,),
            in_specs=[
                pl.BlockSpec((1, 3, 34 * 32, 3), lambda b: (b, 0, 0, 0)),
                pl.BlockSpec((9, 3, 16), lambda b: (0, 0, 0)),
                pl.BlockSpec((1, 16), lambda b: (0, 0)),
                pl.BlockSpec((9, 16, 32), lambda b: (0, 0, 0)),
                pl.BlockSpec((1, 32), lambda b: (0, 0)),
            ],
            out_specs=pl.BlockSpec((1, 8, 8, 32), lambda b: (b, 0, 0, 0)),
            scratch_shapes=[
                pltpu.VMEM((32, 32, 16), jnp.float32),    # conv1 output
                pltpu.VMEM((18, 18, 16), jnp.float32),    # padded pool1 output
                pltpu.VMEM((3, 18 * 16, 16), jnp.bfloat16),  # conv2 shifted panels
                pltpu.VMEM((16, 16, 32), jnp.float32),    # conv2 output
            ],
        ),
        compiler_params=pltpu.CompilerParams(
            dimension_semantics=("parallel",)),
    )(x_panels, kp["w1"], kp["b1"], kp["w2"], kp["b2"])


def fc_head(feats, kp):
    """feats: (B, 2048) bf16 -> logits (B, 10) f32."""
    B, K = feats.shape
    return pl.pallas_call(
        _fc_kernel,
        out_shape=jax.ShapeDtypeStruct((B, 10), jnp.float32),
        grid_spec=pltpu.PrefetchScalarGridSpec(
            num_scalar_prefetch=0,
            grid=(1,),
            in_specs=[
                pl.BlockSpec((B, K), lambda i: (0, 0)),
                pl.BlockSpec((K, 128), lambda i: (0, 0)),
                pl.BlockSpec((1, 128), lambda i: (0, 0)),
                pl.BlockSpec((128, 10), lambda i: (0, 0)),
                pl.BlockSpec((1, 10), lambda i: (0, 0)),
            ],
            out_specs=pl.BlockSpec((B, 10), lambda i: (0, 0)),
        ),
        compiler_params=pltpu.CompilerParams(
            dimension_semantics=("arbitrary",)),
    )(feats, kp["w3"], kp["b3"], kp["w4"], kp["b4"])


def net_forward(x_nchw, kp):
    B = x_nchw.shape[0]
    x = jnp.transpose(x_nchw, (0, 2, 3, 1))                       # NHWC
    xp = jnp.pad(x, ((0, 0), (1, 1), (1, 1), (0, 0)))             # (B, 34, 34, 3)
    # Stage the three kw-shifted, row-flattened bf16 panels for conv1 here so the
    # kernel only ever does aligned bf16 loads (fuses with the transpose/pad above).
    panels = jnp.stack([xp[:, :, 0:32, :], xp[:, :, 1:33, :], xp[:, :, 2:34, :]],
                       axis=1)                                    # (B, 3, 34, 32, 3)
    panels = panels.reshape(B, 3, 34 * 32, 3).astype(jnp.bfloat16)
    feats = conv_features(panels, kp)                             # (B, 8, 8, 32) bf16
    feats = feats.reshape(B, 32 * 8 * 8)                          # free NHWC flatten
    return fc_head(feats, kp)                                     # (B, 10) f32


# ----------------------------- Param handling ------------------------------ #

def init_params(key):
    """PyTorch-layout parameters (OIHW convs, fc weights as (K, N))."""
    ks = jax.random.split(key, 8)

    def uniform(k, shape, fan_in):
        bound = 1.0 / np.sqrt(fan_in)
        return jax.random.uniform(k, shape, jnp.float32, -bound, bound)

    return dict(
        conv1_w=uniform(ks[0], (16, 3, 3, 3), 3 * 9),
        conv1_b=uniform(ks[1], (16,), 3 * 9),
        conv2_w=uniform(ks[2], (32, 16, 3, 3), 16 * 9),
        conv2_b=uniform(ks[3], (32,), 16 * 9),
        fc1_w=uniform(ks[4], (32 * 8 * 8, 128), 32 * 8 * 8),   # rows in NCHW (c,h,w) order
        fc1_b=uniform(ks[5], (128,), 32 * 8 * 8),
        fc2_w=uniform(ks[6], (128, 10), 128),
        fc2_b=uniform(ks[7], (10,), 128),
    )


def prepare_params(params):
    """One-time conversion to kernel layout: bf16 matmul operands, conv taps as
    (9, Cin, Cout), and fc1 rows permuted from NCHW to NHWC flatten order."""
    cdt = jnp.bfloat16
    w1 = jnp.transpose(params["conv1_w"], (2, 3, 1, 0)).reshape(9, 3, 16).astype(cdt)
    w2 = jnp.transpose(params["conv2_w"], (2, 3, 1, 0)).reshape(9, 16, 32).astype(cdt)
    w3 = (params["fc1_w"].reshape(32, 8, 8, 128)
          .transpose(1, 2, 0, 3).reshape(32 * 8 * 8, 128).astype(cdt))
    w4 = params["fc2_w"].astype(cdt)
    return dict(
        w1=w1, b1=params["conv1_b"].reshape(1, 16).astype(jnp.float32),
        w2=w2, b2=params["conv2_b"].reshape(1, 32).astype(jnp.float32),
        w3=w3, b3=params["fc1_b"].reshape(1, 128).astype(jnp.float32),
        w4=w4, b4=params["fc2_b"].reshape(1, 10).astype(jnp.float32),
    )


# ----------------------------- Pure-JAX reference --------------------------- #

def net_reference(x_nchw, params):
    dn = lax.conv_dimension_numbers(x_nchw.shape, params["conv1_w"].shape,
                                    ("NCHW", "OIHW", "NCHW"))
    y = lax.conv_general_dilated(x_nchw, params["conv1_w"], (1, 1),
                                 ((1, 1), (1, 1)), dimension_numbers=dn)
    y = jnp.maximum(y + params["conv1_b"][None, :, None, None], 0.0)
    y = lax.reduce_window(y, -jnp.inf, lax.max, (1, 1, 2, 2), (1, 1, 2, 2), "VALID")
    y = lax.conv_general_dilated(y, params["conv2_w"], (1, 1),
                                 ((1, 1), (1, 1)), dimension_numbers=dn)
    y = jnp.maximum(y + params["conv2_b"][None, :, None, None], 0.0)
    y = lax.reduce_window(y, -jnp.inf, lax.max, (1, 1, 2, 2), (1, 1, 2, 2), "VALID")
    y = y.reshape(y.shape[0], -1)                                 # NCHW flatten
    y = jnp.maximum(y @ params["fc1_w"] + params["fc1_b"], 0.0)
    return y @ params["fc2_w"] + params["fc2_b"]


if __name__ == "__main__":
    key = jax.random.PRNGKey(0)
    k_in, k_par = jax.random.split(key)
    # Module implies CIFAR-style input: (B, 3, 32, 32) so that fc1 sees 32*8*8.
    x = jax.random.normal(k_in, (2, 3, 32, 32), jnp.float32)
    params = init_params(k_par)
    kparams = prepare_params(params)

    out = jax.block_until_ready(jax.jit(net_forward)(x, kparams))
    assert out.shape == (2, 10) and out.dtype == jnp.float32

    ref = jax.block_until_ready(net_reference(x, params))
    # bf16 MXU operands (f32 accumulation) -> compare against the f32 reference
    # with a correspondingly loose tolerance.
    np.testing.assert_allclose(np.asarray(out), np.asarray(ref),
                               rtol=2e-2, atol=2e-2)

    print("KERNEL_OK")
</pallas_src>

<mosaic_0001>
module attributes {stable_mosaic.version = 11 : i64} {
  func.func @_conv_block_kernel(%arg0: i32, %arg1: memref<1x3x1088x3xbf16, #tpu.memory_space<vmem>>, %arg2: memref<9x3x16xbf16, #tpu.memory_space<vmem>>, %arg3: memref<1x16xf32, #tpu.memory_space<vmem>>, %arg4: memref<9x16x32xbf16, #tpu.memory_space<vmem>>, %arg5: memref<1x32xf32, #tpu.memory_space<vmem>>, %arg6: memref<1x8x8x32xbf16, #tpu.memory_space<vmem>>, %arg7: memref<32x32x16xf32, #tpu.memory_space<vmem>>, %arg8: memref<18x18x16xf32, #tpu.memory_space<vmem>>, %arg9: memref<3x288x16xbf16, #tpu.memory_space<vmem>>, %arg10: memref<16x16x32xf32, #tpu.memory_space<vmem>>) attributes {dimension_semantics = [#tpu.dimension_semantics<parallel>], iteration_bounds = array<i64: 2>, scalar_prefetch = 0 : i64, scratch_operands = 4 : i64, tpu.core_type = #tpu.core_type<tc>, window_params = [{transform_indices = @transform_0, window_bounds = array<i64: 1, 3, 1088, 3>}, {pipeline_mode = #tpu.pipeline_mode<synchronous>, transform_indices = @transform_1, window_bounds = array<i64: 9, 3, 16>}, {pipeline_mode = #tpu.pipeline_mode<synchronous>, transform_indices = @transform_2, window_bounds = array<i64: 1, 16>}, {pipeline_mode = #tpu.pipeline_mode<synchronous>, transform_indices = @transform_3, window_bounds = array<i64: 9, 16, 32>}, {pipeline_mode = #tpu.pipeline_mode<synchronous>, transform_indices = @transform_4, window_bounds = array<i64: 1, 32>}, {transform_indices = @transform_5, window_bounds = array<i64: 1, 8, 8, 32>}]} {
    %c0 = arith.constant 0 : index
    %c0_0 = arith.constant 0 : index
    %c0_1 = arith.constant 0 : index
    %c0_2 = arith.constant 0 : index
    %0 = vector.load %arg1[%c0, %c0_0, %c0_1, %c0_2] : memref<1x3x1088x3xbf16, #tpu.memory_space<vmem>>, vector<1x1x1024x3xbf16>
    %1 = vector.shape_cast %0 : vector<1x1x1024x3xbf16> to vector<1024x3xbf16>
    %c0_3 = arith.constant 0 : index
    %c0_4 = arith.constant 0 : index
    %c0_5 = arith.constant 0 : index
    %2 = vector.load %arg2[%c0_3, %c0_4, %c0_5] : memref<9x3x16xbf16, #tpu.memory_space<vmem>>, vector<1x3x16xbf16>
    %3 = vector.shape_cast %2 : vector<1x3x16xbf16> to vector<3x16xbf16>
    %cst = arith.constant dense<0.000000e+00> : vector<1024x16xf32>
    %4 = tpu.matmul %1, %3, %cst {dimension_numbers = #tpu.dot_dimension_numbers<[1], [0], [0], [1], [0, 0, 1, 1], [], []>} : vector<1024x3xbf16>, vector<3x16xbf16>, vector<1024x16xf32> -> vector<1024x16xf32>
    %c0_6 = arith.constant 0 : index
    %c1 = arith.constant 1 : index
    %c0_7 = arith.constant 0 : index
    %c0_8 = arith.constant 0 : index
    %5 = vector.load %arg1[%c0_6, %c1, %c0_7, %c0_8] : memref<1x3x1088x3xbf16, #tpu.memory_space<vmem>>, vector<1x1x1024x3xbf16>
    %6 = vector.shape_cast %5 : vector<1x1x1024x3xbf16> to vector<1024x3xbf16>
    %c1_9 = arith.constant 1 : index
    %c0_10 = arith.constant 0 : index
    %c0_11 = arith.constant 0 : index
    %7 = vector.load %arg2[%c1_9, %c0_10, %c0_11] : memref<9x3x16xbf16, #tpu.memory_space<vmem>>, vector<1x3x16xbf16>
    %8 = vector.shape_cast %7 : vector<1x3x16xbf16> to vector<3x16xbf16>
    %cst_12 = arith.constant dense<0.000000e+00> : vector<1024x16xf32>
    %9 = tpu.matmul %6, %8, %cst_12 {dimension_numbers = #tpu.dot_dimension_numbers<[1], [0], [0], [1], [0, 0, 1, 1], [], []>} : vector<1024x3xbf16>, vector<3x16xbf16>, vector<1024x16xf32> -> vector<1024x16xf32>
    %10 = arith.addf %4, %9 : vector<1024x16xf32>
    %c0_13 = arith.constant 0 : index
    %c2 = arith.constant 2 : index
    %c0_14 = arith.constant 0 : index
    %c0_15 = arith.constant 0 : index
    %11 = vector.load %arg1[%c0_13, %c2, %c0_14, %c0_15] : memref<1x3x1088x3xbf16, #tpu.memory_space<vmem>>, vector<1x1x1024x3xbf16>
    %12 = vector.shape_cast %11 : vector<1x1x1024x3xbf16> to vector<1024x3xbf16>
    %c2_16 = arith.constant 2 : index
    %c0_17 = arith.constant 0 : index
    %c0_18 = arith.constant 0 : index
    %13 = vector.load %arg2[%c2_16, %c0_17, %c0_18] : memref<9x3x16xbf16, #tpu.memory_space<vmem>>, vector<1x3x16xbf16>
    %14 = vector.shape_cast %13 : vector<1x3x16xbf16> to vector<3x16xbf16>
    %cst_19 = arith.constant dense<0.000000e+00> : vector<1024x16xf32>
    %15 = tpu.matmul %12, %14, %cst_19 {dimension_numbers = #tpu.dot_dimension_numbers<[1], [0], [0], [1], [0, 0, 1, 1], [], []>} : vector<1024x3xbf16>, vector<3x16xbf16>, vector<1024x16xf32> -> vector<1024x16xf32>
    %16 = arith.addf %10, %15 : vector<1024x16xf32>
    %c0_20 = arith.constant 0 : index
    %c0_21 = arith.constant 0 : index
    %c32 = arith.constant 32 : index
    %c0_22 = arith.constant 0 : index
    %17 = vector.load %arg1[%c0_20, %c0_21, %c32, %c0_22] : memref<1x3x1088x3xbf16, #tpu.memory_space<vmem>>, vector<1x1x1024x3xbf16>
    %18 = vector.shape_cast %17 : vector<1x1x1024x3xbf16> to vector<1024x3xbf16>
    %c3 = arith.constant 3 : index
    %c0_23 = arith.constant 0 : index
    %c0_24 = arith.constant 0 : index
    %19 = vector.load %arg2[%c3, %c0_23, %c0_24] : memref<9x3x16xbf16, #tpu.memory_space<vmem>>, vector<1x3x16xbf16>
    %20 = vector.shape_cast %19 : vector<1x3x16xbf16> to vector<3x16xbf16>
    %cst_25 = arith.constant dense<0.000000e+00> : vector<1024x16xf32>
    %21 = tpu.matmul %18, %20, %cst_25 {dimension_numbers = #tpu.dot_dimension_numbers<[1], [0], [0], [1], [0, 0, 1, 1], [], []>} : vector<1024x3xbf16>, vector<3x16xbf16>, vector<1024x16xf32> -> vector<1024x16xf32>
    %22 = arith.addf %16, %21 : vector<1024x16xf32>
    %c0_26 = arith.constant 0 : index
    %c1_27 = arith.constant 1 : index
    %c32_28 = arith.constant 32 : index
    %c0_29 = arith.constant 0 : index
    %23 = vector.load %arg1[%c0_26, %c1_27, %c32_28, %c0_29] : memref<1x3x1088x3xbf16, #tpu.memory_space<vmem>>, vector<1x1x1024x3xbf16>
    %24 = vector.shape_cast %23 : vector<1x1x1024x3xbf16> to vector<1024x3xbf16>
    %c4 = arith.constant 4 : index
    %c0_30 = arith.constant 0 : index
    %c0_31 = arith.constant 0 : index
    %25 = vector.load %arg2[%c4, %c0_30, %c0_31] : memref<9x3x16xbf16, #tpu.memory_space<vmem>>, vector<1x3x16xbf16>
    %26 = vector.shape_cast %25 : vector<1x3x16xbf16> to vector<3x16xbf16>
    %cst_32 = arith.constant dense<0.000000e+00> : vector<1024x16xf32>
    %27 = tpu.matmul %24, %26, %cst_32 {dimension_numbers = #tpu.dot_dimension_numbers<[1], [0], [0], [1], [0, 0, 1, 1], [], []>} : vector<1024x3xbf16>, vector<3x16xbf16>, vector<1024x16xf32> -> vector<1024x16xf32>
    %28 = arith.addf %22, %27 : vector<1024x16xf32>
    %c0_33 = arith.constant 0 : index
    %c2_34 = arith.constant 2 : index
    %c32_35 = arith.constant 32 : index
    %c0_36 = arith.constant 0 : index
    %29 = vector.load %arg1[%c0_33, %c2_34, %c32_35, %c0_36] : memref<1x3x1088x3xbf16, #tpu.memory_space<vmem>>, vector<1x1x1024x3xbf16>
    %30 = vector.shape_cast %29 : vector<1x1x1024x3xbf16> to vector<1024x3xbf16>
    %c5 = arith.constant 5 : index
    %c0_37 = arith.constant 0 : index
    %c0_38 = arith.constant 0 : index
    %31 = vector.load %arg2[%c5, %c0_37, %c0_38] : memref<9x3x16xbf16, #tpu.memory_space<vmem>>, vector<1x3x16xbf16>
    %32 = vector.shape_cast %31 : vector<1x3x16xbf16> to vector<3x16xbf16>
    %cst_39 = arith.constant dense<0.000000e+00> : vector<1024x16xf32>
    %33 = tpu.matmul %30, %32, %cst_39 {dimension_numbers = #tpu.dot_dimension_numbers<[1], [0], [0], [1], [0, 0, 1, 1], [], []>} : vector<1024x3xbf16>, vector<3x16xbf16>, vector<1024x16xf32> -> vector<1024x16xf32>
    %34 = arith.addf %28, %33 : vector<1024x16xf32>
    %c0_40 = arith.constant 0 : index
    %c0_41 = arith.constant 0 : index
    %c64 = arith.constant 64 : index
    %c0_42 = arith.constant 0 : index
    %35 = vector.load %arg1[%c0_40, %c0_41, %c64, %c0_42] : memref<1x3x1088x3xbf16, #tpu.memory_space<vmem>>, vector<1x1x1024x3xbf16>
    %36 = vector.shape_cast %35 : vector<1x1x1024x3xbf16> to vector<1024x3xbf16>
    %c6 = arith.constant 6 : index
    %c0_43 = arith.constant 0 : index
    %c0_44 = arith.constant 0 : index
    %37 = vector.load %arg2[%c6, %c0_43, %c0_44] : memref<9x3x16xbf16, #tpu.memory_space<vmem>>, vector<1x3x16xbf16>
    %38 = vector.shape_cast %37 : vector<1x3x16xbf16> to vector<3x16xbf16>
    %cst_45 = arith.constant dense<0.000000e+00> : vector<1024x16xf32>
    %39 = tpu.matmul %36, %38, %cst_45 {dimension_numbers = #tpu.dot_dimension_numbers<[1], [0], [0], [1], [0, 0, 1, 1], [], []>} : vector<1024x3xbf16>, vector<3x16xbf16>, vector<1024x16xf32> -> vector<1024x16xf32>
    %40 = arith.addf %34, %39 : vector<1024x16xf32>
    %c0_46 = arith.constant 0 : index
    %c1_47 = arith.constant 1 : index
    %c64_48 = arith.constant 64 : index
    %c0_49 = arith.constant 0 : index
    %41 = vector.load %arg1[%c0_46, %c1_47, %c64_48, %c0_49] : memref<1x3x1088x3xbf16, #tpu.memory_space<vmem>>, vector<1x1x1024x3xbf16>
    %42 = vector.shape_cast %41 : vector<1x1x1024x3xbf16> to vector<1024x3xbf16>
    %c7 = arith.constant 7 : index
    %c0_50 = arith.constant 0 : index
    %c0_51 = arith.constant 0 : index
    %43 = vector.load %arg2[%c7, %c0_50, %c0_51] : memref<9x3x16xbf16, #tpu.memory_space<vmem>>, vector<1x3x16xbf16>
    %44 = vector.shape_cast %43 : vector<1x3x16xbf16> to vector<3x16xbf16>
    %cst_52 = arith.constant dense<0.000000e+00> : vector<1024x16xf32>
    %45 = tpu.matmul %42, %44, %cst_52 {dimension_numbers = #tpu.dot_dimension_numbers<[1], [0], [0], [1], [0, 0, 1, 1], [], []>} : vector<1024x3xbf16>, vector<3x16xbf16>, vector<1024x16xf32> -> vector<1024x16xf32>
    %46 = arith.addf %40, %45 : vector<1024x16xf32>
    %c0_53 = arith.constant 0 : index
    %c2_54 = arith.constant 2 : index
    %c64_55 = arith.constant 64 : index
    %c0_56 = arith.constant 0 : index
    %47 = vector.load %arg1[%c0_53, %c2_54, %c64_55, %c0_56] : memref<1x3x1088x3xbf16, #tpu.memory_space<vmem>>, vector<1x1x1024x3xbf16>
    %48 = vector.shape_cast %47 : vector<1x1x1024x3xbf16> to vector<1024x3xbf16>
    %c8 = arith.constant 8 : index
    %c0_57 = arith.constant 0 : index
    %c0_58 = arith.constant 0 : index
    %49 = vector.load %arg2[%c8, %c0_57, %c0_58] : memref<9x3x16xbf16, #tpu.memory_space<vmem>>, vector<1x3x16xbf16>
    %50 = vector.shape_cast %49 : vector<1x3x16xbf16> to vector<3x16xbf16>
    %cst_59 = arith.constant dense<0.000000e+00> : vector<1024x16xf32>
    %51 = tpu.matmul %48, %50, %cst_59 {dimension_numbers = #tpu.dot_dimension_numbers<[1], [0], [0], [1], [0, 0, 1, 1], [], []>} : vector<1024x3xbf16>, vector<3x16xbf16>, vector<1024x16xf32> -> vector<1024x16xf32>
    %52 = arith.addf %46, %51 : vector<1024x16xf32>
    %c0_60 = arith.constant 0 : index
    %c0_61 = arith.constant 0 : index
    %53 = vector.load %arg3[%c0_60, %c0_61] : memref<1x16xf32, #tpu.memory_space<vmem>>, vector<1x16xf32>
    %54 = vector.broadcast %53 : vector<1x16xf32> to vector<1024x16xf32>
    %55 = arith.addf %52, %54 : vector<1024x16xf32>
    %cst_62 = arith.constant 0.000000e+00 : f32
    %56 = vector.broadcast %cst_62 : f32 to vector<1024x16xf32>
    %57 = arith.maximumf %55, %56 : vector<1024x16xf32>
    %58 = vector.shape_cast %57 : vector<1024x16xf32> to vector<32x32x16xf32>
    %c0_63 = arith.constant 0 : index
    %c0_64 = arith.constant 0 : index
    %c0_65 = arith.constant 0 : index
    %59 = vector.load %arg7[%c0_63, %c0_64, %c0_65] : memref<32x32x16xf32, #tpu.memory_space<vmem>>, vector<32x32x16xf32>
    tpu.vector_store %arg7[%c0_63, %c0_64, %c0_65], %58 {strides = array<i32>} : memref<32x32x16xf32, #tpu.memory_space<vmem>>, vector<32x32x16xf32>,
    %cst_66 = arith.constant 0.000000e+00 : f32
    %60 = vector.broadcast %cst_66 : f32 to vector<18x18x16xf32>
    %c0_67 = arith.constant 0 : index
    %c0_68 = arith.constant 0 : index
    %c0_69 = arith.constant 0 : index
    %61 = vector.load %arg8[%c0_67, %c0_68, %c0_69] : memref<18x18x16xf32, #tpu.memory_space<vmem>>, vector<18x18x16xf32>
    tpu.vector_store %arg8[%c0_67, %c0_68, %c0_69], %60 {strides = array<i32>} : memref<18x18x16xf32, #tpu.memory_space<vmem>>, vector<18x18x16xf32>,
    %c0_70 = arith.constant 0 : index
    %c0_71 = arith.constant 0 : index
    %c0_72 = arith.constant 0 : index
    %62 = tpu.strided_load %arg7[%c0_70, %c0_71, %c0_72] {strides = array<i32: 2, 2, 1>} : memref<32x32x16xf32, #tpu.memory_space<vmem>>, vector<16x16x16xf32>
    %c0_73 = arith.constant 0 : index
    %c1_74 = arith.constant 1 : index
    %c0_75 = arith.constant 0 : index
    %63 = tpu.strided_load %arg7[%c0_73, %c1_74, %c0_75] {strides = array<i32: 2, 2, 1>} : memref<32x32x16xf32, #tpu.memory_space<vmem>>, vector<16x16x16xf32>
    %c1_76 = arith.constant 1 : index
    %c0_77 = arith.constant 0 : index
    %c0_78 = arith.constant 0 : index
    %64 = tpu.strided_load %arg7[%c1_76, %c0_77, %c0_78] {strides = array<i32: 2, 2, 1>} : memref<32x32x16xf32, #tpu.memory_space<vmem>>, vector<16x16x16xf32>
    %c1_79 = arith.constant 1 : index
    %c1_80 = arith.constant 1 : index
    %c0_81 = arith.constant 0 : index
    %65 = tpu.strided_load %arg7[%c1_79, %c1_80, %c0_81] {strides = array<i32: 2, 2, 1>} : memref<32x32x16xf32, #tpu.memory_space<vmem>>, vector<16x16x16xf32>
    %66 = arith.maximumf %62, %63 : vector<16x16x16xf32>
    %67 = arith.maximumf %64, %65 : vector<16x16x16xf32>
    %68 = arith.maximumf %66, %67 : vector<16x16x16xf32>
    %c1_82 = arith.constant 1 : index
    %c1_83 = arith.constant 1 : index
    %c0_84 = arith.constant 0 : index
    %69 = vector.load %arg8[%c1_82, %c1_83, %c0_84] : memref<18x18x16xf32, #tpu.memory_space<vmem>>, vector<16x16x16xf32>
    tpu.vector_store %arg8[%c1_82, %c1_83, %c0_84], %68 {strides = array<i32>} : memref<18x18x16xf32, #tpu.memory_space<vmem>>, vector<16x16x16xf32>,
    %c0_85 = arith.constant 0 : index
    %c0_86 = arith.constant 0 : index
    %c0_87 = arith.constant 0 : index
    %70 = vector.load %arg8[%c0_85, %c0_86, %c0_87] : memref<18x18x16xf32, #tpu.memory_space<vmem>>, vector<18x16x16xf32>
    %71 = vector.shape_cast %70 : vector<18x16x16xf32> to vector<288x16xf32>
    %72 = arith.truncf %71 : vector<288x16xf32> to vector<288x16xbf16>
    %c0_88 = arith.constant 0 : index
    %c0_89 = arith.constant 0 : index
    %c0_90 = arith.constant 0 : index
    %73 = vector.load %arg9[%c0_88, %c0_89, %c0_90] : memref<3x288x16xbf16, #tpu.memory_space<vmem>>, vector<1x288x16xbf16>
    %74 = vector.shape_cast %73 : vector<1x288x16xbf16> to vector<288x16xbf16>
    %75 = vector.shape_cast %72 : vector<288x16xbf16> to vector<1x288x16xbf16>
    tpu.vector_store %arg9[%c0_88, %c0_89, %c0_90], %75 {strides = array<i32>} : memref<3x288x16xbf16, #tpu.memory_space<vmem>>, vector<1x288x16xbf16>,
    %c0_91 = arith.constant 0 : index
    %c1_92 = arith.constant 1 : index
    %c0_93 = arith.constant 0 : index
    %76 = vector.load %arg8[%c0_91, %c1_92, %c0_93] : memref<18x18x16xf32, #tpu.memory_space<vmem>>, vector<18x16x16xf32>
    %77 = vector.shape_cast %76 : vector<18x16x16xf32> to vector<288x16xf32>
    %78 = arith.truncf %77 : vector<288x16xf32> to vector<288x16xbf16>
    %c1_94 = arith.constant 1 : index
    %c0_95 = arith.constant 0 : index
    %c0_96 = arith.constant 0 : index
    %79 = vector.load %arg9[%c1_94, %c0_95, %c0_96] : memref<3x288x16xbf16, #tpu.memory_space<vmem>>, vector<1x288x16xbf16>
    %80 = vector.shape_cast %79 : vector<1x288x16xbf16> to vector<288x16xbf16>
    %81 = vector.shape_cast %78 : vector<288x16xbf16> to vector<1x288x16xbf16>
    tpu.vector_store %arg9[%c1_94, %c0_95, %c0_96], %81 {strides = array<i32>} : memref<3x288x16xbf16, #tpu.memory_space<vmem>>, vector<1x288x16xbf16>,
    %c0_97 = arith.constant 0 : index
    %c2_98 = arith.constant 2 : index
    %c0_99 = arith.constant 0 : index
    %82 = vector.load %arg8[%c0_97, %c2_98, %c0_99] : memref<18x18x16xf32, #tpu.memory_space<vmem>>, vector<18x16x16xf32>
    %83 = vector.shape_cast %82 : vector<18x16x16xf32> to vector<288x16xf32>
    %84 = arith.truncf %83 : vector<288x16xf32> to vector<288x16xbf16>
    %c2_100 = arith.constant 2 : index
    %c0_101 = arith.constant 0 : index
    %c0_102 = arith.constant 0 : index
    %85 = vector.load %arg9[%c2_100, %c0_101, %c0_102] : memref<3x288x16xbf16, #tpu.memory_space<vmem>>, vector<1x288x16xbf16>
    %86 = vector.shape_cast %85 : vector<1x288x16xbf16> to vector<288x16xbf16>
    %87 = vector.shape_cast %84 : vector<288x16xbf16> to vector<1x288x16xbf16>
    tpu.vector_store %arg9[%c2_100, %c0_101, %c0_102], %87 {strides = array<i32>} : memref<3x288x16xbf16, #tpu.memory_space<vmem>>, vector<1x288x16xbf16>,
    %c0_103 = arith.constant 0 : index
    %c0_104 = arith.constant 0 : index
    %c0_105 = arith.constant 0 : index
    %88 = vector.load %arg9[%c0_103, %c0_104, %c0_105] : memref<3x288x16xbf16, #tpu.memory_space<vmem>>, vector<1x256x16xbf16>
    %89 = vector.shape_cast %88 : vector<1x256x16xbf16> to vector<256x16xbf16>
    %c0_106 = arith.constant 0 : index
    %c0_107 = arith.constant 0 : index
    %c0_108 = arith.constant 0 : index
    %90 = vector.load %arg4[%c0_106, %c0_107, %c0_108] : memref<9x16x32xbf16, #tpu.memory_space<vmem>>, vector<1x16x32xbf16>
    %91 = vector.shape_cast %90 : vector<1x16x32xbf16> to vector<16x32xbf16>
    %cst_109 = arith.constant dense<0.000000e+00> : vector<256x32xf32>
    %92 = tpu.matmul %89, %91, %cst_109 {dimension_numbers = #tpu.dot_dimension_numbers<[1], [0], [0], [1], [0, 0, 1, 1], [], []>} : vector<256x16xbf16>, vector<16x32xbf16>, vector<256x32xf32> -> vector<256x32xf32>
    %c1_110 = arith.constant 1 : index
    %c0_111 = arith.constant 0 : index
    %c0_112 = arith.constant 0 : index
    %93 = vector.load %arg9[%c1_110, %c0_111, %c0_112] : memref<3x288x16xbf16, #tpu.memory_space<vmem>>, vector<1x256x16xbf16>
    %94 = vector.shape_cast %93 : vector<1x256x16xbf16> to vector<256x16xbf16>
    %c1_113 = arith.constant 1 : index
    %c0_114 = arith.constant 0 : index
    %c0_115 = arith.constant 0 : index
    %95 = vector.load %arg4[%c1_113, %c0_114, %c0_115] : memref<9x16x32xbf16, #tpu.memory_space<vmem>>, vector<1x16x32xbf16>
    %96 = vector.shape_cast %95 : vector<1x16x32xbf16> to vector<16x32xbf16>
    %cst_116 = arith.constant dense<0.000000e+00> : vector<256x32xf32>
    %97 = tpu.matmul %94, %96, %cst_116 {dimension_numbers = #tpu.dot_dimension_numbers<[1], [0], [0], [1], [0, 0, 1, 1], [], []>} : vector<256x16xbf16>, vector<16x32xbf16>, vector<256x32xf32> -> vector<256x32xf32>
    %98 = arith.addf %92, %97 : vector<256x32xf32>
    %c2_117 = arith.constant 2 : index
    %c0_118 = arith.constant 0 : index
    %c0_119 = arith.constant 0 : index
    %99 = vector.load %arg9[%c2_117, %c0_118, %c0_119] : memref<3x288x16xbf16, #tpu.memory_space<vmem>>, vector<1x256x16xbf16>
    %100 = vector.shape_cast %99 : vector<1x256x16xbf16> to vector<256x16xbf16>
    %c2_120 = arith.constant 2 : index
    %c0_121 = arith.constant 0 : index
    %c0_122 = arith.constant 0 : index
    %101 = vector.load %arg4[%c2_120, %c0_121, %c0_122] : memref<9x16x32xbf16, #tpu.memory_space<vmem>>, vector<1x16x32xbf16>
    %102 = vector.shape_cast %101 : vector<1x16x32xbf16> to vector<16x32xbf16>
    %cst_123 = arith.constant dense<0.000000e+00> : vector<256x32xf32>
    %103 = tpu.matmul %100, %102, %cst_123 {dimension_numbers = #tpu.dot_dimension_numbers<[1], [0], [0], [1], [0, 0, 1, 1], [], []>} : vector<256x16xbf16>, vector<16x32xbf16>, vector<256x32xf32> -> vector<256x32xf32>
    %104 = arith.addf %98, %103 : vector<256x32xf32>
    %c0_124 = arith.constant 0 : index
    %c16 = arith.constant 16 : index
    %c0_125 = arith.constant 0 : index
    %105 = vector.load %arg9[%c0_124, %c16, %c0_125] : memref<3x288x16xbf16, #tpu.memory_space<vmem>>, vector<1x256x16xbf16>
    %106 = vector.shape_cast %105 : vector<1x256x16xbf16> to vector<256x16xbf16>
    %c3_126 = arith.constant 3 : index
    %c0_127 = arith.constant 0 : index
    %c0_128 = arith.constant 0 : index
    %107 = vector.load %arg4[%c3_126, %c0_127, %c0_128] : memref<9x16x32xbf16, #tpu.memory_space<vmem>>, vector<1x16x32xbf16>
    %108 = vector.shape_cast %107 : vector<1x16x32xbf16> to vector<16x32xbf16>
    %cst_129 = arith.constant dense<0.000000e+00> : vector<256x32xf32>
    %109 = tpu.matmul %106, %108, %cst_129 {dimension_numbers = #tpu.dot_dimension_numbers<[1], [0], [0], [1], [0, 0, 1, 1], [], []>} : vector<256x16xbf16>, vector<16x32xbf16>, vector<256x32xf32> -> vector<256x32xf32>
    %110 = arith.addf %104, %109 : vector<256x32xf32>
    %c1_130 = arith.constant 1 : index
    %c16_131 = arith.constant 16 : index
    %c0_132 = arith.constant 0 : index
    %111 = vector.load %arg9[%c1_130, %c16_131, %c0_132] : memref<3x288x16xbf16, #tpu.memory_space<vmem>>, vector<1x256x16xbf16>
    %112 = vector.shape_cast %111 : vector<1x256x16xbf16> to vector<256x16xbf16>
    %c4_133 = arith.constant 4 : index
    %c0_134 = arith.constant 0 : index
    %c0_135 = arith.constant 0 : index
    %113 = vector.load %arg4[%c4_133, %c0_134, %c0_135] : memref<9x16x32xbf16, #tpu.memory_space<vmem>>, vector<1x16x32xbf16>
    %114 = vector.shape_cast %113 : vector<1x16x32xbf16> to vector<16x32xbf16>
    %cst_136 = arith.constant dense<0.000000e+00> : vector<256x32xf32>
    %115 = tpu.matmul %112, %114, %cst_136 {dimension_numbers = #tpu.dot_dimension_numbers<[1], [0], [0], [1], [0, 0, 1, 1], [], []>} : vector<256x16xbf16>, vector<16x32xbf16>, vector<256x32xf32> -> vector<256x32xf32>
    %116 = arith.addf %110, %115 : vector<256x32xf32>
    %c2_137 = arith.constant 2 : index
    %c16_138 = arith.constant 16 : index
    %c0_139 = arith.constant 0 : index
    %117 = vector.load %arg9[%c2_137, %c16_138, %c0_139] : memref<3x288x16xbf16, #tpu.memory_space<vmem>>, vector<1x256x16xbf16>
    %118 = vector.shape_cast %117 : vector<1x256x16xbf16> to vector<256x16xbf16>
    %c5_140 = arith.constant 5 : index
    %c0_141 = arith.constant 0 : index
    %c0_142 = arith.constant 0 : index
    %119 = vector.load %arg4[%c5_140, %c0_141, %c0_142] : memref<9x16x32xbf16, #tpu.memory_space<vmem>>, vector<1x16x32xbf16>
    %120 = vector.shape_cast %119 : vector<1x16x32xbf16> to vector<16x32xbf16>
    %cst_143 = arith.constant dense<0.000000e+00> : vector<256x32xf32>
    %121 = tpu.matmul %118, %120, %cst_143 {dimension_numbers = #tpu.dot_dimension_numbers<[1], [0], [0], [1], [0, 0, 1, 1], [], []>} : vector<256x16xbf16>, vector<16x32xbf16>, vector<256x32xf32> -> vector<256x32xf32>
    %122 = arith.addf %116, %121 : vector<256x32xf32>
    %c0_144 = arith.constant 0 : index
    %c32_145 = arith.constant 32 : index
    %c0_146 = arith.constant 0 : index
    %123 = vector.load %arg9[%c0_144, %c32_145, %c0_146] : memref<3x288x16xbf16, #tpu.memory_space<vmem>>, vector<1x256x16xbf16>
    %124 = vector.shape_cast %123 : vector<1x256x16xbf16> to vector<256x16xbf16>
    %c6_147 = arith.constant 6 : index
    %c0_148 = arith.constant 0 : index
    %c0_149 = arith.constant 0 : index
    %125 = vector.load %arg4[%c6_147, %c0_148, %c0_149] : memref<9x16x32xbf16, #tpu.memory_space<vmem>>, vector<1x16x32xbf16>
    %126 = vector.shape_cast %125 : vector<1x16x32xbf16> to vector<16x32xbf16>
    %cst_150 = arith.constant dense<0.000000e+00> : vector<256x32xf32>
    %127 = tpu.matmul %124, %126, %cst_150 {dimension_numbers = #tpu.dot_dimension_numbers<[1], [0], [0], [1], [0, 0, 1, 1], [], []>} : vector<256x16xbf16>, vector<16x32xbf16>, vector<256x32xf32> -> vector<256x32xf32>
    %128 = arith.addf %122, %127 : vector<256x32xf32>
    %c1_151 = arith.constant 1 : index
    %c32_152 = arith.constant 32 : index
    %c0_153 = arith.constant 0 : index
    %129 = vector.load %arg9[%c1_151, %c32_152, %c0_153] : memref<3x288x16xbf16, #tpu.memory_space<vmem>>, vector<1x256x16xbf16>
    %130 = vector.shape_cast %129 : vector<1x256x16xbf16> to vector<256x16xbf16>
    %c7_154 = arith.constant 7 : index
    %c0_155 = arith.constant 0 : index
    %c0_156 = arith.constant 0 : index
    %131 = vector.load %arg4[%c7_154, %c0_155, %c0_156] : memref<9x16x32xbf16, #tpu.memory_space<vmem>>, vector<1x16x32xbf16>
    %132 = vector.shape_cast %131 : vector<1x16x32xbf16> to vector<16x32xbf16>
    %cst_157 = arith.constant dense<0.000000e+00> : vector<256x32xf32>
    %133 = tpu.matmul %130, %132, %cst_157 {dimension_numbers = #tpu.dot_dimension_numbers<[1], [0], [0], [1], [0, 0, 1, 1], [], []>} : vector<256x16xbf16>, vector<16x32xbf16>, vector<256x32xf32> -> vector<256x32xf32>
    %134 = arith.addf %128, %133 : vector<256x32xf32>
    %c2_158 = arith.constant 2 : index
    %c32_159 = arith.constant 32 : index
    %c0_160 = arith.constant 0 : index
    %135 = vector.load %arg9[%c2_158, %c32_159, %c0_160] : memref<3x288x16xbf16, #tpu.memory_space<vmem>>, vector<1x256x16xbf16>
    %136 = vector.shape_cast %135 : vector<1x256x16xbf16> to vector<256x16xbf16>
    %c8_161 = arith.constant 8 : index
    %c0_162 = arith.constant 0 : index
    %c0_163 = arith.constant 0 : index
    %137 = vector.load %arg4[%c8_161, %c0_162, %c0_163] : memref<9x16x32xbf16, #tpu.memory_space<vmem>>, vector<1x16x32xbf16>
    %138 = vector.shape_cast %137 : vector<1x16x32xbf16> to vector<16x32xbf16>
    %cst_164 = arith.constant dense<0.000000e+00> : vector<256x32xf32>
    %139 = tpu.matmul %136, %138, %cst_164 {dimension_numbers = #tpu.dot_dimension_numbers<[1], [0], [0], [1], [0, 0, 1, 1], [], []>} : vector<256x16xbf16>, vector<16x32xbf16>, vector<256x32xf32> -> vector<256x32xf32>
    %140 = arith.addf %134, %139 : vector<256x32xf32>
    %c0_165 = arith.constant 0 : index
    %c0_166 = arith.constant 0 : index
    %141 = vector.load %arg5[%c0_165, %c0_166] : memref<1x32xf32, #tpu.memory_space<vmem>>, vector<1x32xf32>
    %142 = vector.broadcast %141 : vector<1x32xf32> to vector<256x32xf32>
    %143 = arith.addf %140, %142 : vector<256x32xf32>
    %cst_167 = arith.constant 0.000000e+00 : f32
    %144 = vector.broadcast %cst_167 : f32 to vector<256x32xf32>
    %145 = arith.maximumf %143, %144 : vector<256x32xf32>
    %146 = vector.shape_cast %145 : vector<256x32xf32> to vector<16x16x32xf32>
    %c0_168 = arith.constant 0 : index
    %c0_169 = arith.constant 0 : index
    %c0_170 = arith.constant 0 : index
    %147 = vector.load %arg10[%c0_168, %c0_169, %c0_170] : memref<16x16x32xf32, #tpu.memory_space<vmem>>, vector<16x16x32xf32>
    tpu.vector_store %arg10[%c0_168, %c0_169, %c0_170], %146 {strides = array<i32>} : memref<16x16x32xf32, #tpu.memory_space<vmem>>, vector<16x16x32xf32>,
    %c0_171 = arith.constant 0 : index
    %c0_172 = arith.constant 0 : index
    %c0_173 = arith.constant 0 : index
    %148 = tpu.strided_load %arg10[%c0_171, %c0_172, %c0_173] {strides = array<i32: 2, 2, 1>} : memref<16x16x32xf32, #tpu.memory_space<vmem>>, vector<8x8x32xf32>
    %c0_174 = arith.constant 0 : index
    %c1_175 = arith.constant 1 : index
    %c0_176 = arith.constant 0 : index
    %149 = tpu.strided_load %arg10[%c0_174, %c1_175, %c0_176] {strides = array<i32: 2, 2, 1>} : memref<16x16x32xf32, #tpu.memory_space<vmem>>, vector<8x8x32xf32>
    %c1_177 = arith.constant 1 : index
    %c0_178 = arith.constant 0 : index
    %c0_179 = arith.constant 0 : index
    %150 = tpu.strided_load %arg10[%c1_177, %c0_178, %c0_179] {strides = array<i32: 2, 2, 1>} : memref<16x16x32xf32, #tpu.memory_space<vmem>>, vector<8x8x32xf32>
    %c1_180 = arith.constant 1 : index
    %c1_181 = arith.constant 1 : index
    %c0_182 = arith.constant 0 : index
    %151 = tpu.strided_load %arg10[%c1_180, %c1_181, %c0_182] {strides = array<i32: 2, 2, 1>} : memref<16x16x32xf32, #tpu.memory_space<vmem>>, vector<8x8x32xf32>
    %152 = arith.maximumf %148, %149 : vector<8x8x32xf32>
    %153 = arith.maximumf %150, %151 : vector<8x8x32xf32>
    %154 = arith.maximumf %152, %153 : vector<8x8x32xf32>
    %155 = arith.truncf %154 : vector<8x8x32xf32> to vector<8x8x32xbf16>
    %c0_183 = arith.constant 0 : index
    %c0_184 = arith.constant 0 : index
    %c0_185 = arith.constant 0 : index
    %c0_186 = arith.constant 0 : index
    %156 = vector.load %arg6[%c0_183, %c0_184, %c0_185, %c0_186] : memref<1x8x8x32xbf16, #tpu.memory_space<vmem>>, vector<1x8x8x32xbf16>
    %157 = vector.shape_cast %156 : vector<1x8x8x32xbf16> to vector<8x8x32xbf16>
    %158 = vector.shape_cast %155 : vector<8x8x32xbf16> to vector<1x8x8x32xbf16>
    tpu.vector_store %arg6[%c0_183, %c0_184, %c0_185, %c0_186], %158 {strides = array<i32>} : memref<1x8x8x32xbf16, #tpu.memory_space<vmem>>, vector<1x8x8x32xbf16>,
    return
  }
  func.func @transform_0(%arg0: i32) -> (i32, i32, i32, i32) {
    %c0_i32 = arith.constant 0 : i32
    %c0_i32_0 = arith.constant 0 : i32
    %c0_i32_1 = arith.constant 0 : i32
    %c0_i32_2 = arith.constant 0 : i32
    return %arg0, %c0_i32, %c0_i32_0, %c0_i32_1 : i32, i32, i32, i32
  }
  func.func @transform_1(%arg0: i32) -> (i32, i32, i32) {
    %c0_i32 = arith.constant 0 : i32
    %c0_i32_0 = arith.constant 0 : i32
    %c0_i32_1 = arith.constant 0 : i32
    %c0_i32_2 = arith.constant 0 : i32
    return %c0_i32, %c0_i32_0, %c0_i32_1 : i32, i32, i32
  }
  func.func @transform_2(%arg0: i32) -> (i32, i32) {
    %c0_i32 = arith.constant 0 : i32
    %c0_i32_0 = arith.constant 0 : i32
    %c0_i32_1 = arith.constant 0 : i32
    return %c0_i32, %c0_i32_0 : i32, i32
  }
  func.func @transform_3(%arg0: i32) -> (i32, i32, i32) {
    %c0_i32 = arith.constant 0 : i32
    %c0_i32_0 = arith.constant 0 : i32
    %c0_i32_1 = arith.constant 0 : i32
    %c0_i32_2 = arith.constant 0 : i32
    return %c0_i32, %c0_i32_0, %c0_i32_1 : i32, i32, i32
  }
  func.func @transform_4(%arg0: i32) -> (i32, i32) {
    %c0_i32 = arith.constant 0 : i32
    %c0_i32_0 = arith.constant 0 : i32
    %c0_i32_1 = arith.constant 0 : i32
    return %c0_i32, %c0_i32_0 : i32, i32
  }
  func.func @transform_5(%arg0: i32) -> (i32, i32, i32, i32) {
    %c0_i32 = arith.constant 0 : i32
    %c0_i32_0 = arith.constant 0 : i32
    %c0_i32_1 = arith.constant 0 : i32
    %c0_i32_2 = arith.constant 0 : i32
    return %arg0, %c0_i32, %c0_i32_0, %c0_i32_1 : i32, i32, i32, i32
  }
}

module attributes {stable_mosaic.version = 11 : i64} {
  func.func @_fc_kernel(%arg0: i32, %arg1: memref<2x2048xbf16, #tpu.memory_space<vmem>>, %arg2: memref<2048x128xbf16, #tpu.memory_space<vmem>>, %arg3: memref<1x128xf32, #tpu.memory_space<vmem>>, %arg4: memref<128x10xbf16, #tpu.memory_space<vmem>>, %arg5: memref<1x10xf32, #tpu.memory_space<vmem>>, %arg6: memref<2x10xf32, #tpu.memory_space<vmem>>) attributes {dimension_semantics = [#tpu.dimension_semantics<arbitrary>], iteration_bounds = array<i64: 1>, scalar_prefetch = 0 : i64, scratch_operands = 0 : i64, tpu.core_type = #tpu.core_type<tc>, window_params = [{pipeline_mode = #tpu.pipeline_mode<synchronous>, transform_indices = @transform_0, window_bounds = array<i64: 2, 2048>}, {pipeline_mode = #tpu.pipeline_mode<synchronous>, transform_indices = @transform_1, window_bounds = array<i64: 2048, 128>}, {pipeline_mode = #tpu.pipeline_mode<synchronous>, transform_indices = @transform_2, window_bounds = array<i64: 1, 128>}, {pipeline_mode = #tpu.pipeline_mode<synchronous>, transform_indices = @transform_3, window_bounds = array<i64: 128, 10>}, {pipeline_mode = #tpu.pipeline_mode<synchronous>, transform_indices = @transform_4, window_bounds = array<i64: 1, 10>}, {pipeline_mode = #tpu.pipeline_mode<synchronous>, transform_indices = @transform_5, window_bounds = array<i64: 2, 10>}]} {
    %c0 = arith.constant 0 : index
    %c0_0 = arith.constant 0 : index
    %0 = vector.load %arg1[%c0, %c0_0] : memref<2x2048xbf16, #tpu.memory_space<vmem>>, vector<2x2048xbf16>
    %c0_1 = arith.constant 0 : index
    %c0_2 = arith.constant 0 : index
    %1 = vector.load %arg2[%c0_1, %c0_2] : memref<2048x128xbf16, #tpu.memory_space<vmem>>, vector<2048x128xbf16>
    %cst = arith.constant dense<0.000000e+00> : vector<2x128xf32>
    %2 = tpu.matmul %0, %1, %cst {dimension_numbers = #tpu.dot_dimension_numbers<[1], [0], [0], [1], [0, 0, 1, 1], [], []>} : vector<2x2048xbf16>, vector<2048x128xbf16>, vector<2x128xf32> -> vector<2x128xf32>
    %c0_3 = arith.constant 0 : index
    %c0_4 = arith.constant 0 : index
    %3 = vector.load %arg3[%c0_3, %c0_4] : memref<1x128xf32, #tpu.memory_space<vmem>>, vector<1x128xf32>
    %4 = vector.broadcast %3 : vector<1x128xf32> to vector<2x128xf32>
    %5 = arith.addf %2, %4 : vector<2x128xf32>
    %cst_5 = arith.constant 0.000000e+00 : f32
    %6 = vector.broadcast %cst_5 : f32 to vector<2x128xf32>
    %7 = arith.maximumf %5, %6 : vector<2x128xf32>
    %8 = arith.truncf %7 : vector<2x128xf32> to vector<2x128xbf16>
    %c0_6 = arith.constant 0 : index
    %c0_7 = arith.constant 0 : index
    %9 = vector.load %arg4[%c0_6, %c0_7] : memref<128x10xbf16, #tpu.memory_space<vmem>>, vector<128x10xbf16>
    %cst_8 = arith.constant dense<0.000000e+00> : vector<2x10xf32>
    %10 = tpu.matmul %8, %9, %cst_8 {dimension_numbers = #tpu.dot_dimension_numbers<[1], [0], [0], [1], [0, 0, 1, 1], [], []>} : vector<2x128xbf16>, vector<128x10xbf16>, vector<2x10xf32> -> vector<2x10xf32>
    %c0_9 = arith.constant 0 : index
    %c0_10 = arith.constant 0 : index
    %11 = vector.load %arg5[%c0_9, %c0_10] : memref<1x10xf32, #tpu.memory_space<vmem>>, vector<1x10xf32>
    %12 = vector.broadcast %11 : vector<1x10xf32> to vector<2x10xf32>
    %13 = arith.addf %10, %12 : vector<2x10xf32>
    %c0_11 = arith.constant 0 : index
    %c0_12 = arith.constant 0 : index
    %14 = vector.load %arg6[%c0_11, %c0_12] : memref<2x10xf32, #tpu.memory_space<vmem>>, vector<2x10xf32>
    tpu.vector_store %arg6[%c0_11, %c0_12], %13 {strides = array<i32>} : memref<2x10xf32, #tpu.memory_space<vmem>>, vector<2x10xf32>,
    return
  }
  func.func @transform_0(%arg0: i32) -> (i32, i32) {
    %c0_i32 = arith.constant 0 : i32
    %c0_i32_0 = arith.constant 0 : i32
    %c0_i32_1 = arith.constant 0 : i32
    return %c0_i32, %c0_i32_0 : i32, i32
  }
  func.func @transform_1(%arg0: i32) -> (i32, i32) {
    %c0_i32 = arith.constant 0 : i32
    %c0_i32_0 = arith.constant 0 : i32
    %c0_i32_1 = arith.constant 0 : i32
    return %c0_i32, %c0_i32_0 : i32, i32
  }
  func.func @transform_2(%arg0: i32) -> (i32, i32) {
    %c0_i32 = arith.constant 0 : i32
    %c0_i32_0 = arith.constant 0 : i32
    %c0_i32_1 = arith.constant 0 : i32
    return %c0_i32, %c0_i32_0 : i32, i32
  }
  func.func @transform_3(%arg0: i32) -> (i32, i32) {
    %c0_i32 = arith.constant 0 : i32
    %c0_i32_0 = arith.constant 0 : i32
    %c0_i32_1 = arith.constant 0 : i32
    return %c0_i32, %c0_i32_0 : i32, i32
  }
  func.func @transform_4(%arg0: i32) -> (i32, i32) {
    %c0_i32 = arith.constant 0 : i32
    %c0_i32_0 = arith.constant 0 : i32
    %c0_i32_1 = arith.constant 0 : i32
    return %c0_i32, %c0_i32_0 : i32, i32
  }
  func.func @transform_5(%arg0: i32) -> (i32, i32) {
    %c0_i32 = arith.constant 0 : i32
    %c0_i32_0 = arith.constant 0 : i32
    %c0_i32_1 = arith.constant 0 : i32
    return %c0_i32, %c0_i32_0 : i32, i32
  }
}

</mosaic_0001>

<bundles_post_ra>
// kernel: net_forward.3
= control target key start
LH: loop header
LB: loop body
LE: loop exit
PB: predicated region body
PF: predicated region fallthrough
CT: control target
= control target key end

     0   :  { %v293_v28 = vlaneseq  ;;  %v2129_v36 = vmov 1966171168   ;;  %s2619_s0 = inlined_call_operand.vmem [shape: bf16[2,2048], index: 0, kind: input, shape index: {}]   ;;  %s2620_s1 = inlined_call_operand.vmem [shape: bf16[2048,128], index: 1, kind: input, shape index: {}]   ;;  %s2621_s2 = inlined_call_operand.vmem [shape: f32[1,128], index: 2, kind: input, shape index: {}]   ;;  %s2622_s3 = inlined_call_operand.vmem [shape: bf16[128,10], index: 3, kind: input, shape index: {}]   ;;  %s2623_s4 = inlined_call_operand.vmem [shape: f32[1,10], index: 4, kind: input, shape index: {}]   ;;  %s2624_s5 = inlined_call_operand.hbm [shape: f32[2,10], index: 5, kind: output, shape index: {}]  }
   0x1   :  { %v1967_v0 = vld [vmem:[%s2620_s1 + $0x40] sm:$0xff]   ;;  %v1971_v4 = vld [vmem:[%s2620_s1 + $0x48] sm:$0xff]   ;;  %v1975_v8 = vld [vmem:[%s2620_s1 + $0x50] sm:$0xff]   ;;  %v291_v37 = vunpack.c.l.s4 %v2129_v36 }
   0x2   :  { %v1968_v1 = vld [vmem:[%s2620_s1 + $0xc0] sm:$0xff]   ;;  %1758 = vmatprep.subr.bf16.mxu0 %v1967_v0  ;;  %v1972_v5 = vld [vmem:[%s2620_s1 + $0xc8] sm:$0xff]   ;;  %v1976_v9 = vld [vmem:[%s2620_s1 + $0xd0] sm:$0xff]   ;;  %v294_v33 = vshrl.u32 %v293_v28, 7 }
   0x3   :  { %v1969_v2 = vld [vmem:[%s2620_s1] sm:$0xff]   ;;  %1780 = vmatprep.subr.bf16.mxu1 %v1968_v1  ;;  %v1973_v6 = vld [vmem:[%s2620_s1 + $0x8] sm:$0xff]   ;;  %v1977_v10 = vld [vmem:[%s2620_s1 + $0x10] sm:$0xff]   ;;  %v292_v40 = vunpack.c.0.s8 %v291_v37 }
   0x4   :  { %v1970_v3 = vld [vmem:[%s2620_s1 + $0x80] sm:$0xff]   ;;  %1759 = vmatpush3.bf16.msra.mxu0 %v1969_v2  ;;  %v1974_v7 = vld [vmem:[%s2620_s1 + $0x88] sm:$0xff]   ;;  %v1978_v11 = vld [vmem:[%s2620_s1 + $0x90] sm:$0xff]  }
   0x5   :  { %1781 = vmatpush3.bf16.msra.mxu1 %v1970_v3  ;;  %1760 = vmatprep.subr.bf16.mxu0 %v1971_v4  ;;  %v1979_v12 = vld [vmem:[%s2620_s1 + $0x58] sm:$0xff]   ;;  %v1983_v16 = vld [vmem:[%s2620_s1 + $0x60] sm:$0xff]   ;;  %v1987_v20 = vld [vmem:[%s2620_s1 + $0x68] sm:$0xff]   ;;  %v2268_v41 = vsub.s32 %v292_v40, %v294_v33 }
   0x6   :  { %1782 = vmatprep.subr.bf16.mxu1 %v1972_v5  ;;  %v1980_v13 = vld [vmem:[%s2620_s1 + $0xd8] sm:$0xff]   ;;  %v1984_v17 = vld [vmem:[%s2620_s1 + $0xe0] sm:$0xff]   ;;  %v1988_v21 = vld [vmem:[%s2620_s1 + $0xe8] sm:$0xff]  }
   0x7   :  { %v1981_v14 = vld [vmem:[%s2620_s1 + $0x18] sm:$0xff]   ;;  %v1985_v18 = vld [vmem:[%s2620_s1 + $0x20] sm:$0xff]   ;;  %v1989_v22 = vld [vmem:[%s2620_s1 + $0x28] sm:$0xff]  }
   0x8   :  { %1761 = vmatpush3.bf16.msra.mxu0 %v1973_v6  ;;  %v1982_v15 = vld [vmem:[%s2620_s1 + $0x98] sm:$0xff]   ;;  %v1986_v19 = vld [vmem:[%s2620_s1 + $0xa0] sm:$0xff]   ;;  %v1990_v23 = vld [vmem:[%s2620_s1 + $0xa8] sm:$0xff]  }
   0x9   :  { %1783 = vmatpush3.bf16.msra.mxu1 %v1974_v7  ;;  %1762 = vmatprep.subr.bf16.mxu0 %v1975_v8  ;;  %v1991_v24 = vld [vmem:[%s2620_s1 + $0x70] sm:$0xff]   ;;  %v1995_v29 = vld [vmem:[%s2620_s1 + $0x78] sm:$0xff]   ;;  %v22_v34 = vld [vmem:[%s2619_s0] sm:$0xff] }
   0xa   :  { %1784 = vmatprep.subr.bf16.mxu1 %v1976_v9  ;;  %v1992_v25 = vld [vmem:[%s2620_s1 + $0xf0] sm:$0xff]   ;;  %v1996_v30 = vld [vmem:[%s2620_s1 + $0xf8] sm:$0xff]   ;;  %v2000_v35 = vld [vmem:[%s2620_s1 + $0x140] sm:$0xff]   ;;  %v289_v39 = vcombine.high %v22_v34, %v22_v34  ;;  %v296_v42 = vrot.slane %v22_v34, %v2268_v41 }
   0xb   :  { %v1993_v26 = vld [vmem:[%s2620_s1 + $0x30] sm:$0xff]   ;;  %v1997_v31 = vld [vmem:[%s2620_s1 + $0x38] sm:$0xff]   ;;  %v2001_v38 = vld [vmem:[%s2620_s1 + $0x1c0] sm:$0xff]  }
   0xc   :  { %1763 = vmatpush3.bf16.msra.mxu0 %v1977_v10  ;;  %v1994_v27 = vld [vmem:[%s2620_s1 + $0xb0] sm:$0xff]   ;;  %v1998_v32 = vld [vmem:[%s2620_s1 + $0xb8] sm:$0xff]   ;;  %v2272_v43 = vrot.slane %v289_v39, %v2268_v41  ;;  %v304_v44 = vcombine.high %v296_v42, %v296_v42  ;;  %v312_v45 = vrot.slane %v296_v42, %v2268_v41  ;;  %v2002_v47 = vld [vmem:[%s2620_s1 + $0x100] sm:$0xff]  }
   0xd   :  { %1785 = vmatpush3.bf16.msra.mxu1 %v1978_v11  ;;  %1764 = vmatprep.subr.bf16.mxu0 %v1979_v12  ;;  %v2003_v49 = vld [vmem:[%s2620_s1 + $0x180] sm:$0xff]   ;;  %v2004_v52 = vld [vmem:[%s2620_s1 + $0x148] sm:$0xff]   ;;  %v2008_v58 = vld [vmem:[%s2620_s1 + $0x150] sm:$0xff]  }
   0xe   :  { %1786 = vmatprep.subr.bf16.mxu1 %v1980_v13  ;;  %v305_v46 = vcombine.high %v2272_v43, %v2272_v43  ;;  %v326_v48 = vrot.slane %v304_v44, %v2268_v41  ;;  %v334_v51 = vcombine.high %v312_v45, %v312_v45  ;;  %v2005_v54 = vld [vmem:[%s2620_s1 + $0x1c8] sm:$0xff]   ;;  %v2009_v59 = vld [vmem:[%s2620_s1 + $0x1d0] sm:$0xff]   ;;  %v2012_v62 = vld [vmem:[%s2620_s1 + $0x158] sm:$0xff]  }
   0xf   :  { %v2006_v55 = vld [vmem:[%s2620_s1 + $0x108] sm:$0xff]   ;;  %v2010_v60 = vld [vmem:[%s2620_s1 + $0x110] sm:$0xff]   ;;  %v2013_v63 = vld [vmem:[%s2620_s1 + $0x1d8] sm:$0xff]  }
  0x10   :  { %1765 = vmatpush3.bf16.msra.mxu0 %v1981_v14  ;;  %v333_v50 = vrot.slane %v305_v46, %v2268_v41  ;;  %1203 = vmatprep.mubr.bf16.mxu0 %v326_v48  ;;  %v336_v53 = vcombine.high %v326_v48, %v326_v48  ;;  %v2007_v57 = vld [vmem:[%s2620_s1 + $0x188] sm:$0xff]   ;;  %v2011_v61 = vld [vmem:[%s2620_s1 + $0x190] sm:$0xff]   ;;  %v2014_v0 = vld [vmem:[%s2620_s1 + $0x118] sm:$0xff]  }
  0x11   :  { %1787 = vmatpush3.bf16.msra.mxu1 %v1982_v15  ;;  %1766 = vmatprep.subr.bf16.mxu0 %v1983_v16  ;;  %v2015_v1 = vld [vmem:[%s2620_s1 + $0x198] sm:$0xff]   ;;  %v2016_v2 = vld [vmem:[%s2620_s1 + $0x160] sm:$0xff]   ;;  %v2020_v6 = vld [vmem:[%s2620_s1 + $0x168] sm:$0xff]  }
  0x12   :  { %1788 = vmatprep.subr.bf16.mxu1 %v1984_v17  ;;  %v337_v56 = vcombine.high %v333_v50, %v333_v50  ;;  %1243 = vmatprep.mubr.bf16.mxu1 %v336_v53  ;;  %v2017_v3 = vld [vmem:[%s2620_s1 + $0x1e0] sm:$0xff]   ;;  %v2021_v7 = vld [vmem:[%s2620_s1 + $0x1e8] sm:$0xff]   ;;  %v2024_v10 = vld [vmem:[%s2620_s1 + $0x170] sm:$0xff]  }
  0x13   :  { %v2018_v4 = vld [vmem:[%s2620_s1 + $0x120] sm:$0xff]   ;;  %v2022_v8 = vld [vmem:[%s2620_s1 + $0x128] sm:$0xff]   ;;  %v2025_v11 = vld [vmem:[%s2620_s1 + $0x1f0] sm:$0xff]  }
  0x14   :  { %1767 = vmatpush3.bf16.msra.mxu0 %v1985_v18  ;;  %v2019_v5 = vld [vmem:[%s2620_s1 + $0x1a0] sm:$0xff]   ;;  %v2023_v9 = vld [vmem:[%s2620_s1 + $0x1a8] sm:$0xff]   ;;  %v2026_v12 = vld [vmem:[%s2620_s1 + $0x130] sm:$0xff]   ;;  %v319_v18 = vrot.slane %v2272_v43, %v2268_v41 }
  0x15   :  { %1789 = vmatpush3.bf16.msra.mxu1 %v1986_v19  ;;  %1768 = vmatprep.subr.bf16.mxu0 %v1987_v20  ;;  %v2027_v13 = vld [vmem:[%s2620_s1 + $0x1b0] sm:$0xff]   ;;  %v2028_v14 = vld [vmem:[%s2620_s1 + $0x178] sm:$0xff]   ;;  %v2032_v19 = vld [vmem:[%s2620_s1 + $0x240] sm:$0xff]  }
  0x16   :  { %1790 = vmatprep.subr.bf16.mxu1 %v1988_v21  ;;  %v2029_v15 = vld [vmem:[%s2620_s1 + $0x1f8] sm:$0xff]   ;;  %v2033_v20 = vld [vmem:[%s2620_s1 + $0x2c0] sm:$0xff]   ;;  %v2040_v28 = vld [vmem:[%s2620_s1 + $0x250] sm:$0xff]  }
  0x17   :  { %v2030_v16 = vld [vmem:[%s2620_s1 + $0x138] sm:$0xff]   ;;  %v2034_v21 = vld [vmem:[%s2620_s1 + $0x200] sm:$0xff]   ;;  %v2052_v40 = vld [vmem:[%s2620_s1 + $0x268] sm:$0xff]  }
  0x18   :  { %1769 = vmatpush3.bf16.msra.mxu0 %v1989_v22  ;;  %v2031_v17 = vld [vmem:[%s2620_s1 + $0x1b8] sm:$0xff]   ;;  %v2035_v22 = vld [vmem:[%s2620_s1 + $0x280] sm:$0xff]   ;;  %v2053_v42 = vld [vmem:[%s2620_s1 + $0x2e8] sm:$0xff]  }
  0x19   :  { %1791 = vmatpush3.bf16.msra.mxu1 %v1990_v23  ;;  %1770 = vmatprep.subr.bf16.mxu0 %v1991_v24  ;;  %v335_v23 = vcombine.high %v319_v18, %v319_v18  ;;  %v2036_v24 = vld [vmem:[%s2620_s1 + $0x248] sm:$0xff]   ;;  %v2045_v33 = vld [vmem:[%s2620_s1 + $0x2d8] sm:$0xff]   ;;  %v2048_v36 = vld [vmem:[%s2620_s1 + $0x260] sm:$0xff]  }
  0x1a   :  { %1792 = vmatprep.subr.bf16.mxu1 %v1992_v25  ;;  %v2037_v25 = vld [vmem:[%s2620_s1 + $0x2c8] sm:$0xff]   ;;  %v2046_v34 = vld [vmem:[%s2620_s1 + $0x218] sm:$0xff]   ;;  %v2049_v37 = vld [vmem:[%s2620_s1 + $0x2e0] sm:$0xff]  }
  0x1b   :  { %v2051_v39 = vld [vmem:[%s2620_s1 + $0x2a0] sm:$0xff]   ;;  %v2054_v43 = vld [vmem:[%s2620_s1 + $0x228] sm:$0xff]  }
  0x1c   :  { %1771 = vmatpush3.bf16.msra.mxu0 %v1993_v26  ;;  %v2038_v26 = vld [vmem:[%s2620_s1 + $0x208] sm:$0xff]  }
  0x1d   :  { %1793 = vmatpush3.bf16.msra.mxu1 %v1994_v27  ;;  %1772 = vmatprep.subr.bf16.mxu0 %v1995_v29  ;;  %v2039_v27 = vld [vmem:[%s2620_s1 + $0x288] sm:$0xff]   ;;  %v2041_v29 = vld [vmem:[%s2620_s1 + $0x2d0] sm:$0xff]  }
  0x1e   :  { %1794 = vmatprep.subr.bf16.mxu1 %v1996_v30  ;;  %v2042_v30 = vld [vmem:[%s2620_s1 + $0x210] sm:$0xff]   ;;  %v2055_v44 = vld [vmem:[%s2620_s1 + $0x2a8] sm:$0xff]  }
  0x1f   :  { %v23_v46 = vld [vmem:[%s2619_s0 + $0x8] sm:$0xff] }
  0x20   :  { %1773 = vmatpush3.bf16.msra.mxu0 %v1997_v31  ;;  %v2043_v31 = vld [vmem:[%s2620_s1 + $0x290] sm:$0xff]   ;;  %v345_v48 = vrot.slane %v23_v46, %v2268_v41 }
  0x21   :  { %1795 = vmatpush3.bf16.msra.mxu1 %v1998_v32  ;;  %1802 = vmatprep.subr.bf16.mxu0 %v2000_v35  ;;  %v2044_v32 = vld [vmem:[%s2620_s1 + $0x258] sm:$0xff]  }
  0x22   :  { %1824 = vmatprep.subr.bf16.mxu1 %v2001_v38  ;;  %v2047_v35 = vld [vmem:[%s2620_s1 + $0x298] sm:$0xff]   ;;  %v2050_v38 = vld [vmem:[%s2620_s1 + $0x220] sm:$0xff]  }
  0x23   :  { %1204 = vmatmul.mubr.bf16.vlgmr.msra.gmra.mrb[0].mxu0 %v312_v45  ;;  %v2056_v45 = vld [vmem:[%s2620_s1 + $0x270] sm:$0xff]  }
  0x24   :  { %1803 = vmatpush3.bf16.msra.mxu0 %v2002_v47  ;;  %1244 = vmatmul.mubr.bf16.vlgmr.msra.gmra.mrb[0].mxu1 %v334_v51  ;;  %v2057_v47 = vld [vmem:[%s2620_s1 + $0x2f0] sm:$0xff]  }
  0x25   :  { %1804 = vmatprep.subr.bf16.mxu0 %v2004_v52  ;;  %1825 = vmatpush3.bf16.msra.mxu1 %v2003_v49  ;;  %v338_v49 = vcombine.high %v23_v46, %v23_v46  ;;  %v2059_v51 = vld [vmem:[%s2620_s1 + $0x2b0] sm:$0xff]   ;;  %v353_v52 = vcombine.high %v345_v48, %v345_v48 }
  0x26   :  { %1283 = vmatprep.mubr.bf16.mxu0 %v333_v50  ;;  %1826 = vmatprep.subr.bf16.mxu1 %v2005_v54  ;;  %v2058_v50 = vld [vmem:[%s2620_s1 + $0x230] sm:$0xff]   ;;  %v2060_v54 = vld [vmem:[%s2620_s1 + $0x278] sm:$0xff]  }
  0x27   :  { %1323 = vmatprep.mubr.bf16.mxu1 %v337_v56  ;;  %v2460_v53 = vrot.slane %v338_v49, %v2268_v41  ;;  %v375_v56 = vrot.slane %v353_v52, %v2268_v41 }
  0x28   :  { %1805 = vmatpush3.bf16.msra.mxu0 %v2006_v55  ;;  %v2061_v55 = vld [vmem:[%s2620_s1 + $0x2f8] sm:$0xff]  }
  0x29   :  { %1806 = vmatprep.subr.bf16.mxu0 %v2008_v58  ;;  %1827 = vmatpush3.bf16.msra.mxu1 %v2007_v57  ;;  %v354_v57 = vcombine.high %v2460_v53, %v2460_v53  ;;  %v2062_v58 = vld [vmem:[%s2620_s1 + $0x238] sm:$0xff]  }
  0x2a   :  { %1828 = vmatprep.subr.bf16.mxu1 %v2009_v59  ;;  %v2063_v59 = vld [vmem:[%s2620_s1 + $0x2b8] sm:$0xff]  }
  0x2c   :  { %1807 = vmatpush3.bf16.msra.mxu0 %v2010_v60  ;;  %v385_v60 = vcombine.high %v375_v56, %v375_v56 }
  0x2d   :  { %1808 = vmatprep.subr.bf16.mxu0 %v2012_v62  ;;  %1829 = vmatpush3.bf16.msra.mxu1 %v2011_v61  ;;  %v361_v61 = vrot.slane %v345_v48, %v2268_v41  ;;  %v2064_v62 = vld [vmem:[%s2620_s1 + $0x340] sm:$0xff]  }
  0x2e   :  { %1830 = vmatprep.subr.bf16.mxu1 %v2013_v63  ;;  %v2065_v63 = vld [vmem:[%s2620_s1 + $0x3c0] sm:$0xff]  }
  0x30   :  { %1809 = vmatpush3.bf16.msra.mxu0 %v2014_v0  ;;  %v382_v0 = vrot.slane %v354_v57, %v2268_v41 }
  0x31   :  { %1810 = vmatprep.subr.bf16.mxu0 %v2016_v2  ;;  %1831 = vmatpush3.bf16.msra.mxu1 %v2015_v1  ;;  %v2066_v1 = vld [vmem:[%s2620_s1 + $0x300] sm:$0xff]  }
  0x32   :  { %1832 = vmatprep.subr.bf16.mxu1 %v2017_v3  ;;  %v2067_v2 = vld [vmem:[%s2620_s1 + $0x380] sm:$0xff]   ;;  %v383_v3 = vcombine.high %v361_v61, %v361_v61 }
  0x34   :  { %1811 = vmatpush3.bf16.msra.mxu0 %v2018_v4  ;;  %v2068_v4 = vld [vmem:[%s2620_s1 + $0x348] sm:$0xff]  }
  0x35   :  { %1812 = vmatprep.subr.bf16.mxu0 %v2020_v6  ;;  %1833 = vmatpush3.bf16.msra.mxu1 %v2019_v5  ;;  %v2069_v5 = vld [vmem:[%s2620_s1 + $0x3c8] sm:$0xff]   ;;  %v386_v6 = vcombine.high %v382_v0, %v382_v0 }
  0x36   :  { %1834 = vmatprep.subr.bf16.mxu1 %v2021_v7  ;;  %v2070_v7 = vld [vmem:[%s2620_s1 + $0x308] sm:$0xff]  }
  0x38   :  { %1813 = vmatpush3.bf16.msra.mxu0 %v2022_v8  ;;  %v2071_v8 = vld [vmem:[%s2620_s1 + $0x388] sm:$0xff]  }
  0x39   :  { %1814 = vmatprep.subr.bf16.mxu0 %v2024_v10  ;;  %1835 = vmatpush3.bf16.msra.mxu1 %v2023_v9  ;;  %v2072_v9 = vld [vmem:[%s2620_s1 + $0x350] sm:$0xff]  }
  0x3a   :  { %1836 = vmatprep.subr.bf16.mxu1 %v2025_v11  ;;  %v2073_v10 = vld [vmem:[%s2620_s1 + $0x3d0] sm:$0xff]  }
  0x3b   :  { %v2074_v11 = vld [vmem:[%s2620_s1 + $0x310] sm:$0xff]  }
  0x3c   :  { %1815 = vmatpush3.bf16.msra.mxu0 %v2026_v12  ;;  %v2075_v12 = vld [vmem:[%s2620_s1 + $0x390] sm:$0xff]  }
  0x3d   :  { %1816 = vmatprep.subr.bf16.mxu0 %v2028_v14  ;;  %1837 = vmatpush3.bf16.msra.mxu1 %v2027_v13  ;;  %v2076_v13 = vld [vmem:[%s2620_s1 + $0x358] sm:$0xff]  }
  0x3e   :  { %1838 = vmatprep.subr.bf16.mxu1 %v2029_v15  ;;  %v2077_v14 = vld [vmem:[%s2620_s1 + $0x3d8] sm:$0xff]  }
  0x3f   :  { %v2078_v15 = vld [vmem:[%s2620_s1 + $0x318] sm:$0xff]  }
  0x40   :  { %1817 = vmatpush3.bf16.msra.mxu0 %v2030_v16  ;;  %v2079_v16 = vld [vmem:[%s2620_s1 + $0x398] sm:$0xff]  }
  0x41   :  { %1846 = vmatprep.subr.bf16.mxu0 %v2032_v19  ;;  %1839 = vmatpush3.bf16.msra.mxu1 %v2031_v17  ;;  %v2080_v17 = vld [vmem:[%s2620_s1 + $0x360] sm:$0xff]  }
  0x42   :  { %1868 = vmatprep.subr.bf16.mxu1 %v2033_v20  ;;  %v2082_v19 = vld [vmem:[%s2620_s1 + $0x320] sm:$0xff]  }
  0x43   :  { %1284 = vmatmul.mubr.bf16.vlgmr.msra.gmra.mrb[4].mxu0 %v319_v18  ;;  %v2081_v18 = vld [vmem:[%s2620_s1 + $0x3e0] sm:$0xff]  }
  0x44   :  { %1847 = vmatpush3.bf16.msra.mxu0 %v2034_v21  ;;  %1324 = vmatmul.mubr.bf16.vlgmr.msra.gmra.mrb[4].mxu1 %v335_v23  ;;  %v2083_v20 = vld [vmem:[%s2620_s1 + $0x3a0] sm:$0xff]   ;;  %v2084_v21 = vld [vmem:[%s2620_s1 + $0x368] sm:$0xff]  }
  0x45   :  { %1848 = vmatprep.subr.bf16.mxu0 %v2036_v24  ;;  %1869 = vmatpush3.bf16.msra.mxu1 %v2035_v22  ;;  %v2085_v22 = vld [vmem:[%s2620_s1 + $0x3e8] sm:$0xff]  }
  0x46   :  { %1870 = vmatprep.subr.bf16.mxu1 %v2037_v25  ;;  %1363 = vmatprep.mubr.bf16.mxu0 %v375_v56  ;;  %v2086_v23 = vld [vmem:[%s2620_s1 + $0x328] sm:$0xff]   ;;  %v2088_v25 = vld [vmem:[%s2620_s1 + $0x370] sm:$0xff]  }
  0x47   :  { %1403 = vmatprep.mubr.bf16.mxu1 %v385_v60  ;;  %v2087_v24 = vld [vmem:[%s2620_s1 + $0x3a8] sm:$0xff]  }
  0x48   :  { %1849 = vmatpush3.bf16.msra.mxu0 %v2038_v26  ;;  %v2089_v26 = vld [vmem:[%s2620_s1 + $0x3f0] sm:$0xff]  }
  0x49   :  { %1850 = vmatprep.subr.bf16.mxu0 %v2040_v28  ;;  %1871 = vmatpush3.bf16.msra.mxu1 %v2039_v27  ;;  %v2090_v27 = vld [vmem:[%s2620_s1 + $0x330] sm:$0xff]  }
  0x4a   :  { %1872 = vmatprep.subr.bf16.mxu1 %v2041_v29  ;;  %v2091_v28 = vld [vmem:[%s2620_s1 + $0x3b0] sm:$0xff]   ;;  %v2092_v29 = vld [vmem:[%s2620_s1 + $0x378] sm:$0xff]  }
  0x4c   :  { %1851 = vmatpush3.bf16.msra.mxu0 %v2042_v30  ;;  %v2093_v30 = vld [vmem:[%s2620_s1 + $0x3f8] sm:$0xff]  }
  0x4d   :  { %1852 = vmatprep.subr.bf16.mxu0 %v2044_v32  ;;  %1873 = vmatpush3.bf16.msra.mxu1 %v2043_v31 }
  0x4e   :  { %1874 = vmatprep.subr.bf16.mxu1 %v2045_v33 }
  0x50   :  { %1853 = vmatpush3.bf16.msra.mxu0 %v2046_v34 }
  0x51   :  { %1854 = vmatprep.subr.bf16.mxu0 %v2048_v36  ;;  %1875 = vmatpush3.bf16.msra.mxu1 %v2047_v35 }
  0x52   :  { %1876 = vmatprep.subr.bf16.mxu1 %v2049_v37 }
  0x54   :  { %1855 = vmatpush3.bf16.msra.mxu0 %v2050_v38 }
  0x55   :  { %1856 = vmatprep.subr.bf16.mxu0 %v2052_v40  ;;  %1877 = vmatpush3.bf16.msra.mxu1 %v2051_v39 }
  0x56   :  { %1878 = vmatprep.subr.bf16.mxu1 %v2053_v42 }
  0x58   :  { %1857 = vmatpush3.bf16.msra.mxu0 %v2054_v43 }
  0x59   :  { %1858 = vmatprep.subr.bf16.mxu0 %v2056_v45  ;;  %1879 = vmatpush3.bf16.msra.mxu1 %v2055_v44 }
  0x5a   :  { %1880 = vmatprep.subr.bf16.mxu1 %v2057_v47 }
  0x5c   :  { %1859 = vmatpush3.bf16.msra.mxu0 %v2058_v50 }
  0x5d   :  { %1860 = vmatprep.subr.bf16.mxu0 %v2060_v54  ;;  %1881 = vmatpush3.bf16.msra.mxu1 %v2059_v51 }
  0x5e   :  { %1882 = vmatprep.subr.bf16.mxu1 %v2061_v55 }
  0x60   :  { %1861 = vmatpush3.bf16.msra.mxu0 %v2062_v58 }
  0x61   :  { %1890 = vmatprep.subr.bf16.mxu0 %v2064_v62  ;;  %1883 = vmatpush3.bf16.msra.mxu1 %v2063_v59 }
  0x62   :  { %1912 = vmatprep.subr.bf16.mxu1 %v2065_v63 }
  0x63   :  { %1364 = vmatmul.mubr.bf16.vlgmr.msra.gmra.mrb[8].mxu0 %v361_v61 }
  0x64   :  { %1891 = vmatpush3.bf16.msra.mxu0 %v2066_v1  ;;  %1443 = vmatprep.mubr.bf16.mxu0 %v382_v0 }
  0x65   :  { %1404 = vmatmul.mubr.bf16.vlgmr.msra.gmra.mrb[8].mxu1 %v383_v3  ;;  %1892 = vmatprep.subr.bf16.mxu0 %v2068_v4 }
  0x66   :  { %1913 = vmatpush3.bf16.msra.mxu1 %v2067_v2  ;;  %1483 = vmatprep.mubr.bf16.mxu1 %v386_v6 }
  0x67   :  { %1914 = vmatprep.subr.bf16.mxu1 %v2069_v5 }
  0x68   :  { %1893 = vmatpush3.bf16.msra.mxu0 %v2070_v7 }
  0x69   :  { %1894 = vmatprep.subr.bf16.mxu0 %v2072_v9 }
  0x6a   :  { %1915 = vmatpush3.bf16.msra.mxu1 %v2071_v8 }
  0x6b   :  { %1916 = vmatprep.subr.bf16.mxu1 %v2073_v10 }
  0x6c   :  { %1895 = vmatpush3.bf16.msra.mxu0 %v2074_v11 }
  0x6d   :  { %1896 = vmatprep.subr.bf16.mxu0 %v2076_v13 }
  0x6e   :  { %1917 = vmatpush3.bf16.msra.mxu1 %v2075_v12 }
  0x6f   :  { %1918 = vmatprep.subr.bf16.mxu1 %v2077_v14 }
  0x70   :  { %1897 = vmatpush3.bf16.msra.mxu0 %v2078_v15 }
  0x71   :  { %1898 = vmatprep.subr.bf16.mxu0 %v2080_v17 }
  0x72   :  { %1919 = vmatpush3.bf16.msra.mxu1 %v2079_v16 }
  0x73   :  { %1920 = vmatprep.subr.bf16.mxu1 %v2081_v18 }
  0x74   :  { %1899 = vmatpush3.bf16.msra.mxu0 %v2082_v19 }
  0x75   :  { %1900 = vmatprep.subr.bf16.mxu0 %v2084_v21 }
  0x76   :  { %1921 = vmatpush3.bf16.msra.mxu1 %v2083_v20 }
  0x77   :  { %1922 = vmatprep.subr.bf16.mxu1 %v2085_v22 }
  0x78   :  { %1901 = vmatpush3.bf16.msra.mxu0 %v2086_v23 }
  0x79   :  { %1902 = vmatprep.subr.bf16.mxu0 %v2088_v25 }
  0x7a   :  { %1923 = vmatpush3.bf16.msra.mxu1 %v2087_v24 }
  0x7b   :  { %1924 = vmatprep.subr.bf16.mxu1 %v2089_v26 }
  0x7c   :  { %10 = vsyncpa [#allocation3], 0  ;;  %1903 = vmatpush3.bf16.msra.mxu0 %v2090_v27  ;;  %v2094_v31 = vld [vmem:[%s2620_s1 + $0x338] sm:$0xff]   ;;  %v368_v32 = vrot.slane %v2460_v53, %v2268_v41  ;;  %v2097_v35 = vld [vmem:[%s2622_s3] sm:$0xff]   ;;  %v2130_v36 = vmov 0.0   ;;  %vm2131_vm0 = vmmov 0  }
  0x7d   :  { %1904 = vmatprep.subr.bf16.mxu0 %v2092_v29  ;;  %v2095_v33 = vld [vmem:[%s2620_s1 + $0x3b8] sm:$0xff]   ;;  %v2098_v41 = vld [vmem:[%s2622_s3 + $0x8] sm:$0xff]   ;;  %v2099_v37 = vld [vmem:[%s2622_s3 + $0x10] sm:$0xff]   ;;  %s2132_s16 = smov [#allocation2]   ;;  %vm1604_vm1 = vcmask 74752  }
  0x7e   :  { %1925 = vmatpush3.bf16.msra.mxu1 %v2091_v28  ;;  %v384_v34 = vcombine.high %v368_v32, %v368_v32  ;;  %v2100_v38 = vld [vmem:[%s2622_s3 + $0x18] sm:$0xff]   ;;  %v2101_v39 = vld [vmem:[%s2622_s3 + $0x20] sm:$0xff]   ;;  %v2102_v40 = vld [vmem:[%s2622_s3 + $0x28] sm:$0xff]   ;;  %s1612_s17 = sshll.u32 %s2132_s16, 4  ;;  %s1613_s17 = int_to_ptr.vmem [resolvable:$true] %s1612_s17 }
  0x7f   :  { %1926 = vmatprep.subr.bf16.mxu1 %v2093_v30  ;;  %v2103_v42 = vld [vmem:[%s2622_s3 + $0x30] sm:$0xff]   ;;  %v2104_v43 = vld [vmem:[%s2622_s3 + $0x38] sm:$0xff]   ;;  %v1620_v45 = vld [vmem:[%s2621_s2] ss:$0 sm:$0xff]  ;;  %s2105_s18 = scalar_lea.vmem %s1613_s17, 32  ;;  %p2110_p1 = scmp.lt.s32.totalorder %s1613_s17, %s1613_s17 }
  0x80   :  { %1905 = vmatpush3.bf16.msra.mxu0 %v2094_v31  ;;  %v1749_v31 = vld [vmem:[%s2623_s4] ss:$0 sm:$0xff]  ;;  %p2106_p0 = scmp.ne.s32.totalorder %s1613_s17, %s2105_s18  ;;  %p2111_p2 = scmp.lt.s32.totalorder %s2105_s18, %s2105_s18 }
  0x81   :  { %1943 = vmatprep.subr.bf16.mxu0 %v2130_v36 }
  0x82   :  { %1927 = vmatpush3.bf16.msra.mxu1 %v2095_v33  ;;  %p2112_p3 = por %p2111_p2, %p2110_p1 }
  0x83   :  { %1444 = vmatmul.mubr.bf16.vlgmr.msra.gmra.mrb[12].mxu0 %v368_v32 }
  0x84   :  { %1944 = vmatpush3.bf16.msra.mxu0 %v2097_v35  ;;  %1959 = vmatprep.mubr.msk.bf16.mxu0 %vm2131_vm0, %v2130_v36  ;;  %p2113_p4 = pnand %p2112_p3, %p2106_p0 }
  0x85   :  { %1484 = vmatmul.mubr.bf16.vlgmr.msra.gmra.mrb[12].mxu1 %v384_v34  ;;  %1945 = vmatprep.subr.bf16.mxu0 %v2130_v36 }
  0x88   :  { %1946 = vmatpush3.bf16.msra.mxu0 %v2098_v41 }
  0x89   :  { %1947 = vmatprep.subr.bf16.mxu0 %v2130_v36 }
  0x8c   :  { %1948 = vmatpush3.bf16.msra.mxu0 %v2099_v37 }
  0x8d   :  { %1949 = vmatprep.subr.bf16.mxu0 %v2130_v36 }
  0x90   :  { %1950 = vmatpush3.bf16.msra.mxu0 %v2100_v38 }
  0x91   :  { %1951 = vmatprep.subr.bf16.mxu0 %v2130_v36 }
  0x94   :  { %1952 = vmatpush3.bf16.msra.mxu0 %v2101_v39 }
  0x95   :  { %1953 = vmatprep.subr.bf16.mxu0 %v2130_v36 }
  0x98   :  { %1954 = vmatpush3.bf16.msra.mxu0 %v2102_v40 }
  0x99   :  { %1955 = vmatprep.subr.bf16.mxu0 %v2130_v36 }
  0x9c   :  { %1956 = vmatpush3.bf16.msra.mxu0 %v2103_v42 }
  0x9d   :  { %1957 = vmatprep.subr.bf16.mxu0 %v2130_v36 }
  0xa0   :  { %1958 = vmatpush3.bf16.msra.mxu0 %v2104_v43 }
  0xf6   :  { %v1774_v44 = vpop.f32.mrb[0].mxu0 }
  0xf7   :  { %v1775_v46 = vpop.f32.mrb[1].mxu0  ;;  %v1796_v47 = vpop.f32.mrb[0].mxu1 }
  0xf8   :  { %v1776_v48 = vadd.f32 %v1775_v46, %v1774_v44  ;;  %v1777_v49 = vpop.f32.mrb[2].mxu0  ;;  %v1797_v50 = vpop.f32.mrb[1].mxu1 }
  0xf9   :  { %v1778_v51 = vpop.f32.mrb[3].mxu0  ;;  %v1798_v53 = vadd.f32 %v1797_v50, %v1796_v47  ;;  %v1799_v54 = vpop.f32.mrb[2].mxu1 }
  0xfa   :  { %v1206_v52 = vadd.f32 %v1776_v48, %v1620_v45  ;;  %v1800_v55 = vpop.f32.mrb[3].mxu1 }
  0xfc   :  { %v1246_v56 = vadd.f32 %v1798_v53, %v1206_v52 }
 0x116   :  { %v1818_v57 = vpop.f32.mrb[4].mxu0 }
 0x117   :  { %v1819_v58 = vpop.f32.mrb[5].mxu0  ;;  %v1840_v59 = vpop.f32.mrb[4].mxu1 }
 0x118   :  { %v1820_v60 = vadd.f32 %v1819_v58, %v1818_v57  ;;  %v1821_v61 = vpop.f32.mrb[6].mxu0  ;;  %v1841_v62 = vpop.f32.mrb[5].mxu1 }
 0x119   :  { %v1822_v63 = vpop.f32.mrb[7].mxu0  ;;  %v1842_v1 = vadd.f32 %v1841_v62, %v1840_v59  ;;  %v1843_v2 = vpop.f32.mrb[6].mxu1 }
 0x11a   :  { %v1286_v0 = vadd.f32 %v1820_v60, %v1246_v56  ;;  %v1844_v3 = vpop.f32.mrb[7].mxu1 }
 0x11c   :  { %v1326_v4 = vadd.f32 %v1842_v1, %v1286_v0 }
 0x136   :  { %v1862_v5 = vpop.f32.mrb[8].mxu0 }
 0x137   :  { %v1863_v6 = vpop.f32.mrb[9].mxu0 }
 0x138   :  { %v1884_v7 = vpop.f32.mrb[8].mxu1  ;;  %v1864_v8 = vadd.f32 %v1863_v6, %v1862_v5  ;;  %v1865_v9 = vpop.f32.mrb[10].mxu0 }
 0x139   :  { %v1885_v10 = vpop.f32.mrb[9].mxu1  ;;  %v1866_v11 = vpop.f32.mrb[11].mxu0 }
 0x13a   :  { %v1366_v12 = vadd.f32 %v1864_v8, %v1326_v4  ;;  %v1886_v13 = vadd.f32 %v1885_v10, %v1884_v7  ;;  %v1887_v14 = vpop.f32.mrb[10].mxu1 }
 0x13b   :  { %v1888_v15 = vpop.f32.mrb[11].mxu1 }
 0x13c   :  { %v1406_v16 = vadd.f32 %v1886_v13, %v1366_v12 }
 0x156   :  { %v1906_v17 = vpop.f32.mrb[12].mxu0 }
 0x157   :  { %v1907_v18 = vpop.f32.mrb[13].mxu0 }
 0x158   :  { %v1928_v19 = vpop.f32.mrb[12].mxu1  ;;  %v1908_v20 = vadd.f32 %v1907_v18, %v1906_v17  ;;  %v1909_v21 = vpop.f32.mrb[14].mxu0 }
 0x159   :  { %v1929_v22 = vpop.f32.mrb[13].mxu1  ;;  %v1910_v23 = vpop.f32.mrb[15].mxu0 }
 0x15a   :  { %v1446_v24 = vadd.f32 %v1908_v20, %v1406_v16  ;;  %v1930_v25 = vadd.f32 %v1929_v22, %v1928_v19  ;;  %v1931_v26 = vpop.f32.mrb[14].mxu1 }
 0x15b   :  { %v1932_v27 = vpop.f32.mrb[15].mxu1 }
 0x15c   :  { %v1486_v28 = vadd.f32 %v1930_v25, %v1446_v24 }
 0x15e   :  { %v1491_v29 = vmax.f32 %v1486_v28, 0.0 }
 0x160   :  { %v1492_v30 = vpack.c.bf16 %v1491_v29, %v1491_v29 }
 0x162   :  { %1960 = vmatmul.mubr.bf16.vlgmr.msra.gmra.mrb[16].mxu0 %v1492_v30 }
 0x235   :  { %v1598_v32 = vpop.f32.mrb[16].mxu0 }
 0x236   :  { %v1599_v33 = vadd.f32 %v1749_v31, %v1598_v32  ;;  %v1961_v34 = vpop.f32.mrb[17].mxu0 }
 0x237   :  { %v1601_v35 = vpop.f32.mrb[18].mxu0 }
 0x238   :  { %v1962_v36 = vpop.f32.mrb[19].mxu0  ;;  %1605 = vst.msk [vmem:[#allocation2] sm:$0x3] %vm1604_vm1, %v1599_v33 }
 0x239   :  { %2116 = shalt.err (!%p2113_p4)
}
 0x23a   :  { %s2117_s4 = scalar_lea.hbm %s2624_s5, 32 }
 0x23b   :  { %p2118_p5 = scmp.ne.s32.totalorder %s2624_s5, %s2117_s4  ;;  %p2121_p6 = scmp.lt.u32.totalorder %s2117_s4, %s2624_s5 }
 0x23d   :  { %p2123_p7 = pnand %p2121_p6, %p2118_p5 }
 0x23f   :  { %2126 = shalt.err (!%p2123_p7)
}
 0x240   :  { %1615 = dma.vmem_to_hbm [thread:$0]  %s1613_s17, 32, %s2624_s5, [#allocation3]  }
 0x241   :  { %2127 = dma.done.wait [#allocation3], 32  }
 0x242   :  { %2128 = vsyncadd [#allocation3], 4294967264 }
 0x243   :  { %1619 = vsyncpa [#allocation3], 1 }

// kernel: net_forward.2
= control target key start
LH: loop header
LB: loop body
LE: loop exit
PB: predicated region body
PF: predicated region fallthrough
CT: control target
= control target key end

     0   :  { %s21802_s18 = smov 0   ;;  %s24298_s0 = inlined_call_operand.vmem [shape: bf16[2,3,1088,3], index: 0, kind: input, shape index: {}]   ;;  %s24299_s1 = inlined_call_operand.vmem [shape: bf16[9,3,16], index: 1, kind: input, shape index: {}]   ;;  %s24300_s2 = inlined_call_operand.vmem [shape: f32[1,16], index: 2, kind: input, shape index: {}]   ;;  %s24301_s3 = inlined_call_operand.vmem [shape: bf16[9,16,32], index: 3, kind: input, shape index: {}]   ;;  %s24302_s4 = inlined_call_operand.vmem [shape: f32[1,32], index: 4, kind: input, shape index: {}]   ;;  %s24303_s5 = inlined_call_operand.vmem [shape: bf16[2,8,8,32], index: 5, kind: output, shape index: {}]  }
   0x1 LB: > { %s15557_s19 = sadd.s32 4294967295, %s21768_s18   ;;  %p15561_p0 = scmp.ge.s32.totalorder %s21768_s18, 1  ;;  %s21768_s18 = sphi %s21802_s18, %s15_s18  }
   0x2   : > { %p187_p1 = scmp.lt.s32.totalorder %s21768_s18, 3 }
   0x4   : > { %p188_p2 = pnand %p15561_p0, %p187_p1 }
   0x6   : > { %191 = sbr.rel (%p188_p2) target bundleno = 2436 (0x984), region = 40 }
   0xd   : > { %vm999_vm0 = vcmask 1040384   ;;  %vm1000_vm1 = vcmask 1041408   ;;  %v16207_v0 = vld [vmem:[%s24299_s1 + $0x6] sm:$0x3]  ;;  %p215_p3 = scmp.lt.s32.totalorder %s15557_s19, 1  ;;  %v21770_v1 = vmov 65535  }
   0xe   : > { %v1001_v2 = vsel %vm999_vm0, 4294967295, %v21770_v1  ;;  %v15693_v3 = vld [vmem:[%s24299_s1 + $0x2] sm:$0x3]  ;;  %v16464_v4 = vld [vmem:[%s24299_s1 + $0x8] sm:$0x3]  ;;  %vm806_vm2 = vcmask 23552  }
   0xf   : > { %v21819_v5 = vsel %vm1000_vm1, %v1001_v2, 0  ;;  %s24463_s19 = smov (!%p215_p3, %s15557_s19), 1  ;;  %v16721_v55 = vld [vmem:[%s24299_s1 + $0xa] sm:$0x3]  ;;  %vm12101_vm3 = vcmask 130048   ;;  %vm12232_vm4 = vcmask 123904  }
  0x10   : > { %v21824_v6 = vand.u32 %v16207_v0, %v21819_v5  ;;  %v1004_v7 = vand.u32 %v15693_v3, %v21819_v5  ;;  %v5891_v8 = vand.u32 %v16464_v4, %v21819_v5  ;;  %s21163_s26 = smul.u32 1632, %s24463_s19  ;;  %v21928_v56 = vand.u32 %v16721_v55, %v21819_v5  ;;  %s17666_s24 = sshll.u32 %s24463_s19, 5 }
  0x11   : > { %vm15287_vm5 = vcmask 261120   ;;  %s24231_s27 = scalar_lea.vmem %s24303_s5, %s17666_s24  ;;  %vm15415_vm6 = vcmask 257024  }
  0x12   : > { %18795 = vmatprep.subr.bf16.mxu0 %v21824_v6  ;;  %18405 = vmatprep.subr.bf16.mxu1 %v1004_v7  ;;  %s21834_s29 = scalar_lea.vmem %s24298_s0, %s21163_s26 }
  0x13   : > { %18796 = vmatpush3.bf16.msra.mxu0 %v21824_v6  ;;  %18406 = vmatpush3.bf16.msra.mxu1 %v1004_v7  ;;  %v21174_v9 = vld [vmem:[%s21834_s29 + $0x220] sm:$0xff]   ;;  %v21175_v10 = vld [vmem:[%s21834_s29 + $0x10] sm:$0xff]   ;;  %v21176_v11 = vld [vmem:[%s21834_s29 + $0x228] sm:$0xff]  }
  0x14   : > { %18925 = vmatprep.subr.bf16.mxu0 %v5891_v8  ;;  %18407 = vmatprep.mubr.msk.bf16.mxu1 %vm806_vm2, %v21174_v9  ;;  %v21177_v12 = vld [vmem:[%s21834_s29 + $0x18] sm:$0xff]   ;;  %v21178_v13 = vld [vmem:[%s21834_s29 + $0x230] sm:$0xff]   ;;  %v21179_v14 = vld [vmem:[%s21834_s29 + $0x20] sm:$0xff]  }
  0x15   : > { %18797 = vmatprep.mubr.msk.bf16.mxu0 %vm806_vm2, %v21175_v10  ;;  %v21180_v15 = vld [vmem:[%s21834_s29 + $0x238] sm:$0xff]   ;;  %v21181_v16 = vld [vmem:[%s21834_s29 + $0x28] sm:$0xff]   ;;  %v21182_v17 = vld [vmem:[%s21834_s29 + $0x240] sm:$0xff]  }
  0x16   : > { %18408 = vmatmul.mubr.msk.bf16.vlgmr.msra.gmra.mrb[0].mxu1 %vm806_vm2, %v21176_v11  ;;  %18798 = vmatmul.mubr.msk.bf16.vlgmr.msra.gmra.mrb[0].mxu0 %vm806_vm2, %v21177_v12  ;;  %v21183_v18 = vld [vmem:[%s21834_s29 + $0x30] sm:$0xff]   ;;  %v21184_v19 = vld [vmem:[%s21834_s29 + $0x248] sm:$0xff]   ;;  %v21185_v20 = vld [vmem:[%s21834_s29 + $0x38] sm:$0xff]  }
  0x17   : > { %18926 = vmatpush3.bf16.msra.mxu0 %v5891_v8  ;;  %18411 = vmatprep.mubr.msk.bf16.mxu1 %vm806_vm2, %v21178_v13  ;;  %v21186_v21 = vld [vmem:[%s21834_s29 + $0x250] sm:$0xff]   ;;  %v21187_v22 = vld [vmem:[%s21834_s29 + $0x40] sm:$0xff]   ;;  %v21188_v23 = vld [vmem:[%s21834_s29 + $0x258] sm:$0xff]  }
  0x18   : > { %18801 = vmatprep.mubr.msk.bf16.mxu0 %vm806_vm2, %v21179_v14  ;;  %v21189_v24 = vld [vmem:[%s21834_s29 + $0x48] sm:$0xff]   ;;  %v21190_v25 = vld [vmem:[%s21834_s29 + $0x260] sm:$0xff]   ;;  %v21191_v26 = vld [vmem:[%s21834_s29 + $0x50] sm:$0xff]   ;;  %19055 = vmatprep.subr.bf16.mxu0 %v21928_v56 }
  0x19   : > { %v21192_v27 = vld [vmem:[%s21834_s29 + $0x268] sm:$0xff]   ;;  %v21193_v28 = vld [vmem:[%s21834_s29 + $0x58] sm:$0xff]   ;;  %v21194_v29 = vld [vmem:[%s21834_s29 + $0x270] sm:$0xff]  }
  0x1a   : > { %v21195_v30 = vld [vmem:[%s21834_s29 + $0x60] sm:$0xff]   ;;  %v21196_v31 = vld [vmem:[%s21834_s29 + $0x278] sm:$0xff]   ;;  %v21197_v32 = vld [vmem:[%s21834_s29 + $0x68] sm:$0xff]  }
  0x1b   : > { %v21198_v33 = vld [vmem:[%s21834_s29 + $0x280] sm:$0xff]   ;;  %v21199_v34 = vld [vmem:[%s21834_s29 + $0x70] sm:$0xff]   ;;  %v21200_v35 = vld [vmem:[%s21834_s29 + $0x288] sm:$0xff]  }
  0x1c   : > { %v21201_v36 = vld [vmem:[%s21834_s29 + $0x78] sm:$0xff]   ;;  %v21202_v37 = vld [vmem:[%s21834_s29 + $0x290] sm:$0xff]   ;;  %v21203_v38 = vld [vmem:[%s21834_s29 + $0x80] sm:$0xff]  }
  0x1d   : > { %v21204_v39 = vld [vmem:[%s21834_s29 + $0x298] sm:$0xff]   ;;  %v21205_v40 = vld [vmem:[%s21834_s29 + $0x88] sm:$0xff]   ;;  %v21206_v41 = vld [vmem:[%s21834_s29 + $0x2a0] sm:$0xff]  }
  0x1e   : > { %18412 = vmatmul.mubr.msk.bf16.gmra.mrb[4].mxu1 %vm806_vm2, %v21180_v15  ;;  %18802 = vmatmul.mubr.msk.bf16.gmra.mrb[4].mxu0 %vm806_vm2, %v21181_v16  ;;  %v21207_v42 = vld [vmem:[%s21834_s29 + $0x90] sm:$0xff]   ;;  %v21208_v43 = vld [vmem:[%s21834_s29 + $0x2a8] sm:$0xff]   ;;  %v21209_v44 = vld [vmem:[%s21834_s29 + $0x98] sm:$0xff]  }
  0x1f   : > { %18415 = vmatprep.mubr.msk.bf16.mxu1 %vm806_vm2, %v21182_v17  ;;  %18805 = vmatprep.mubr.msk.bf16.mxu0 %vm806_vm2, %v21183_v18  ;;  %v21210_v45 = vld [vmem:[%s21834_s29 + $0x2b0] sm:$0xff]   ;;  %v21211_v46 = vld [vmem:[%s21834_s29 + $0xa0] sm:$0xff]   ;;  %v21212_v47 = vld [vmem:[%s21834_s29 + $0x2b8] sm:$0xff]  }
  0x20   : > { %v21213_v48 = vld [vmem:[%s21834_s29 + $0xa8] sm:$0xff]   ;;  %v21214_v49 = vld [vmem:[%s21834_s29 + $0x2c0] sm:$0xff]   ;;  %v21215_v50 = vld [vmem:[%s21834_s29 + $0xb0] sm:$0xff]  }
  0x21   : > { %v21216_v51 = vld [vmem:[%s21834_s29 + $0x2c8] sm:$0xff]   ;;  %v21217_v52 = vld [vmem:[%s21834_s29 + $0xb8] sm:$0xff]   ;;  %v21218_v53 = vld [vmem:[%s21834_s29 + $0x2d0] sm:$0xff]  }
  0x22   : > { %v21219_v54 = vld [vmem:[%s21834_s29 + $0xc0] sm:$0xff]   ;;  %v21220_v57 = vld [vmem:[%s21834_s29 + $0x2d8] sm:$0xff]   ;;  %v21221_v58 = vld [vmem:[%s21834_s29 + $0xc8] sm:$0xff]  }
  0x23   : > { %v21222_v59 = vld [vmem:[%s21834_s29 + $0x2e0] sm:$0xff]   ;;  %v21223_v60 = vld [vmem:[%s21834_s29 + $0xd0] sm:$0xff]   ;;  %v21224_v61 = vld [vmem:[%s21834_s29 + $0x2e8] sm:$0xff]  }
  0x24   : > { %v21225_v62 = vld [vmem:[%s21834_s29 + $0xd8] sm:$0xff]   ;;  %v21226_v63 = vld [vmem:[%s21834_s29 + $0x2f0] sm:$0xff]   ;;  %v21227_v0 = vld [vmem:[%s21834_s29 + $0xe0] sm:$0xff]  }
  0x25   : > { %v21228_v1 = vld [vmem:[%s21834_s29 + $0x2f8] sm:$0xff]   ;;  %v21229_v2 = vld [vmem:[%s21834_s29 + $0xe8] sm:$0xff]   ;;  %v21230_v3 = vld [vmem:[%s21834_s29 + $0x300] sm:$0xff]  }
  0x26   : > { %18416 = vmatmul.mubr.msk.bf16.gmra.mrb[8].mxu1 %vm806_vm2, %v21184_v19  ;;  %18806 = vmatmul.mubr.msk.bf16.gmra.mrb[8].mxu0 %vm806_vm2, %v21185_v20  ;;  %v21231_v4 = vld [vmem:[%s21834_s29 + $0xf0] sm:$0xff]   ;;  %v21232_v7 = vld [vmem:[%s21834_s29 + $0x308] sm:$0xff]   ;;  %v21233_v8 = vld [vmem:[%s21834_s29 + $0xf8] sm:$0xff]  }
  0x27   : > { %18419 = vmatprep.mubr.msk.bf16.mxu1 %vm806_vm2, %v21186_v21  ;;  %18809 = vmatprep.mubr.msk.bf16.mxu0 %vm806_vm2, %v21187_v22  ;;  %v21234_v9 = vld [vmem:[%s21834_s29 + $0x310] sm:$0xff]   ;;  %v21235_v10 = vld [vmem:[%s21834_s29 + $0x100] sm:$0xff]   ;;  %v21236_v11 = vld [vmem:[%s21834_s29 + $0x318] sm:$0xff]  }
  0x28   : > { %v21237_v12 = vld [vmem:[%s21834_s29 + $0x108] sm:$0xff]   ;;  %v21238_v13 = vld [vmem:[%s21834_s29 + $0x320] sm:$0xff]   ;;  %v21239_v14 = vld [vmem:[%s21834_s29 + $0x110] sm:$0xff]  }
  0x29   : > { %v21240_v15 = vld [vmem:[%s21834_s29 + $0x328] sm:$0xff]   ;;  %v21241_v16 = vld [vmem:[%s21834_s29 + $0x118] sm:$0xff]   ;;  %v354_v17 = vld [vmem:[%s24299_s1] sm:$0x3] }
  0x2a   : > { %v21242_v18 = vld [vmem:[%s21834_s29 + $0x330] sm:$0xff]   ;;  %v2064_v19 = vand.u32 %v21819_v5, %v354_v17  ;;  %v21243_v20 = vld [vmem:[%s21834_s29 + $0x120] sm:$0xff]   ;;  %v21244_v21 = vld [vmem:[%s21834_s29 + $0x338] sm:$0xff]  }
  0x2b   : > { %v21245_v22 = vld [vmem:[%s21834_s29 + $0x128] sm:$0xff]   ;;  %v21278_v55 = vld [vmem:[%s21834_s29 + $0x3c0] sm:$0xff]  }
  0x2c   : > { %18535 = vmatprep.subr.bf16.mxu1 %v2064_v19  ;;  %v21302_v17 = vld [vmem:[%s21834_s29] sm:$0xff]  }
  0x2d   : > { %18536 = vmatpush3.bf16.msra.mxu1 %v2064_v19  ;;  %v21304_v19 = vld [vmem:[%s21834_s29 + $0x8] sm:$0xff]  }
  0x2e   : > { %18420 = vmatmul.mubr.msk.bf16.gmra.mrb[12].mxu1 %vm806_vm2, %v21188_v23  ;;  %18810 = vmatmul.mubr.msk.bf16.gmra.mrb[12].mxu0 %vm806_vm2, %v21189_v24  ;;  %v21246_v23 = vld [vmem:[%s21834_s29 + $0x340] sm:$0xff]   ;;  %v21247_v24 = vld [vmem:[%s21834_s29 + $0x130] sm:$0xff]  }
  0x2f   : > { %18423 = vmatprep.mubr.msk.bf16.mxu1 %vm806_vm2, %v21190_v25  ;;  %18813 = vmatprep.mubr.msk.bf16.mxu0 %vm806_vm2, %v21191_v26  ;;  %v21248_v25 = vld [vmem:[%s21834_s29 + $0x348] sm:$0xff]   ;;  %v21249_v26 = vld [vmem:[%s21834_s29 + $0x138] sm:$0xff]  }
  0x36   : > { %18424 = vmatmul.mubr.msk.bf16.gmra.mrb[16].mxu1 %vm806_vm2, %v21192_v27  ;;  %18814 = vmatmul.mubr.msk.bf16.gmra.mrb[16].mxu0 %vm806_vm2, %v21193_v28  ;;  %v21250_v27 = vld [vmem:[%s21834_s29 + $0x350] sm:$0xff]   ;;  %v21251_v28 = vld [vmem:[%s21834_s29 + $0x140] sm:$0xff]  }
  0x37   : > { %18427 = vmatprep.mubr.msk.bf16.mxu1 %vm806_vm2, %v21194_v29  ;;  %18817 = vmatprep.mubr.msk.bf16.mxu0 %vm806_vm2, %v21195_v30  ;;  %v21252_v29 = vld [vmem:[%s21834_s29 + $0x358] sm:$0xff]   ;;  %v21253_v30 = vld [vmem:[%s21834_s29 + $0x148] sm:$0xff]  }
  0x3e   : > { %18428 = vmatmul.mubr.msk.bf16.gmra.mrb[20].mxu1 %vm806_vm2, %v21196_v31  ;;  %18818 = vmatmul.mubr.msk.bf16.gmra.mrb[20].mxu0 %vm806_vm2, %v21197_v32  ;;  %v21254_v31 = vld [vmem:[%s21834_s29 + $0x360] sm:$0xff]   ;;  %v21255_v32 = vld [vmem:[%s21834_s29 + $0x230] sm:$0xff]  }
  0x3f   : > { %18431 = vmatprep.mubr.msk.bf16.mxu1 %vm806_vm2, %v21198_v33  ;;  %18821 = vmatprep.mubr.msk.bf16.mxu0 %vm806_vm2, %v21199_v34  ;;  %v21256_v33 = vld [vmem:[%s21834_s29 + $0x368] sm:$0xff]   ;;  %v21257_v34 = vld [vmem:[%s21834_s29 + $0x238] sm:$0xff]  }
  0x46   : > { %18432 = vmatmul.mubr.msk.bf16.gmra.mrb[24].mxu1 %vm806_vm2, %v21200_v35  ;;  %18822 = vmatmul.mubr.msk.bf16.gmra.mrb[24].mxu0 %vm806_vm2, %v21201_v36  ;;  %v21258_v35 = vld [vmem:[%s21834_s29 + $0x370] sm:$0xff]   ;;  %v21259_v36 = vld [vmem:[%s21834_s29 + $0x240] sm:$0xff]  }
  0x47   : > { %18435 = vmatprep.mubr.msk.bf16.mxu1 %vm806_vm2, %v21202_v37  ;;  %18825 = vmatprep.mubr.msk.bf16.mxu0 %vm806_vm2, %v21203_v38  ;;  %v21260_v37 = vld [vmem:[%s21834_s29 + $0x378] sm:$0xff]   ;;  %v21261_v38 = vld [vmem:[%s21834_s29 + $0x248] sm:$0xff]  }
  0x4e   : > { %18436 = vmatmul.mubr.msk.bf16.gmra.mrb[28].mxu1 %vm806_vm2, %v21204_v39  ;;  %18826 = vmatmul.mubr.msk.bf16.gmra.mrb[28].mxu0 %vm806_vm2, %v21205_v40  ;;  %v21262_v39 = vld [vmem:[%s21834_s29 + $0x380] sm:$0xff]   ;;  %v21263_v40 = vld [vmem:[%s21834_s29 + $0x250] sm:$0xff]  }
  0x4f   : > { %18439 = vmatprep.mubr.msk.bf16.mxu1 %vm806_vm2, %v21206_v41  ;;  %18829 = vmatprep.mubr.msk.bf16.mxu0 %vm806_vm2, %v21207_v42  ;;  %v21264_v41 = vld [vmem:[%s21834_s29 + $0x388] sm:$0xff]   ;;  %v21265_v42 = vld [vmem:[%s21834_s29 + $0x258] sm:$0xff]  }
  0x56   : > { %18440 = vmatmul.mubr.msk.bf16.gmra.mrb[32].mxu1 %vm806_vm2, %v21208_v43  ;;  %18830 = vmatmul.mubr.msk.bf16.gmra.mrb[32].mxu0 %vm806_vm2, %v21209_v44  ;;  %v21266_v43 = vld [vmem:[%s21834_s29 + $0x390] sm:$0xff]   ;;  %v21267_v44 = vld [vmem:[%s21834_s29 + $0x260] sm:$0xff]  }
  0x57   : > { %18443 = vmatprep.mubr.msk.bf16.mxu1 %vm806_vm2, %v21210_v45  ;;  %18833 = vmatprep.mubr.msk.bf16.mxu0 %vm806_vm2, %v21211_v46  ;;  %v21268_v45 = vld [vmem:[%s21834_s29 + $0x398] sm:$0xff]   ;;  %v21269_v46 = vld [vmem:[%s21834_s29 + $0x268] sm:$0xff]  }
  0x5e   : > { %18444 = vmatmul.mubr.msk.bf16.gmra.mrb[36].mxu1 %vm806_vm2, %v21212_v47  ;;  %18834 = vmatmul.mubr.msk.bf16.gmra.mrb[36].mxu0 %vm806_vm2, %v21213_v48  ;;  %v21270_v47 = vld [vmem:[%s21834_s29 + $0x3a0] sm:$0xff]   ;;  %v21271_v48 = vld [vmem:[%s21834_s29 + $0x270] sm:$0xff]  }
  0x5f   : > { %18447 = vmatprep.mubr.msk.bf16.mxu1 %vm806_vm2, %v21214_v49  ;;  %18837 = vmatprep.mubr.msk.bf16.mxu0 %vm806_vm2, %v21215_v50  ;;  %v21272_v49 = vld [vmem:[%s21834_s29 + $0x3a8] sm:$0xff]   ;;  %v21273_v50 = vld [vmem:[%s21834_s29 + $0x278] sm:$0xff]  }
  0x66   : > { %18448 = vmatmul.mubr.msk.bf16.gmra.mrb[40].mxu1 %vm806_vm2, %v21216_v51  ;;  %18838 = vmatmul.mubr.msk.bf16.gmra.mrb[40].mxu0 %vm806_vm2, %v21217_v52  ;;  %v21274_v51 = vld [vmem:[%s21834_s29 + $0x3b0] sm:$0xff]   ;;  %v21275_v52 = vld [vmem:[%s21834_s29 + $0x280] sm:$0xff]  }
  0x67   : > { %18451 = vmatprep.mubr.msk.bf16.mxu1 %vm806_vm2, %v21218_v53  ;;  %18841 = vmatprep.mubr.msk.bf16.mxu0 %vm806_vm2, %v21219_v54  ;;  %v21276_v53 = vld [vmem:[%s21834_s29 + $0x3b8] sm:$0xff]   ;;  %v21277_v54 = vld [vmem:[%s21834_s29 + $0x288] sm:$0xff]  }
  0x6e   : > { %18452 = vmatmul.mubr.msk.bf16.gmra.mrb[44].mxu1 %vm806_vm2, %v21220_v57  ;;  %18842 = vmatmul.mubr.msk.bf16.gmra.mrb[44].mxu0 %vm806_vm2, %v21221_v58  ;;  %v21280_v57 = vld [vmem:[%s21834_s29 + $0x3c8] sm:$0xff]   ;;  %v21281_v58 = vld [vmem:[%s21834_s29 + $0x298] sm:$0xff]  }
  0x6f   : > { %18455 = vmatprep.mubr.msk.bf16.mxu1 %vm806_vm2, %v21222_v59  ;;  %18845 = vmatprep.mubr.msk.bf16.mxu0 %vm806_vm2, %v21223_v60  ;;  %v21282_v59 = vld [vmem:[%s21834_s29 + $0x3d0] sm:$0xff]   ;;  %v21283_v60 = vld [vmem:[%s21834_s29 + $0x2a0] sm:$0xff]  }
  0x76   : > { %18456 = vmatmul.mubr.msk.bf16.gmra.mrb[48].mxu1 %vm806_vm2, %v21224_v61  ;;  %18846 = vmatmul.mubr.msk.bf16.gmra.mrb[48].mxu0 %vm806_vm2, %v21225_v62  ;;  %v21284_v61 = vld [vmem:[%s21834_s29 + $0x3d8] sm:$0xff]   ;;  %v21285_v62 = vld [vmem:[%s21834_s29 + $0x2a8] sm:$0xff]  }
  0x77   : > { %18459 = vmatprep.mubr.msk.bf16.mxu1 %vm806_vm2, %v21226_v63  ;;  %18849 = vmatprep.mubr.msk.bf16.mxu0 %vm806_vm2, %v21227_v0  ;;  %v21286_v63 = vld [vmem:[%s21834_s29 + $0x3e0] sm:$0xff]   ;;  %v21287_v0 = vld [vmem:[%s21834_s29 + $0x2b0] sm:$0xff]  }
  0x7e   : > { %18460 = vmatmul.mubr.msk.bf16.gmra.mrb[52].mxu1 %vm806_vm2, %v21228_v1  ;;  %18850 = vmatmul.mubr.msk.bf16.gmra.mrb[52].mxu0 %vm806_vm2, %v21229_v2  ;;  %v21288_v1 = vld [vmem:[%s21834_s29 + $0x3e8] sm:$0xff]   ;;  %v21289_v2 = vld [vmem:[%s21834_s29 + $0x2b8] sm:$0xff]  }
  0x7f   : > { %18463 = vmatprep.mubr.msk.bf16.mxu1 %vm806_vm2, %v21230_v3  ;;  %18853 = vmatprep.mubr.msk.bf16.mxu0 %vm806_vm2, %v21231_v4  ;;  %v21290_v3 = vld [vmem:[%s21834_s29 + $0x3f0] sm:$0xff]   ;;  %v21291_v4 = vld [vmem:[%s21834_s29 + $0x2c0] sm:$0xff]  }
  0x86   : > { %18464 = vmatmul.mubr.msk.bf16.gmra.mrb[56].mxu1 %vm806_vm2, %v21232_v7  ;;  %18854 = vmatmul.mubr.msk.bf16.gmra.mrb[56].mxu0 %vm806_vm2, %v21233_v8  ;;  %v21292_v7 = vld [vmem:[%s21834_s29 + $0x3f8] sm:$0xff]   ;;  %v21293_v8 = vld [vmem:[%s21834_s29 + $0x2c8] sm:$0xff]  }
  0x87   : > { %18467 = vmatprep.mubr.msk.bf16.mxu1 %vm806_vm2, %v21234_v9  ;;  %18857 = vmatprep.mubr.msk.bf16.mxu0 %vm806_vm2, %v21235_v10  ;;  %v21294_v9 = vld [vmem:[%s21834_s29 + $0x400] sm:$0xff]   ;;  %v21295_v10 = vld [vmem:[%s21834_s29 + $0x2d0] sm:$0xff]  }
  0x8e   : > { %18468 = vmatmul.mubr.msk.bf16.gmra.mrb[60].mxu1 %vm806_vm2, %v21236_v11  ;;  %18858 = vmatmul.mubr.msk.bf16.gmra.mrb[60].mxu0 %vm806_vm2, %v21237_v12  ;;  %v21296_v11 = vld [vmem:[%s21834_s29 + $0x408] sm:$0xff]   ;;  %v21297_v12 = vld [vmem:[%s21834_s29 + $0x2d8] sm:$0xff]  }
  0x8f   : > { %18471 = vmatprep.mubr.msk.bf16.mxu1 %vm806_vm2, %v21238_v13  ;;  %18861 = vmatprep.mubr.msk.bf16.mxu0 %vm806_vm2, %v21239_v14  ;;  %v21298_v13 = vld [vmem:[%s21834_s29 + $0x410] sm:$0xff]   ;;  %v21299_v14 = vld [vmem:[%s21834_s29 + $0x2e0] sm:$0xff]  }
  0x96   : > { %18472 = vmatmul.mubr.msk.bf16.gmra.mrb[64].mxu1 %vm806_vm2, %v21240_v15  ;;  %18862 = vmatmul.mubr.msk.bf16.gmra.mrb[64].mxu0 %vm806_vm2, %v21241_v16  ;;  %v21300_v15 = vld [vmem:[%s21834_s29 + $0x418] sm:$0xff]   ;;  %v21301_v16 = vld [vmem:[%s21834_s29 + $0x2e8] sm:$0xff]  }
  0x97   : > { %18475 = vmatprep.mubr.msk.bf16.mxu1 %vm806_vm2, %v21242_v18  ;;  %18865 = vmatprep.mubr.msk.bf16.mxu0 %vm806_vm2, %v21243_v20  ;;  %v21303_v18 = vld [vmem:[%s21834_s29 + $0x2f0] sm:$0xff]   ;;  %v21305_v20 = vld [vmem:[%s21834_s29 + $0x2f8] sm:$0xff]  }
  0x9e   : > { %18476 = vmatmul.mubr.msk.bf16.gmra.mrb[68].mxu1 %vm806_vm2, %v21244_v21  ;;  %18866 = vmatmul.mubr.msk.bf16.gmra.mrb[68].mxu0 %vm806_vm2, %v21245_v22  ;;  %v21306_v21 = vld [vmem:[%s21834_s29 + $0x10] sm:$0xff]   ;;  %v21307_v22 = vld [vmem:[%s21834_s29 + $0x300] sm:$0xff]  }
  0x9f   : > { %18479 = vmatprep.mubr.msk.bf16.mxu1 %vm806_vm2, %v21246_v23  ;;  %18869 = vmatprep.mubr.msk.bf16.mxu0 %vm806_vm2, %v21247_v24  ;;  %v21308_v23 = vld [vmem:[%s21834_s29 + $0x18] sm:$0xff]   ;;  %v21309_v24 = vld [vmem:[%s21834_s29 + $0x308] sm:$0xff]  }
  0xa6   : > { %18480 = vmatmul.mubr.msk.bf16.gmra.mrb[72].mxu1 %vm806_vm2, %v21248_v25  ;;  %18870 = vmatmul.mubr.msk.bf16.gmra.mrb[72].mxu0 %vm806_vm2, %v21249_v26  ;;  %v21310_v25 = vld [vmem:[%s21834_s29 + $0x20] sm:$0xff]   ;;  %v21311_v26 = vld [vmem:[%s21834_s29 + $0x310] sm:$0xff]  }
  0xa7   : > { %18483 = vmatprep.mubr.msk.bf16.mxu1 %vm806_vm2, %v21250_v27  ;;  %18873 = vmatprep.mubr.msk.bf16.mxu0 %vm806_vm2, %v21251_v28  ;;  %v21312_v27 = vld [vmem:[%s21834_s29 + $0x28] sm:$0xff]   ;;  %v21313_v28 = vld [vmem:[%s21834_s29 + $0x318] sm:$0xff]  }
  0xae   : > { %18484 = vmatmul.mubr.msk.bf16.gmra.mrb[76].mxu1 %vm806_vm2, %v21252_v29  ;;  %18874 = vmatmul.mubr.msk.bf16.gmra.mrb[76].mxu0 %vm806_vm2, %v21253_v30  ;;  %v21314_v29 = vld [vmem:[%s21834_s29 + $0x30] sm:$0xff]   ;;  %v21315_v30 = vld [vmem:[%s21834_s29 + $0x320] sm:$0xff]  }
  0xaf   : > { %18487 = vmatprep.mubr.msk.bf16.mxu1 %vm806_vm2, %v21254_v31  ;;  %18927 = vmatprep.mubr.msk.bf16.mxu0 %vm806_vm2, %v21255_v32  ;;  %v21316_v31 = vld [vmem:[%s21834_s29 + $0x38] sm:$0xff]   ;;  %v21317_v32 = vld [vmem:[%s21834_s29 + $0x328] sm:$0xff]  }
  0xb6   : > { %18488 = vmatmul.mubr.msk.bf16.gmra.mrb[80].mxu1 %vm806_vm2, %v21256_v33  ;;  %18928 = vmatmul.mubr.msk.bf16.vlgmr.msra.gmra.mrb[0].mxu0 %vm806_vm2, %v21257_v34  ;;  %v21318_v33 = vld [vmem:[%s21834_s29 + $0x40] sm:$0xff]   ;;  %v21319_v34 = vld [vmem:[%s21834_s29 + $0x330] sm:$0xff]  }
  0xb7   : > { %18491 = vmatprep.mubr.msk.bf16.mxu1 %vm806_vm2, %v21258_v35  ;;  %19056 = vmatpush3.bf16.msra.mxu0 %v21928_v56  ;;  %v21279_v56 = vld [vmem:[%s21834_s29 + $0x290] sm:$0xff]   ;;  %v21320_v35 = vld [vmem:[%s21834_s29 + $0x48] sm:$0xff]  }
  0xb8   : > { %18931 = vmatprep.mubr.msk.bf16.mxu0 %vm806_vm2, %v21259_v36  ;;  %v16850_v36 = vld [vmem:[%s24299_s1 + $0xc] sm:$0x3] }
  0xbe   : > { %18492 = vmatmul.mubr.msk.bf16.gmra.mrb[84].mxu1 %vm806_vm2, %v21260_v37  ;;  %18932 = vmatmul.mubr.msk.bf16.gmra.mrb[4].mxu0 %vm806_vm2, %v21261_v38  ;;  %v21321_v37 = vld [vmem:[%s21834_s29 + $0x338] sm:$0xff]   ;;  %v21322_v38 = vld [vmem:[%s21834_s29 + $0x50] sm:$0xff]  }
  0xbf   : > { %18495 = vmatprep.mubr.msk.bf16.mxu1 %vm806_vm2, %v21262_v39  ;;  %18935 = vmatprep.mubr.msk.bf16.mxu0 %vm806_vm2, %v21263_v40  ;;  %v22147_v39 = vand.u32 %v16850_v36, %v21819_v5  ;;  %v21323_v40 = vld [vmem:[%s21834_s29 + $0x340] sm:$0xff]  }
  0xc0   : > { %v21379_v36 = vld [vmem:[%s21834_s29 + $0x420] sm:$0xff]  }
  0xc1   : > { %19185 = vmatprep.subr.bf16.mxu0 %v22147_v39 }
  0xc6   : > { %18496 = vmatmul.mubr.msk.bf16.gmra.mrb[88].mxu1 %vm806_vm2, %v21264_v41  ;;  %18936 = vmatmul.mubr.msk.bf16.gmra.mrb[8].mxu0 %vm806_vm2, %v21265_v42  ;;  %v21324_v41 = vld [vmem:[%s21834_s29 + $0x58] sm:$0xff]   ;;  %v21325_v42 = vld [vmem:[%s21834_s29 + $0x348] sm:$0xff]  }
  0xc7   : > { %18499 = vmatprep.mubr.msk.bf16.mxu1 %vm806_vm2, %v21266_v43  ;;  %18939 = vmatprep.mubr.msk.bf16.mxu0 %vm806_vm2, %v21267_v44  ;;  %v21326_v43 = vld [vmem:[%s21834_s29 + $0x60] sm:$0xff]   ;;  %v21327_v44 = vld [vmem:[%s21834_s29 + $0x350] sm:$0xff]  }
  0xce   : > { %18500 = vmatmul.mubr.msk.bf16.gmra.mrb[92].mxu1 %vm806_vm2, %v21268_v45  ;;  %18940 = vmatmul.mubr.msk.bf16.gmra.mrb[12].mxu0 %vm806_vm2, %v21269_v46  ;;  %v21328_v45 = vld [vmem:[%s21834_s29 + $0x68] sm:$0xff]   ;;  %v21329_v46 = vld [vmem:[%s21834_s29 + $0x358] sm:$0xff]  }
  0xcf   : > { %18503 = vmatprep.mubr.msk.bf16.mxu1 %vm806_vm2, %v21270_v47  ;;  %18943 = vmatprep.mubr.msk.bf16.mxu0 %vm806_vm2, %v21271_v48  ;;  %v21330_v47 = vld [vmem:[%s21834_s29 + $0x70] sm:$0xff]   ;;  %v21331_v48 = vld [vmem:[%s21834_s29 + $0x360] sm:$0xff]  }
  0xd6   : > { %18504 = vmatmul.mubr.msk.bf16.gmra.mrb[96].mxu1 %vm806_vm2, %v21272_v49  ;;  %18944 = vmatmul.mubr.msk.bf16.gmra.mrb[16].mxu0 %vm806_vm2, %v21273_v50  ;;  %v21332_v49 = vld [vmem:[%s21834_s29 + $0x78] sm:$0xff]   ;;  %v21333_v50 = vld [vmem:[%s21834_s29 + $0x368] sm:$0xff]  }
  0xd7   : > { %18507 = vmatprep.mubr.msk.bf16.mxu1 %vm806_vm2, %v21274_v51  ;;  %18947 = vmatprep.mubr.msk.bf16.mxu0 %vm806_vm2, %v21275_v52  ;;  %v21334_v51 = vld [vmem:[%s21834_s29 + $0x80] sm:$0xff]   ;;  %v21335_v52 = vld [vmem:[%s21834_s29 + $0x370] sm:$0xff]  }
  0xde   : > { %18508 = vmatmul.mubr.msk.bf16.gmra.mrb[100].mxu1 %vm806_vm2, %v21276_v53  ;;  %18948 = vmatmul.mubr.msk.bf16.gmra.mrb[20].mxu0 %vm806_vm2, %v21277_v54  ;;  %v21336_v53 = vld [vmem:[%s21834_s29 + $0x88] sm:$0xff]   ;;  %v21337_v54 = vld [vmem:[%s21834_s29 + $0x378] sm:$0xff]  }
  0xdf   : > { %18511 = vmatprep.mubr.msk.bf16.mxu1 %vm806_vm2, %v21278_v55  ;;  %18951 = vmatprep.mubr.msk.bf16.mxu0 %vm806_vm2, %v21279_v56  ;;  %v21338_v55 = vld [vmem:[%s21834_s29 + $0x90] sm:$0xff]   ;;  %v21339_v56 = vld [vmem:[%s21834_s29 + $0x380] sm:$0xff]  }
  0xe6   : > { %18512 = vmatmul.mubr.msk.bf16.gmra.mrb[104].mxu1 %vm806_vm2, %v21280_v57  ;;  %18952 = vmatmul.mubr.msk.bf16.gmra.mrb[24].mxu0 %vm806_vm2, %v21281_v58  ;;  %v21340_v57 = vld [vmem:[%s21834_s29 + $0x98] sm:$0xff]   ;;  %v21341_v58 = vld [vmem:[%s21834_s29 + $0x388] sm:$0xff]  }
  0xe7   : > { %18515 = vmatprep.mubr.msk.bf16.mxu1 %vm806_vm2, %v21282_v59  ;;  %18955 = vmatprep.mubr.msk.bf16.mxu0 %vm806_vm2, %v21283_v60  ;;  %v21342_v59 = vld [vmem:[%s21834_s29 + $0xa0] sm:$0xff]   ;;  %v21343_v60 = vld [vmem:[%s21834_s29 + $0x390] sm:$0xff]  }
  0xee   : > { %18516 = vmatmul.mubr.msk.bf16.gmra.mrb[108].mxu1 %vm806_vm2, %v21284_v61  ;;  %18956 = vmatmul.mubr.msk.bf16.gmra.mrb[28].mxu0 %vm806_vm2, %v21285_v62  ;;  %v21344_v61 = vld [vmem:[%s21834_s29 + $0xa8] sm:$0xff]   ;;  %v21345_v62 = vld [vmem:[%s21834_s29 + $0x398] sm:$0xff]  }
  0xef   : > { %18519 = vmatprep.mubr.msk.bf16.mxu1 %vm806_vm2, %v21286_v63  ;;  %18959 = vmatprep.mubr.msk.bf16.mxu0 %vm806_vm2, %v21287_v0  ;;  %v21346_v63 = vld [vmem:[%s21834_s29 + $0xb0] sm:$0xff]   ;;  %v21347_v0 = vld [vmem:[%s21834_s29 + $0x3a0] sm:$0xff]  }
  0xf6   : > { %18520 = vmatmul.mubr.msk.bf16.gmra.mrb[112].mxu1 %vm806_vm2, %v21288_v1  ;;  %18960 = vmatmul.mubr.msk.bf16.gmra.mrb[32].mxu0 %vm806_vm2, %v21289_v2  ;;  %v21348_v1 = vld [vmem:[%s21834_s29 + $0xb8] sm:$0xff]   ;;  %v21349_v2 = vld [vmem:[%s21834_s29 + $0x3a8] sm:$0xff]  }
  0xf7   : > { %18523 = vmatprep.mubr.msk.bf16.mxu1 %vm806_vm2, %v21290_v3  ;;  %18963 = vmatprep.mubr.msk.bf16.mxu0 %vm806_vm2, %v21291_v4  ;;  %v21350_v3 = vld [vmem:[%s21834_s29 + $0xc0] sm:$0xff]   ;;  %v21351_v4 = vld [vmem:[%s21834_s29 + $0x3b0] sm:$0xff]  }
  0xfe   : > { %18524 = vmatmul.mubr.msk.bf16.gmra.mrb[116].mxu1 %vm806_vm2, %v21292_v7  ;;  %18964 = vmatmul.mubr.msk.bf16.gmra.mrb[36].mxu0 %vm806_vm2, %v21293_v8  ;;  %v21352_v7 = vld [vmem:[%s21834_s29 + $0xc8] sm:$0xff]   ;;  %v21353_v8 = vld [vmem:[%s21834_s29 + $0x3b8] sm:$0xff]  }
  0xff   : > { %18527 = vmatprep.mubr.msk.bf16.mxu1 %vm806_vm2, %v21294_v9  ;;  %18967 = vmatprep.mubr.msk.bf16.mxu0 %vm806_vm2, %v21295_v10  ;;  %v21354_v9 = vld [vmem:[%s21834_s29 + $0xd0] sm:$0xff]   ;;  %v21355_v10 = vld [vmem:[%s21834_s29 + $0x3c0] sm:$0xff]  }
 0x106   : > { %18528 = vmatmul.mubr.msk.bf16.gmra.mrb[120].mxu1 %vm806_vm2, %v21296_v11  ;;  %18968 = vmatmul.mubr.msk.bf16.gmra.mrb[40].mxu0 %vm806_vm2, %v21297_v12  ;;  %v21356_v11 = vld [vmem:[%s21834_s29 + $0xd8] sm:$0xff]   ;;  %v21357_v12 = vld [vmem:[%s21834_s29 + $0x3c8] sm:$0xff]  }
 0x107   : > { %18531 = vmatprep.mubr.msk.bf16.mxu1 %vm806_vm2, %v21298_v13  ;;  %18971 = vmatprep.mubr.msk.bf16.mxu0 %vm806_vm2, %v21299_v14  ;;  %v21358_v13 = vld [vmem:[%s21834_s29 + $0xe0] sm:$0xff]   ;;  %v21359_v14 = vld [vmem:[%s21834_s29 + $0x3d0] sm:$0xff]  }
 0x10e   : > { %18532 = vmatmul.mubr.msk.bf16.gmra.mrb[124].mxu1 %vm806_vm2, %v21300_v15  ;;  %18972 = vmatmul.mubr.msk.bf16.gmra.mrb[44].mxu0 %vm806_vm2, %v21301_v16  ;;  %v21360_v15 = vld [vmem:[%s21834_s29 + $0xe8] sm:$0xff]   ;;  %v21361_v16 = vld [vmem:[%s21834_s29 + $0x3d8] sm:$0xff]  }
 0x10f   : > { %18537 = vmatprep.mubr.msk.bf16.mxu1 %vm806_vm2, %v21302_v17  ;;  %18975 = vmatprep.mubr.msk.bf16.mxu0 %vm806_vm2, %v21303_v18  ;;  %v21362_v17 = vld [vmem:[%s21834_s29 + $0xf0] sm:$0xff]   ;;  %v21363_v18 = vld [vmem:[%s21834_s29 + $0x3e0] sm:$0xff]  }
 0x116   : > { %18538 = vmatmul.mubr.msk.bf16.vlgmr.msra.gmra.mrb[0].mxu1 %vm806_vm2, %v21304_v19  ;;  %18976 = vmatmul.mubr.msk.bf16.gmra.mrb[48].mxu0 %vm806_vm2, %v21305_v20  ;;  %v21364_v19 = vld [vmem:[%s21834_s29 + $0xf8] sm:$0xff]   ;;  %v21365_v20 = vld [vmem:[%s21834_s29 + $0x3e8] sm:$0xff]  }
 0x117   : > { %18541 = vmatprep.mubr.msk.bf16.mxu1 %vm806_vm2, %v21306_v21  ;;  %18979 = vmatprep.mubr.msk.bf16.mxu0 %vm806_vm2, %v21307_v22  ;;  %v21366_v21 = vld [vmem:[%s21834_s29 + $0x100] sm:$0xff]   ;;  %v21367_v22 = vld [vmem:[%s21834_s29 + $0x3f0] sm:$0xff]  }
 0x11e   : > { %18542 = vmatmul.mubr.msk.bf16.gmra.mrb[4].mxu1 %vm806_vm2, %v21308_v23  ;;  %18980 = vmatmul.mubr.msk.bf16.gmra.mrb[52].mxu0 %vm806_vm2, %v21309_v24  ;;  %v16078_v23 = vld [vmem:[%s24299_s1 + $0x4] sm:$0x3]  ;;  %v21368_v24 = vld [vmem:[%s21834_s29 + $0x108] sm:$0xff]  }
 0x11f   : > { %18545 = vmatprep.mubr.msk.bf16.mxu1 %vm806_vm2, %v21310_v25  ;;  %18983 = vmatprep.mubr.msk.bf16.mxu0 %vm806_vm2, %v21311_v26  ;;  %v3255_v25 = vand.u32 %v16078_v23, %v21819_v5  ;;  %v21369_v26 = vld [vmem:[%s21834_s29 + $0x3f8] sm:$0xff]  }
 0x120   : > { %v21428_v23 = vld [vmem:[%s21834_s29 + $0x1f8] sm:$0xff]  }
 0x121   : > { %18665 = vmatprep.subr.bf16.mxu1 %v3255_v25 }
 0x122   : > { %18666 = vmatpush3.bf16.msra.mxu1 %v3255_v25  ;;  %v21430_v25 = vld [vmem:[%s21834_s29 + $0x440] sm:$0xff]  }
 0x123   : > { %19881 = vmatprep.subr.bf16.mxu1 %v21824_v6 }
 0x126   : > { %18546 = vmatmul.mubr.msk.bf16.gmra.mrb[8].mxu1 %vm806_vm2, %v21312_v27  ;;  %18984 = vmatmul.mubr.msk.bf16.gmra.mrb[56].mxu0 %vm806_vm2, %v21313_v28  ;;  %v21370_v27 = vld [vmem:[%s21834_s29 + $0x110] sm:$0xff]   ;;  %v21371_v28 = vld [vmem:[%s21834_s29 + $0x400] sm:$0xff]  }
 0x127   : > { %18549 = vmatprep.mubr.msk.bf16.mxu1 %vm806_vm2, %v21314_v29  ;;  %18987 = vmatprep.mubr.msk.bf16.mxu0 %vm806_vm2, %v21315_v30  ;;  %v21372_v29 = vld [vmem:[%s21834_s29 + $0x118] sm:$0xff]   ;;  %v21373_v30 = vld [vmem:[%s21834_s29 + $0x408] sm:$0xff]  }
 0x12e   : > { %18550 = vmatmul.mubr.msk.bf16.gmra.mrb[12].mxu1 %vm806_vm2, %v21316_v31  ;;  %18988 = vmatmul.mubr.msk.bf16.gmra.mrb[60].mxu0 %vm806_vm2, %v21317_v32  ;;  %v21374_v31 = vld [vmem:[%s21834_s29 + $0x120] sm:$0xff]   ;;  %v21375_v32 = vld [vmem:[%s21834_s29 + $0x410] sm:$0xff]  }
 0x12f   : > { %18553 = vmatprep.mubr.msk.bf16.mxu1 %vm806_vm2, %v21318_v33  ;;  %18991 = vmatprep.mubr.msk.bf16.mxu0 %vm806_vm2, %v21319_v34  ;;  %v21376_v33 = vld [vmem:[%s21834_s29 + $0x128] sm:$0xff]   ;;  %v21377_v34 = vld [vmem:[%s21834_s29 + $0x418] sm:$0xff]  }
 0x136   : > { %18554 = vmatmul.mubr.msk.bf16.gmra.mrb[16].mxu1 %vm806_vm2, %v21320_v35  ;;  %18992 = vmatmul.mubr.msk.bf16.gmra.mrb[64].mxu0 %vm806_vm2, %v21321_v37  ;;  %v21378_v35 = vld [vmem:[%s21834_s29 + $0x130] sm:$0xff]   ;;  %v21380_v37 = vld [vmem:[%s21834_s29 + $0x138] sm:$0xff]  }
 0x137   : > { %18557 = vmatprep.mubr.msk.bf16.mxu1 %vm806_vm2, %v21322_v38  ;;  %18995 = vmatprep.mubr.msk.bf16.mxu0 %vm806_vm2, %v21323_v40  ;;  %v21381_v38 = vld [vmem:[%s21834_s29 + $0x428] sm:$0xff]   ;;  %v21382_v40 = vld [vmem:[%s21834_s29 + $0x140] sm:$0xff]  }
 0x13e   : > { %18558 = vmatmul.mubr.msk.bf16.gmra.mrb[20].mxu1 %vm806_vm2, %v21324_v41  ;;  %18996 = vmatmul.mubr.msk.bf16.gmra.mrb[68].mxu0 %vm806_vm2, %v21325_v42  ;;  %v21383_v41 = vld [vmem:[%s21834_s29 + $0x450] sm:$0xff]   ;;  %v21384_v42 = vld [vmem:[%s21834_s29 + $0x148] sm:$0xff]  }
 0x13f   : > { %18561 = vmatprep.mubr.msk.bf16.mxu1 %vm806_vm2, %v21326_v43  ;;  %18999 = vmatprep.mubr.msk.bf16.mxu0 %vm806_vm2, %v21327_v44  ;;  %v21385_v43 = vld [vmem:[%s21834_s29 + $0x458] sm:$0xff]   ;;  %v21386_v44 = vld [vmem:[%s21834_s29 + $0x150] sm:$0xff]  }
 0x146   : > { %18562 = vmatmul.mubr.msk.bf16.gmra.mrb[24].mxu1 %vm806_vm2, %v21328_v45  ;;  %19000 = vmatmul.mubr.msk.bf16.gmra.mrb[72].mxu0 %vm806_vm2, %v21329_v46  ;;  %v21387_v45 = vld [vmem:[%s21834_s29 + $0x460] sm:$0xff]   ;;  %v21388_v46 = vld [vmem:[%s21834_s29 + $0x158] sm:$0xff]  }
 0x147   : > { %18565 = vmatprep.mubr.msk.bf16.mxu1 %vm806_vm2, %v21330_v47  ;;  %19003 = vmatprep.mubr.msk.bf16.mxu0 %vm806_vm2, %v21331_v48  ;;  %v21389_v47 = vld [vmem:[%s21834_s29 + $0x468] sm:$0xff]   ;;  %v21390_v48 = vld [vmem:[%s21834_s29 + $0x160] sm:$0xff]  }
 0x14e   : > { %18566 = vmatmul.mubr.msk.bf16.gmra.mrb[28].mxu1 %vm806_vm2, %v21332_v49  ;;  %19004 = vmatmul.mubr.msk.bf16.gmra.mrb[76].mxu0 %vm806_vm2, %v21333_v50  ;;  %v21391_v49 = vld [vmem:[%s21834_s29 + $0x470] sm:$0xff]   ;;  %v21392_v50 = vld [vmem:[%s21834_s29 + $0x168] sm:$0xff]  }
 0x14f   : > { %18569 = vmatprep.mubr.msk.bf16.mxu1 %vm806_vm2, %v21334_v51  ;;  %19007 = vmatprep.mubr.msk.bf16.mxu0 %vm806_vm2, %v21335_v52  ;;  %v21394_v51 = vld [vmem:[%s21834_s29 + $0x170] sm:$0xff]   ;;  %v21395_v52 = vld [vmem:[%s21834_s29 + $0x480] sm:$0xff]  }
 0x156   : > { %18570 = vmatmul.mubr.msk.bf16.gmra.mrb[32].mxu1 %vm806_vm2, %v21336_v53  ;;  %19008 = vmatmul.mubr.msk.bf16.gmra.mrb[80].mxu0 %vm806_vm2, %v21337_v54  ;;  %v21396_v53 = vld [vmem:[%s21834_s29 + $0x178] sm:$0xff]   ;;  %v21397_v54 = vld [vmem:[%s21834_s29 + $0x488] sm:$0xff]  }
 0x157   : > { %18573 = vmatprep.mubr.msk.bf16.mxu1 %vm806_vm2, %v21338_v55  ;;  %19011 = vmatprep.mubr.msk.bf16.mxu0 %vm806_vm2, %v21339_v56  ;;  %v21398_v55 = vld [vmem:[%s21834_s29 + $0x180] sm:$0xff]   ;;  %v21399_v56 = vld [vmem:[%s21834_s29 + $0x490] sm:$0xff]  }
 0x15e   : > { %18574 = vmatmul.mubr.msk.bf16.gmra.mrb[36].mxu1 %vm806_vm2, %v21340_v57  ;;  %19012 = vmatmul.mubr.msk.bf16.gmra.mrb[84].mxu0 %vm806_vm2, %v21341_v58  ;;  %v21400_v57 = vld [vmem:[%s21834_s29 + $0x188] sm:$0xff]   ;;  %v21401_v58 = vld [vmem:[%s21834_s29 + $0x498] sm:$0xff]  }
 0x15f   : > { %18577 = vmatprep.mubr.msk.bf16.mxu1 %vm806_vm2, %v21342_v59  ;;  %19015 = vmatprep.mubr.msk.bf16.mxu0 %vm806_vm2, %v21343_v60  ;;  %v21402_v59 = vld [vmem:[%s21834_s29 + $0x190] sm:$0xff]   ;;  %v21403_v60 = vld [vmem:[%s21834_s29 + $0x4a0] sm:$0xff]  }
 0x166   : > { %18578 = vmatmul.mubr.msk.bf16.gmra.mrb[40].mxu1 %vm806_vm2, %v21344_v61  ;;  %19016 = vmatmul.mubr.msk.bf16.gmra.mrb[88].mxu0 %vm806_vm2, %v21345_v62  ;;  %v21404_v61 = vld [vmem:[%s21834_s29 + $0x198] sm:$0xff]   ;;  %v21405_v62 = vld [vmem:[%s21834_s29 + $0x4a8] sm:$0xff]  }
 0x167   : > { %18581 = vmatprep.mubr.msk.bf16.mxu1 %vm806_vm2, %v21346_v63  ;;  %19019 = vmatprep.mubr.msk.bf16.mxu0 %vm806_vm2, %v21347_v0  ;;  %v21406_v63 = vld [vmem:[%s21834_s29 + $0x1a0] sm:$0xff]   ;;  %v21407_v0 = vld [vmem:[%s21834_s29 + $0x4b0] sm:$0xff]  }
 0x16e   : > { %18582 = vmatmul.mubr.msk.bf16.gmra.mrb[44].mxu1 %vm806_vm2, %v21348_v1  ;;  %19020 = vmatmul.mubr.msk.bf16.gmra.mrb[92].mxu0 %vm806_vm2, %v21349_v2  ;;  %v21408_v1 = vld [vmem:[%s21834_s29 + $0x1a8] sm:$0xff]   ;;  %v21409_v2 = vld [vmem:[%s21834_s29 + $0x4b8] sm:$0xff]  }
 0x16f   : > { %18585 = vmatprep.mubr.msk.bf16.mxu1 %vm806_vm2, %v21350_v3  ;;  %19023 = vmatprep.mubr.msk.bf16.mxu0 %vm806_vm2, %v21351_v4  ;;  %v21410_v3 = vld [vmem:[%s21834_s29 + $0x1b0] sm:$0xff]   ;;  %v21411_v4 = vld [vmem:[%s21834_s29 + $0x4c0] sm:$0xff]  }
 0x176   : > { %18586 = vmatmul.mubr.msk.bf16.gmra.mrb[48].mxu1 %vm806_vm2, %v21352_v7  ;;  %19024 = vmatmul.mubr.msk.bf16.gmra.mrb[96].mxu0 %vm806_vm2, %v21353_v8  ;;  %v21412_v7 = vld [vmem:[%s21834_s29 + $0x1b8] sm:$0xff]   ;;  %v21413_v8 = vld [vmem:[%s21834_s29 + $0x4c8] sm:$0xff]  }
 0x177   : > { %18589 = vmatprep.mubr.msk.bf16.mxu1 %vm806_vm2, %v21354_v9  ;;  %19027 = vmatprep.mubr.msk.bf16.mxu0 %vm806_vm2, %v21355_v10  ;;  %v21414_v9 = vld [vmem:[%s21834_s29 + $0x1c0] sm:$0xff]   ;;  %v21415_v10 = vld [vmem:[%s21834_s29 + $0x4d0] sm:$0xff]  }
 0x17e   : > { %18590 = vmatmul.mubr.msk.bf16.gmra.mrb[52].mxu1 %vm806_vm2, %v21356_v11  ;;  %19028 = vmatmul.mubr.msk.bf16.gmra.mrb[100].mxu0 %vm806_vm2, %v21357_v12  ;;  %v21416_v11 = vld [vmem:[%s21834_s29 + $0x1c8] sm:$0xff]   ;;  %v21417_v12 = vld [vmem:[%s21834_s29 + $0x4d8] sm:$0xff]  }
 0x17f   : > { %18593 = vmatprep.mubr.msk.bf16.mxu1 %vm806_vm2, %v21358_v13  ;;  %19031 = vmatprep.mubr.msk.bf16.mxu0 %vm806_vm2, %v21359_v14  ;;  %v21418_v13 = vld [vmem:[%s21834_s29 + $0x1d0] sm:$0xff]   ;;  %v21419_v14 = vld [vmem:[%s21834_s29 + $0x4e0] sm:$0xff]  }
 0x186   : > { %18594 = vmatmul.mubr.msk.bf16.gmra.mrb[56].mxu1 %vm806_vm2, %v21360_v15  ;;  %19032 = vmatmul.mubr.msk.bf16.gmra.mrb[104].mxu0 %vm806_vm2, %v21361_v16  ;;  %v21420_v15 = vld [vmem:[%s21834_s29 + $0x1d8] sm:$0xff]   ;;  %v21421_v16 = vld [vmem:[%s21834_s29 + $0x4e8] sm:$0xff]  }
 0x187   : > { %18597 = vmatprep.mubr.msk.bf16.mxu1 %vm806_vm2, %v21362_v17  ;;  %19035 = vmatprep.mubr.msk.bf16.mxu0 %vm806_vm2, %v21363_v18  ;;  %v21422_v17 = vld [vmem:[%s21834_s29 + $0x1e0] sm:$0xff]   ;;  %v21423_v18 = vld [vmem:[%s21834_s29 + $0x4f0] sm:$0xff]  }
 0x18e   : > { %18598 = vmatmul.mubr.msk.bf16.gmra.mrb[60].mxu1 %vm806_vm2, %v21364_v19  ;;  %19036 = vmatmul.mubr.msk.bf16.gmra.mrb[108].mxu0 %vm806_vm2, %v21365_v20  ;;  %v21424_v19 = vld [vmem:[%s21834_s29 + $0x1e8] sm:$0xff]   ;;  %v21425_v20 = vld [vmem:[%s21834_s29 + $0x4f8] sm:$0xff]  }
 0x18f   : > { %18601 = vmatprep.mubr.msk.bf16.mxu1 %vm806_vm2, %v21366_v21  ;;  %19039 = vmatprep.mubr.msk.bf16.mxu0 %vm806_vm2, %v21367_v22  ;;  %v21426_v21 = vld [vmem:[%s21834_s29 + $0x1f0] sm:$0xff]   ;;  %v21427_v22 = vld [vmem:[%s21834_s29 + $0x500] sm:$0xff]  }
 0x196   : > { %18602 = vmatmul.mubr.msk.bf16.gmra.mrb[64].mxu1 %vm806_vm2, %v21368_v24  ;;  %19040 = vmatmul.mubr.msk.bf16.gmra.mrb[112].mxu0 %vm806_vm2, %v21369_v26  ;;  %v21429_v24 = vld [vmem:[%s21834_s29 + $0x508] sm:$0xff]   ;;  %v21431_v26 = vld [vmem:[%s21834_s29 + $0x510] sm:$0xff]  }
 0x197   : > { %18605 = vmatprep.mubr.msk.bf16.mxu1 %vm806_vm2, %v21370_v27  ;;  %19043 = vmatprep.mubr.msk.bf16.mxu0 %vm806_vm2, %v21371_v28  ;;  %v21432_v27 = vld [vmem:[%s21834_s29 + $0x448] sm:$0xff]   ;;  %v21433_v28 = vld [vmem:[%s21834_s29 + $0x518] sm:$0xff]  }
 0x19e   : > { %18606 = vmatmul.mubr.msk.bf16.gmra.mrb[68].mxu1 %vm806_vm2, %v21372_v29  ;;  %19044 = vmatmul.mubr.msk.bf16.gmra.mrb[116].mxu0 %vm806_vm2, %v21373_v30  ;;  %v21434_v29 = vld [vmem:[%s21834_s29 + $0x450] sm:$0xff]   ;;  %v21435_v30 = vld [vmem:[%s21834_s29 + $0x520] sm:$0xff]  }
 0x19f   : > { %18609 = vmatprep.mubr.msk.bf16.mxu1 %vm806_vm2, %v21374_v31  ;;  %19047 = vmatprep.mubr.msk.bf16.mxu0 %vm806_vm2, %v21375_v32  ;;  %v21436_v31 = vld [vmem:[%s21834_s29 + $0x458] sm:$0xff]   ;;  %v21437_v32 = vld [vmem:[%s21834_s29 + $0x528] sm:$0xff]  }
 0x1a6   : > { %18610 = vmatmul.mubr.msk.bf16.gmra.mrb[72].mxu1 %vm806_vm2, %v21376_v33  ;;  %19048 = vmatmul.mubr.msk.bf16.gmra.mrb[120].mxu0 %vm806_vm2, %v21377_v34  ;;  %v21438_v33 = vld [vmem:[%s21834_s29 + $0x460] sm:$0xff]   ;;  %v21439_v34 = vld [vmem:[%s21834_s29 + $0x530] sm:$0xff]  }
 0x1a7   : > { %18613 = vmatprep.mubr.msk.bf16.mxu1 %vm806_vm2, %v21378_v35  ;;  %19051 = vmatprep.mubr.msk.bf16.mxu0 %vm806_vm2, %v21379_v36  ;;  %v21440_v35 = vld [vmem:[%s21834_s29 + $0x468] sm:$0xff]   ;;  %v21441_v36 = vld [vmem:[%s21834_s29 + $0x538] sm:$0xff]  }
 0x1ae   : > { %18614 = vmatmul.mubr.msk.bf16.gmra.mrb[76].mxu1 %vm806_vm2, %v21380_v37  ;;  %19052 = vmatmul.mubr.msk.bf16.gmra.mrb[124].mxu0 %vm806_vm2, %v21381_v38  ;;  %v21442_v37 = vld [vmem:[%s21834_s29 + $0x470] sm:$0xff]   ;;  %v21444_v38 = vld [vmem:[%s21834_s29 + $0x478] sm:$0xff]  }
 0x1af   : > { %18617 = vmatprep.mubr.msk.bf16.mxu1 %vm806_vm2, %v21382_v40  ;;  %19057 = vmatprep.mubr.msk.bf16.mxu0 %vm806_vm2, %v21383_v41  ;;  %v21445_v40 = vld [vmem:[%s21834_s29 + $0x548] sm:$0xff]   ;;  %v21446_v41 = vld [vmem:[%s21834_s29 + $0x480] sm:$0xff]  }
 0x1b6   : > { %18618 = vmatmul.mubr.msk.bf16.gmra.mrb[80].mxu1 %vm806_vm2, %v21384_v42  ;;  %19058 = vmatmul.mubr.msk.bf16.vlgmr.msra.gmra.mrb[0].mxu0 %vm806_vm2, %v21385_v43  ;;  %v21447_v42 = vld [vmem:[%s21834_s29 + $0x550] sm:$0xff]   ;;  %v17107_v43 = vld [vmem:[%s24299_s1 + $0xe] sm:$0x3] }
 0x1b7   : > { %18621 = vmatprep.mubr.msk.bf16.mxu1 %vm806_vm2, %v21386_v44  ;;  %19186 = vmatpush3.bf16.msra.mxu0 %v22147_v39  ;;  %v21393_v39 = vld [vmem:[%s21834_s29 + $0x478] sm:$0xff]   ;;  %v22414_v44 = vand.u32 %v17107_v43, %v21819_v5  ;;  %v21509_v43 = vld [vmem:[%s21834_s29 + $0x648] sm:$0xff]  }
 0x1b8   : > { %19061 = vmatprep.mubr.msk.bf16.mxu0 %vm806_vm2, %v21387_v45  ;;  %v21448_v45 = vld [vmem:[%s21834_s29 + $0x488] sm:$0xff]  }
 0x1b9   : > { %19315 = vmatprep.subr.bf16.mxu0 %v22414_v44 }
 0x1be   : > { %18622 = vmatmul.mubr.msk.bf16.gmra.mrb[84].mxu1 %vm806_vm2, %v21388_v46  ;;  %19062 = vmatmul.mubr.msk.bf16.gmra.mrb[4].mxu0 %vm806_vm2, %v21389_v47  ;;  %v21449_v46 = vld [vmem:[%s21834_s29 + $0x558] sm:$0xff]   ;;  %v21450_v47 = vld [vmem:[%s21834_s29 + $0x490] sm:$0xff]  }
 0x1bf   : > { %18625 = vmatprep.mubr.msk.bf16.mxu1 %vm806_vm2, %v21390_v48  ;;  %19065 = vmatprep.mubr.msk.bf16.mxu0 %vm806_vm2, %v21391_v49  ;;  %v21451_v48 = vld [vmem:[%s21834_s29 + $0x560] sm:$0xff]   ;;  %v21452_v49 = vld [vmem:[%s21834_s29 + $0x498] sm:$0xff]  }
 0x1c6   : > { %18626 = vmatmul.mubr.msk.bf16.gmra.mrb[88].mxu1 %vm806_vm2, %v21392_v50  ;;  %19066 = vmatmul.mubr.msk.bf16.gmra.mrb[8].mxu0 %vm806_vm2, %v21393_v39  ;;  %v21453_v50 = vld [vmem:[%s21834_s29 + $0x568] sm:$0xff]   ;;  %v21454_v39 = vld [vmem:[%s21834_s29 + $0x4a0] sm:$0xff]  }
 0x1c7   : > { %18629 = vmatprep.mubr.msk.bf16.mxu1 %vm806_vm2, %v21394_v51  ;;  %19069 = vmatprep.mubr.msk.bf16.mxu0 %vm806_vm2, %v21395_v52  ;;  %v21455_v51 = vld [vmem:[%s21834_s29 + $0x570] sm:$0xff]   ;;  %v21456_v52 = vld [vmem:[%s21834_s29 + $0x4a8] sm:$0xff]  }
 0x1ce   : > { %18630 = vmatmul.mubr.msk.bf16.gmra.mrb[92].mxu1 %vm806_vm2, %v21396_v53  ;;  %19070 = vmatmul.mubr.msk.bf16.gmra.mrb[12].mxu0 %vm806_vm2, %v21397_v54  ;;  %v21457_v53 = vld [vmem:[%s21834_s29 + $0x578] sm:$0xff]   ;;  %v21458_v54 = vld [vmem:[%s21834_s29 + $0x4b0] sm:$0xff]  }
 0x1cf   : > { %18633 = vmatprep.mubr.msk.bf16.mxu1 %vm806_vm2, %v21398_v55  ;;  %19073 = vmatprep.mubr.msk.bf16.mxu0 %vm806_vm2, %v21399_v56  ;;  %v21459_v55 = vld [vmem:[%s21834_s29 + $0x580] sm:$0xff]   ;;  %v21460_v56 = vld [vmem:[%s21834_s29 + $0x4b8] sm:$0xff]  }
 0x1d6   : > { %18634 = vmatmul.mubr.msk.bf16.gmra.mrb[96].mxu1 %vm806_vm2, %v21400_v57  ;;  %19074 = vmatmul.mubr.msk.bf16.gmra.mrb[16].mxu0 %vm806_vm2, %v21401_v58  ;;  %v21461_v57 = vld [vmem:[%s21834_s29 + $0x588] sm:$0xff]   ;;  %v21462_v58 = vld [vmem:[%s21834_s29 + $0x4c0] sm:$0xff]  }
 0x1d7   : > { %18637 = vmatprep.mubr.msk.bf16.mxu1 %vm806_vm2, %v21402_v59  ;;  %19077 = vmatprep.mubr.msk.bf16.mxu0 %vm806_vm2, %v21403_v60  ;;  %v21463_v59 = vld [vmem:[%s21834_s29 + $0x590] sm:$0xff]   ;;  %v21464_v60 = vld [vmem:[%s21834_s29 + $0x4c8] sm:$0xff]  }
 0x1de   : > { %18638 = vmatmul.mubr.msk.bf16.gmra.mrb[100].mxu1 %vm806_vm2, %v21404_v61  ;;  %19078 = vmatmul.mubr.msk.bf16.gmra.mrb[20].mxu0 %vm806_vm2, %v21405_v62  ;;  %v21465_v61 = vld [vmem:[%s21834_s29 + $0x598] sm:$0xff]   ;;  %v21466_v62 = vld [vmem:[%s21834_s29 + $0x4d0] sm:$0xff]  }
 0x1df   : > { %18641 = vmatprep.mubr.msk.bf16.mxu1 %vm806_vm2, %v21406_v63  ;;  %19081 = vmatprep.mubr.msk.bf16.mxu0 %vm806_vm2, %v21407_v0  ;;  %v21467_v63 = vld [vmem:[%s21834_s29 + $0x5a0] sm:$0xff]   ;;  %v21468_v0 = vld [vmem:[%s21834_s29 + $0x4d8] sm:$0xff]  }
 0x1e6   : > { %18642 = vmatmul.mubr.msk.bf16.gmra.mrb[104].mxu1 %vm806_vm2, %v21408_v1  ;;  %19082 = vmatmul.mubr.msk.bf16.gmra.mrb[24].mxu0 %vm806_vm2, %v21409_v2  ;;  %v21469_v1 = vld [vmem:[%s21834_s29 + $0x5a8] sm:$0xff]   ;;  %v21470_v2 = vld [vmem:[%s21834_s29 + $0x4e0] sm:$0xff]  }
 0x1e7   : > { %18645 = vmatprep.mubr.msk.bf16.mxu1 %vm806_vm2, %v21410_v3  ;;  %19085 = vmatprep.mubr.msk.bf16.mxu0 %vm806_vm2, %v21411_v4  ;;  %v21471_v3 = vld [vmem:[%s21834_s29 + $0x5b0] sm:$0xff]   ;;  %v21472_v4 = vld [vmem:[%s21834_s29 + $0x4e8] sm:$0xff]  }
 0x1ee   : > { %18646 = vmatmul.mubr.msk.bf16.gmra.mrb[108].mxu1 %vm806_vm2, %v21412_v7  ;;  %19086 = vmatmul.mubr.msk.bf16.gmra.mrb[28].mxu0 %vm806_vm2, %v21413_v8  ;;  %v21473_v7 = vld [vmem:[%s21834_s29 + $0x5b8] sm:$0xff]   ;;  %v21474_v8 = vld [vmem:[%s21834_s29 + $0x4f0] sm:$0xff]  }
 0x1ef   : > { %18649 = vmatprep.mubr.msk.bf16.mxu1 %vm806_vm2, %v21414_v9  ;;  %19089 = vmatprep.mubr.msk.bf16.mxu0 %vm806_vm2, %v21415_v10  ;;  %v21475_v9 = vld [vmem:[%s21834_s29 + $0x5c0] sm:$0xff]   ;;  %v21476_v10 = vld [vmem:[%s21834_s29 + $0x4f8] sm:$0xff]  }
 0x1f6   : > { %18650 = vmatmul.mubr.msk.bf16.gmra.mrb[112].mxu1 %vm806_vm2, %v21416_v11  ;;  %19090 = vmatmul.mubr.msk.bf16.gmra.mrb[32].mxu0 %vm806_vm2, %v21417_v12  ;;  %v21477_v11 = vld [vmem:[%s21834_s29 + $0x5c8] sm:$0xff]   ;;  %v21478_v12 = vld [vmem:[%s21834_s29 + $0x500] sm:$0xff]  }
 0x1f7   : > { %18653 = vmatprep.mubr.msk.bf16.mxu1 %vm806_vm2, %v21418_v13  ;;  %19093 = vmatprep.mubr.msk.bf16.mxu0 %vm806_vm2, %v21419_v14  ;;  %v21479_v13 = vld [vmem:[%s21834_s29 + $0x5d0] sm:$0xff]   ;;  %v21480_v14 = vld [vmem:[%s21834_s29 + $0x508] sm:$0xff]  }
 0x1fe   : > { %18654 = vmatmul.mubr.msk.bf16.gmra.mrb[116].mxu1 %vm806_vm2, %v21420_v15  ;;  %19094 = vmatmul.mubr.msk.bf16.gmra.mrb[36].mxu0 %vm806_vm2, %v21421_v16  ;;  %v21481_v15 = vld [vmem:[%s21834_s29 + $0x5d8] sm:$0xff]   ;;  %v21482_v16 = vld [vmem:[%s21834_s29 + $0x510] sm:$0xff]  }
 0x1ff   : > { %18657 = vmatprep.mubr.msk.bf16.mxu1 %vm806_vm2, %v21422_v17  ;;  %19097 = vmatprep.mubr.msk.bf16.mxu0 %vm806_vm2, %v21423_v18  ;;  %v21483_v17 = vld [vmem:[%s21834_s29 + $0x5e0] sm:$0xff]   ;;  %v21484_v18 = vld [vmem:[%s21834_s29 + $0x518] sm:$0xff]  }
 0x206   : > { %18658 = vmatmul.mubr.msk.bf16.gmra.mrb[120].mxu1 %vm806_vm2, %v21424_v19  ;;  %19098 = vmatmul.mubr.msk.bf16.gmra.mrb[40].mxu0 %vm806_vm2, %v21425_v20  ;;  %v21485_v19 = vld [vmem:[%s21834_s29 + $0x5e8] sm:$0xff]   ;;  %v21486_v20 = vld [vmem:[%s21834_s29 + $0x520] sm:$0xff]  }
 0x207   : > { %18661 = vmatprep.mubr.msk.bf16.mxu1 %vm806_vm2, %v21426_v21  ;;  %19101 = vmatprep.mubr.msk.bf16.mxu0 %vm806_vm2, %v21427_v22  ;;  %v21487_v21 = vld [vmem:[%s21834_s29 + $0x5f0] sm:$0xff]   ;;  %v21488_v22 = vld [vmem:[%s21834_s29 + $0x528] sm:$0xff]  }
 0x20e   : > { %18662 = vmatmul.mubr.msk.bf16.gmra.mrb[124].mxu1 %vm806_vm2, %v21428_v23  ;;  %19102 = vmatmul.mubr.msk.bf16.gmra.mrb[44].mxu0 %vm806_vm2, %v21429_v24  ;;  %v21489_v23 = vld [vmem:[%s21834_s29 + $0x5f8] sm:$0xff]   ;;  %v21490_v24 = vld [vmem:[%s21834_s29 + $0x530] sm:$0xff]  }
 0x20f   : > { %18667 = vmatprep.mubr.msk.bf16.mxu1 %vm806_vm2, %v21430_v25  ;;  %19105 = vmatprep.mubr.msk.bf16.mxu0 %vm806_vm2, %v21431_v26  ;;  %v21491_v25 = vld [vmem:[%s21834_s29 + $0x600] sm:$0xff]   ;;  %v21492_v26 = vld [vmem:[%s21834_s29 + $0x538] sm:$0xff]  }
 0x216   : > { %18668 = vmatmul.mubr.msk.bf16.vlgmr.msra.gmra.mrb[0].mxu1 %vm806_vm2, %v21432_v27  ;;  %19106 = vmatmul.mubr.msk.bf16.gmra.mrb[48].mxu0 %vm806_vm2, %v21433_v28  ;;  %v21493_v27 = vld [vmem:[%s21834_s29 + $0x608] sm:$0xff]   ;;  %v21494_v28 = vld [vmem:[%s21834_s29 + $0x540] sm:$0xff]  }
 0x217   : > { %18671 = vmatprep.mubr.msk.bf16.mxu1 %vm806_vm2, %v21434_v29  ;;  %19109 = vmatprep.mubr.msk.bf16.mxu0 %vm806_vm2, %v21435_v30  ;;  %v21495_v29 = vld [vmem:[%s21834_s29 + $0x610] sm:$0xff]   ;;  %v21496_v30 = vld [vmem:[%s21834_s29 + $0x548] sm:$0xff]  }
 0x218   : > { %19882 = vmatpush3.bf16.msra.mxu1 %v21824_v6  ;;  %v21443_v6 = vld [vmem:[%s21834_s29 + $0x540] sm:$0xff]  }
 0x21e   : > { %18672 = vmatmul.mubr.msk.bf16.gmra.mrb[4].mxu1 %vm806_vm2, %v21436_v31  ;;  %19110 = vmatmul.mubr.msk.bf16.gmra.mrb[52].mxu0 %vm806_vm2, %v21437_v32  ;;  %v21497_v31 = vld [vmem:[%s21834_s29 + $0x618] sm:$0xff]   ;;  %v21498_v32 = vld [vmem:[%s21834_s29 + $0x550] sm:$0xff]  }
 0x21f   : > { %18675 = vmatprep.mubr.msk.bf16.mxu1 %vm806_vm2, %v21438_v33  ;;  %19113 = vmatprep.mubr.msk.bf16.mxu0 %vm806_vm2, %v21439_v34  ;;  %v21499_v33 = vld [vmem:[%s21834_s29 + $0x620] sm:$0xff]   ;;  %v21500_v34 = vld [vmem:[%s21834_s29 + $0x558] sm:$0xff]  }
 0x226   : > { %18676 = vmatmul.mubr.msk.bf16.gmra.mrb[8].mxu1 %vm806_vm2, %v21440_v35  ;;  %19114 = vmatmul.mubr.msk.bf16.gmra.mrb[56].mxu0 %vm806_vm2, %v21441_v36  ;;  %v21501_v35 = vld [vmem:[%s21834_s29 + $0x628] sm:$0xff]   ;;  %v21502_v36 = vld [vmem:[%s21834_s29 + $0x560] sm:$0xff]  }
 0x227   : > { %18679 = vmatprep.mubr.msk.bf16.mxu1 %vm806_vm2, %v21442_v37  ;;  %19117 = vmatprep.mubr.msk.bf16.mxu0 %vm806_vm2, %v21443_v6  ;;  %v21503_v37 = vld [vmem:[%s21834_s29 + $0x630] sm:$0xff]   ;;  %v21504_v6 = vld [vmem:[%s21834_s29 + $0x568] sm:$0xff]  }
 0x22e   : > { %18680 = vmatmul.mubr.msk.bf16.gmra.mrb[12].mxu1 %vm806_vm2, %v21444_v38  ;;  %19118 = vmatmul.mubr.msk.bf16.gmra.mrb[60].mxu0 %vm806_vm2, %v21445_v40  ;;  %v21505_v38 = vld [vmem:[%s21834_s29 + $0x638] sm:$0xff]   ;;  %v21506_v40 = vld [vmem:[%s21834_s29 + $0x570] sm:$0xff]  }
 0x22f   : > { %18683 = vmatprep.mubr.msk.bf16.mxu1 %vm806_vm2, %v21446_v41  ;;  %19121 = vmatprep.mubr.msk.bf16.mxu0 %vm806_vm2, %v21447_v42  ;;  %v21507_v41 = vld [vmem:[%s21834_s29 + $0x640] sm:$0xff]   ;;  %v21508_v42 = vld [vmem:[%s21834_s29 + $0x578] sm:$0xff]  }
 0x236   : > { %18684 = vmatmul.mubr.msk.bf16.gmra.mrb[16].mxu1 %vm806_vm2, %v21448_v45  ;;  %19122 = vmatmul.mubr.msk.bf16.gmra.mrb[64].mxu0 %vm806_vm2, %v21449_v46  ;;  %v21510_v45 = vld [vmem:[%s21834_s29 + $0x580] sm:$0xff]  }
 0x237   : > { %18687 = vmatprep.mubr.msk.bf16.mxu1 %vm806_vm2, %v21450_v47  ;;  %19125 = vmatprep.mubr.msk.bf16.mxu0 %vm806_vm2, %v21451_v48  ;;  %v21511_v46 = vld [vmem:[%s21834_s29 + $0x20] sm:$0xff]   ;;  %v21512_v47 = vld [vmem:[%s21834_s29 + $0x588] sm:$0xff]  }
 0x238   : > { %v21513_v48 = vld [vmem:[%s21834_s29 + $0x28] sm:$0xff]  }
 0x23e   : > { %18688 = vmatmul.mubr.msk.bf16.gmra.mrb[20].mxu1 %vm806_vm2, %v21452_v49  ;;  %19126 = vmatmul.mubr.msk.bf16.gmra.mrb[68].mxu0 %vm806_vm2, %v21453_v50  ;;  %v21514_v49 = vld [vmem:[%s21834_s29 + $0x590] sm:$0xff]  }
 0x23f   : > { %18691 = vmatprep.mubr.msk.bf16.mxu1 %vm806_vm2, %v21454_v39  ;;  %19129 = vmatprep.mubr.msk.bf16.mxu0 %vm806_vm2, %v21455_v51  ;;  %v21515_v50 = vld [vmem:[%s21834_s29 + $0x30] sm:$0xff]   ;;  %v21516_v39 = vld [vmem:[%s21834_s29 + $0x598] sm:$0xff]  }
 0x240   : > { %v21517_v51 = vld [vmem:[%s21834_s29 + $0x38] sm:$0xff]  }
 0x246   : > { %18692 = vmatmul.mubr.msk.bf16.gmra.mrb[24].mxu1 %vm806_vm2, %v21456_v52  ;;  %19130 = vmatmul.mubr.msk.bf16.gmra.mrb[72].mxu0 %vm806_vm2, %v21457_v53  ;;  %v21518_v52 = vld [vmem:[%s21834_s29 + $0x5a0] sm:$0xff]  }
 0x247   : > { %18695 = vmatprep.mubr.msk.bf16.mxu1 %vm806_vm2, %v21458_v54  ;;  %19133 = vmatprep.mubr.msk.bf16.mxu0 %vm806_vm2, %v21459_v55  ;;  %v21519_v53 = vld [vmem:[%s21834_s29 + $0x40] sm:$0xff]   ;;  %v21520_v54 = vld [vmem:[%s21834_s29 + $0x5a8] sm:$0xff]   ;;  %v21522_v55 = vld [vmem:[%s21834_s29 + $0x5b0] sm:$0xff]  }
 0x24e   : > { %18696 = vmatmul.mubr.msk.bf16.gmra.mrb[28].mxu1 %vm806_vm2, %v21460_v56  ;;  %19134 = vmatmul.mubr.msk.bf16.gmra.mrb[76].mxu0 %vm806_vm2, %v21461_v57  ;;  %v21523_v56 = vld [vmem:[%s21834_s29 + $0x50] sm:$0xff]   ;;  %v21524_v57 = vld [vmem:[%s21834_s29 + $0x5b8] sm:$0xff]  }
 0x24f   : > { %18699 = vmatprep.mubr.msk.bf16.mxu1 %vm806_vm2, %v21462_v58  ;;  %19137 = vmatprep.mubr.msk.bf16.mxu0 %vm806_vm2, %v21463_v59  ;;  %v21525_v58 = vld [vmem:[%s21834_s29 + $0x58] sm:$0xff]   ;;  %v21526_v59 = vld [vmem:[%s21834_s29 + $0x5c0] sm:$0xff]  }
 0x256   : > { %18700 = vmatmul.mubr.msk.bf16.gmra.mrb[32].mxu1 %vm806_vm2, %v21464_v60  ;;  %19138 = vmatmul.mubr.msk.bf16.gmra.mrb[80].mxu0 %vm806_vm2, %v21465_v61  ;;  %v21527_v60 = vld [vmem:[%s21834_s29 + $0x60] sm:$0xff]   ;;  %v21528_v61 = vld [vmem:[%s21834_s29 + $0x5c8] sm:$0xff]  }
 0x257   : > { %18703 = vmatprep.mubr.msk.bf16.mxu1 %vm806_vm2, %v21466_v62  ;;  %19141 = vmatprep.mubr.msk.bf16.mxu0 %vm806_vm2, %v21467_v63  ;;  %v21529_v62 = vld [vmem:[%s21834_s29 + $0x68] sm:$0xff]   ;;  %v21530_v63 = vld [vmem:[%s21834_s29 + $0x5d0] sm:$0xff]  }
 0x25e   : > { %18704 = vmatmul.mubr.msk.bf16.gmra.mrb[36].mxu1 %vm806_vm2, %v21468_v0  ;;  %19142 = vmatmul.mubr.msk.bf16.gmra.mrb[84].mxu0 %vm806_vm2, %v21469_v1  ;;  %v21531_v0 = vld [vmem:[%s21834_s29 + $0x70] sm:$0xff]   ;;  %v21532_v1 = vld [vmem:[%s21834_s29 + $0x5d8] sm:$0xff]  }
 0x25f   : > { %18707 = vmatprep.mubr.msk.bf16.mxu1 %vm806_vm2, %v21470_v2  ;;  %19145 = vmatprep.mubr.msk.bf16.mxu0 %vm806_vm2, %v21471_v3  ;;  %v21533_v2 = vld [vmem:[%s21834_s29 + $0x78] sm:$0xff]   ;;  %v21534_v3 = vld [vmem:[%s21834_s29 + $0x5e0] sm:$0xff]  }
 0x266   : > { %18708 = vmatmul.mubr.msk.bf16.gmra.mrb[40].mxu1 %vm806_vm2, %v21472_v4  ;;  %19146 = vmatmul.mubr.msk.bf16.gmra.mrb[88].mxu0 %vm806_vm2, %v21473_v7  ;;  %v21535_v4 = vld [vmem:[%s21834_s29 + $0x80] sm:$0xff]   ;;  %v21536_v7 = vld [vmem:[%s21834_s29 + $0x5e8] sm:$0xff]  }
 0x267   : > { %18711 = vmatprep.mubr.msk.bf16.mxu1 %vm806_vm2, %v21474_v8  ;;  %19149 = vmatprep.mubr.msk.bf16.mxu0 %vm806_vm2, %v21475_v9  ;;  %v21537_v8 = vld [vmem:[%s21834_s29 + $0x88] sm:$0xff]   ;;  %v21538_v9 = vld [vmem:[%s21834_s29 + $0x5f0] sm:$0xff]  }
 0x26e   : > { %18712 = vmatmul.mubr.msk.bf16.gmra.mrb[44].mxu1 %vm806_vm2, %v21476_v10  ;;  %19150 = vmatmul.mubr.msk.bf16.gmra.mrb[92].mxu0 %vm806_vm2, %v21477_v11  ;;  %v21539_v10 = vld [vmem:[%s21834_s29 + $0x90] sm:$0xff]  }
 0x26f   : > { %18715 = vmatprep.mubr.msk.bf16.mxu1 %vm806_vm2, %v21478_v12  ;;  %19153 = vmatprep.mubr.msk.bf16.mxu0 %vm806_vm2, %v21479_v13  ;;  %v21540_v12 = vld [vmem:[%s21834_s29 + $0x5f8] sm:$0xff]  }
 0x276   : > { %18716 = vmatmul.mubr.msk.bf16.gmra.mrb[48].mxu1 %vm806_vm2, %v21480_v14  ;;  %19154 = vmatmul.mubr.msk.bf16.gmra.mrb[96].mxu0 %vm806_vm2, %v21481_v15  ;;  %v21541_v14 = vld [vmem:[%s21834_s29 + $0x98] sm:$0xff]   ;;  %v21542_v15 = vld [vmem:[%s21834_s29 + $0x600] sm:$0xff]  }
 0x277   : > { %18719 = vmatprep.mubr.msk.bf16.mxu1 %vm806_vm2, %v21482_v16  ;;  %19157 = vmatprep.mubr.msk.bf16.mxu0 %vm806_vm2, %v21483_v17  ;;  %v21543_v17 = vld [vmem:[%s21834_s29 + $0xa0] sm:$0xff]  }
 0x27e   : > { %18720 = vmatmul.mubr.msk.bf16.gmra.mrb[52].mxu1 %vm806_vm2, %v21484_v18  ;;  %19158 = vmatmul.mubr.msk.bf16.gmra.mrb[100].mxu0 %vm806_vm2, %v21485_v19 }
 0x27f   : > { %18723 = vmatprep.mubr.msk.bf16.mxu1 %vm806_vm2, %v21486_v20  ;;  %19161 = vmatprep.mubr.msk.bf16.mxu0 %vm806_vm2, %v21487_v21  ;;  %v21544_v20 = vld [vmem:[%s21834_s29 + $0x608] sm:$0xff]  }
 0x286   : > { %18724 = vmatmul.mubr.msk.bf16.gmra.mrb[56].mxu1 %vm806_vm2, %v21488_v22  ;;  %19162 = vmatmul.mubr.msk.bf16.gmra.mrb[104].mxu0 %vm806_vm2, %v21489_v23  ;;  %v21545_v22 = vld [vmem:[%s21834_s29 + $0xa8] sm:$0xff]   ;;  %v21546_v23 = vld [vmem:[%s21834_s29 + $0x610] sm:$0xff]  }
 0x287   : > { %18727 = vmatprep.mubr.msk.bf16.mxu1 %vm806_vm2, %v21490_v24  ;;  %19165 = vmatprep.mubr.msk.bf16.mxu0 %vm806_vm2, %v21491_v25  ;;  %v21547_v25 = vld [vmem:[%s21834_s29 + $0xb0] sm:$0xff]  }
 0x28e   : > { %18728 = vmatmul.mubr.msk.bf16.gmra.mrb[60].mxu1 %vm806_vm2, %v21492_v26  ;;  %19166 = vmatmul.mubr.msk.bf16.gmra.mrb[108].mxu0 %vm806_vm2, %v21493_v27 }
 0x28f   : > { %18731 = vmatprep.mubr.msk.bf16.mxu1 %vm806_vm2, %v21494_v28  ;;  %19169 = vmatprep.mubr.msk.bf16.mxu0 %vm806_vm2, %v21495_v29  ;;  %v21548_v28 = vld [vmem:[%s21834_s29 + $0x618] sm:$0xff]  }
 0x296   : > { %18732 = vmatmul.mubr.msk.bf16.gmra.mrb[64].mxu1 %vm806_vm2, %v21496_v30  ;;  %19170 = vmatmul.mubr.msk.bf16.gmra.mrb[112].mxu0 %vm806_vm2, %v21497_v31  ;;  %v21549_v30 = vld [vmem:[%s21834_s29 + $0xb8] sm:$0xff]   ;;  %v21550_v31 = vld [vmem:[%s21834_s29 + $0x620] sm:$0xff]  }
 0x297   : > { %18735 = vmatprep.mubr.msk.bf16.mxu1 %vm806_vm2, %v21498_v32  ;;  %19173 = vmatprep.mubr.msk.bf16.mxu0 %vm806_vm2, %v21499_v33  ;;  %v21551_v33 = vld [vmem:[%s21834_s29 + $0xc0] sm:$0xff]  }
 0x29e   : > { %18736 = vmatmul.mubr.msk.bf16.gmra.mrb[68].mxu1 %vm806_vm2, %v21500_v34  ;;  %19174 = vmatmul.mubr.msk.bf16.gmra.mrb[116].mxu0 %vm806_vm2, %v21501_v35 }
 0x29f   : > { %18739 = vmatprep.mubr.msk.bf16.mxu1 %vm806_vm2, %v21502_v36  ;;  %19177 = vmatprep.mubr.msk.bf16.mxu0 %vm806_vm2, %v21503_v37  ;;  %v21552_v36 = vld [vmem:[%s21834_s29 + $0x628] sm:$0xff]  }
 0x2a6   : > { %18740 = vmatmul.mubr.msk.bf16.gmra.mrb[72].mxu1 %vm806_vm2, %v21504_v6  ;;  %19178 = vmatmul.mubr.msk.bf16.gmra.mrb[120].mxu0 %vm806_vm2, %v21505_v38  ;;  %v21553_v6 = vld [vmem:[%s21834_s29 + $0xc8] sm:$0xff]   ;;  %v21554_v38 = vld [vmem:[%s21834_s29 + $0x630] sm:$0xff]  }
 0x2a7   : > { %18743 = vmatprep.mubr.msk.bf16.mxu1 %vm806_vm2, %v21506_v40  ;;  %19181 = vmatprep.mubr.msk.bf16.mxu0 %vm806_vm2, %v21507_v41  ;;  %v21555_v41 = vld [vmem:[%s21834_s29 + $0xd0] sm:$0xff]  }
 0x2ae   : > { %18744 = vmatmul.mubr.msk.bf16.gmra.mrb[76].mxu1 %vm806_vm2, %v21508_v42  ;;  %19182 = vmatmul.mubr.msk.bf16.gmra.mrb[124].mxu0 %vm806_vm2, %v21509_v43 }
 0x2af   : > { %18747 = vmatprep.mubr.msk.bf16.mxu1 %vm806_vm2, %v21510_v45  ;;  %19187 = vmatprep.mubr.msk.bf16.mxu0 %vm806_vm2, %v21511_v46  ;;  %v21556_v45 = vld [vmem:[%s21834_s29 + $0x638] sm:$0xff]  }
 0x2b6   : > { %18748 = vmatmul.mubr.msk.bf16.gmra.mrb[80].mxu1 %vm806_vm2, %v21512_v47  ;;  %19188 = vmatmul.mubr.msk.bf16.vlgmr.msra.gmra.mrb[0].mxu0 %vm806_vm2, %v21513_v48  ;;  %v21557_v47 = vld [vmem:[%s21834_s29 + $0xd8] sm:$0xff]   ;;  %v21558_v48 = vld [vmem:[%s21834_s29 + $0x150] sm:$0xff]  }
 0x2b7   : > { %18751 = vmatprep.mubr.msk.bf16.mxu1 %vm806_vm2, %v21514_v49  ;;  %19316 = vmatpush3.bf16.msra.mxu0 %v22414_v44  ;;  %v21521_v44 = vld [vmem:[%s21834_s29 + $0x48] sm:$0xff]  }
 0x2b8   : > { %19191 = vmatprep.mubr.msk.bf16.mxu0 %vm806_vm2, %v21515_v50  ;;  %v21559_v50 = vld [vmem:[%s21834_s29 + $0xe0] sm:$0xff]  }
 0x2be   : > { %18752 = vmatmul.mubr.msk.bf16.gmra.mrb[84].mxu1 %vm806_vm2, %v21516_v39  ;;  %19192 = vmatmul.mubr.msk.bf16.gmra.mrb[4].mxu0 %vm806_vm2, %v21517_v51 }
 0x2bf   : > { %18755 = vmatprep.mubr.msk.bf16.mxu1 %vm806_vm2, %v21518_v52  ;;  %19195 = vmatprep.mubr.msk.bf16.mxu0 %vm806_vm2, %v21519_v53  ;;  %v21560_v52 = vld [vmem:[%s21834_s29 + $0x158] sm:$0xff]  }
 0x2c6   : > { %18756 = vmatmul.mubr.msk.bf16.gmra.mrb[88].mxu1 %vm806_vm2, %v21520_v54  ;;  %19196 = vmatmul.mubr.msk.bf16.gmra.mrb[8].mxu0 %vm806_vm2, %v21521_v44  ;;  %v21561_v54 = vld [vmem:[%s21834_s29 + $0xe8] sm:$0xff]   ;;  %v21562_v44 = vld [vmem:[%s21834_s29 + $0x160] sm:$0xff]  }
 0x2c7   : > { %18759 = vmatprep.mubr.msk.bf16.mxu1 %vm806_vm2, %v21522_v55  ;;  %19199 = vmatprep.mubr.msk.bf16.mxu0 %vm806_vm2, %v21523_v56  ;;  %v21563_v56 = vld [vmem:[%s21834_s29 + $0xf0] sm:$0xff]  }
 0x2ce   : > { %18760 = vmatmul.mubr.msk.bf16.gmra.mrb[92].mxu1 %vm806_vm2, %v21524_v57  ;;  %19200 = vmatmul.mubr.msk.bf16.gmra.mrb[12].mxu0 %vm806_vm2, %v21525_v58 }
 0x2cf   : > { %18763 = vmatprep.mubr.msk.bf16.mxu1 %vm806_vm2, %v21526_v59  ;;  %19203 = vmatprep.mubr.msk.bf16.mxu0 %vm806_vm2, %v21527_v60  ;;  %v21564_v59 = vld [vmem:[%s21834_s29 + $0x168] sm:$0xff]  }
 0x2d6   : > { %18764 = vmatmul.mubr.msk.bf16.gmra.mrb[96].mxu1 %vm806_vm2, %v21528_v61  ;;  %19204 = vmatmul.mubr.msk.bf16.gmra.mrb[16].mxu0 %vm806_vm2, %v21529_v62  ;;  %v21565_v61 = vld [vmem:[%s21834_s29 + $0xf8] sm:$0xff]   ;;  %v21566_v62 = vld [vmem:[%s21834_s29 + $0x170] sm:$0xff]  }
 0x2d7   : > { %18767 = vmatprep.mubr.msk.bf16.mxu1 %vm806_vm2, %v21530_v63  ;;  %19207 = vmatprep.mubr.msk.bf16.mxu0 %vm806_vm2, %v21531_v0  ;;  %v21567_v0 = vld [vmem:[%s21834_s29 + $0x100] sm:$0xff]  }
 0x2de   : > { %18768 = vmatmul.mubr.msk.bf16.gmra.mrb[100].mxu1 %vm806_vm2, %v21532_v1  ;;  %19208 = vmatmul.mubr.msk.bf16.gmra.mrb[20].mxu0 %vm806_vm2, %v21533_v2 }
 0x2df   : > { %18771 = vmatprep.mubr.msk.bf16.mxu1 %vm806_vm2, %v21534_v3  ;;  %19211 = vmatprep.mubr.msk.bf16.mxu0 %vm806_vm2, %v21535_v4  ;;  %v21568_v3 = vld [vmem:[%s21834_s29 + $0x178] sm:$0xff]  }
 0x2e6   : > { %18772 = vmatmul.mubr.msk.bf16.gmra.mrb[104].mxu1 %vm806_vm2, %v21536_v7  ;;  %19212 = vmatmul.mubr.msk.bf16.gmra.mrb[24].mxu0 %vm806_vm2, %v21537_v8  ;;  %v21569_v7 = vld [vmem:[%s21834_s29 + $0x108] sm:$0xff]   ;;  %v21570_v8 = vld [vmem:[%s21834_s29 + $0x180] sm:$0xff]  }
 0x2e7   : > { %18775 = vmatprep.mubr.msk.bf16.mxu1 %vm806_vm2, %v21538_v9  ;;  %19215 = vmatprep.mubr.msk.bf16.mxu0 %vm806_vm2, %v21539_v10  ;;  %v21571_v10 = vld [vmem:[%s21834_s29 + $0x110] sm:$0xff]  }
 0x2e9   : > { %v22602_v11 = vpop.f32.mrb[0].mxu1 }
 0x2ea   : > { %v22605_v13 = vpop.f32.mrb[1].mxu1 }
 0x2eb   : > { %v22609_v16 = vpop.f32.mrb[2].mxu1 }
 0x2ec   : > { %v22612_v18 = vpop.f32.mrb[3].mxu1 }
 0x2ee   : > { %18776 = vmatmul.mubr.msk.bf16.gmra.mrb[108].mxu1 %vm806_vm2, %v21540_v12  ;;  %19216 = vmatmul.mubr.msk.bf16.gmra.mrb[28].mxu0 %vm806_vm2, %v21541_v14 }
 0x2ef   : > { %18779 = vmatprep.mubr.msk.bf16.mxu1 %vm806_vm2, %v21542_v15  ;;  %19219 = vmatprep.mubr.msk.bf16.mxu0 %vm806_vm2, %v21543_v17  ;;  %v21572_v15 = vld [vmem:[%s21834_s29 + $0x188] sm:$0xff]  }
 0x2f1   : > { %v22618_v19 = vpop.f32.mrb[4].mxu1 }
 0x2f2   : > { %v22621_v21 = vpop.f32.mrb[5].mxu1 }
 0x2f3   : > { %v22625_v24 = vpop.f32.mrb[6].mxu1 }
 0x2f4   : > { %v22628_v26 = vpop.f32.mrb[7].mxu1 }
 0x2f6   : > { %18780 = vmatmul.mubr.msk.bf16.gmra.mrb[112].mxu1 %vm806_vm2, %v21544_v20  ;;  %19220 = vmatmul.mubr.msk.bf16.gmra.mrb[32].mxu0 %vm806_vm2, %v21545_v22  ;;  %v21573_v20 = vld [vmem:[%s21834_s29 + $0x118] sm:$0xff]   ;;  %v21574_v22 = vld [vmem:[%s21834_s29 + $0x190] sm:$0xff]  }
 0x2f7   : > { %18783 = vmatprep.mubr.msk.bf16.mxu1 %vm806_vm2, %v21546_v23  ;;  %19223 = vmatprep.mubr.msk.bf16.mxu0 %vm806_vm2, %v21547_v25  ;;  %v21575_v25 = vld [vmem:[%s21834_s29 + $0x120] sm:$0xff]  }
 0x2f9   : > { %v22634_v27 = vpop.f32.mrb[8].mxu1 }
 0x2fa   : > { %v22637_v29 = vpop.f32.mrb[9].mxu1 }
 0x2fb   : > { %v22641_v32 = vpop.f32.mrb[10].mxu1 }
 0x2fc   : > { %v22644_v34 = vpop.f32.mrb[11].mxu1 }
 0x2fe   : > { %18784 = vmatmul.mubr.msk.bf16.gmra.mrb[116].mxu1 %vm806_vm2, %v21548_v28  ;;  %19224 = vmatmul.mubr.msk.bf16.gmra.mrb[36].mxu0 %vm806_vm2, %v21549_v30  ;;  %v17364_v30 = vld [vmem:[%s24299_s1 + $0x10] sm:$0x3] }
 0x2ff   : > { %18787 = vmatprep.mubr.msk.bf16.mxu1 %vm806_vm2, %v21550_v31  ;;  %19227 = vmatprep.mubr.msk.bf16.mxu0 %vm806_vm2, %v21551_v33  ;;  %v22752_v33 = vand.u32 %v17364_v30, %v21819_v5 }
 0x301   : > { %v22650_v35 = vpop.f32.mrb[12].mxu1  ;;  %19445 = vmatprep.subr.bf16.mxu0 %v22752_v33 }
 0x302   : > { %v22653_v37 = vpop.f32.mrb[13].mxu1 }
 0x303   : > { %v22657_v40 = vpop.f32.mrb[14].mxu1 }
 0x304   : > { %v22660_v42 = vpop.f32.mrb[15].mxu1 }
 0x306   : > { %18788 = vmatmul.mubr.msk.bf16.gmra.mrb[120].mxu1 %vm806_vm2, %v21552_v36  ;;  %19228 = vmatmul.mubr.msk.bf16.gmra.mrb[40].mxu0 %vm806_vm2, %v21553_v6  ;;  %v21576_v36 = vld [vmem:[%s21834_s29 + $0x198] sm:$0xff]  }
 0x307   : > { %18791 = vmatprep.mubr.msk.bf16.mxu1 %vm806_vm2, %v21554_v38  ;;  %19231 = vmatprep.mubr.msk.bf16.mxu0 %vm806_vm2, %v21555_v41  ;;  %v21577_v38 = vld [vmem:[%s21834_s29 + $0x128] sm:$0xff]   ;;  %v21578_v41 = vld [vmem:[%s21834_s29 + $0x1a0] sm:$0xff]  }
 0x309   : > { %v22666_v43 = vpop.f32.mrb[16].mxu1 }
 0x30a   : > { %v22669_v46 = vpop.f32.mrb[17].mxu1 }
 0x30b   : > { %v22673_v49 = vpop.f32.mrb[18].mxu1 }
 0x30c   : > { %v22676_v39 = vpop.f32.mrb[19].mxu1 }
 0x30e   : > { %18792 = vmatmul.mubr.msk.bf16.gmra.mrb[124].mxu1 %vm806_vm2, %v21556_v45  ;;  %19232 = vmatmul.mubr.msk.bf16.gmra.mrb[44].mxu0 %vm806_vm2, %v21557_v47  ;;  %v21579_v47 = vld [vmem:[%s21834_s29 + $0x130] sm:$0xff]  }
 0x30f   : > { %18877 = vmatprep.mubr.msk.bf16.mxu1 %vm806_vm2, %v21558_v48  ;;  %19235 = vmatprep.mubr.msk.bf16.mxu0 %vm806_vm2, %v21559_v50  ;;  %v21580_v50 = vld [vmem:[%s21834_s29 + $0x1a8] sm:$0xff]  }
 0x311   : > { %v22682_v51 = vpop.f32.mrb[20].mxu1 }
 0x312   : > { %v22685_v53 = vpop.f32.mrb[21].mxu1 }
 0x313   : > { %v22689_v55 = vpop.f32.mrb[22].mxu1 }
 0x314   : > { %v22692_v57 = vpop.f32.mrb[23].mxu1 }
 0x316   : > { %18878 = vmatmul.mubr.msk.bf16.vlgmr.msra.gmra.mrb[80].mxu1 %vm806_vm2, %v21560_v52  ;;  %19236 = vmatmul.mubr.msk.bf16.gmra.mrb[48].mxu0 %vm806_vm2, %v21561_v54  ;;  %v21581_v54 = vld [vmem:[%s21834_s29 + $0x138] sm:$0xff]  }
 0x317   : > { %18881 = vmatprep.mubr.msk.bf16.mxu1 %vm806_vm2, %v21562_v44  ;;  %19239 = vmatprep.mubr.msk.bf16.mxu0 %vm806_vm2, %v21563_v56  ;;  %v21582_v44 = vld [vmem:[%s21834_s29 + $0x1b0] sm:$0xff]  }
 0x319   : > { %v22698_v58 = vpop.f32.mrb[24].mxu1 }
 0x31a   : > { %v22701_v60 = vpop.f32.mrb[25].mxu1 }
 0x31b   : > { %v22705_v63 = vpop.f32.mrb[26].mxu1 }
 0x31c   : > { %v22708_v1 = vpop.f32.mrb[27].mxu1 }
 0x31e   : > { %18882 = vmatmul.mubr.msk.bf16.gmra.mrb[84].mxu1 %vm806_vm2, %v21564_v59  ;;  %19240 = vmatmul.mubr.msk.bf16.gmra.mrb[52].mxu0 %vm806_vm2, %v21565_v61  ;;  %v21583_v59 = vld [vmem:[%s21834_s29 + $0x140] sm:$0xff]  }
 0x31f   : > { %18885 = vmatprep.mubr.msk.bf16.mxu1 %vm806_vm2, %v21566_v62  ;;  %19243 = vmatprep.mubr.msk.bf16.mxu0 %vm806_vm2, %v21567_v0  ;;  %v21584_v0 = vld [vmem:[%s21834_s29 + $0x1b8] sm:$0xff]  }
 0x321   : > { %v22714_v2 = vpop.f32.mrb[28].mxu1 }
 0x322   : > { %v22717_v4 = vpop.f32.mrb[29].mxu1 }
 0x323   : > { %v22721_v9 = vpop.f32.mrb[30].mxu1 }
 0x324   : > { %v22724_v12 = vpop.f32.mrb[31].mxu1 }
 0x326   : > { %18886 = vmatmul.mubr.msk.bf16.gmra.mrb[88].mxu1 %vm806_vm2, %v21568_v3  ;;  %19244 = vmatmul.mubr.msk.bf16.gmra.mrb[56].mxu0 %vm806_vm2, %v21569_v7  ;;  %v21585_v7 = vld [vmem:[%s21834_s29 + $0x148] sm:$0xff]  }
 0x327   : > { %18889 = vmatprep.mubr.msk.bf16.mxu1 %vm806_vm2, %v21570_v8  ;;  %19247 = vmatprep.mubr.msk.bf16.mxu0 %vm806_vm2, %v21571_v10  ;;  %v21586_v8 = vld [vmem:[%s21834_s29 + $0x1c0] sm:$0xff]  }
 0x329   : > { %v22730_v14 = vpop.f32.mrb[32].mxu1 }
 0x32a   : > { %v22733_v17 = vpop.f32.mrb[33].mxu1 }
 0x32b   : > { %v22737_v23 = vpop.f32.mrb[34].mxu1 }
 0x32c   : > { %v22740_v28 = vpop.f32.mrb[35].mxu1 }
 0x32e   : > { %18890 = vmatmul.mubr.msk.bf16.gmra.mrb[92].mxu1 %vm806_vm2, %v21572_v15  ;;  %19248 = vmatmul.mubr.msk.bf16.gmra.mrb[60].mxu0 %vm806_vm2, %v21573_v20  ;;  %v21587_v15 = vld [vmem:[%s21834_s29 + $0x150] sm:$0xff]  }
 0x32f   : > { %18893 = vmatprep.mubr.msk.bf16.mxu1 %vm806_vm2, %v21574_v22  ;;  %19251 = vmatprep.mubr.msk.bf16.mxu0 %vm806_vm2, %v21575_v25  ;;  %v21588_v25 = vld [vmem:[%s21834_s29 + $0x1c8] sm:$0xff]  }
 0x331   : > { %v22749_v31 = vpop.f32.mrb[36].mxu1 }
 0x332   : > { %v22755_v6 = vpop.f32.mrb[37].mxu1 }
 0x333   : > { %v22759_v45 = vpop.f32.mrb[38].mxu1 }
 0x334   : > { %v22763_v48 = vpop.f32.mrb[39].mxu1 }
 0x336   : > { %18894 = vmatmul.mubr.msk.bf16.gmra.mrb[96].mxu1 %vm806_vm2, %v21576_v36  ;;  %19252 = vmatmul.mubr.msk.bf16.gmra.mrb[64].mxu0 %vm806_vm2, %v21577_v38  ;;  %v21589_v36 = vld [vmem:[%s21834_s29 + $0x158] sm:$0xff]   ;;  %v21590_v38 = vld [vmem:[%s21834_s29 + $0x1d0] sm:$0xff]  }
 0x337   : > { %18897 = vmatprep.mubr.msk.bf16.mxu1 %vm806_vm2, %v21578_v41  ;;  %19255 = vmatprep.mubr.msk.bf16.mxu0 %vm806_vm2, %v21579_v47  ;;  %v21591_v47 = vld [vmem:[%s21834_s29 + $0x160] sm:$0xff]  }
 0x339   : > { %v22769_v5 = vpop.f32.mrb[40].mxu1 }
 0x33a   : > { %v22772_v52 = vpop.f32.mrb[41].mxu1 }
 0x33b   : > { %v22776_v56 = vpop.f32.mrb[42].mxu1 }
 0x33c   : > { %v22779_v61 = vpop.f32.mrb[43].mxu1 }
 0x33e   : > { %18898 = vmatmul.mubr.msk.bf16.gmra.mrb[100].mxu1 %vm806_vm2, %v21580_v50  ;;  %19256 = vmatmul.mubr.msk.bf16.gmra.mrb[68].mxu0 %vm806_vm2, %v21581_v54 }
 0x33f   : > { %18901 = vmatprep.mubr.msk.bf16.mxu1 %vm806_vm2, %v21582_v44  ;;  %19259 = vmatprep.mubr.msk.bf16.mxu0 %vm806_vm2, %v21583_v59  ;;  %v21592_v44 = vld [vmem:[%s21834_s29 + $0x1d8] sm:$0xff]  }
 0x341   : > { %v22785_v62 = vpop.f32.mrb[44].mxu1 }
 0x342   : > { %v22788_v3 = vpop.f32.mrb[45].mxu1 }
 0x343   : > { %v22792_v10 = vpop.f32.mrb[46].mxu1 }
 0x344   : > { %v22795_v20 = vpop.f32.mrb[47].mxu1 }
 0x346   : > { %18902 = vmatmul.mubr.msk.bf16.gmra.mrb[104].mxu1 %vm806_vm2, %v21584_v0  ;;  %19260 = vmatmul.mubr.msk.bf16.gmra.mrb[72].mxu0 %vm806_vm2, %v21585_v7  ;;  %v21593_v0 = vld [vmem:[%s21834_s29 + $0x168] sm:$0xff]   ;;  %v21594_v7 = vld [vmem:[%s21834_s29 + $0x1e0] sm:$0xff]  }
 0x347   : > { %18905 = vmatprep.mubr.msk.bf16.mxu1 %vm806_vm2, %v21586_v8  ;;  %19263 = vmatprep.mubr.msk.bf16.mxu0 %vm806_vm2, %v21587_v15  ;;  %v21595_v15 = vld [vmem:[%s21834_s29 + $0x170] sm:$0xff]  }
 0x349   : > { %v22801_v22 = vpop.f32.mrb[48].mxu1 }
 0x34a   : > { %v22804_v30 = vpop.f32.mrb[49].mxu1 }
 0x34b   : > { %24304 = vst [vmem:[#allocation6_spill] sm:$0xff] %v22804_v30  ;;  %v22808_v41 = vpop.f32.mrb[50].mxu1 }
 0x34c   : > { %24305 = vst [vmem:[#allocation7_spill] sm:$0xff] %v22808_v41  ;;  %v22811_v50 = vpop.f32.mrb[51].mxu1 }
 0x34d   : > { %24306 = vst [vmem:[#allocation8_spill] sm:$0xff] %v22811_v50 }
 0x34e   : > { %18906 = vmatmul.mubr.msk.bf16.gmra.mrb[108].mxu1 %vm806_vm2, %v21588_v25  ;;  %19264 = vmatmul.mubr.msk.bf16.gmra.mrb[76].mxu0 %vm806_vm2, %v21589_v36 }
 0x34f   : > { %18909 = vmatprep.mubr.msk.bf16.mxu1 %vm806_vm2, %v21590_v38  ;;  %19267 = vmatprep.mubr.msk.bf16.mxu0 %vm806_vm2, %v21591_v47  ;;  %v21596_v38 = vld [vmem:[%s21834_s29 + $0x1e8] sm:$0xff]  }
 0x351   : > { %v22817_v54 = vpop.f32.mrb[52].mxu1 }
 0x352   : > { %24307 = vst [vmem:[#allocation9_spill] sm:$0xff] %v22817_v54  ;;  %v22820_v59 = vpop.f32.mrb[53].mxu1 }
 0x353   : > { %24308 = vst [vmem:[#allocation10_spill] sm:$0xff] %v22820_v59  ;;  %v22824_v8 = vpop.f32.mrb[54].mxu1  ;;  %v21598_v59 = vld [vmem:[%s21834_s29 + $0x1f0] sm:$0xff]  }
 0x354   : > { %24309 = vst [vmem:[#allocation11_spill] sm:$0xff] %v22824_v8  ;;  %v22827_v25 = vpop.f32.mrb[55].mxu1  ;;  %v21597_v8 = vld [vmem:[%s21834_s29 + $0x178] sm:$0xff]  }
 0x355   : > { %24310 = vst [vmem:[#allocation12_spill] sm:$0xff] %v22827_v25 }
 0x356   : > { %18910 = vmatmul.mubr.msk.bf16.gmra.mrb[112].mxu1 %vm806_vm2, %v21592_v44  ;;  %19268 = vmatmul.mubr.msk.bf16.gmra.mrb[80].mxu0 %vm806_vm2, %v21593_v0  ;;  %v21599_v44 = vld [vmem:[%s21834_s29 + $0x180] sm:$0xff]  }
 0x357   : > { %18913 = vmatprep.mubr.msk.bf16.mxu1 %vm806_vm2, %v21594_v7  ;;  %19271 = vmatprep.mubr.msk.bf16.mxu0 %vm806_vm2, %v21595_v15  ;;  %v21600_v7 = vld [vmem:[%s21834_s29 + $0x1f8] sm:$0xff]  }
 0x359   : > { %v22833_v36 = vpop.f32.mrb[56].mxu1 }
 0x35a   : > { %24311 = vst [vmem:[#allocation13_spill] sm:$0xff] %v22833_v36  ;;  %v22836_v47 = vpop.f32.mrb[57].mxu1 }
 0x35b   : > { %24312 = vst [vmem:[#allocation14_spill] sm:$0xff] %v22836_v47  ;;  %v22840_v25 = vpop.f32.mrb[58].mxu1  ;;  %v21602_v47 = vld [vmem:[%s21834_s29 + $0x200] sm:$0xff]  }
 0x35c   : > { %24313 = vst [vmem:[#allocation15_spill] sm:$0xff] %v22840_v25  ;;  %v22843_v54 = vpop.f32.mrb[59].mxu1  ;;  %v21601_v25 = vld [vmem:[%s21834_s29 + $0x188] sm:$0xff]  }
 0x35d   : > { %24314 = vst [vmem:[#allocation16_spill] sm:$0xff] %v22843_v54  ;;  %v21603_v54 = vld [vmem:[%s21834_s29 + $0x190] sm:$0xff]  }
 0x35e   : > { %18914 = vmatmul.mubr.msk.bf16.gmra.mrb[116].mxu1 %vm806_vm2, %v21596_v38  ;;  %19272 = vmatmul.mubr.msk.bf16.gmra.mrb[84].mxu0 %vm806_vm2, %v21597_v8  ;;  %v21604_v8 = vld [vmem:[%s21834_s29 + $0x208] sm:$0xff]  }
 0x35f   : > { %18917 = vmatprep.mubr.msk.bf16.mxu1 %vm806_vm2, %v21598_v59  ;;  %19275 = vmatprep.mubr.msk.bf16.mxu0 %vm806_vm2, %v21599_v44 }
 0x361   : > { %v22849_v0 = vpop.f32.mrb[60].mxu1 }
 0x362   : > { %24315 = vst [vmem:[#allocation17_spill] sm:$0xff] %v22849_v0  ;;  %v22852_v15 = vpop.f32.mrb[61].mxu1 }
 0x363   : > { %24316 = vst [vmem:[#allocation18_spill] sm:$0xff] %v22852_v15  ;;  %v22856_v36 = vpop.f32.mrb[62].mxu1  ;;  %v21605_v15 = vld [vmem:[%s21834_s29 + $0x198] sm:$0xff]  }
 0x364   : > { %24317 = vst [vmem:[#allocation19_spill] sm:$0xff] %v22856_v36  ;;  %v22859_v38 = vpop.f32.mrb[63].mxu1 }
 0x365   : > { %24318 = vst [vmem:[#allocation20_spill] sm:$0xff] %v22859_v38  ;;  %v21606_v38 = vld [vmem:[%s21834_s29 + $0x1a0] sm:$0xff]  }
 0x366   : > { %18918 = vmatmul.mubr.msk.bf16.gmra.mrb[120].mxu1 %vm806_vm2, %v21600_v7  ;;  %19276 = vmatmul.mubr.msk.bf16.gmra.mrb[88].mxu0 %vm806_vm2, %v21601_v25 }
 0x367   : > { %18921 = vmatprep.mubr.msk.bf16.mxu1 %vm806_vm2, %v21602_v47  ;;  %19279 = vmatprep.mubr.msk.bf16.mxu0 %vm806_vm2, %v21603_v54  ;;  %v21607_v47 = vld [vmem:[%s21834_s29 + $0x1a8] sm:$0xff]  }
 0x369   : > { %v22865_v59 = vpop.f32.mrb[64].mxu1 }
 0x36a   : > { %24319 = vst [vmem:[#allocation21_spill] sm:$0xff] %v22865_v59  ;;  %v22868_v44 = vpop.f32.mrb[65].mxu1 }
 0x36b   : > { %24320 = vst [vmem:[#allocation22_spill] sm:$0xff] %v22868_v44  ;;  %v22871_v36 = vpop.f32.mrb[66].mxu1 }
 0x36c   : > { %24321 = vst [vmem:[#allocation23_spill] sm:$0xff] %v22871_v36  ;;  %v22874_v0 = vpop.f32.mrb[67].mxu1  ;;  %v21608_v36 = vld [vmem:[%s21834_s29 + $0x1b0] sm:$0xff]  }
 0x36d   : > { %24322 = vst [vmem:[#allocation24_spill] sm:$0xff] %v22874_v0 }
 0x36e   : > { %18922 = vmatmul.mubr.msk.bf16.gmra.mrb[124].mxu1 %vm806_vm2, %v21604_v8  ;;  %19280 = vmatmul.mubr.msk.bf16.gmra.mrb[92].mxu0 %vm806_vm2, %v21605_v15 }
 0x36f   : > { %19283 = vmatprep.mubr.msk.bf16.mxu0 %vm806_vm2, %v21606_v38  ;;  %v21609_v38 = vld [vmem:[%s21834_s29 + $0x1b8] sm:$0xff]  }
 0x371   : > { %v22879_v54 = vpop.f32.mrb[68].mxu1 }
 0x372   : > { %24323 = vst [vmem:[#allocation25_spill] sm:$0xff] %v22879_v54  ;;  %v22881_v25 = vpop.f32.mrb[69].mxu1  ;;  %v21610_v54 = vld [vmem:[%s21834_s29 + $0x1c0] sm:$0xff]  }
 0x373   : > { %24324 = vst [vmem:[#allocation26_spill] sm:$0xff] %v22881_v25  ;;  %v22884_v7 = vpop.f32.mrb[70].mxu1 }
 0x374   : > { %24325 = vst [vmem:[#allocation27_spill] sm:$0xff] %v22884_v7  ;;  %v22887_v44 = vpop.f32.mrb[71].mxu1 }
 0x375   : > { %24326 = vst [vmem:[#allocation28_spill] sm:$0xff] %v22887_v44  ;;  %v21612_v44 = vld [vmem:[%s21834_s29 + $0x1d0] sm:$0xff]  }
 0x376   : > { %19284 = vmatmul.mubr.msk.bf16.gmra.mrb[96].mxu0 %vm806_vm2, %v21607_v47 }
 0x377   : > { %19287 = vmatprep.mubr.msk.bf16.mxu0 %vm806_vm2, %v21608_v36 }
 0x379   : > { %v22891_v8 = vpop.f32.mrb[72].mxu1 }
 0x37a   : > { %24327 = vst [vmem:[#allocation29_spill] sm:$0xff] %v22891_v8  ;;  %v22893_v15 = vpop.f32.mrb[73].mxu1 }
 0x37b   : > { %24328 = vst [vmem:[#allocation30_spill] sm:$0xff] %v22893_v15  ;;  %v22896_v25 = vpop.f32.mrb[74].mxu1  ;;  %v21611_v15 = vld [vmem:[%s21834_s29 + $0x1c8] sm:$0xff]  }
 0x37c   : > { %24329 = vst [vmem:[#allocation31_spill] sm:$0xff] %v22896_v25  ;;  %v22899_v7 = vpop.f32.mrb[75].mxu1 }
 0x37d   : > { %24330 = vst [vmem:[#allocation32_spill] sm:$0xff] %v22899_v7 }
 0x37e   : > { %19288 = vmatmul.mubr.msk.bf16.gmra.mrb[100].mxu0 %vm806_vm2, %v21609_v38  ;;  %v21613_v38 = vld [vmem:[%s21834_s29 + $0x1d8] sm:$0xff]  }
 0x37f   : > { %19291 = vmatprep.mubr.msk.bf16.mxu0 %vm806_vm2, %v21610_v54  ;;  %v21614_v54 = vld [vmem:[%s21834_s29 + $0x1e0] sm:$0xff]  }
 0x381   : > { %v22903_v47 = vpop.f32.mrb[76].mxu1 }
 0x382   : > { %24331 = vst [vmem:[#allocation33_spill] sm:$0xff] %v22903_v47  ;;  %v22905_v36 = vpop.f32.mrb[77].mxu1 }
 0x383   : > { %24332 = vst [vmem:[#allocation34_spill] sm:$0xff] %v22905_v36  ;;  %v22908_v8 = vpop.f32.mrb[78].mxu1  ;;  %v21615_v36 = vld [vmem:[%s21834_s29 + $0x1e8] sm:$0xff]  }
 0x384   : > { %24333 = vst [vmem:[#allocation35_spill] sm:$0xff] %v22908_v8  ;;  %v22911_v25 = vpop.f32.mrb[79].mxu1  ;;  %v21616_v8 = vld [vmem:[%s21834_s29 + $0x1f0] sm:$0xff]  }
 0x385   : > { %24334 = vst [vmem:[#allocation36_spill] sm:$0xff] %v22911_v25  ;;  %v21617_v25 = vld [vmem:[%s21834_s29 + $0x1f8] sm:$0xff]  }
 0x386   : > { %19292 = vmatmul.mubr.msk.bf16.gmra.mrb[104].mxu0 %vm806_vm2, %v21611_v15  ;;  %v21618_v15 = vld [vmem:[%s21834_s29 + $0x200] sm:$0xff]  }
 0x387   : > { %19295 = vmatprep.mubr.msk.bf16.mxu0 %vm806_vm2, %v21612_v44  ;;  %v21619_v44 = vld [vmem:[%s21834_s29 + $0x208] sm:$0xff]  }
 0x38e   : > { %19296 = vmatmul.mubr.msk.bf16.gmra.mrb[108].mxu0 %vm806_vm2, %v21613_v38  ;;  %v21620_v38 = vld [vmem:[%s21834_s29 + $0x210] sm:$0xff]  }
 0x38f   : > { %19299 = vmatprep.mubr.msk.bf16.mxu0 %vm806_vm2, %v21614_v54  ;;  %v21621_v54 = vld [vmem:[%s21834_s29 + $0x218] sm:$0xff]  }
 0x396   : > { %19300 = vmatmul.mubr.msk.bf16.gmra.mrb[112].mxu0 %vm806_vm2, %v21615_v36  ;;  %v21622_v36 = vld [vmem:[%s21834_s29 + $0x240] sm:$0xff]  }
 0x397   : > { %19303 = vmatprep.mubr.msk.bf16.mxu0 %vm806_vm2, %v21616_v8  ;;  %v21624_v8 = vld [vmem:[%s21834_s29 + $0x250] sm:$0xff]  }
 0x39e   : > { %19304 = vmatmul.mubr.msk.bf16.gmra.mrb[116].mxu0 %vm806_vm2, %v21617_v25  ;;  %v21623_v25 = vld [vmem:[%s21834_s29 + $0x248] sm:$0xff]  }
 0x39f   : > { %19307 = vmatprep.mubr.msk.bf16.mxu0 %vm806_vm2, %v21618_v15  ;;  %v21625_v15 = vld [vmem:[%s21834_s29 + $0x258] sm:$0xff]  }
 0x3a6   : > { %19308 = vmatmul.mubr.msk.bf16.gmra.mrb[120].mxu0 %vm806_vm2, %v21619_v44  ;;  %v21626_v44 = vld [vmem:[%s21834_s29 + $0x260] sm:$0xff]  }
 0x3a7   : > { %19311 = vmatprep.mubr.msk.bf16.mxu0 %vm806_vm2, %v21620_v38  ;;  %v21627_v38 = vld [vmem:[%s21834_s29 + $0x268] sm:$0xff]  }
 0x3ae   : > { %19312 = vmatmul.mubr.msk.bf16.gmra.mrb[124].mxu0 %vm806_vm2, %v21621_v54  ;;  %v21628_v54 = vld [vmem:[%s21834_s29 + $0x270] sm:$0xff]  }
 0x3af   : > { %19317 = vmatprep.mubr.msk.bf16.mxu0 %vm806_vm2, %v21622_v36  ;;  %v21629_v36 = vld [vmem:[%s21834_s29 + $0x278] sm:$0xff]  }
 0x3b6   : > { %19318 = vmatmul.mubr.msk.bf16.vlgmr.msra.gmra.mrb[0].mxu0 %vm806_vm2, %v21623_v25  ;;  %v21631_v25 = vld [vmem:[%s21834_s29 + $0x288] sm:$0xff]  }
 0x3b7   : > { %19446 = vmatpush3.bf16.msra.mxu0 %v22752_v33  ;;  %19321 = vmatprep.mubr.msk.bf16.mxu0 %vm806_vm2, %v21624_v8  ;;  %v21630_v33 = vld [vmem:[%s21834_s29 + $0x280] sm:$0xff]   ;;  %v21632_v8 = vld [vmem:[%s21834_s29 + $0x290] sm:$0xff]  }
 0x3be   : > { %19322 = vmatmul.mubr.msk.bf16.gmra.mrb[4].mxu0 %vm806_vm2, %v21625_v15  ;;  %v21633_v15 = vld [vmem:[%s21834_s29 + $0x298] sm:$0xff]  }
 0x3bf   : > { %19325 = vmatprep.mubr.msk.bf16.mxu0 %vm806_vm2, %v21626_v44  ;;  %v21634_v44 = vld [vmem:[%s21834_s29 + $0x2a0] sm:$0xff]  }
 0x3c6   : > { %19326 = vmatmul.mubr.msk.bf16.gmra.mrb[8].mxu0 %vm806_vm2, %v21627_v38  ;;  %v21635_v38 = vld [vmem:[%s21834_s29 + $0x2a8] sm:$0xff]  }
 0x3c7   : > { %19329 = vmatprep.mubr.msk.bf16.mxu0 %vm806_vm2, %v21628_v54  ;;  %v21636_v54 = vld [vmem:[%s21834_s29 + $0x2b0] sm:$0xff]  }
 0x3ce   : > { %19330 = vmatmul.mubr.msk.bf16.gmra.mrb[12].mxu0 %vm806_vm2, %v21629_v36 }
 0x3cf   : > { %19333 = vmatprep.mubr.msk.bf16.mxu0 %vm806_vm2, %v21630_v33 }
 0x3d6   : > { %19334 = vmatmul.mubr.msk.bf16.gmra.mrb[16].mxu0 %vm806_vm2, %v21631_v25 }
 0x3d7   : > { %19337 = vmatprep.mubr.msk.bf16.mxu0 %vm806_vm2, %v21632_v8  ;;  %v21637_v8 = vld [vmem:[%s21834_s29 + $0x2b8] sm:$0xff]  }
 0x3de   : > { %19338 = vmatmul.mubr.msk.bf16.gmra.mrb[20].mxu0 %vm806_vm2, %v21633_v15  ;;  %v21638_v15 = vld [vmem:[%s21834_s29 + $0x2c0] sm:$0xff]  }
 0x3df   : > { %19341 = vmatprep.mubr.msk.bf16.mxu0 %vm806_vm2, %v21634_v44 }
 0x3e6   : > { %19342 = vmatmul.mubr.msk.bf16.gmra.mrb[24].mxu0 %vm806_vm2, %v21635_v38 }
 0x3e7   : > { %19345 = vmatprep.mubr.msk.bf16.mxu0 %vm806_vm2, %v21636_v54 }
 0x3e9   : > { %v22964_v36 = vpop.f32.mrb[80].mxu1 }
 0x3ea   : > { %24335 = vst [vmem:[#allocation37_spill] sm:$0xff] %v22964_v36  ;;  %v22966_v33 = vpop.f32.mrb[81].mxu1  ;;  %v21639_v36 = vld [vmem:[%s21834_s29 + $0x2c8] sm:$0xff]  }
 0x3eb   : > { %24336 = vst [vmem:[#allocation38_spill] sm:$0xff] %v22966_v33  ;;  %v22968_v25 = vpop.f32.mrb[82].mxu1 }
 0x3ec   : > { %24337 = vst [vmem:[#allocation39_spill] sm:$0xff] %v22968_v25  ;;  %v22971_v47 = vpop.f32.mrb[83].mxu1  ;;  %v21640_v25 = vld [vmem:[%s21834_s29 + $0x2d0] sm:$0xff]  }
 0x3ed   : > { %24338 = vst [vmem:[#allocation40_spill] sm:$0xff] %v22971_v47 }
 0x3ee   : > { %19346 = vmatmul.mubr.msk.bf16.gmra.mrb[28].mxu0 %vm806_vm2, %v21637_v8 }
 0x3ef   : > { %19349 = vmatprep.mubr.msk.bf16.mxu0 %vm806_vm2, %v21638_v15 }
 0x3f1   : > { %v22976_v44 = vpop.f32.mrb[84].mxu1 }
 0x3f2   : > { %24339 = vst [vmem:[#allocation41_spill] sm:$0xff] %v22976_v44  ;;  %v22978_v38 = vpop.f32.mrb[85].mxu1  ;;  %v21641_v44 = vld [vmem:[%s21834_s29 + $0x2d8] sm:$0xff]  }
 0x3f3   : > { %24340 = vst [vmem:[#allocation42_spill] sm:$0xff] %v22978_v38  ;;  %v22980_v54 = vpop.f32.mrb[86].mxu1 }
 0x3f4   : > { %24341 = vst [vmem:[#allocation43_spill] sm:$0xff] %v22980_v54  ;;  %v22983_v33 = vpop.f32.mrb[87].mxu1  ;;  %v21642_v54 = vld [vmem:[%s21834_s29 + $0x2e0] sm:$0xff]  }
 0x3f5   : > { %24342 = vst [vmem:[#allocation44_spill] sm:$0xff] %v22983_v33 }
 0x3f6   : > { %19350 = vmatmul.mubr.msk.bf16.gmra.mrb[32].mxu0 %vm806_vm2, %v21639_v36 }
 0x3f7   : > { %19353 = vmatprep.mubr.msk.bf16.mxu0 %vm806_vm2, %v21640_v25 }
 0x3f9   : > { %v22988_v47 = vpop.f32.mrb[88].mxu1 }
 0x3fa   : > { %24343 = vst [vmem:[#allocation45_spill] sm:$0xff] %v22988_v47  ;;  %v22990_v8 = vpop.f32.mrb[89].mxu1  ;;  %v21643_v47 = vld [vmem:[%s21834_s29 + $0x2e8] sm:$0xff]  }
 0x3fb   : > { %24344 = vst [vmem:[#allocation46_spill] sm:$0xff] %v22990_v8  ;;  %v22992_v15 = vpop.f32.mrb[90].mxu1 }
 0x3fc   : > { %24345 = vst [vmem:[#allocation47_spill] sm:$0xff] %v22992_v15  ;;  %v22995_v38 = vpop.f32.mrb[91].mxu1  ;;  %v21644_v15 = vld [vmem:[%s21834_s29 + $0x2f0] sm:$0xff]  }
 0x3fd   : > { %24346 = vst [vmem:[#allocation48_spill] sm:$0xff] %v22995_v38 }
 0x3fe   : > { %19354 = vmatmul.mubr.msk.bf16.gmra.mrb[36].mxu0 %vm806_vm2, %v21641_v44 }
 0x3ff   : > { %19357 = vmatprep.mubr.msk.bf16.mxu0 %vm806_vm2, %v21642_v54 }
 0x401   : > { %v23000_v33 = vpop.f32.mrb[92].mxu1 }
 0x402   : > { %24347 = vst [vmem:[#allocation49_spill] sm:$0xff] %v23000_v33  ;;  %v23002_v36 = vpop.f32.mrb[93].mxu1  ;;  %v21645_v33 = vld [vmem:[%s21834_s29 + $0x2f8] sm:$0xff]  }
 0x403   : > { %24348 = vst [vmem:[#allocation50_spill] sm:$0xff] %v23002_v36  ;;  %v23004_v25 = vpop.f32.mrb[94].mxu1 }
 0x404   : > { %24349 = vst [vmem:[#allocation51_spill] sm:$0xff] %v23004_v25  ;;  %v23007_v8 = vpop.f32.mrb[95].mxu1  ;;  %v21646_v25 = vld [vmem:[%s21834_s29 + $0x300] sm:$0xff]  }
 0x405   : > { %24350 = vst [vmem:[#allocation52_spill] sm:$0xff] %v23007_v8 }
 0x406   : > { %19358 = vmatmul.mubr.msk.bf16.gmra.mrb[40].mxu0 %vm806_vm2, %v21643_v47 }
 0x407   : > { %19361 = vmatprep.mubr.msk.bf16.mxu0 %vm806_vm2, %v21644_v15 }
 0x409   : > { %v23012_v38 = vpop.f32.mrb[96].mxu1 }
 0x40a   : > { %24351 = vst [vmem:[#allocation53_spill] sm:$0xff] %v23012_v38  ;;  %v23014_v44 = vpop.f32.mrb[97].mxu1  ;;  %v21647_v38 = vld [vmem:[%s21834_s29 + $0x308] sm:$0xff]  }
 0x40b   : > { %24352 = vst [vmem:[#allocation54_spill] sm:$0xff] %v23014_v44  ;;  %v23016_v54 = vpop.f32.mrb[98].mxu1 }
 0x40c   : > { %24353 = vst [vmem:[#allocation55_spill] sm:$0xff] %v23016_v54  ;;  %v23019_v36 = vpop.f32.mrb[99].mxu1  ;;  %v21648_v54 = vld [vmem:[%s21834_s29 + $0x310] sm:$0xff]  }
 0x40d   : > { %24354 = vst [vmem:[#allocation56_spill] sm:$0xff] %v23019_v36 }
 0x40e   : > { %19362 = vmatmul.mubr.msk.bf16.gmra.mrb[44].mxu0 %vm806_vm2, %v21645_v33 }
 0x40f   : > { %19365 = vmatprep.mubr.msk.bf16.mxu0 %vm806_vm2, %v21646_v25 }
 0x411   : > { %v23024_v8 = vpop.f32.mrb[100].mxu1 }
 0x412   : > { %24355 = vst [vmem:[#allocation57_spill] sm:$0xff] %v23024_v8  ;;  %v23026_v47 = vpop.f32.mrb[101].mxu1  ;;  %v21649_v8 = vld [vmem:[%s21834_s29 + $0x318] sm:$0xff]  }
 0x413   : > { %24356 = vst [vmem:[#allocation58_spill] sm:$0xff] %v23026_v47  ;;  %v23028_v15 = vpop.f32.mrb[102].mxu1 }
 0x414   : > { %24357 = vst [vmem:[#allocation59_spill] sm:$0xff] %v23028_v15  ;;  %v23031_v44 = vpop.f32.mrb[103].mxu1  ;;  %v21650_v15 = vld [vmem:[%s21834_s29 + $0x320] sm:$0xff]  }
 0x415   : > { %24358 = vst [vmem:[#allocation60_spill] sm:$0xff] %v23031_v44 }
 0x416   : > { %19366 = vmatmul.mubr.msk.bf16.gmra.mrb[48].mxu0 %vm806_vm2, %v21647_v38 }
 0x417   : > { %19369 = vmatprep.mubr.msk.bf16.mxu0 %vm806_vm2, %v21648_v54 }
 0x419   : > { %v23036_v36 = vpop.f32.mrb[104].mxu1 }
 0x41a   : > { %24359 = vst [vmem:[#allocation61_spill] sm:$0xff] %v23036_v36  ;;  %v23038_v33 = vpop.f32.mrb[105].mxu1  ;;  %v21651_v36 = vld [vmem:[%s21834_s29 + $0x328] sm:$0xff]  }
 0x41b   : > { %24360 = vst [vmem:[#allocation62_spill] sm:$0xff] %v23038_v33  ;;  %v23040_v25 = vpop.f32.mrb[106].mxu1 }
 0x41c   : > { %24361 = vst [vmem:[#allocation63_spill] sm:$0xff] %v23040_v25  ;;  %v23043_v47 = vpop.f32.mrb[107].mxu1  ;;  %v21652_v25 = vld [vmem:[%s21834_s29 + $0x330] sm:$0xff]  }
 0x41d   : > { %24362 = vst [vmem:[#allocation64_spill] sm:$0xff] %v23043_v47 }
 0x41e   : > { %19370 = vmatmul.mubr.msk.bf16.gmra.mrb[52].mxu0 %vm806_vm2, %v21649_v8 }
 0x41f   : > { %19373 = vmatprep.mubr.msk.bf16.mxu0 %vm806_vm2, %v21650_v15 }
 0x421   : > { %v23048_v44 = vpop.f32.mrb[108].mxu1 }
 0x422   : > { %24363 = vst [vmem:[#allocation65_spill] sm:$0xff] %v23048_v44  ;;  %v23050_v38 = vpop.f32.mrb[109].mxu1  ;;  %v21653_v44 = vld [vmem:[%s21834_s29 + $0x338] sm:$0xff]  }
 0x423   : > { %24364 = vst [vmem:[#allocation66_spill] sm:$0xff] %v23050_v38  ;;  %v23052_v54 = vpop.f32.mrb[110].mxu1 }
 0x424   : > { %24365 = vst [vmem:[#allocation67_spill] sm:$0xff] %v23052_v54  ;;  %v23055_v33 = vpop.f32.mrb[111].mxu1  ;;  %v21654_v54 = vld [vmem:[%s21834_s29 + $0x340] sm:$0xff]  }
 0x425   : > { %24366 = vst [vmem:[#allocation68_spill] sm:$0xff] %v23055_v33 }
 0x426   : > { %19374 = vmatmul.mubr.msk.bf16.gmra.mrb[56].mxu0 %vm806_vm2, %v21651_v36 }
 0x427   : > { %19377 = vmatprep.mubr.msk.bf16.mxu0 %vm806_vm2, %v21652_v25 }
 0x429   : > { %v23060_v47 = vpop.f32.mrb[112].mxu1 }
 0x42a   : > { %24367 = vst [vmem:[#allocation69_spill] sm:$0xff] %v23060_v47  ;;  %v23062_v8 = vpop.f32.mrb[113].mxu1  ;;  %v21655_v47 = vld [vmem:[%s21834_s29 + $0x348] sm:$0xff]  }
 0x42b   : > { %24368 = vst [vmem:[#allocation70_spill] sm:$0xff] %v23062_v8  ;;  %v23064_v15 = vpop.f32.mrb[114].mxu1 }
 0x42c   : > { %24369 = vst [vmem:[#allocation71_spill] sm:$0xff] %v23064_v15  ;;  %v23067_v38 = vpop.f32.mrb[115].mxu1  ;;  %v21656_v15 = vld [vmem:[%s21834_s29 + $0x350] sm:$0xff]  }
 0x42d   : > { %24370 = vst [vmem:[#allocation72_spill] sm:$0xff] %v23067_v38 }
 0x42e   : > { %19378 = vmatmul.mubr.msk.bf16.gmra.mrb[60].mxu0 %vm806_vm2, %v21653_v44 }
 0x42f   : > { %19381 = vmatprep.mubr.msk.bf16.mxu0 %vm806_vm2, %v21654_v54 }
 0x431   : > { %v23072_v33 = vpop.f32.mrb[116].mxu1 }
 0x432   : > { %24371 = vst [vmem:[#allocation73_spill] sm:$0xff] %v23072_v33  ;;  %v23074_v36 = vpop.f32.mrb[117].mxu1  ;;  %v21658_v33 = vld [vmem:[%s21834_s29 + $0x360] sm:$0xff]  }
 0x433   : > { %24372 = vst [vmem:[#allocation74_spill] sm:$0xff] %v23074_v36  ;;  %v23076_v25 = vpop.f32.mrb[118].mxu1  ;;  %v21657_v36 = vld [vmem:[%s21834_s29 + $0x358] sm:$0xff]  }
 0x434   : > { %24373 = vst [vmem:[#allocation75_spill] sm:$0xff] %v23076_v25  ;;  %v23079_v8 = vpop.f32.mrb[119].mxu1 }
 0x435   : > { %24374 = vst [vmem:[#allocation76_spill] sm:$0xff] %v23079_v8  ;;  %v21771_v8 = vmov 0.0  }
 0x436   : > { %19382 = vmatmul.mubr.msk.bf16.gmra.mrb[64].mxu0 %vm806_vm2, %v21655_v47  ;;  %12235 = vst.msk [vmem:[#allocation3 + $0x20] sm:$0xff] %vm12101_vm3, %v21771_v8  ;;  %12230 = vst.msk [vmem:[#allocation3] sm:$0xff] %vm12101_vm3, %v21771_v8 }
 0x437   : > { %19385 = vmatprep.mubr.msk.bf16.mxu0 %vm806_vm2, %v21656_v15  ;;  %12236 = vst.msk [vmem:[#allocation3 + $0x28] sm:$0x3] %vm12232_vm4, %v21771_v8  ;;  %12233 = vst.msk [vmem:[#allocation3 + $0x10] sm:$0x3] %vm12232_vm4, %v21771_v8 }
 0x438   : > { %12231 = vst.msk [vmem:[#allocation3 + $0x8] sm:$0xff] %vm12101_vm3, %v21771_v8  ;;  %12234 = vst.msk [vmem:[#allocation3 + $0x18] sm:$0xff] %vm12101_vm3, %v21771_v8 }
 0x439   : > { %v23084_v38 = vpop.f32.mrb[120].mxu1  ;;  %12237 = vst.msk [vmem:[#allocation3 + $0x30] sm:$0xff] %vm12101_vm3, %v21771_v8  ;;  %12238 = vst.msk [vmem:[#allocation3 + $0x38] sm:$0xff] %vm12101_vm3, %v21771_v8 }
 0x43a   : > { %24375 = vst [vmem:[#allocation77_spill] sm:$0xff] %v23084_v38  ;;  %v23086_v44 = vpop.f32.mrb[121].mxu1  ;;  %v21659_v38 = vld [vmem:[%s21834_s29 + $0x368] sm:$0xff]   ;;  %12239 = vst.msk [vmem:[#allocation3 + $0x40] sm:$0x3] %vm12232_vm4, %v21771_v8 }
 0x43b   : > { %24376 = vst [vmem:[#allocation78_spill] sm:$0xff] %v23086_v44  ;;  %v23088_v54 = vpop.f32.mrb[122].mxu1  ;;  %12240 = vst.msk [vmem:[#allocation3 + $0x48] sm:$0xff] %vm12101_vm3, %v21771_v8 }
 0x43c   : > { %24377 = vst [vmem:[#allocation79_spill] sm:$0xff] %v23088_v54  ;;  %v23091_v25 = vpop.f32.mrb[123].mxu1  ;;  %12241 = vst.msk [vmem:[#allocation3 + $0x50] sm:$0xff] %vm12101_vm3, %v21771_v8 }
 0x43d   : > { %24378 = vst [vmem:[#allocation80_spill] sm:$0xff] %v23091_v25  ;;  %v21660_v25 = vld [vmem:[%s21834_s29 + $0x370] sm:$0xff]   ;;  %12242 = vst.msk [vmem:[#allocation3 + $0x58] sm:$0x3] %vm12232_vm4, %v21771_v8 }
 0x43e   : > { %19386 = vmatmul.mubr.msk.bf16.gmra.mrb[68].mxu0 %vm806_vm2, %v21657_v36  ;;  %v21661_v36 = vld [vmem:[%s21834_s29 + $0x378] sm:$0xff]   ;;  %12243 = vst.msk [vmem:[#allocation3 + $0x60] sm:$0xff] %vm12101_vm3, %v21771_v8  ;;  %12244 = vst.msk [vmem:[#allocation3 + $0x68] sm:$0xff] %vm12101_vm3, %v21771_v8 }
 0x43f   : > { %19389 = vmatprep.mubr.msk.bf16.mxu0 %vm806_vm2, %v21658_v33  ;;  %v21662_v33 = vld [vmem:[%s21834_s29 + $0x380] sm:$0xff]   ;;  %12245 = vst.msk [vmem:[#allocation3 + $0x70] sm:$0x3] %vm12232_vm4, %v21771_v8  ;;  %12248 = vst.msk [vmem:[#allocation3 + $0x88] sm:$0x3] %vm12232_vm4, %v21771_v8 }
 0x440   : > { %12246 = vst.msk [vmem:[#allocation3 + $0x78] sm:$0xff] %vm12101_vm3, %v21771_v8  ;;  %12247 = vst.msk [vmem:[#allocation3 + $0x80] sm:$0xff] %vm12101_vm3, %v21771_v8 }
 0x441   : > { %v23096_v47 = vpop.f32.mrb[124].mxu1  ;;  %12249 = vst.msk [vmem:[#allocation3 + $0x90] sm:$0xff] %vm12101_vm3, %v21771_v8  ;;  %12250 = vst.msk [vmem:[#allocation3 + $0x98] sm:$0xff] %vm12101_vm3, %v21771_v8 }
 0x442   : > { %24379 = vst [vmem:[#allocation81_spill] sm:$0xff] %v23096_v47  ;;  %v23098_v15 = vpop.f32.mrb[125].mxu1  ;;  %v21710_v47 = vld [vmem:[%s21834_s29 + $0x520] sm:$0xff]   ;;  %12251 = vst.msk [vmem:[#allocation3 + $0xa0] sm:$0x3] %vm12232_vm4, %v21771_v8 }
 0x443   : > { %24380 = vst [vmem:[#allocation82_spill] sm:$0xff] %v23098_v15  ;;  %v23100_v44 = vpop.f32.mrb[126].mxu1  ;;  %v21663_v15 = vld [vmem:[%s21834_s29 + $0x388] sm:$0xff]   ;;  %12252 = vst.msk [vmem:[#allocation3 + $0xa8] sm:$0xff] %vm12101_vm3, %v21771_v8 }
 0x444   : > { %24381 = vst [vmem:[#allocation83_spill] sm:$0xff] %v23100_v44  ;;  %v23103_v54 = vpop.f32.mrb[127].mxu1  ;;  %v21664_v44 = vld [vmem:[%s21834_s29 + $0x390] sm:$0xff]   ;;  %12253 = vst.msk [vmem:[#allocation3 + $0xb0] sm:$0xff] %vm12101_vm3, %v21771_v8 }
 0x445   : > { %24382 = vst [vmem:[#allocation84_spill] sm:$0xff] %v23103_v54  ;;  %v21665_v54 = vld [vmem:[%s21834_s29 + $0x398] sm:$0xff]   ;;  %12254 = vst.msk [vmem:[#allocation3 + $0xb8] sm:$0x3] %vm12232_vm4, %v21771_v8 }
 0x446   : > { %19390 = vmatmul.mubr.msk.bf16.gmra.mrb[72].mxu0 %vm806_vm2, %v21659_v38  ;;  %v21666_v38 = vld [vmem:[%s21834_s29 + $0x3a0] sm:$0xff]   ;;  %12255 = vst.msk [vmem:[#allocation3 + $0xc0] sm:$0xff] %vm12101_vm3, %v21771_v8  ;;  %12256 = vst.msk [vmem:[#allocation3 + $0xc8] sm:$0xff] %vm12101_vm3, %v21771_v8 }
 0x447   : > { %19393 = vmatprep.mubr.msk.bf16.mxu0 %vm806_vm2, %v21660_v25  ;;  %v21667_v25 = vld [vmem:[%s21834_s29 + $0x3a8] sm:$0xff]   ;;  %12257 = vst.msk [vmem:[#allocation3 + $0xd0] sm:$0x3] %vm12232_vm4, %v21771_v8  ;;  %12260 = vst.msk [vmem:[#allocation3 + $0xe8] sm:$0x3] %vm12232_vm4, %v21771_v8 }
 0x448   : > { %12258 = vst.msk [vmem:[#allocation3 + $0xd8] sm:$0xff] %vm12101_vm3, %v21771_v8  ;;  %12259 = vst.msk [vmem:[#allocation3 + $0xe0] sm:$0xff] %vm12101_vm3, %v21771_v8 }
 0x449   : > { %12261 = vst.msk [vmem:[#allocation3 + $0xf0] sm:$0xff] %vm12101_vm3, %v21771_v8  ;;  %12262 = vst.msk [vmem:[#allocation3 + $0xf8] sm:$0xff] %vm12101_vm3, %v21771_v8 }
 0x44a   : > { %12263 = vst.msk [vmem:[#allocation3 + $0x100] sm:$0x3] %vm12232_vm4, %v21771_v8  ;;  %12266 = vst.msk [vmem:[#allocation3 + $0x118] sm:$0x3] %vm12232_vm4, %v21771_v8 }
 0x44b   : > { %12264 = vst.msk [vmem:[#allocation3 + $0x108] sm:$0xff] %vm12101_vm3, %v21771_v8  ;;  %12265 = vst.msk [vmem:[#allocation3 + $0x110] sm:$0xff] %vm12101_vm3, %v21771_v8 }
 0x44c   : > { %12267 = vst.msk [vmem:[#allocation3 + $0x120] sm:$0xff] %vm12101_vm3, %v21771_v8  ;;  %12268 = vst.msk [vmem:[#allocation3 + $0x128] sm:$0xff] %vm12101_vm3, %v21771_v8 }
 0x44d   : > { %12269 = vst.msk [vmem:[#allocation3 + $0x130] sm:$0x3] %vm12232_vm4, %v21771_v8  ;;  %12272 = vst.msk [vmem:[#allocation3 + $0x148] sm:$0x3] %vm12232_vm4, %v21771_v8 }
 0x44e   : > { %19394 = vmatmul.mubr.msk.bf16.gmra.mrb[76].mxu0 %vm806_vm2, %v21661_v36  ;;  %v21668_v36 = vld [vmem:[%s21834_s29 + $0x3b0] sm:$0xff]   ;;  %12270 = vst.msk [vmem:[#allocation3 + $0x138] sm:$0xff] %vm12101_vm3, %v21771_v8  ;;  %12271 = vst.msk [vmem:[#allocation3 + $0x140] sm:$0xff] %vm12101_vm3, %v21771_v8 }
 0x44f   : > { %19397 = vmatprep.mubr.msk.bf16.mxu0 %vm806_vm2, %v21662_v33  ;;  %v21669_v33 = vld [vmem:[%s21834_s29 + $0x3b8] sm:$0xff]   ;;  %12273 = vst.msk [vmem:[#allocation3 + $0x150] sm:$0xff] %vm12101_vm3, %v21771_v8  ;;  %12274 = vst.msk [vmem:[#allocation3 + $0x158] sm:$0xff] %vm12101_vm3, %v21771_v8 }
 0x450   : > { %12275 = vst.msk [vmem:[#allocation3 + $0x160] sm:$0x3] %vm12232_vm4, %v21771_v8  ;;  %12278 = vst.msk [vmem:[#allocation3 + $0x178] sm:$0x3] %vm12232_vm4, %v21771_v8 }
 0x451   : > { %12276 = vst.msk [vmem:[#allocation3 + $0x168] sm:$0xff] %vm12101_vm3, %v21771_v8  ;;  %12277 = vst.msk [vmem:[#allocation3 + $0x170] sm:$0xff] %vm12101_vm3, %v21771_v8 }
 0x452   : > { %12279 = vst.msk [vmem:[#allocation3 + $0x180] sm:$0xff] %vm12101_vm3, %v21771_v8  ;;  %12280 = vst.msk [vmem:[#allocation3 + $0x188] sm:$0xff] %vm12101_vm3, %v21771_v8 }
 0x453   : > { %12281 = vst.msk [vmem:[#allocation3 + $0x190] sm:$0x3] %vm12232_vm4, %v21771_v8  ;;  %12284 = vst.msk [vmem:[#allocation3 + $0x1a8] sm:$0x3] %vm12232_vm4, %v21771_v8 }
 0x454   : > { %12282 = vst.msk [vmem:[#allocation3 + $0x198] sm:$0xff] %vm12101_vm3, %v21771_v8  ;;  %12283 = vst.msk [vmem:[#allocation3 + $0x1a0] sm:$0xff] %vm12101_vm3, %v21771_v8 }
 0x456   : > { %19398 = vmatmul.mubr.msk.bf16.gmra.mrb[80].mxu0 %vm806_vm2, %v21663_v15  ;;  %v21670_v15 = vld [vmem:[%s21834_s29 + $0x3c0] sm:$0xff]  }
 0x457   : > { %19401 = vmatprep.mubr.msk.bf16.mxu0 %vm806_vm2, %v21664_v44  ;;  %v21671_v44 = vld [vmem:[%s21834_s29 + $0x3c8] sm:$0xff]  }
 0x45e   : > { %19402 = vmatmul.mubr.msk.bf16.gmra.mrb[84].mxu0 %vm806_vm2, %v21665_v54  ;;  %v21672_v54 = vld [vmem:[%s21834_s29 + $0x3d0] sm:$0xff]  }
 0x45f   : > { %19405 = vmatprep.mubr.msk.bf16.mxu0 %vm806_vm2, %v21666_v38  ;;  %v21673_v38 = vld [vmem:[%s21834_s29 + $0x3d8] sm:$0xff]  }
 0x466   : > { %19406 = vmatmul.mubr.msk.bf16.gmra.mrb[88].mxu0 %vm806_vm2, %v21667_v25  ;;  %v21674_v25 = vld [vmem:[%s21834_s29 + $0x3e0] sm:$0xff]  }
 0x467   : > { %19409 = vmatprep.mubr.msk.bf16.mxu0 %vm806_vm2, %v21668_v36  ;;  %v21675_v36 = vld [vmem:[%s21834_s29 + $0x3e8] sm:$0xff]  }
 0x46e   : > { %19410 = vmatmul.mubr.msk.bf16.gmra.mrb[92].mxu0 %vm806_vm2, %v21669_v33  ;;  %v21676_v33 = vld [vmem:[%s21834_s29 + $0x3f0] sm:$0xff]  }
 0x46f   : > { %19413 = vmatprep.mubr.msk.bf16.mxu0 %vm806_vm2, %v21670_v15  ;;  %v21677_v15 = vld [vmem:[%s21834_s29 + $0x3f8] sm:$0xff]  }
 0x476   : > { %19414 = vmatmul.mubr.msk.bf16.gmra.mrb[96].mxu0 %vm806_vm2, %v21671_v44  ;;  %v21678_v44 = vld [vmem:[%s21834_s29 + $0x400] sm:$0xff]  }
 0x477   : > { %19417 = vmatprep.mubr.msk.bf16.mxu0 %vm806_vm2, %v21672_v54  ;;  %v21679_v54 = vld [vmem:[%s21834_s29 + $0x408] sm:$0xff]  }
 0x47e   : > { %19418 = vmatmul.mubr.msk.bf16.gmra.mrb[100].mxu0 %vm806_vm2, %v21673_v38  ;;  %v21680_v38 = vld [vmem:[%s21834_s29 + $0x410] sm:$0xff]  }
 0x47f   : > { %19421 = vmatprep.mubr.msk.bf16.mxu0 %vm806_vm2, %v21674_v25  ;;  %v21681_v25 = vld [vmem:[%s21834_s29 + $0x418] sm:$0xff]  }
 0x486   : > { %19422 = vmatmul.mubr.msk.bf16.gmra.mrb[104].mxu0 %vm806_vm2, %v21675_v36  ;;  %v21682_v36 = vld [vmem:[%s21834_s29 + $0x420] sm:$0xff]  }
 0x487   : > { %19425 = vmatprep.mubr.msk.bf16.mxu0 %vm806_vm2, %v21676_v33  ;;  %v21683_v33 = vld [vmem:[%s21834_s29 + $0x428] sm:$0xff]  }
 0x48e   : > { %19426 = vmatmul.mubr.msk.bf16.gmra.mrb[108].mxu0 %vm806_vm2, %v21677_v15  ;;  %v21684_v15 = vld [vmem:[%s21834_s29 + $0x430] sm:$0xff]  }
 0x48f   : > { %19429 = vmatprep.mubr.msk.bf16.mxu0 %vm806_vm2, %v21678_v44  ;;  %v21685_v44 = vld [vmem:[%s21834_s29 + $0x438] sm:$0xff]  }
 0x496   : > { %19430 = vmatmul.mubr.msk.bf16.gmra.mrb[112].mxu0 %vm806_vm2, %v21679_v54  ;;  %v21686_v54 = vld [vmem:[%s21834_s29 + $0x460] sm:$0xff]  }
 0x497   : > { %19433 = vmatprep.mubr.msk.bf16.mxu0 %vm806_vm2, %v21680_v38  ;;  %v21687_v38 = vld [vmem:[%s21834_s29 + $0x468] sm:$0xff]  }
 0x49e   : > { %19434 = vmatmul.mubr.msk.bf16.gmra.mrb[116].mxu0 %vm806_vm2, %v21681_v25  ;;  %v21688_v25 = vld [vmem:[%s21834_s29 + $0x470] sm:$0xff]  }
 0x49f   : > { %19437 = vmatprep.mubr.msk.bf16.mxu0 %vm806_vm2, %v21682_v36  ;;  %v21689_v36 = vld [vmem:[%s21834_s29 + $0x478] sm:$0xff]  }
 0x4a6   : > { %19438 = vmatmul.mubr.msk.bf16.gmra.mrb[120].mxu0 %vm806_vm2, %v21683_v33  ;;  %v21690_v33 = vld [vmem:[%s21834_s29 + $0x480] sm:$0xff]  }
 0x4a7   : > { %19441 = vmatprep.mubr.msk.bf16.mxu0 %vm806_vm2, %v21684_v15  ;;  %v21691_v15 = vld [vmem:[%s21834_s29 + $0x488] sm:$0xff]  }
 0x4ae   : > { %19442 = vmatmul.mubr.msk.bf16.gmra.mrb[124].mxu0 %vm806_vm2, %v21685_v44  ;;  %v21692_v44 = vld [vmem:[%s21834_s29 + $0x490] sm:$0xff]  }
 0x4af   : > { %19447 = vmatprep.mubr.msk.bf16.mxu0 %vm806_vm2, %v21686_v54  ;;  %v21693_v54 = vld [vmem:[%s21834_s29 + $0x498] sm:$0xff]  }
 0x4b6   : > { %19448 = vmatmul.mubr.msk.bf16.vlgmr.msra.gmra.mrb[0].mxu0 %vm806_vm2, %v21687_v38  ;;  %v21694_v38 = vld [vmem:[%s21834_s29 + $0x4a0] sm:$0xff]  }
 0x4b7   : > { %19451 = vmatprep.mubr.msk.bf16.mxu0 %vm806_vm2, %v21688_v25  ;;  %v21695_v25 = vld [vmem:[%s21834_s29 + $0x4a8] sm:$0xff]  }
 0x4be   : > { %19452 = vmatmul.mubr.msk.bf16.gmra.mrb[4].mxu0 %vm806_vm2, %v21689_v36  ;;  %v21696_v36 = vld [vmem:[%s21834_s29 + $0x4b0] sm:$0xff]  }
 0x4bf   : > { %19455 = vmatprep.mubr.msk.bf16.mxu0 %vm806_vm2, %v21690_v33  ;;  %v21697_v33 = vld [vmem:[%s21834_s29 + $0x4b8] sm:$0xff]  }
 0x4c6   : > { %19456 = vmatmul.mubr.msk.bf16.gmra.mrb[8].mxu0 %vm806_vm2, %v21691_v15  ;;  %v21698_v15 = vld [vmem:[%s21834_s29 + $0x4c0] sm:$0xff]  }
 0x4c7   : > { %19459 = vmatprep.mubr.msk.bf16.mxu0 %vm806_vm2, %v21692_v44  ;;  %v21699_v44 = vld [vmem:[%s21834_s29 + $0x4c8] sm:$0xff]  }
 0x4ce   : > { %19460 = vmatmul.mubr.msk.bf16.gmra.mrb[12].mxu0 %vm806_vm2, %v21693_v54  ;;  %v21700_v54 = vld [vmem:[%s21834_s29 + $0x4d0] sm:$0xff]  }
 0x4cf   : > { %19463 = vmatprep.mubr.msk.bf16.mxu0 %vm806_vm2, %v21694_v38  ;;  %v21701_v38 = vld [vmem:[%s21834_s29 + $0x4d8] sm:$0xff]  }
 0x4d6   : > { %19464 = vmatmul.mubr.msk.bf16.gmra.mrb[16].mxu0 %vm806_vm2, %v21695_v25  ;;  %v21702_v25 = vld [vmem:[%s21834_s29 + $0x4e0] sm:$0xff]  }
 0x4d7   : > { %19467 = vmatprep.mubr.msk.bf16.mxu0 %vm806_vm2, %v21696_v36  ;;  %v21703_v36 = vld [vmem:[%s21834_s29 + $0x4e8] sm:$0xff]  }
 0x4de   : > { %19468 = vmatmul.mubr.msk.bf16.gmra.mrb[20].mxu0 %vm806_vm2, %v21697_v33  ;;  %v21704_v33 = vld [vmem:[%s21834_s29 + $0x4f0] sm:$0xff]  }
 0x4df   : > { %19471 = vmatprep.mubr.msk.bf16.mxu0 %vm806_vm2, %v21698_v15  ;;  %v21705_v15 = vld [vmem:[%s21834_s29 + $0x4f8] sm:$0xff]  }
 0x4e6   : > { %19472 = vmatmul.mubr.msk.bf16.gmra.mrb[24].mxu0 %vm806_vm2, %v21699_v44  ;;  %v21706_v44 = vld [vmem:[%s21834_s29 + $0x500] sm:$0xff]  }
 0x4e7   : > { %19475 = vmatprep.mubr.msk.bf16.mxu0 %vm806_vm2, %v21700_v54  ;;  %v21707_v54 = vld [vmem:[%s21834_s29 + $0x508] sm:$0xff]  }
 0x4ee   : > { %19476 = vmatmul.mubr.msk.bf16.gmra.mrb[28].mxu0 %vm806_vm2, %v21701_v38  ;;  %v21708_v38 = vld [vmem:[%s21834_s29 + $0x510] sm:$0xff]  }
 0x4ef   : > { %19479 = vmatprep.mubr.msk.bf16.mxu0 %vm806_vm2, %v21702_v25  ;;  %v21709_v25 = vld [vmem:[%s21834_s29 + $0x518] sm:$0xff]  }
 0x4f6   : > { %19480 = vmatmul.mubr.msk.bf16.gmra.mrb[32].mxu0 %vm806_vm2, %v21703_v36  ;;  %v21711_v36 = vld [vmem:[%s21834_s29 + $0x528] sm:$0xff]  }
 0x4f7   : > { %19483 = vmatprep.mubr.msk.bf16.mxu0 %vm806_vm2, %v21704_v33  ;;  %v21712_v33 = vld [vmem:[%s21834_s29 + $0x530] sm:$0xff]  }
 0x4fe   : > { %19484 = vmatmul.mubr.msk.bf16.gmra.mrb[36].mxu0 %vm806_vm2, %v21705_v15  ;;  %v21713_v15 = vld [vmem:[%s21834_s29 + $0x538] sm:$0xff]  }
 0x4ff   : > { %19487 = vmatprep.mubr.msk.bf16.mxu0 %vm806_vm2, %v21706_v44  ;;  %v21714_v44 = vld [vmem:[%s21834_s29 + $0x540] sm:$0xff]  }
 0x506   : > { %19488 = vmatmul.mubr.msk.bf16.gmra.mrb[40].mxu0 %vm806_vm2, %v21707_v54  ;;  %v21716_v54 = vld [vmem:[%s21834_s29 + $0x550] sm:$0xff]  }
 0x507   : > { %19491 = vmatprep.mubr.msk.bf16.mxu0 %vm806_vm2, %v21708_v38  ;;  %v21717_v38 = vld [vmem:[%s21834_s29 + $0x558] sm:$0xff]  }
 0x50e   : > { %19492 = vmatmul.mubr.msk.bf16.gmra.mrb[44].mxu0 %vm806_vm2, %v21709_v25  ;;  %v21718_v25 = vld [vmem:[%s21834_s29 + $0x560] sm:$0xff]  }
 0x50f   : > { %19495 = vmatprep.mubr.msk.bf16.mxu0 %vm806_vm2, %v21710_v47  ;;  %v21715_v47 = vld [vmem:[%s21834_s29 + $0x548] sm:$0xff]  }
 0x516   : > { %19496 = vmatmul.mubr.msk.bf16.gmra.mrb[48].mxu0 %vm806_vm2, %v21711_v36  ;;  %v12741_v36 = vld [vmem:[#allocation3 + $0x1] sm:$0xff] }
 0x517   : > { %19499 = vmatprep.mubr.msk.bf16.mxu0 %vm806_vm2, %v21712_v33  ;;  %v12742_v33 = vld [vmem:[#allocation3 + $0x9] sm:$0xff] }
 0x518   : > { %v12777_v8 = vpack.c.bf16 %v12742_v33, %v12741_v36  ;;  %v21723_v36 = vld [vmem:[%s21834_s29 + $0x588] sm:$0xff]   ;;  %v21724_v33 = vld [vmem:[%s21834_s29 + $0x590] sm:$0xff]  }
 0x51a   : > { %12796 = vst.msk [vmem:[#allocation4 + $0x90] sm:$0xff] %vm12101_vm3, %v12777_v8  ;;  %v21725_v8 = vld [vmem:[%s21834_s29 + $0x598] sm:$0xff]  }
 0x51e   : > { %19500 = vmatmul.mubr.msk.bf16.gmra.mrb[52].mxu0 %vm806_vm2, %v21713_v15  ;;  %v21719_v15 = vld [vmem:[%s21834_s29 + $0x568] sm:$0xff]  }
 0x51f   : > { %19503 = vmatprep.mubr.msk.bf16.mxu0 %vm806_vm2, %v21714_v44  ;;  %v21720_v44 = vld [vmem:[%s21834_s29 + $0x570] sm:$0xff]  }
 0x526   : > { %19504 = vmatmul.mubr.msk.bf16.gmra.mrb[56].mxu0 %vm806_vm2, %v21715_v47  ;;  %v21750_v47 = vld [vmem:[%s24301_s3 + $0x8] sm:$0xff]  }
 0x527   : > { %19507 = vmatprep.mubr.msk.bf16.mxu0 %vm806_vm2, %v21716_v54  ;;  %19575 = vmatprep.subr.bf16.mxu1 %v21750_v47  ;;  %v12905_v54 = vld [vmem:[#allocation4 + $0x90] sm:$0xff] }
 0x528   : > { %19576 = vmatpush3.bf16.msra.mxu1 %v21750_v47  ;;  %19577 = vmatprep.mubr.msk.bf16.mxu1 %vm12101_vm3, %v12905_v54  ;;  %v21728_v47 = vld [vmem:[%s21834_s29 + $0x5b0] sm:$0xff]   ;;  %v21729_v54 = vld [vmem:[%s21834_s29 + $0x5b8] sm:$0xff]  }
 0x52e   : > { %19508 = vmatmul.mubr.msk.bf16.gmra.mrb[60].mxu0 %vm806_vm2, %v21717_v38  ;;  %v21721_v38 = vld [vmem:[%s21834_s29 + $0x578] sm:$0xff]  }
 0x52f   : > { %19511 = vmatprep.mubr.msk.bf16.mxu0 %vm806_vm2, %v21718_v25  ;;  %v21722_v25 = vld [vmem:[%s21834_s29 + $0x580] sm:$0xff]  }
 0x536   : > { %19512 = vmatmul.mubr.msk.bf16.gmra.mrb[64].mxu0 %vm806_vm2, %v21719_v15  ;;  %v21726_v15 = vld [vmem:[%s21834_s29 + $0x5a0] sm:$0xff]  }
 0x537   : > { %19515 = vmatprep.mubr.msk.bf16.mxu0 %vm806_vm2, %v21720_v44  ;;  %v21727_v44 = vld [vmem:[%s21834_s29 + $0x5a8] sm:$0xff]  }
 0x53e   : > { %19516 = vmatmul.mubr.msk.bf16.gmra.mrb[68].mxu0 %vm806_vm2, %v21721_v38  ;;  %v21730_v38 = vld [vmem:[%s21834_s29 + $0x5c0] sm:$0xff]  }
 0x53f   : > { %19519 = vmatprep.mubr.msk.bf16.mxu0 %vm806_vm2, %v21722_v25  ;;  %v21731_v25 = vld [vmem:[%s21834_s29 + $0x5c8] sm:$0xff]  }
 0x546   : > { %19520 = vmatmul.mubr.msk.bf16.gmra.mrb[72].mxu0 %vm806_vm2, %v21723_v36  ;;  %v21732_v36 = vld [vmem:[%s21834_s29 + $0x5d0] sm:$0xff]  }
 0x547   : > { %19523 = vmatprep.mubr.msk.bf16.mxu0 %vm806_vm2, %v21724_v33  ;;  %v21733_v33 = vld [vmem:[%s21834_s29 + $0x5d8] sm:$0xff]  }
 0x54e   : > { %19524 = vmatmul.mubr.msk.bf16.gmra.mrb[76].mxu0 %vm806_vm2, %v21725_v8  ;;  %v21734_v8 = vld [vmem:[%s21834_s29 + $0x5e0] sm:$0xff]  }
 0x54f   : > { %19527 = vmatprep.mubr.msk.bf16.mxu0 %vm806_vm2, %v21726_v15  ;;  %v21735_v15 = vld [vmem:[%s21834_s29 + $0x5e8] sm:$0xff]  }
 0x556   : > { %19528 = vmatmul.mubr.msk.bf16.gmra.mrb[80].mxu0 %vm806_vm2, %v21727_v44  ;;  %v21736_v44 = vld [vmem:[%s21834_s29 + $0x5f0] sm:$0xff]  }
 0x557   : > { %19531 = vmatprep.mubr.msk.bf16.mxu0 %vm806_vm2, %v21728_v47  ;;  %v21737_v47 = vld [vmem:[%s21834_s29 + $0x5f8] sm:$0xff]  }
 0x55e   : > { %19532 = vmatmul.mubr.msk.bf16.gmra.mrb[84].mxu0 %vm806_vm2, %v21729_v54  ;;  %v21738_v54 = vld [vmem:[%s21834_s29 + $0x600] sm:$0xff]  }
 0x55f   : > { %19535 = vmatprep.mubr.msk.bf16.mxu0 %vm806_vm2, %v21730_v38  ;;  %v21739_v38 = vld [vmem:[%s21834_s29 + $0x608] sm:$0xff]  }
 0x566   : > { %19536 = vmatmul.mubr.msk.bf16.gmra.mrb[88].mxu0 %vm806_vm2, %v21731_v25  ;;  %v21740_v25 = vld [vmem:[%s21834_s29 + $0x610] sm:$0xff]  }
 0x567   : > { %19539 = vmatprep.mubr.msk.bf16.mxu0 %vm806_vm2, %v21732_v36 }
 0x56e   : > { %19540 = vmatmul.mubr.msk.bf16.gmra.mrb[92].mxu0 %vm806_vm2, %v21733_v33  ;;  %v23330_v33 = vld [vmem:[%s24300_s2] ss:$0 sm:$0xff] }
 0x56f   : > { %19543 = vmatprep.mubr.msk.bf16.mxu0 %vm806_vm2, %v21734_v8 }
 0x576   : > { %19544 = vmatmul.mubr.msk.bf16.gmra.mrb[96].mxu0 %vm806_vm2, %v21735_v15 }
 0x577   : > { %19547 = vmatprep.mubr.msk.bf16.mxu0 %vm806_vm2, %v21736_v44  ;;  %v21741_v44 = vld [vmem:[%s21834_s29 + $0x618] sm:$0xff]  }
 0x57e   : > { %19548 = vmatmul.mubr.msk.bf16.gmra.mrb[100].mxu0 %vm806_vm2, %v21737_v47 }
 0x57f   : > { %19551 = vmatprep.mubr.msk.bf16.mxu0 %vm806_vm2, %v21738_v54  ;;  %v21742_v54 = vld [vmem:[%s21834_s29 + $0x620] sm:$0xff]  }
 0x586   : > { %19552 = vmatmul.mubr.msk.bf16.gmra.mrb[104].mxu0 %vm806_vm2, %v21739_v38 }
 0x587   : > { %19555 = vmatprep.mubr.msk.bf16.mxu0 %vm806_vm2, %v21740_v25 }
 0x589   : > { %v19449_v36 = vpop.f32.mrb[0].mxu0 }
 0x58a   : > { %v19883_v8 = vadd.f32 %v19449_v36, %v22602_v11  ;;  %v11199_v15 = vpop.f32.mrb[1].mxu0 }
 0x58b   : > { %v19884_v47 = vadd.f32 %v11199_v15, %v22605_v13  ;;  %v19450_v7 = vpop.f32.mrb[2].mxu0  ;;  %v21744_v15 = vld [vmem:[%s21834_s29 + $0x630] sm:$0xff]  }
 0x58c   : > { %v11847_v0 = vadd.f32 %v19883_v8, %v23330_v33  ;;  %v19885_v38 = vadd.f32 %v19450_v7, %v22609_v16  ;;  %v11202_v59 = vpop.f32.mrb[3].mxu0 }
 0x58d   : > { %v11845_v25 = vadd.f32 %v19884_v47, %v23330_v33  ;;  %v19886_v50 = vadd.f32 %v11202_v59, %v22612_v18  ;;  %v21743_v59 = vld [vmem:[%s21834_s29 + $0x628] sm:$0xff]  }
 0x58e   : > { %v11975_v41 = vmax.f32 %v11847_v0, 0.0  ;;  %v11848_v30 = vadd.f32 %v19885_v38, %v23330_v33  ;;  %19556 = vmatmul.mubr.msk.bf16.gmra.mrb[108].mxu0 %vm806_vm2, %v21741_v44 }
 0x58f   : > { %v11973_v11 = vmax.f32 %v11845_v25, 0.0  ;;  %v11846_v13 = vadd.f32 %v19886_v50, %v23330_v33  ;;  %19559 = vmatprep.mubr.msk.bf16.mxu0 %vm806_vm2, %v21742_v54 }
 0x590   : > { %12104 = vst.msk [vmem:[#allocation2 + $0x10] sm:$0xff] %vm12101_vm3, %v11975_v41  ;;  %v11976_v16 = vmax.f32 %v11848_v30, 0.0 }
 0x591   : > { %12102 = vst.msk [vmem:[#allocation2] sm:$0xff] %vm12101_vm3, %v11973_v11  ;;  %v11974_v7 = vmax.f32 %v11846_v13, 0.0  ;;  %v19453_v36 = vpop.f32.mrb[4].mxu0 }
 0x592   : > { %12105 = vst.msk [vmem:[#allocation2 + $0x18] sm:$0xff] %vm12101_vm3, %v11976_v16  ;;  %v19887_v18 = vadd.f32 %v19453_v36, %v22618_v19  ;;  %v11215_v0 = vpop.f32.mrb[5].mxu0 }
 0x593   : > { %12103 = vst.msk [vmem:[#allocation2 + $0x8] sm:$0xff] %vm12101_vm3, %v11974_v7  ;;  %v19888_v8 = vadd.f32 %v11215_v0, %v22621_v21  ;;  %v19454_v50 = vpop.f32.mrb[6].mxu0  ;;  %v21745_v7 = vld [vmem:[%s21834_s29 + $0x638] sm:$0xff]   ;;  %v21746_v0 = vld [vmem:[%s21834_s29 + $0x640] sm:$0xff]  }
 0x594   : > { %v11851_v44 = vadd.f32 %v19887_v18, %v23330_v33  ;;  %v19889_v30 = vadd.f32 %v19454_v50, %v22625_v24  ;;  %v11218_v41 = vpop.f32.mrb[7].mxu0 }
 0x595   : > { %v11849_v47 = vadd.f32 %v19888_v8, %v23330_v33  ;;  %v19890_v54 = vadd.f32 %v11218_v41, %v22628_v26 }
 0x596   : > { %v11979_v38 = vmax.f32 %v11851_v44, 0.0  ;;  %v11852_v19 = vadd.f32 %v19889_v30, %v23330_v33  ;;  %19560 = vmatmul.mubr.msk.bf16.gmra.mrb[112].mxu0 %vm806_vm2, %v21743_v59 }
 0x597   : > { %v11977_v25 = vmax.f32 %v11849_v47, 0.0  ;;  %v11850_v21 = vadd.f32 %v19890_v54, %v23330_v33  ;;  %19563 = vmatprep.mubr.msk.bf16.mxu0 %vm806_vm2, %v21744_v15 }
 0x598   : > { %12108 = vst.msk [vmem:[#allocation2 + $0x30] sm:$0xff] %vm12101_vm3, %v11979_v38  ;;  %v11980_v24 = vmax.f32 %v11852_v19, 0.0 }
 0x599   : > { %12106 = vst.msk [vmem:[#allocation2 + $0x20] sm:$0xff] %vm12101_vm3, %v11977_v25  ;;  %v11978_v11 = vmax.f32 %v11850_v21, 0.0  ;;  %v19457_v13 = vpop.f32.mrb[8].mxu0  ;;  %v12287_v41 = vld [vmem:[#allocation2 + $0x10] ss:$2 sm:$0xff] }
 0x59a   : > { %12109 = vst.msk [vmem:[#allocation2 + $0x38] sm:$0xff] %vm12101_vm3, %v11980_v24  ;;  %v19891_v26 = vadd.f32 %v19457_v13, %v22634_v27  ;;  %v11231_v16 = vpop.f32.mrb[9].mxu0  ;;  %v12351_v47 = vld [vmem:[#allocation2 + $0x11] ss:$2 sm:$0xff]  ;;  %v12285_v38 = vld [vmem:[#allocation2] ss:$2 sm:$0xff] }
 0x59b   : > { %12107 = vst.msk [vmem:[#allocation2 + $0x28] sm:$0xff] %vm12101_vm3, %v11978_v11  ;;  %v19892_v36 = vadd.f32 %v11231_v16, %v22637_v29  ;;  %v19458_v18 = vpop.f32.mrb[10].mxu0  ;;  %v12541_v11 = vmax.f32 %v12287_v41, %v12351_v47 }
 0x59c   : > { %v11855_v59 = vadd.f32 %v19891_v26, %v23330_v33  ;;  %v19893_v8 = vadd.f32 %v19458_v18, %v22641_v32  ;;  %v11234_v50 = vpop.f32.mrb[11].mxu0  ;;  %v12349_v32 = vld [vmem:[#allocation2 + $0x1] ss:$2 sm:$0xff] }
 0x59d   : > { %v11853_v15 = vadd.f32 %v19892_v36, %v23330_v33  ;;  %v19894_v44 = vadd.f32 %v11234_v50, %v22644_v34  ;;  %v21747_v18 = vld [vmem:[%s21834_s29 + $0x648] sm:$0xff]  }
 0x59e   : > { %v11983_v30 = vmax.f32 %v11855_v59, 0.0  ;;  %v11856_v27 = vadd.f32 %v19893_v8, %v23330_v33  ;;  %19564 = vmatmul.mubr.msk.bf16.gmra.mrb[116].mxu0 %vm806_vm2, %v21745_v7 }
 0x59f   : > { %v11981_v54 = vmax.f32 %v11853_v15, 0.0  ;;  %v11854_v29 = vadd.f32 %v19894_v44, %v23330_v33  ;;  %19567 = vmatprep.mubr.msk.bf16.mxu0 %vm806_vm2, %v21746_v0  ;;  %v12540_v0 = vmax.f32 %v12285_v38, %v12349_v32  ;;  %v21748_v15 = vld [vmem:[%s21834_s29 + $0x650] sm:$0xff]  }
 0x5a0   : > { %12112 = vst.msk [vmem:[#allocation2 + $0x50] sm:$0xff] %vm12101_vm3, %v11983_v30  ;;  %v11984_v19 = vmax.f32 %v11856_v27, 0.0 }
 0x5a1   : > { %v12415_v25 = vld [vmem:[#allocation2 + $0x30] ss:$2 sm:$0xff]  ;;  %v12479_v34 = vld [vmem:[#allocation2 + $0x31] ss:$2 sm:$0xff]  ;;  %12110 = vst.msk [vmem:[#allocation2 + $0x40] sm:$0xff] %vm12101_vm3, %v11981_v54  ;;  %v11982_v21 = vmax.f32 %v11854_v29, 0.0 }
 0x5a2   : > { %v19461_v24 = vpop.f32.mrb[12].mxu0  ;;  %v12573_v13 = vmax.f32 %v12415_v25, %v12479_v34  ;;  %v12413_v26 = vld [vmem:[#allocation2 + $0x20] ss:$2 sm:$0xff]  ;;  %v12477_v16 = vld [vmem:[#allocation2 + $0x21] ss:$2 sm:$0xff]  ;;  %12113 = vst.msk [vmem:[#allocation2 + $0x58] sm:$0xff] %vm12101_vm3, %v11984_v19 }
 0x5a3   : > { %v19895_v7 = vadd.f32 %v19461_v24, %v22650_v35  ;;  %v11247_v36 = vpop.f32.mrb[13].mxu0  ;;  %v12572_v59 = vmax.f32 %v12413_v26, %v12477_v16  ;;  %12111 = vst.msk [vmem:[#allocation2 + $0x48] sm:$0xff] %vm12101_vm3, %v11982_v21  ;;  %v21749_v21 = vld [vmem:[%s21834_s29 + $0x658] sm:$0xff]  }
 0x5a4   : > { %v19896_v8 = vadd.f32 %v11247_v36, %v22653_v37  ;;  %v19462_v50 = vpop.f32.mrb[14].mxu0  ;;  %v12605_v44 = vmax.f32 %v12541_v11, %v12573_v13 }
 0x5a5   : > { %v11859_v30 = vadd.f32 %v19895_v7, %v23330_v33  ;;  %v19897_v27 = vadd.f32 %v19462_v50, %v22657_v40  ;;  %v11250_v41 = vpop.f32.mrb[15].mxu0  ;;  %v12604_v47 = vmax.f32 %v12540_v0, %v12572_v59 }
 0x5a6   : > { %v11857_v54 = vadd.f32 %v19896_v8, %v23330_v33  ;;  %v19898_v35 = vadd.f32 %v11250_v41, %v22660_v42  ;;  %12638 = vst.msk [vmem:[#allocation3 + $0x21] sm:$0xff] %vm12101_vm3, %v12605_v44  ;;  %19568 = vmatmul.mubr.msk.bf16.gmra.mrb[120].mxu0 %vm806_vm2, %v21747_v18 }
 0x5a7   : > { %v11987_v29 = vmax.f32 %v11859_v30, 0.0  ;;  %v11860_v38 = vadd.f32 %v19897_v27, %v23330_v33  ;;  %12637 = vst.msk [vmem:[#allocation3 + $0x19] sm:$0xff] %vm12101_vm3, %v12604_v47  ;;  %19571 = vmatprep.mubr.msk.bf16.mxu0 %vm806_vm2, %v21748_v15 }
 0x5a8   : > { %v11985_v37 = vmax.f32 %v11857_v54, 0.0  ;;  %v11858_v32 = vadd.f32 %v19898_v35, %v23330_v33 }
 0x5a9   : > { %12116 = vst.msk [vmem:[#allocation2 + $0x70] sm:$0xff] %vm12101_vm3, %v11987_v29  ;;  %v11988_v40 = vmax.f32 %v11860_v38, 0.0  ;;  %v19465_v19 = vpop.f32.mrb[16].mxu0  ;;  %v12291_v15 = vld [vmem:[#allocation2 + $0x50] ss:$2 sm:$0xff] }
 0x5aa   : > { %12114 = vst.msk [vmem:[#allocation2 + $0x60] sm:$0xff] %vm12101_vm3, %v11985_v37  ;;  %v11986_v42 = vmax.f32 %v11858_v32, 0.0  ;;  %v19899_v25 = vadd.f32 %v19465_v19, %v22666_v43  ;;  %v11263_v34 = vpop.f32.mrb[17].mxu0  ;;  %v12355_v44 = vld [vmem:[#allocation2 + $0x51] ss:$2 sm:$0xff] }
 0x5ab   : > { %12117 = vst.msk [vmem:[#allocation2 + $0x78] sm:$0xff] %vm12101_vm3, %v11988_v40  ;;  %v19900_v24 = vadd.f32 %v11263_v34, %v22669_v46  ;;  %v19466_v11 = vpop.f32.mrb[18].mxu0  ;;  %v12289_v54 = vld [vmem:[#allocation2 + $0x40] ss:$2 sm:$0xff] }
 0x5ac   : > { %12115 = vst.msk [vmem:[#allocation2 + $0x68] sm:$0xff] %vm12101_vm3, %v11986_v42  ;;  %v11863_v13 = vadd.f32 %v19899_v25, %v23330_v33  ;;  %v19901_v26 = vadd.f32 %v19466_v11, %v22673_v49  ;;  %v11266_v16 = vpop.f32.mrb[19].mxu0  ;;  %v12543_v42 = vmax.f32 %v12291_v15, %v12355_v44 }
 0x5ad   : > { %v11861_v7 = vadd.f32 %v19900_v24, %v23330_v33  ;;  %v19902_v36 = vadd.f32 %v11266_v16, %v22676_v39  ;;  %v12744_v18 = vld [vmem:[#allocation3 + $0x21] sm:$0xff] }
 0x5ae   : > { %v12817_v0 = vld [vmem:[#allocation3 + $0x22] sm:$0xff]  ;;  %v11991_v59 = vmax.f32 %v11863_v13, 0.0  ;;  %v11864_v43 = vadd.f32 %v19901_v26, %v23330_v33  ;;  %19572 = vmatmul.mubr.msk.bf16.gmra.mrb[124].mxu0 %vm806_vm2, %v21749_v21  ;;  %v12743_v8 = vld [vmem:[#allocation3 + $0x19] sm:$0xff] }
 0x5af   : > { %v12671_v50 = vld [vmem:[#allocation3 + $0x18] sm:$0xff]  ;;  %v12672_v46 = vld [vmem:[#allocation3 + $0x20] sm:$0xff]  ;;  %v11989_v30 = vmax.f32 %v11861_v7, 0.0  ;;  %v11862_v49 = vadd.f32 %v19902_v36, %v23330_v33  ;;  %v12778_v27 = vpack.c.bf16 %v12744_v18, %v12743_v8 }
 0x5b0   : > { %v12706_v41 = vpack.c.bf16 %v12672_v46, %v12671_v50  ;;  %v12816_v47 = vld [vmem:[#allocation3 + $0x1a] sm:$0xff]  ;;  %12120 = vst.msk [vmem:[#allocation2 + $0x90] sm:$0xff] %vm12101_vm3, %v11991_v59  ;;  %v11992_v35 = vmax.f32 %v11864_v43, 0.0 }
 0x5b1   : > { %v12353_v39 = vld [vmem:[#allocation2 + $0x41] ss:$2 sm:$0xff]  ;;  %v12851_v29 = vpack.c.bf16 %v12817_v0, %v12816_v47  ;;  %12118 = vst.msk [vmem:[#allocation2 + $0x80] sm:$0xff] %vm12101_vm3, %v11989_v30  ;;  %v11990_v32 = vmax.f32 %v11862_v49, 0.0  ;;  %v19469_v40 = vpop.f32.mrb[20].mxu0  ;;  %12797 = vst.msk [vmem:[#allocation4 + $0x98] sm:$0xff] %vm12101_vm3, %v12778_v27 }
 0x5b2   : > { %v12419_v38 = vld [vmem:[#allocation2 + $0x70] ss:$2 sm:$0xff]  ;;  %v12483_v37 = vld [vmem:[#allocation2 + $0x71] ss:$2 sm:$0xff]  ;;  %12724 = vst.msk [vmem:[#allocation4 + $0x8] sm:$0xff] %vm12101_vm3, %v12706_v41  ;;  %12121 = vst.msk [vmem:[#allocation2 + $0x98] sm:$0xff] %vm12101_vm3, %v11992_v35  ;;  %v19903_v21 = vadd.f32 %v19469_v40, %v22682_v51  ;;  %v12542_v11 = vmax.f32 %v12289_v54, %v12353_v39 }
 0x5b3   : > { %v12575_v19 = vmax.f32 %v12419_v38, %v12483_v37  ;;  %v12417_v25 = vld [vmem:[#allocation2 + $0x60] ss:$2 sm:$0xff]  ;;  %v12481_v34 = vld [vmem:[#allocation2 + $0x61] ss:$2 sm:$0xff]  ;;  %v11279_v24 = vpop.f32.mrb[21].mxu0  ;;  %12870 = vst.msk [vmem:[#allocation4 + $0x128] sm:$0xff] %vm12101_vm3, %v12851_v29 }
 0x5b4   : > { %v12574_v13 = vmax.f32 %v12417_v25, %v12481_v34  ;;  %12119 = vst.msk [vmem:[#allocation2 + $0x88] sm:$0xff] %vm12101_vm3, %v11990_v32  ;;  %v19904_v26 = vadd.f32 %v11279_v24, %v22685_v53  ;;  %v19470_v16 = vpop.f32.mrb[22].mxu0  ;;  %v11867_v36 = vadd.f32 %v19903_v21, %v23330_v33 }
 0x5b5   : > { %v12607_v7 = vmax.f32 %v12543_v42, %v12575_v19  ;;  %v19905_v18 = vadd.f32 %v19470_v16, %v22689_v55  ;;  %v11282_v0 = vpop.f32.mrb[23].mxu0 }
 0x5b6   : > { %v12606_v59 = vmax.f32 %v12542_v11, %v12574_v13  ;;  %v11865_v43 = vadd.f32 %v19904_v26, %v23330_v33  ;;  %v19906_v51 = vadd.f32 %v11282_v0, %v22692_v57  ;;  %v11995_v8 = vmax.f32 %v11867_v36, 0.0 }
 0x5b7   : > { %12640 = vst.msk [vmem:[#allocation3 + $0x39] sm:$0xff] %vm12101_vm3, %v12607_v7  ;;  %v11868_v50 = vadd.f32 %v19905_v18, %v23330_v33 }
 0x5b8   : > { %12639 = vst.msk [vmem:[#allocation3 + $0x31] sm:$0xff] %vm12101_vm3, %v12606_v59  ;;  %v11993_v53 = vmax.f32 %v11865_v43, 0.0  ;;  %v11866_v46 = vadd.f32 %v19906_v51, %v23330_v33  ;;  %12124 = vst.msk [vmem:[#allocation2 + $0xb0] sm:$0xff] %vm12101_vm3, %v11995_v8  ;;  %v12906_v55 = vld [vmem:[#allocation4 + $0x98] sm:$0xff] }
 0x5b9   : > { %v11996_v15 = vmax.f32 %v11868_v50, 0.0  ;;  %v19473_v30 = vpop.f32.mrb[24].mxu0  ;;  %19578 = vmatmul.mubr.msk.bf16.vlgmr.msra.gmra.mrb[128].mxu1 %vm12101_vm3, %v12906_v55  ;;  %v12295_v25 = vld [vmem:[#allocation2 + $0x90] ss:$2 sm:$0xff] }
 0x5ba   : > { %12122 = vst.msk [vmem:[#allocation2 + $0xa0] sm:$0xff] %vm12101_vm3, %v11993_v53  ;;  %v11994_v44 = vmax.f32 %v11866_v46, 0.0  ;;  %v19907_v57 = vadd.f32 %v19473_v30, %v22698_v58  ;;  %v11295_v49 = vpop.f32.mrb[25].mxu0 }
 0x5bb   : > { %12125 = vst.msk [vmem:[#allocation2 + $0xb8] sm:$0xff] %vm12101_vm3, %v11996_v15  ;;  %v19908_v27 = vadd.f32 %v11295_v49, %v22701_v60  ;;  %v19474_v41 = vpop.f32.mrb[26].mxu0  ;;  %v12359_v60 = vld [vmem:[#allocation2 + $0x91] ss:$2 sm:$0xff]  ;;  %v12293_v13 = vld [vmem:[#allocation2 + $0x80] ss:$2 sm:$0xff] }
 0x5bc   : > { %12123 = vst.msk [vmem:[#allocation2 + $0xa8] sm:$0xff] %vm12101_vm3, %v11994_v44  ;;  %v11871_v47 = vadd.f32 %v19907_v57, %v23330_v33  ;;  %v19909_v54 = vadd.f32 %v19474_v41, %v22705_v63  ;;  %v11298_v39 = vpop.f32.mrb[27].mxu0  ;;  %v12357_v26 = vld [vmem:[#allocation2 + $0x81] ss:$2 sm:$0xff]  ;;  %v12545_v59 = vmax.f32 %v12295_v25, %v12359_v60 }
 0x5bd   : > { %v11869_v35 = vadd.f32 %v19908_v27, %v23330_v33  ;;  %v19910_v29 = vadd.f32 %v11298_v39, %v22708_v1  ;;  %v12544_v46 = vmax.f32 %v12293_v13, %v12357_v26 }
 0x5be   : > { %v12746_v38 = vld [vmem:[#allocation3 + $0x39] sm:$0xff]  ;;  %v11999_v32 = vmax.f32 %v11871_v47, 0.0  ;;  %v11872_v58 = vadd.f32 %v19909_v54, %v23330_v33 }
 0x5bf   : > { %v12819_v37 = vld [vmem:[#allocation3 + $0x3a] sm:$0xff]  ;;  %v12745_v40 = vld [vmem:[#allocation3 + $0x31] sm:$0xff]  ;;  %v11997_v34 = vmax.f32 %v11869_v35, 0.0  ;;  %v11870_v21 = vadd.f32 %v19910_v29, %v23330_v33 }
 0x5c0   : > { %v12673_v42 = vld [vmem:[#allocation3 + $0x30] sm:$0xff]  ;;  %v12674_v19 = vld [vmem:[#allocation3 + $0x38] sm:$0xff]  ;;  %v12779_v24 = vpack.c.bf16 %v12746_v38, %v12745_v40  ;;  %12128 = vst.msk [vmem:[#allocation2 + $0xd0] sm:$0xff] %vm12101_vm3, %v11999_v32  ;;  %v12000_v1 = vmax.f32 %v11872_v58, 0.0 }
 0x5c1   : > { %v12707_v63 = vpack.c.bf16 %v12674_v19, %v12673_v42  ;;  %v12818_v11 = vld [vmem:[#allocation3 + $0x32] sm:$0xff]  ;;  %12126 = vst.msk [vmem:[#allocation2 + $0xc0] sm:$0xff] %vm12101_vm3, %v11997_v34  ;;  %v11998_v18 = vmax.f32 %v11870_v21, 0.0  ;;  %v19477_v0 = vpop.f32.mrb[28].mxu0 }
 0x5c2   : > { %v12852_v16 = vpack.c.bf16 %v12819_v37, %v12818_v11  ;;  %v12423_v7 = vld [vmem:[#allocation2 + $0xb0] ss:$2 sm:$0xff]  ;;  %v12487_v36 = vld [vmem:[#allocation2 + $0xb1] ss:$2 sm:$0xff]  ;;  %12798 = vst.msk [vmem:[#allocation4 + $0xa0] sm:$0xff] %vm12101_vm3, %v12779_v24  ;;  %12129 = vst.msk [vmem:[#allocation2 + $0xd8] sm:$0xff] %vm12101_vm3, %v12000_v1  ;;  %v19911_v50 = vadd.f32 %v19477_v0, %v22714_v2 }
 0x5c3   : > { %12725 = vst.msk [vmem:[#allocation4 + $0x10] sm:$0xff] %vm12101_vm3, %v12707_v63  ;;  %v12577_v43 = vmax.f32 %v12423_v7, %v12487_v36  ;;  %v12421_v51 = vld [vmem:[#allocation2 + $0xa0] ss:$2 sm:$0xff]  ;;  %v12485_v8 = vld [vmem:[#allocation2 + $0xa1] ss:$2 sm:$0xff]  ;;  %v11311_v53 = vpop.f32.mrb[29].mxu0 }
 0x5c4   : > { %12871 = vst.msk [vmem:[#allocation4 + $0x130] sm:$0xff] %vm12101_vm3, %v12852_v16  ;;  %v12576_v15 = vmax.f32 %v12421_v51, %v12485_v8  ;;  %12127 = vst.msk [vmem:[#allocation2 + $0xc8] sm:$0xff] %vm12101_vm3, %v11998_v18  ;;  %v19912_v55 = vadd.f32 %v11311_v53, %v22717_v4  ;;  %v19478_v44 = vpop.f32.mrb[30].mxu0  ;;  %v11875_v57 = vadd.f32 %v19911_v50, %v23330_v33 }
 0x5c5   : > { %v12609_v30 = vmax.f32 %v12545_v59, %v12577_v43  ;;  %v19913_v49 = vadd.f32 %v19478_v44, %v22721_v9  ;;  %v11314_v27 = vpop.f32.mrb[31].mxu0 }
 0x5c6   : > { %v12608_v41 = vmax.f32 %v12544_v46, %v12576_v15  ;;  %v11873_v47 = vadd.f32 %v19912_v55, %v23330_v33  ;;  %v19914_v2 = vadd.f32 %v11314_v27, %v22724_v12  ;;  %v12003_v54 = vmax.f32 %v11875_v57, 0.0 }
 0x5c7   : > { %12642 = vst.msk [vmem:[#allocation3 + $0x51] sm:$0xff] %vm12101_vm3, %v12609_v30  ;;  %v11876_v39 = vadd.f32 %v19913_v49, %v23330_v33 }
 0x5c8   : > { %12641 = vst.msk [vmem:[#allocation3 + $0x49] sm:$0xff] %vm12101_vm3, %v12608_v41  ;;  %v12001_v4 = vmax.f32 %v11873_v47, 0.0  ;;  %v11874_v35 = vadd.f32 %v19914_v2, %v23330_v33  ;;  %12132 = vst.msk [vmem:[#allocation2 + $0xf0] sm:$0xff] %vm12101_vm3, %v12003_v54 }
 0x5c9   : > { %v12004_v29 = vmax.f32 %v11876_v39, 0.0  ;;  %v12907_v9 = vld [vmem:[#allocation4 + $0xa0] sm:$0xff]  ;;  %v19481_v37 = vpop.f32.mrb[32].mxu0 }
 0x5ca   : > { %12130 = vst.msk [vmem:[#allocation2 + $0xe0] sm:$0xff] %vm12101_vm3, %v12001_v4  ;;  %v12002_v38 = vmax.f32 %v11874_v35, 0.0  ;;  %19581 = vmatprep.mubr.msk.bf16.mxu1 %vm12101_vm3, %v12907_v9  ;;  %v19915_v12 = vadd.f32 %v19481_v37, %v22730_v14  ;;  %v11327_v32 = vpop.f32.mrb[33].mxu0  ;;  %v12299_v1 = vld [vmem:[#allocation2 + $0xd0] ss:$2 sm:$0xff] }
 0x5cb   : > { %12133 = vst.msk [vmem:[#allocation2 + $0xf8] sm:$0xff] %vm12101_vm3, %v12004_v29  ;;  %v19916_v58 = vadd.f32 %v11327_v32, %v22733_v17  ;;  %v19482_v40 = vpop.f32.mrb[34].mxu0  ;;  %v12363_v17 = vld [vmem:[#allocation2 + $0xd1] ss:$2 sm:$0xff]  ;;  %v12297_v0 = vld [vmem:[#allocation2 + $0xc0] ss:$2 sm:$0xff] }
 0x5cc   : > { %12131 = vst.msk [vmem:[#allocation2 + $0xe8] sm:$0xff] %vm12101_vm3, %v12002_v38  ;;  %v11879_v42 = vadd.f32 %v19915_v12, %v23330_v33  ;;  %v19917_v19 = vadd.f32 %v19482_v40, %v22737_v23  ;;  %v11330_v25 = vpop.f32.mrb[35].mxu0  ;;  %v12361_v59 = vld [vmem:[#allocation2 + $0xc1] ss:$2 sm:$0xff]  ;;  %v12547_v46 = vmax.f32 %v12299_v1, %v12363_v17 }
 0x5cd   : > { %v11877_v60 = vadd.f32 %v19916_v58, %v23330_v33  ;;  %v19918_v34 = vadd.f32 %v11330_v25, %v22740_v28  ;;  %v12546_v49 = vmax.f32 %v12297_v0, %v12361_v59 }
 0x5ce   : > { %v12748_v21 = vld [vmem:[#allocation3 + $0x51] sm:$0xff]  ;;  %v12007_v63 = vmax.f32 %v11879_v42, 0.0  ;;  %v11880_v14 = vadd.f32 %v19917_v19, %v23330_v33 }
 0x5cf   : > { %v12821_v24 = vld [vmem:[#allocation3 + $0x52] sm:$0xff]  ;;  %v12747_v11 = vld [vmem:[#allocation3 + $0x49] sm:$0xff]  ;;  %v12005_v16 = vmax.f32 %v11877_v60, 0.0  ;;  %v11878_v7 = vadd.f32 %v19918_v34, %v23330_v33 }
 0x5d0   : > { %v12675_v13 = vld [vmem:[#allocation3 + $0x48] sm:$0xff]  ;;  %v12676_v26 = vld [vmem:[#allocation3 + $0x50] sm:$0xff]  ;;  %v12780_v36 = vpack.c.bf16 %v12748_v21, %v12747_v11  ;;  %12136 = vst.msk [vmem:[#allocation2 + $0x110] sm:$0xff] %vm12101_vm3, %v12007_v63  ;;  %v12008_v28 = vmax.f32 %v11880_v14, 0.0 }
 0x5d1   : > { %v12708_v23 = vpack.c.bf16 %v12676_v26, %v12675_v13  ;;  %v12820_v18 = vld [vmem:[#allocation3 + $0x4a] sm:$0xff]  ;;  %12134 = vst.msk [vmem:[#allocation2 + $0x100] sm:$0xff] %vm12101_vm3, %v12005_v16  ;;  %v12006_v50 = vmax.f32 %v11878_v7, 0.0  ;;  %v19485_v53 = vpop.f32.mrb[36].mxu0 }
 0x5d2   : > { %v12853_v43 = vpack.c.bf16 %v12821_v24, %v12820_v18  ;;  %v12427_v51 = vld [vmem:[#allocation2 + $0xf0] ss:$2 sm:$0xff]  ;;  %v12491_v8 = vld [vmem:[#allocation2 + $0xf1] ss:$2 sm:$0xff]  ;;  %12799 = vst.msk [vmem:[#allocation4 + $0xa8] sm:$0xff] %vm12101_vm3, %v12780_v36  ;;  %12137 = vst.msk [vmem:[#allocation2 + $0x118] sm:$0xff] %vm12101_vm3, %v12008_v28  ;;  %v19919_v30 = vadd.f32 %v19485_v53, %v22749_v31 }
 0x5d3   : > { %12726 = vst.msk [vmem:[#allocation4 + $0x18] sm:$0xff] %vm12101_vm3, %v12708_v23  ;;  %v12579_v15 = vmax.f32 %v12427_v51, %v12491_v8  ;;  %v12425_v55 = vld [vmem:[#allocation2 + $0xe0] ss:$2 sm:$0xff]  ;;  %v12489_v44 = vld [vmem:[#allocation2 + $0xe1] ss:$2 sm:$0xff]  ;;  %v11343_v57 = vpop.f32.mrb[37].mxu0 }
 0x5d4   : > { %12872 = vst.msk [vmem:[#allocation4 + $0x138] sm:$0xff] %vm12101_vm3, %v12853_v43  ;;  %v12578_v27 = vmax.f32 %v12425_v55, %v12489_v44  ;;  %12135 = vst.msk [vmem:[#allocation2 + $0x108] sm:$0xff] %vm12101_vm3, %v12006_v50  ;;  %v19920_v41 = vadd.f32 %v11343_v57, %v22755_v6  ;;  %v19486_v47 = vpop.f32.mrb[38].mxu0  ;;  %v11883_v54 = vadd.f32 %v19919_v30, %v23330_v33 }
 0x5d5   : > { %v12611_v2 = vmax.f32 %v12547_v46, %v12579_v15  ;;  %v19921_v39 = vadd.f32 %v19486_v47, %v22759_v45  ;;  %v11346_v4 = vpop.f32.mrb[39].mxu0 }
 0x5d6   : > { %v12610_v35 = vmax.f32 %v12546_v49, %v12578_v27  ;;  %v11881_v29 = vadd.f32 %v19920_v41, %v23330_v33  ;;  %v19922_v31 = vadd.f32 %v11346_v4, %v22763_v48  ;;  %v12011_v9 = vmax.f32 %v11883_v54, 0.0 }
 0x5d7   : > { %12644 = vst.msk [vmem:[#allocation3 + $0x69] sm:$0xff] %vm12101_vm3, %v12611_v2  ;;  %v11884_v38 = vadd.f32 %v19921_v39, %v23330_v33 }
 0x5d8   : > { %12643 = vst.msk [vmem:[#allocation3 + $0x61] sm:$0xff] %vm12101_vm3, %v12610_v35  ;;  %v12009_v6 = vmax.f32 %v11881_v29, 0.0  ;;  %v11882_v37 = vadd.f32 %v19922_v31, %v23330_v33  ;;  %12140 = vst.msk [vmem:[#allocation2 + $0x130] sm:$0xff] %vm12101_vm3, %v12011_v9 }
 0x5d9   : > { %v12012_v12 = vmax.f32 %v11884_v38, 0.0  ;;  %v12908_v45 = vld [vmem:[#allocation4 + $0xa8] sm:$0xff]  ;;  %v19489_v58 = vpop.f32.mrb[40].mxu0 }
 0x5da   : > { %12138 = vst.msk [vmem:[#allocation2 + $0x120] sm:$0xff] %vm12101_vm3, %v12009_v6  ;;  %v12010_v32 = vmax.f32 %v11882_v37, 0.0  ;;  %19582 = vmatmul.mubr.msk.bf16.gmra.mrb[132].mxu1 %vm12101_vm3, %v12908_v45  ;;  %v19923_v48 = vadd.f32 %v19489_v58, %v22769_v5  ;;  %v11359_v40 = vpop.f32.mrb[41].mxu0  ;;  %v12303_v17 = vld [vmem:[#allocation2 + $0x110] ss:$2 sm:$0xff]  ;;  %v21751_v58 = vld [vmem:[%s24301_s3] sm:$0xff]  }
 0x5db   : > { %12141 = vst.msk [vmem:[#allocation2 + $0x138] sm:$0xff] %vm12101_vm3, %v12012_v12  ;;  %v19924_v42 = vadd.f32 %v11359_v40, %v22772_v52  ;;  %v19490_v19 = vpop.f32.mrb[42].mxu0  ;;  %v12367_v52 = vld [vmem:[#allocation2 + $0x111] ss:$2 sm:$0xff]  ;;  %v12301_v18 = vld [vmem:[#allocation2 + $0x100] ss:$2 sm:$0xff]  ;;  %19609 = vmatprep.subr.bf16.mxu1 %v21751_v58 }
 0x5dc   : > { %12139 = vst.msk [vmem:[#allocation2 + $0x128] sm:$0xff] %vm12101_vm3, %v12010_v32  ;;  %v11887_v25 = vadd.f32 %v19923_v48, %v23330_v33  ;;  %v19925_v60 = vadd.f32 %v19490_v19, %v22776_v56  ;;  %v11362_v34 = vpop.f32.mrb[43].mxu0  ;;  %v12365_v0 = vld [vmem:[#allocation2 + $0x101] ss:$2 sm:$0xff]  ;;  %v12549_v50 = vmax.f32 %v12303_v17, %v12367_v52  ;;  %19610 = vmatpush3.bf16.msra.mxu1 %v21751_v58 }
 0x5dd   : > { %v11885_v21 = vadd.f32 %v19924_v42, %v23330_v33  ;;  %v19926_v24 = vadd.f32 %v11362_v34, %v22779_v61  ;;  %v12548_v30 = vmax.f32 %v12301_v18, %v12365_v0  ;;  %v24383_v12 = vld [vmem:[#allocation6_spill] sm:$0xff]  ;;  %v24384_v40 = vld [vmem:[#allocation7_spill] sm:$0xff] }
 0x5de   : > { %v12750_v63 = vld [vmem:[#allocation3 + $0x69] sm:$0xff]  ;;  %v12015_v11 = vmax.f32 %v11887_v25, 0.0  ;;  %v11888_v5 = vadd.f32 %v19925_v60, %v23330_v33 }
 0x5df   : > { %v12823_v14 = vld [vmem:[#allocation3 + $0x6a] sm:$0xff]  ;;  %v12749_v13 = vld [vmem:[#allocation3 + $0x61] sm:$0xff]  ;;  %v12013_v16 = vmax.f32 %v11885_v21, 0.0  ;;  %v11886_v7 = vadd.f32 %v19926_v24, %v23330_v33 }
 0x5e0   : > { %v12677_v26 = vld [vmem:[#allocation3 + $0x60] sm:$0xff]  ;;  %v12678_v1 = vld [vmem:[#allocation3 + $0x68] sm:$0xff]  ;;  %v12781_v36 = vpack.c.bf16 %v12750_v63, %v12749_v13  ;;  %12144 = vst.msk [vmem:[#allocation2 + $0x150] sm:$0xff] %vm12101_vm3, %v12015_v11  ;;  %v12016_v61 = vmax.f32 %v11888_v5, 0.0  ;;  %v24385_v60 = vld [vmem:[#allocation8_spill] sm:$0xff] }
 0x5e1   : > { %v12709_v56 = vpack.c.bf16 %v12678_v1, %v12677_v26  ;;  %v12822_v23 = vld [vmem:[#allocation3 + $0x62] sm:$0xff]  ;;  %12142 = vst.msk [vmem:[#allocation2 + $0x140] sm:$0xff] %vm12101_vm3, %v12013_v16  ;;  %v12014_v51 = vmax.f32 %v11886_v7, 0.0  ;;  %v19493_v8 = vpop.f32.mrb[44].mxu0 }
 0x5e2   : > { %v12854_v59 = vpack.c.bf16 %v12823_v14, %v12822_v23  ;;  %v12431_v28 = vld [vmem:[#allocation2 + $0x130] ss:$2 sm:$0xff]  ;;  %v12495_v43 = vld [vmem:[#allocation2 + $0x131] ss:$2 sm:$0xff]  ;;  %12800 = vst.msk [vmem:[#allocation4 + $0xb0] sm:$0xff] %vm12101_vm3, %v12781_v36  ;;  %12145 = vst.msk [vmem:[#allocation2 + $0x158] sm:$0xff] %vm12101_vm3, %v12016_v61  ;;  %v19927_v55 = vadd.f32 %v19493_v8, %v22785_v62 }
 0x5e3   : > { %12727 = vst.msk [vmem:[#allocation4 + $0x20] sm:$0xff] %vm12101_vm3, %v12709_v56  ;;  %v12581_v53 = vmax.f32 %v12431_v28, %v12495_v43  ;;  %v12429_v46 = vld [vmem:[#allocation2 + $0x120] ss:$2 sm:$0xff]  ;;  %v12493_v15 = vld [vmem:[#allocation2 + $0x121] ss:$2 sm:$0xff]  ;;  %v11375_v44 = vpop.f32.mrb[45].mxu0 }
 0x5e4   : > { %12873 = vst.msk [vmem:[#allocation4 + $0x140] sm:$0xff] %vm12101_vm3, %v12854_v59  ;;  %v12580_v57 = vmax.f32 %v12429_v46, %v12493_v15  ;;  %12143 = vst.msk [vmem:[#allocation2 + $0x148] sm:$0xff] %vm12101_vm3, %v12014_v51  ;;  %v19928_v49 = vadd.f32 %v11375_v44, %v22788_v3  ;;  %v19494_v27 = vpop.f32.mrb[46].mxu0  ;;  %v11891_v47 = vadd.f32 %v19927_v55, %v23330_v33 }
 0x5e5   : > { %v12613_v41 = vmax.f32 %v12549_v50, %v12581_v53  ;;  %v19929_v2 = vadd.f32 %v19494_v27, %v22792_v10  ;;  %v11378_v54 = vpop.f32.mrb[47].mxu0  ;;  %v24386_v53 = vld [vmem:[#allocation9_spill] sm:$0xff] }
 0x5e6   : > { %v12612_v39 = vmax.f32 %v12548_v30, %v12580_v57  ;;  %v11889_v4 = vadd.f32 %v19928_v49, %v23330_v33  ;;  %v19930_v62 = vadd.f32 %v11378_v54, %v22795_v20  ;;  %v12019_v35 = vmax.f32 %v11891_v47, 0.0  ;;  %v24387_v30 = vld [vmem:[#allocation10_spill] sm:$0xff]  ;;  %v24388_v47 = vld [vmem:[#allocation11_spill] sm:$0xff] }
 0x5e7   : > { %12646 = vst.msk [vmem:[#allocation3 + $0x81] sm:$0xff] %vm12101_vm3, %v12613_v41  ;;  %v11892_v29 = vadd.f32 %v19929_v2, %v23330_v33 }
 0x5e8   : > { %12645 = vst.msk [vmem:[#allocation3 + $0x79] sm:$0xff] %vm12101_vm3, %v12612_v39  ;;  %v12017_v3 = vmax.f32 %v11889_v4, 0.0  ;;  %v11890_v31 = vadd.f32 %v19930_v62, %v23330_v33  ;;  %12148 = vst.msk [vmem:[#allocation2 + $0x170] sm:$0xff] %vm12101_vm3, %v12019_v35  ;;  %v24389_v62 = vld [vmem:[#allocation12_spill] sm:$0xff] }
 0x5e9   : > { %v12020_v9 = vmax.f32 %v11892_v29, 0.0  ;;  %v12909_v10 = vld [vmem:[#allocation4 + $0xb0] sm:$0xff]  ;;  %v19497_v6 = vpop.f32.mrb[48].mxu0  ;;  %v12307_v13 = vld [vmem:[#allocation2 + $0x150] ss:$2 sm:$0xff] }
 0x5ea   : > { %12146 = vst.msk [vmem:[#allocation2 + $0x160] sm:$0xff] %vm12101_vm3, %v12017_v3  ;;  %v12018_v38 = vmax.f32 %v11890_v31, 0.0  ;;  %19585 = vmatprep.mubr.msk.bf16.mxu1 %vm12101_vm3, %v12909_v10  ;;  %v19931_v20 = vadd.f32 %v19497_v6, %v22801_v22  ;;  %v11391_v37 = vpop.f32.mrb[49].mxu0  ;;  %v12371_v26 = vld [vmem:[#allocation2 + $0x151] ss:$2 sm:$0xff] }
 0x5eb   : > { %12149 = vst.msk [vmem:[#allocation2 + $0x178] sm:$0xff] %vm12101_vm3, %v12020_v9  ;;  %v19932_v45 = vadd.f32 %v11391_v37, %v24383_v12  ;;  %v19498_v32 = vpop.f32.mrb[50].mxu0  ;;  %v12305_v36 = vld [vmem:[#allocation2 + $0x140] ss:$2 sm:$0xff]  ;;  %v12369_v56 = vld [vmem:[#allocation2 + $0x141] ss:$2 sm:$0xff]  ;;  %v12551_v43 = vmax.f32 %v12307_v13, %v12371_v26 }
 0x5ec   : > { %12147 = vst.msk [vmem:[#allocation2 + $0x168] sm:$0xff] %vm12101_vm3, %v12018_v38  ;;  %v11895_v48 = vadd.f32 %v19931_v20, %v23330_v33  ;;  %v19933_v42 = vadd.f32 %v19498_v32, %v24384_v40  ;;  %v11394_v19 = vpop.f32.mrb[51].mxu0  ;;  %v12550_v55 = vmax.f32 %v12305_v36, %v12369_v56  ;;  %v24390_v37 = vld [vmem:[#allocation13_spill] sm:$0xff]  ;;  %v24391_v32 = vld [vmem:[#allocation14_spill] sm:$0xff] }
 0x5ed   : > { %v11893_v25 = vadd.f32 %v19932_v45, %v23330_v33  ;;  %v19934_v34 = vadd.f32 %v11394_v19, %v24385_v60 }
 0x5ee   : > { %v12752_v22 = vld [vmem:[#allocation3 + $0x81] sm:$0xff]  ;;  %v12023_v24 = vmax.f32 %v11895_v48, 0.0  ;;  %v11896_v63 = vadd.f32 %v19933_v42, %v23330_v33 }
 0x5ef   : > { %v12825_v21 = vld [vmem:[#allocation3 + $0x82] sm:$0xff]  ;;  %v12751_v14 = vld [vmem:[#allocation3 + $0x79] sm:$0xff]  ;;  %v12021_v1 = vmax.f32 %v11893_v25, 0.0  ;;  %v11894_v17 = vadd.f32 %v19934_v34, %v23330_v33  ;;  %v24393_v34 = vld [vmem:[#allocation16_spill] sm:$0xff] }
 0x5f0   : > { %v12679_v11 = vld [vmem:[#allocation3 + $0x78] sm:$0xff]  ;;  %v12680_v5 = vld [vmem:[#allocation3 + $0x80] sm:$0xff]  ;;  %v12782_v52 = vpack.c.bf16 %v12752_v22, %v12751_v14  ;;  %12152 = vst.msk [vmem:[#allocation2 + $0x190] sm:$0xff] %vm12101_vm3, %v12023_v24  ;;  %v12024_v23 = vmax.f32 %v11896_v63, 0.0  ;;  %v24392_v42 = vld [vmem:[#allocation15_spill] sm:$0xff] }
 0x5f1   : > { %v12710_v16 = vpack.c.bf16 %v12680_v5, %v12679_v11  ;;  %v12824_v7 = vld [vmem:[#allocation3 + $0x7a] sm:$0xff]  ;;  %12150 = vst.msk [vmem:[#allocation2 + $0x180] sm:$0xff] %vm12101_vm3, %v12021_v1  ;;  %v12022_v59 = vmax.f32 %v11894_v17, 0.0  ;;  %v19501_v28 = vpop.f32.mrb[52].mxu0 }
 0x5f2   : > { %v12855_v18 = vpack.c.bf16 %v12825_v21, %v12824_v7  ;;  %v12435_v0 = vld [vmem:[#allocation2 + $0x170] ss:$2 sm:$0xff]  ;;  %v12499_v61 = vld [vmem:[#allocation2 + $0x171] ss:$2 sm:$0xff]  ;;  %12801 = vst.msk [vmem:[#allocation4 + $0xb8] sm:$0xff] %vm12101_vm3, %v12782_v52  ;;  %12153 = vst.msk [vmem:[#allocation2 + $0x198] sm:$0xff] %vm12101_vm3, %v12024_v23  ;;  %v19935_v46 = vadd.f32 %v19501_v28, %v24386_v53 }
 0x5f3   : > { %12728 = vst.msk [vmem:[#allocation4 + $0x28] sm:$0xff] %vm12101_vm3, %v12710_v16  ;;  %v12583_v51 = vmax.f32 %v12435_v0, %v12499_v61  ;;  %v12433_v8 = vld [vmem:[#allocation2 + $0x160] ss:$2 sm:$0xff]  ;;  %v12497_v50 = vld [vmem:[#allocation2 + $0x161] ss:$2 sm:$0xff]  ;;  %v11407_v15 = vpop.f32.mrb[53].mxu0 }
 0x5f4   : > { %12874 = vst.msk [vmem:[#allocation4 + $0x148] sm:$0xff] %vm12101_vm3, %v12855_v18  ;;  %v12582_v44 = vmax.f32 %v12433_v8, %v12497_v50  ;;  %12151 = vst.msk [vmem:[#allocation2 + $0x188] sm:$0xff] %vm12101_vm3, %v12022_v59  ;;  %v19936_v57 = vadd.f32 %v11407_v15, %v24387_v30  ;;  %v19502_v49 = vpop.f32.mrb[54].mxu0  ;;  %v11899_v41 = vadd.f32 %v19935_v46, %v23330_v33  ;;  %v24394_v53 = vld [vmem:[#allocation17_spill] sm:$0xff]  ;;  %v24395_v30 = vld [vmem:[#allocation18_spill] sm:$0xff] }
 0x5f5   : > { %v12615_v27 = vmax.f32 %v12551_v43, %v12583_v51  ;;  %v19937_v2 = vadd.f32 %v19502_v49, %v24388_v47  ;;  %v11410_v54 = vpop.f32.mrb[55].mxu0 }
 0x5f6   : > { %v12614_v39 = vmax.f32 %v12550_v55, %v12582_v44  ;;  %v11897_v4 = vadd.f32 %v19936_v57, %v23330_v33  ;;  %v19938_v35 = vadd.f32 %v11410_v54, %v24389_v62  ;;  %v12027_v29 = vmax.f32 %v11899_v41, 0.0  ;;  %v23573_v41 = vld [vmem:[%s24300_s2] ss:$0 sm:$0xff] }
 0x5f7   : > { %12648 = vst.msk [vmem:[#allocation3 + $0x99] sm:$0xff] %vm12101_vm3, %v12615_v27  ;;  %v11900_v3 = vadd.f32 %v19937_v2, %v23330_v33  ;;  %v24396_v2 = vld [vmem:[#allocation19_spill] sm:$0xff] }
 0x5f8   : > { %12647 = vst.msk [vmem:[#allocation3 + $0x91] sm:$0xff] %vm12101_vm3, %v12614_v39  ;;  %v12025_v31 = vmax.f32 %v11897_v4, 0.0  ;;  %v11898_v9 = vadd.f32 %v19938_v35, %v23330_v33  ;;  %12156 = vst.msk [vmem:[#allocation2 + $0x1b0] sm:$0xff] %vm12101_vm3, %v12027_v29  ;;  %v24397_v35 = vld [vmem:[#allocation20_spill] sm:$0xff] }
 0x5f9   : > { %v12028_v10 = vmax.f32 %v11900_v3, 0.0  ;;  %v12910_v38 = vld [vmem:[#allocation4 + $0xb8] sm:$0xff]  ;;  %v19505_v20 = vpop.f32.mrb[56].mxu0  ;;  %v12311_v26 = vld [vmem:[#allocation2 + $0x190] ss:$2 sm:$0xff] }
 0x5fa   : > { %12154 = vst.msk [vmem:[#allocation2 + $0x1a0] sm:$0xff] %vm12101_vm3, %v12025_v31  ;;  %v12026_v6 = vmax.f32 %v11898_v9, 0.0  ;;  %19586 = vmatmul.mubr.msk.bf16.gmra.mrb[136].mxu1 %vm12101_vm3, %v12910_v38  ;;  %v19939_v12 = vadd.f32 %v19505_v20, %v24390_v37  ;;  %v11423_v45 = vpop.f32.mrb[57].mxu0  ;;  %v12375_v1 = vld [vmem:[#allocation2 + $0x191] ss:$2 sm:$0xff] }
 0x5fb   : > { %12157 = vst.msk [vmem:[#allocation2 + $0x1b8] sm:$0xff] %vm12101_vm3, %v12028_v10  ;;  %v19940_v58 = vadd.f32 %v11423_v45, %v24391_v32  ;;  %v19506_v48 = vpop.f32.mrb[58].mxu0  ;;  %v12309_v56 = vld [vmem:[#allocation2 + $0x180] ss:$2 sm:$0xff]  ;;  %v12373_v23 = vld [vmem:[#allocation2 + $0x181] ss:$2 sm:$0xff] }
 0x5fc   : > { %12155 = vst.msk [vmem:[#allocation2 + $0x1a8] sm:$0xff] %vm12101_vm3, %v12026_v6  ;;  %v11903_v40 = vadd.f32 %v19939_v12, %v23330_v33  ;;  %v19941_v19 = vadd.f32 %v19506_v48, %v24392_v42  ;;  %v11426_v25 = vpop.f32.mrb[59].mxu0  ;;  %v12552_v55 = vmax.f32 %v12309_v56, %v12373_v23  ;;  %v24398_v12 = vld [vmem:[#allocation21_spill] sm:$0xff] }
 0x5fd   : > { %v11901_v60 = vadd.f32 %v19940_v58, %v23330_v33  ;;  %v19942_v22 = vadd.f32 %v11426_v25, %v24393_v34  ;;  %v24399_v58 = vld [vmem:[#allocation22_spill] sm:$0xff] }
 0x5fe   : > { %v12754_v21 = vld [vmem:[#allocation3 + $0x99] sm:$0xff]  ;;  %v12031_v63 = vmax.f32 %v11903_v40, 0.0  ;;  %v11904_v14 = vadd.f32 %v19941_v19, %v23330_v33  ;;  %v24400_v19 = vld [vmem:[#allocation23_spill] sm:$0xff] }
 0x5ff   : > { %v12827_v24 = vld [vmem:[#allocation3 + $0x9a] sm:$0xff]  ;;  %v12753_v11 = vld [vmem:[#allocation3 + $0x91] sm:$0xff]  ;;  %v12029_v17 = vmax.f32 %v11901_v60, 0.0  ;;  %v11902_v52 = vadd.f32 %v19942_v22, %v23330_v33  ;;  %v12553_v33 = vmax.f32 %v12311_v26, %v12375_v1 }
 0x600   : > { %v12681_v5 = vld [vmem:[#allocation3 + $0x90] sm:$0xff]  ;;  %v12682_v13 = vld [vmem:[#allocation3 + $0x98] sm:$0xff]  ;;  %v12783_v16 = vpack.c.bf16 %v12754_v21, %v12753_v11  ;;  %12160 = vst.msk [vmem:[#allocation2 + $0x1d0] sm:$0xff] %vm12101_vm3, %v12031_v63  ;;  %v12032_v18 = vmax.f32 %v11904_v14, 0.0 }
 0x601   : > { %v12711_v7 = vpack.c.bf16 %v12682_v13, %v12681_v5  ;;  %v12826_v36 = vld [vmem:[#allocation3 + $0x92] sm:$0xff]  ;;  %12158 = vst.msk [vmem:[#allocation2 + $0x1c0] sm:$0xff] %vm12101_vm3, %v12029_v17  ;;  %v12030_v28 = vmax.f32 %v11902_v52, 0.0  ;;  %v19509_v43 = vpop.f32.mrb[60].mxu0 }
 0x602   : > { %v12856_v0 = vpack.c.bf16 %v12827_v24, %v12826_v36  ;;  %v12439_v61 = vld [vmem:[#allocation2 + $0x1b0] ss:$2 sm:$0xff]  ;;  %v12503_v59 = vld [vmem:[#allocation2 + $0x1b1] ss:$2 sm:$0xff]  ;;  %12802 = vst.msk [vmem:[#allocation4 + $0xc0] sm:$0xff] %vm12101_vm3, %v12783_v16  ;;  %12161 = vst.msk [vmem:[#allocation2 + $0x1d8] sm:$0xff] %vm12101_vm3, %v12032_v18  ;;  %v19943_v46 = vadd.f32 %v19509_v43, %v24394_v53 }
 0x603   : > { %12729 = vst.msk [vmem:[#allocation4 + $0x30] sm:$0xff] %vm12101_vm3, %v12711_v7  ;;  %v12585_v51 = vmax.f32 %v12439_v61, %v12503_v59  ;;  %v12437_v8 = vld [vmem:[#allocation2 + $0x1a0] ss:$2 sm:$0xff]  ;;  %v12501_v50 = vld [vmem:[#allocation2 + $0x1a1] ss:$2 sm:$0xff]  ;;  %v11439_v15 = vpop.f32.mrb[61].mxu0 }
 0x604   : > { %12875 = vst.msk [vmem:[#allocation4 + $0x150] sm:$0xff] %vm12101_vm3, %v12856_v0  ;;  %v12584_v44 = vmax.f32 %v12437_v8, %v12501_v50  ;;  %12159 = vst.msk [vmem:[#allocation2 + $0x1c8] sm:$0xff] %vm12101_vm3, %v12030_v28  ;;  %v19944_v57 = vadd.f32 %v11439_v15, %v24395_v30  ;;  %v19510_v49 = vpop.f32.mrb[62].mxu0  ;;  %v11907_v47 = vadd.f32 %v23573_v41, %v19943_v46  ;;  %v24401_v22 = vld [vmem:[#allocation24_spill] sm:$0xff]  ;;  %v24402_v46 = vld [vmem:[#allocation25_spill] sm:$0xff] }
 0x605   : > { %v12617_v27 = vmax.f32 %v12553_v33, %v12585_v51  ;;  %v19945_v54 = vadd.f32 %v19510_v49, %v24396_v2  ;;  %v11442_v39 = vpop.f32.mrb[63].mxu0 }
 0x606   : > { %v12616_v4 = vmax.f32 %v12552_v55, %v12584_v44  ;;  %v11905_v62 = vadd.f32 %v23573_v41, %v19944_v57  ;;  %v19946_v29 = vadd.f32 %v11442_v39, %v24397_v35  ;;  %v12035_v3 = vmax.f32 %v11907_v47, 0.0  ;;  %v24403_v57 = vld [vmem:[#allocation26_spill] sm:$0xff] }
 0x607   : > { %12650 = vst.msk [vmem:[#allocation3 + $0xb1] sm:$0xff] %vm12101_vm3, %v12617_v27  ;;  %v11908_v31 = vadd.f32 %v23573_v41, %v19945_v54  ;;  %v24404_v54 = vld [vmem:[#allocation27_spill] sm:$0xff] }
 0x608   : > { %12649 = vst.msk [vmem:[#allocation3 + $0xa9] sm:$0xff] %vm12101_vm3, %v12616_v4  ;;  %v12033_v9 = vmax.f32 %v11905_v62, 0.0  ;;  %v11906_v10 = vadd.f32 %v23573_v41, %v19946_v29  ;;  %12164 = vst.msk [vmem:[#allocation2 + $0x1f0] sm:$0xff] %vm12101_vm3, %v12035_v3  ;;  %v24405_v29 = vld [vmem:[#allocation28_spill] sm:$0xff] }
 0x609   : > { %v12036_v38 = vmax.f32 %v11908_v31, 0.0  ;;  %v12911_v6 = vld [vmem:[#allocation4 + $0xc0] sm:$0xff]  ;;  %v19513_v37 = vpop.f32.mrb[64].mxu0  ;;  %v12669_v31 = vld [vmem:[#allocation3] sm:$0xff] }
 0x60a   : > { %12162 = vst.msk [vmem:[#allocation2 + $0x1e0] sm:$0xff] %vm12101_vm3, %v12033_v9  ;;  %v12034_v20 = vmax.f32 %v11906_v10, 0.0  ;;  %19589 = vmatprep.mubr.msk.bf16.mxu1 %vm12101_vm3, %v12911_v6  ;;  %v19947_v45 = vadd.f32 %v19513_v37, %v24398_v12  ;;  %v11455_v32 = vpop.f32.mrb[65].mxu0  ;;  %v12315_v1 = vld [vmem:[#allocation2 + $0x1d0] ss:$2 sm:$0xff]  ;;  %v12670_v9 = vld [vmem:[#allocation3 + $0x8] sm:$0xff] }
 0x60b   : > { %12165 = vst.msk [vmem:[#allocation2 + $0x1f8] sm:$0xff] %vm12101_vm3, %v12036_v38  ;;  %v19948_v48 = vadd.f32 %v11455_v32, %v24399_v58  ;;  %v19514_v40 = vpop.f32.mrb[66].mxu0  ;;  %v12379_v17 = vld [vmem:[#allocation2 + $0x1d1] ss:$2 sm:$0xff]  ;;  %v12313_v23 = vld [vmem:[#allocation2 + $0x1c0] ss:$2 sm:$0xff]  ;;  %v12705_v6 = vpack.c.bf16 %v12670_v9, %v12669_v31 }
 0x60c   : > { %12163 = vst.msk [vmem:[#allocation2 + $0x1e8] sm:$0xff] %vm12101_vm3, %v12034_v20  ;;  %v11911_v42 = vadd.f32 %v23573_v41, %v19947_v45  ;;  %v19949_v25 = vadd.f32 %v19514_v40, %v24400_v19  ;;  %v11458_v60 = vpop.f32.mrb[67].mxu0  ;;  %v12377_v18 = vld [vmem:[#allocation2 + $0x1c1] ss:$2 sm:$0xff]  ;;  %v12555_v51 = vmax.f32 %v12315_v1, %v12379_v17  ;;  %v21752_v19 = vld [vmem:[%s24301_s3 + $0x10] sm:$0xff]  }
 0x60d   : > { %v11909_v34 = vadd.f32 %v23573_v41, %v19948_v48  ;;  %v19950_v21 = vadd.f32 %v11458_v60, %v24401_v22  ;;  %v12554_v44 = vmax.f32 %v12313_v23, %v12377_v18  ;;  %12723 = vst.msk [vmem:[#allocation4] sm:$0xff] %vm12101_vm3, %v12705_v6  ;;  %v24406_v48 = vld [vmem:[#allocation29_spill] sm:$0xff]  ;;  %19643 = vmatprep.subr.bf16.mxu1 %v21752_v19 }
 0x60e   : > { %v12756_v24 = vld [vmem:[#allocation3 + $0xb1] sm:$0xff]  ;;  %v12039_v14 = vmax.f32 %v11911_v42, 0.0  ;;  %v11912_v11 = vadd.f32 %v23573_v41, %v19949_v25  ;;  %v24407_v25 = vld [vmem:[#allocation30_spill] sm:$0xff] }
 0x60f   : > { %v12829_v63 = vld [vmem:[#allocation3 + $0xb2] sm:$0xff]  ;;  %v12755_v5 = vld [vmem:[#allocation3 + $0xa9] sm:$0xff]  ;;  %v12037_v52 = vmax.f32 %v11909_v34, 0.0  ;;  %v11910_v16 = vadd.f32 %v23573_v41, %v19950_v21 }
 0x610   : > { %v12683_v13 = vld [vmem:[#allocation3 + $0xa8] sm:$0xff]  ;;  %v12684_v26 = vld [vmem:[#allocation3 + $0xb0] sm:$0xff]  ;;  %v12784_v7 = vpack.c.bf16 %v12756_v24, %v12755_v5  ;;  %12168 = vst.msk [vmem:[#allocation2 + $0x210] sm:$0xff] %vm12101_vm3, %v12039_v14  ;;  %v12040_v0 = vmax.f32 %v11912_v11, 0.0 }
 0x611   : > { %v12712_v36 = vpack.c.bf16 %v12684_v26, %v12683_v13  ;;  %v12828_v56 = vld [vmem:[#allocation3 + $0xaa] sm:$0xff]  ;;  %12166 = vst.msk [vmem:[#allocation2 + $0x200] sm:$0xff] %vm12101_vm3, %v12037_v52  ;;  %v12038_v43 = vmax.f32 %v11910_v16, 0.0  ;;  %v19517_v33 = vpop.f32.mrb[68].mxu0 }
 0x612   : > { %v12857_v61 = vpack.c.bf16 %v12829_v63, %v12828_v56  ;;  %v12443_v59 = vld [vmem:[#allocation2 + $0x1f0] ss:$2 sm:$0xff]  ;;  %v12507_v28 = vld [vmem:[#allocation2 + $0x1f1] ss:$2 sm:$0xff]  ;;  %12803 = vst.msk [vmem:[#allocation4 + $0xc8] sm:$0xff] %vm12101_vm3, %v12784_v7  ;;  %12169 = vst.msk [vmem:[#allocation2 + $0x218] sm:$0xff] %vm12101_vm3, %v12040_v0  ;;  %v19951_v15 = vadd.f32 %v19517_v33, %v24402_v46 }
 0x613   : > { %12730 = vst.msk [vmem:[#allocation4 + $0x38] sm:$0xff] %vm12101_vm3, %v12712_v36  ;;  %v12587_v8 = vmax.f32 %v12443_v59, %v12507_v28  ;;  %v12441_v50 = vld [vmem:[#allocation2 + $0x1e0] ss:$2 sm:$0xff]  ;;  %v12505_v53 = vld [vmem:[#allocation2 + $0x1e1] ss:$2 sm:$0xff]  ;;  %v11471_v55 = vpop.f32.mrb[69].mxu0 }
 0x614   : > { %12876 = vst.msk [vmem:[#allocation4 + $0x158] sm:$0xff] %vm12101_vm3, %v12857_v61  ;;  %v12586_v30 = vmax.f32 %v12441_v50, %v12505_v53  ;;  %12167 = vst.msk [vmem:[#allocation2 + $0x208] sm:$0xff] %vm12101_vm3, %v12038_v43  ;;  %v19952_v49 = vadd.f32 %v11471_v55, %v24403_v57  ;;  %v19518_v27 = vpop.f32.mrb[70].mxu0  ;;  %v11915_v2 = vadd.f32 %v23573_v41, %v19951_v15  ;;  %v24408_v21 = vld [vmem:[#allocation31_spill] sm:$0xff]  ;;  %v24409_v11 = vld [vmem:[#allocation32_spill] sm:$0xff] }
 0x615   : > { %v12619_v47 = vmax.f32 %v12555_v51, %v12587_v8  ;;  %v19953_v39 = vadd.f32 %v19518_v27, %v24404_v54  ;;  %v11474_v4 = vpop.f32.mrb[71].mxu0  ;;  %v24410_v57 = vld [vmem:[#allocation33_spill] sm:$0xff]  ;;  %v24411_v54 = vld [vmem:[#allocation34_spill] sm:$0xff] }
 0x616   : > { %v12618_v62 = vmax.f32 %v12554_v44, %v12586_v30  ;;  %v11913_v35 = vadd.f32 %v23573_v41, %v19952_v49  ;;  %v19954_v3 = vadd.f32 %v11474_v4, %v24405_v29  ;;  %v12043_v10 = vmax.f32 %v11915_v2, 0.0  ;;  %v24412_v29 = vld [vmem:[#allocation35_spill] sm:$0xff] }
 0x617   : > { %12652 = vst.msk [vmem:[#allocation3 + $0xc9] sm:$0xff] %vm12101_vm3, %v12619_v47  ;;  %v11916_v38 = vadd.f32 %v23573_v41, %v19953_v39 }
 0x618   : > { %12651 = vst.msk [vmem:[#allocation3 + $0xc1] sm:$0xff] %vm12101_vm3, %v12618_v62  ;;  %v12041_v20 = vmax.f32 %v11913_v35, 0.0  ;;  %v11914_v37 = vadd.f32 %v23573_v41, %v19954_v3  ;;  %12172 = vst.msk [vmem:[#allocation2 + $0x230] sm:$0xff] %vm12101_vm3, %v12043_v10 }
 0x619   : > { %v12044_v12 = vmax.f32 %v11916_v38, 0.0  ;;  %v12912_v45 = vld [vmem:[#allocation4 + $0xc8] sm:$0xff]  ;;  %v19521_v58 = vpop.f32.mrb[72].mxu0  ;;  %v24413_v38 = vld [vmem:[#allocation36_spill] sm:$0xff] }
 0x61a   : > { %12170 = vst.msk [vmem:[#allocation2 + $0x220] sm:$0xff] %vm12101_vm3, %v12041_v20  ;;  %v12042_v32 = vmax.f32 %v11914_v37, 0.0  ;;  %19590 = vmatmul.mubr.msk.bf16.gmra.mrb[140].mxu1 %vm12101_vm3, %v12912_v45  ;;  %v19955_v40 = vadd.f32 %v19521_v58, %v24406_v48  ;;  %v11487_v42 = vpop.f32.mrb[73].mxu0  ;;  %v12319_v36 = vld [vmem:[#allocation2 + $0x210] ss:$2 sm:$0xff] }
 0x61b   : > { %12173 = vst.msk [vmem:[#allocation2 + $0x238] sm:$0xff] %vm12101_vm3, %v12044_v12  ;;  %v19956_v60 = vadd.f32 %v11487_v42, %v24407_v25  ;;  %v19522_v34 = vpop.f32.mrb[74].mxu0  ;;  %v12383_v56 = vld [vmem:[#allocation2 + $0x211] ss:$2 sm:$0xff]  ;;  %v12317_v28 = vld [vmem:[#allocation2 + $0x200] ss:$2 sm:$0xff] }
 0x61c   : > { %12171 = vst.msk [vmem:[#allocation2 + $0x228] sm:$0xff] %vm12101_vm3, %v12042_v32  ;;  %v11919_v22 = vadd.f32 %v23573_v41, %v19955_v40  ;;  %v19957_v24 = vadd.f32 %v19522_v34, %v24408_v21  ;;  %v11490_v63 = vpop.f32.mrb[75].mxu0  ;;  %v12381_v43 = vld [vmem:[#allocation2 + $0x201] ss:$2 sm:$0xff]  ;;  %v12557_v15 = vmax.f32 %v12319_v36, %v12383_v56  ;;  %v24414_v42 = vld [vmem:[#allocation37_spill] sm:$0xff] }
 0x61d   : > { %v11917_v14 = vadd.f32 %v23573_v41, %v19956_v60  ;;  %v19958_v5 = vadd.f32 %v11490_v63, %v24409_v11  ;;  %v12556_v47 = vmax.f32 %v12317_v28, %v12381_v43  ;;  %v24415_v60 = vld [vmem:[#allocation38_spill] sm:$0xff] }
 0x61e   : > { %v12758_v13 = vld [vmem:[#allocation3 + $0xc9] sm:$0xff]  ;;  %v12047_v1 = vmax.f32 %v11919_v22, 0.0  ;;  %v11920_v17 = vadd.f32 %v23573_v41, %v19957_v24 }
 0x61f   : > { %v12831_v26 = vld [vmem:[#allocation3 + $0xca] sm:$0xff]  ;;  %v12757_v52 = vld [vmem:[#allocation3 + $0xc1] sm:$0xff]  ;;  %v12045_v23 = vmax.f32 %v11917_v14, 0.0  ;;  %v11918_v18 = vadd.f32 %v23573_v41, %v19958_v5 }
 0x620   : > { %v12685_v16 = vld [vmem:[#allocation3 + $0xc0] sm:$0xff]  ;;  %v12686_v7 = vld [vmem:[#allocation3 + $0xc8] sm:$0xff]  ;;  %v12785_v0 = vpack.c.bf16 %v12758_v13, %v12757_v52  ;;  %12176 = vst.msk [vmem:[#allocation2 + $0x250] sm:$0xff] %vm12101_vm3, %v12047_v1  ;;  %v12048_v33 = vmax.f32 %v11920_v17, 0.0  ;;  %v24417_v5 = vld [vmem:[#allocation40_spill] sm:$0xff] }
 0x621   : > { %v12713_v61 = vpack.c.bf16 %v12686_v7, %v12685_v16  ;;  %v12830_v59 = vld [vmem:[#allocation3 + $0xc2] sm:$0xff]  ;;  %12174 = vst.msk [vmem:[#allocation2 + $0x240] sm:$0xff] %vm12101_vm3, %v12045_v23  ;;  %v12046_v53 = vmax.f32 %v11918_v18, 0.0  ;;  %v19525_v46 = vpop.f32.mrb[76].mxu0 }
 0x622   : > { %v12858_v51 = vpack.c.bf16 %v12831_v26, %v12830_v59  ;;  %v12447_v8 = vld [vmem:[#allocation2 + $0x230] ss:$2 sm:$0xff]  ;;  %v12511_v50 = vld [vmem:[#allocation2 + $0x231] ss:$2 sm:$0xff]  ;;  %12804 = vst.msk [vmem:[#allocation4 + $0xd0] sm:$0xff] %vm12101_vm3, %v12785_v0  ;;  %12177 = vst.msk [vmem:[#allocation2 + $0x258] sm:$0xff] %vm12101_vm3, %v12048_v33  ;;  %v19959_v49 = vadd.f32 %v19525_v46, %v24410_v57 }
 0x623   : > { %12731 = vst.msk [vmem:[#allocation4 + $0x40] sm:$0xff] %vm12101_vm3, %v12713_v61  ;;  %v12589_v55 = vmax.f32 %v12447_v8, %v12511_v50  ;;  %v12445_v44 = vld [vmem:[#allocation2 + $0x220] ss:$2 sm:$0xff]  ;;  %v12509_v30 = vld [vmem:[#allocation2 + $0x221] ss:$2 sm:$0xff]  ;;  %v11503_v27 = vpop.f32.mrb[77].mxu0 }
 0x624   : > { %12877 = vst.msk [vmem:[#allocation4 + $0x160] sm:$0xff] %vm12101_vm3, %v12858_v51  ;;  %v12588_v2 = vmax.f32 %v12445_v44, %v12509_v30  ;;  %12175 = vst.msk [vmem:[#allocation2 + $0x248] sm:$0xff] %vm12101_vm3, %v12046_v53  ;;  %v19960_v39 = vadd.f32 %v11503_v27, %v24411_v54  ;;  %v19526_v4 = vpop.f32.mrb[78].mxu0  ;;  %v11923_v35 = vadd.f32 %v23573_v41, %v19959_v49  ;;  %v24416_v24 = vld [vmem:[#allocation39_spill] sm:$0xff]  ;;  %v24418_v49 = vld [vmem:[#allocation41_spill] sm:$0xff] }
 0x625   : > { %v12621_v62 = vmax.f32 %v12557_v15, %v12589_v55  ;;  %v19961_v3 = vadd.f32 %v19526_v4, %v24412_v29  ;;  %v11506_v31 = vpop.f32.mrb[79].mxu0 }
 0x626   : > { %v12620_v9 = vmax.f32 %v12556_v47, %v12588_v2  ;;  %v11921_v10 = vadd.f32 %v23573_v41, %v19960_v39  ;;  %v19962_v6 = vadd.f32 %v11506_v31, %v24413_v38  ;;  %v12051_v20 = vmax.f32 %v11923_v35, 0.0  ;;  %v24419_v39 = vld [vmem:[#allocation42_spill] sm:$0xff] }
 0x627   : > { %12654 = vst.msk [vmem:[#allocation3 + $0xe1] sm:$0xff] %vm12101_vm3, %v12621_v62  ;;  %v11924_v37 = vadd.f32 %v23573_v41, %v19961_v3  ;;  %v24420_v3 = vld [vmem:[#allocation43_spill] sm:$0xff] }
 0x628   : > { %12653 = vst.msk [vmem:[#allocation3 + $0xd9] sm:$0xff] %vm12101_vm3, %v12620_v9  ;;  %v12049_v12 = vmax.f32 %v11921_v10, 0.0  ;;  %v11922_v45 = vadd.f32 %v23573_v41, %v19962_v6  ;;  %12180 = vst.msk [vmem:[#allocation2 + $0x270] sm:$0xff] %vm12101_vm3, %v12051_v20  ;;  %v24421_v6 = vld [vmem:[#allocation44_spill] sm:$0xff] }
 0x629   : > { %v12052_v32 = vmax.f32 %v11924_v37, 0.0  ;;  %v12913_v58 = vld [vmem:[#allocation4 + $0xd0] sm:$0xff]  ;;  %v19529_v40 = vpop.f32.mrb[80].mxu0  ;;  %v12323_v56 = vld [vmem:[#allocation2 + $0x250] ss:$2 sm:$0xff] }
 0x62a   : > { %12178 = vst.msk [vmem:[#allocation2 + $0x260] sm:$0xff] %vm12101_vm3, %v12049_v12  ;;  %v12050_v48 = vmax.f32 %v11922_v45, 0.0  ;;  %19593 = vmatprep.mubr.msk.bf16.mxu1 %vm12101_vm3, %v12913_v58  ;;  %v19963_v19 = vadd.f32 %v19529_v40, %v24414_v42  ;;  %v11519_v25 = vpop.f32.mrb[81].mxu0  ;;  %v12387_v23 = vld [vmem:[#allocation2 + $0x251] ss:$2 sm:$0xff] }
 0x62b   : > { %12181 = vst.msk [vmem:[#allocation2 + $0x278] sm:$0xff] %vm12101_vm3, %v12052_v32  ;;  %v19964_v34 = vadd.f32 %v11519_v25, %v24415_v60  ;;  %v19530_v22 = vpop.f32.mrb[82].mxu0  ;;  %v12321_v43 = vld [vmem:[#allocation2 + $0x240] ss:$2 sm:$0xff]  ;;  %v12385_v33 = vld [vmem:[#allocation2 + $0x241] ss:$2 sm:$0xff]  ;;  %v12559_v55 = vmax.f32 %v12323_v56, %v12387_v23 }
 0x62c   : > { %12179 = vst.msk [vmem:[#allocation2 + $0x268] sm:$0xff] %vm12101_vm3, %v12050_v48  ;;  %v11927_v21 = vadd.f32 %v23573_v41, %v19963_v19  ;;  %v19965_v63 = vadd.f32 %v19530_v22, %v24416_v24  ;;  %v11522_v14 = vpop.f32.mrb[83].mxu0  ;;  %v12558_v2 = vmax.f32 %v12321_v43, %v12385_v33  ;;  %v24422_v19 = vld [vmem:[#allocation45_spill] sm:$0xff] }
 0x62d   : > { %v11925_v11 = vadd.f32 %v23573_v41, %v19964_v34  ;;  %v19966_v13 = vadd.f32 %v11522_v14, %v24417_v5  ;;  %v24423_v34 = vld [vmem:[#allocation46_spill] sm:$0xff] }
 0x62e   : > { %v12760_v26 = vld [vmem:[#allocation3 + $0xe1] sm:$0xff]  ;;  %v12055_v17 = vmax.f32 %v11927_v21, 0.0  ;;  %v11928_v52 = vadd.f32 %v23573_v41, %v19965_v63 }
 0x62f   : > { %v12833_v1 = vld [vmem:[#allocation3 + $0xe2] sm:$0xff]  ;;  %v12759_v16 = vld [vmem:[#allocation3 + $0xd9] sm:$0xff]  ;;  %v12053_v18 = vmax.f32 %v11925_v11, 0.0  ;;  %v11926_v0 = vadd.f32 %v23573_v41, %v19966_v13  ;;  %v24425_v13 = vld [vmem:[#allocation48_spill] sm:$0xff] }
 0x630   : > { %v12687_v7 = vld [vmem:[#allocation3 + $0xd8] sm:$0xff]  ;;  %v12688_v36 = vld [vmem:[#allocation3 + $0xe0] sm:$0xff]  ;;  %v12786_v61 = vpack.c.bf16 %v12760_v26, %v12759_v16  ;;  %12184 = vst.msk [vmem:[#allocation2 + $0x290] sm:$0xff] %vm12101_vm3, %v12055_v17  ;;  %v12056_v51 = vmax.f32 %v11928_v52, 0.0  ;;  %v24424_v63 = vld [vmem:[#allocation47_spill] sm:$0xff] }
 0x631   : > { %v12714_v59 = vpack.c.bf16 %v12688_v36, %v12687_v7  ;;  %v12832_v28 = vld [vmem:[#allocation3 + $0xda] sm:$0xff]  ;;  %12182 = vst.msk [vmem:[#allocation2 + $0x280] sm:$0xff] %vm12101_vm3, %v12053_v18  ;;  %v12054_v46 = vmax.f32 %v11926_v0, 0.0  ;;  %v19533_v15 = vpop.f32.mrb[84].mxu0 }
 0x632   : > { %v12859_v8 = vpack.c.bf16 %v12833_v1, %v12832_v28  ;;  %v12451_v50 = vld [vmem:[#allocation2 + $0x270] ss:$2 sm:$0xff]  ;;  %v12515_v53 = vld [vmem:[#allocation2 + $0x271] ss:$2 sm:$0xff]  ;;  %12805 = vst.msk [vmem:[#allocation4 + $0xd8] sm:$0xff] %vm12101_vm3, %v12786_v61  ;;  %12185 = vst.msk [vmem:[#allocation2 + $0x298] sm:$0xff] %vm12101_vm3, %v12056_v51  ;;  %v19967_v27 = vadd.f32 %v19533_v15, %v24418_v49 }
 0x633   : > { %12732 = vst.msk [vmem:[#allocation4 + $0x48] sm:$0xff] %vm12101_vm3, %v12714_v59  ;;  %v12591_v44 = vmax.f32 %v12451_v50, %v12515_v53  ;;  %v12449_v30 = vld [vmem:[#allocation2 + $0x260] ss:$2 sm:$0xff]  ;;  %v12513_v57 = vld [vmem:[#allocation2 + $0x261] ss:$2 sm:$0xff]  ;;  %v11535_v47 = vpop.f32.mrb[85].mxu0 }
 0x634   : > { %12878 = vst.msk [vmem:[#allocation4 + $0x168] sm:$0xff] %vm12101_vm3, %v12859_v8  ;;  %v12590_v54 = vmax.f32 %v12449_v30, %v12513_v57  ;;  %12183 = vst.msk [vmem:[#allocation2 + $0x288] sm:$0xff] %vm12101_vm3, %v12054_v46  ;;  %v19968_v4 = vadd.f32 %v11535_v47, %v24419_v39  ;;  %v19534_v62 = vpop.f32.mrb[86].mxu0  ;;  %v11931_v29 = vadd.f32 %v23573_v41, %v19967_v27  ;;  %v24426_v27 = vld [vmem:[#allocation49_spill] sm:$0xff] }
 0x635   : > { %v12623_v35 = vmax.f32 %v12559_v55, %v12591_v44  ;;  %v19969_v31 = vadd.f32 %v19534_v62, %v24420_v3  ;;  %v11538_v9 = vpop.f32.mrb[87].mxu0 }
 0x636   : > { %v12622_v10 = vmax.f32 %v12558_v2, %v12590_v54  ;;  %v11929_v38 = vadd.f32 %v23573_v41, %v19968_v4  ;;  %v19970_v20 = vadd.f32 %v11538_v9, %v24421_v6  ;;  %v12059_v37 = vmax.f32 %v11931_v29, 0.0  ;;  %v24427_v4 = vld [vmem:[#allocation50_spill] sm:$0xff] }
 0x637   : > { %12656 = vst.msk [vmem:[#allocation3 + $0xf9] sm:$0xff] %vm12101_vm3, %v12623_v35  ;;  %v11932_v12 = vadd.f32 %v23573_v41, %v19969_v31  ;;  %v24428_v31 = vld [vmem:[#allocation51_spill] sm:$0xff] }
 0x638   : > { %12655 = vst.msk [vmem:[#allocation3 + $0xf1] sm:$0xff] %vm12101_vm3, %v12622_v10  ;;  %v12057_v45 = vmax.f32 %v11929_v38, 0.0  ;;  %v11930_v32 = vadd.f32 %v23573_v41, %v19970_v20  ;;  %12188 = vst.msk [vmem:[#allocation2 + $0x2b0] sm:$0xff] %vm12101_vm3, %v12059_v37  ;;  %v24429_v20 = vld [vmem:[#allocation52_spill] sm:$0xff] }
 0x639   : > { %v12060_v58 = vmax.f32 %v11932_v12, 0.0  ;;  %v12914_v48 = vld [vmem:[#allocation4 + $0xd8] sm:$0xff]  ;;  %v19537_v42 = vpop.f32.mrb[88].mxu0  ;;  %v12327_v23 = vld [vmem:[#allocation2 + $0x290] ss:$2 sm:$0xff] }
 0x63a   : > { %12186 = vst.msk [vmem:[#allocation2 + $0x2a0] sm:$0xff] %vm12101_vm3, %v12057_v45  ;;  %v12058_v40 = vmax.f32 %v11930_v32, 0.0  ;;  %19594 = vmatmul.mubr.msk.bf16.gmra.mrb[144].mxu1 %vm12101_vm3, %v12914_v48  ;;  %v19971_v25 = vadd.f32 %v19537_v42, %v24422_v19  ;;  %v11551_v60 = vpop.f32.mrb[89].mxu0  ;;  %v12391_v18 = vld [vmem:[#allocation2 + $0x291] ss:$2 sm:$0xff] }
 0x63b   : > { %12189 = vst.msk [vmem:[#allocation2 + $0x2b8] sm:$0xff] %vm12101_vm3, %v12060_v58  ;;  %v19972_v22 = vadd.f32 %v11551_v60, %v24423_v34  ;;  %v19538_v21 = vpop.f32.mrb[90].mxu0  ;;  %v12325_v33 = vld [vmem:[#allocation2 + $0x280] ss:$2 sm:$0xff]  ;;  %v12389_v51 = vld [vmem:[#allocation2 + $0x281] ss:$2 sm:$0xff]  ;;  %v12561_v44 = vmax.f32 %v12327_v23, %v12391_v18 }
 0x63c   : > { %12187 = vst.msk [vmem:[#allocation2 + $0x2a8] sm:$0xff] %vm12101_vm3, %v12058_v40  ;;  %v11935_v24 = vadd.f32 %v23573_v41, %v19971_v25  ;;  %v19973_v14 = vadd.f32 %v19538_v21, %v24424_v63  ;;  %v11554_v11 = vpop.f32.mrb[91].mxu0  ;;  %v12560_v54 = vmax.f32 %v12325_v33, %v12389_v51  ;;  %v24430_v25 = vld [vmem:[#allocation53_spill] sm:$0xff] }
 0x63d   : > { %v11933_v5 = vadd.f32 %v23573_v41, %v19972_v22  ;;  %v19974_v26 = vadd.f32 %v11554_v11, %v24425_v13  ;;  %v24431_v22 = vld [vmem:[#allocation54_spill] sm:$0xff] }
 0x63e   : > { %v12762_v1 = vld [vmem:[#allocation3 + $0xf9] sm:$0xff]  ;;  %v12063_v52 = vmax.f32 %v11935_v24, 0.0  ;;  %v11936_v16 = vadd.f32 %v23573_v41, %v19973_v14  ;;  %v24432_v14 = vld [vmem:[#allocation55_spill] sm:$0xff] }
 0x63f   : > { %v12835_v17 = vld [vmem:[#allocation3 + $0xfa] sm:$0xff]  ;;  %v12761_v7 = vld [vmem:[#allocation3 + $0xf1] sm:$0xff]  ;;  %v12061_v0 = vmax.f32 %v11933_v5, 0.0  ;;  %v11934_v61 = vadd.f32 %v23573_v41, %v19974_v26 }
 0x640   : > { %v12689_v36 = vld [vmem:[#allocation3 + $0xf0] sm:$0xff]  ;;  %v12690_v56 = vld [vmem:[#allocation3 + $0xf8] sm:$0xff]  ;;  %v12787_v59 = vpack.c.bf16 %v12762_v1, %v12761_v7  ;;  %12192 = vst.msk [vmem:[#allocation2 + $0x2d0] sm:$0xff] %vm12101_vm3, %v12063_v52  ;;  %v12064_v8 = vmax.f32 %v11936_v16, 0.0 }
 0x641   : > { %v12715_v28 = vpack.c.bf16 %v12690_v56, %v12689_v36  ;;  %v12834_v43 = vld [vmem:[#allocation3 + $0xf2] sm:$0xff]  ;;  %12190 = vst.msk [vmem:[#allocation2 + $0x2c0] sm:$0xff] %vm12101_vm3, %v12061_v0  ;;  %v12062_v15 = vmax.f32 %v11934_v61, 0.0  ;;  %v19541_v55 = vpop.f32.mrb[92].mxu0 }
 0x642   : > { %v12860_v50 = vpack.c.bf16 %v12835_v17, %v12834_v43  ;;  %v12455_v53 = vld [vmem:[#allocation2 + $0x2b0] ss:$2 sm:$0xff]  ;;  %v12519_v46 = vld [vmem:[#allocation2 + $0x2b1] ss:$2 sm:$0xff]  ;;  %12806 = vst.msk [vmem:[#allocation4 + $0xe0] sm:$0xff] %vm12101_vm3, %v12787_v59  ;;  %12193 = vst.msk [vmem:[#allocation2 + $0x2d8] sm:$0xff] %vm12101_vm3, %v12064_v8  ;;  %v19975_v47 = vadd.f32 %v19541_v55, %v24426_v27 }
 0x643   : > { %12733 = vst.msk [vmem:[#allocation4 + $0x50] sm:$0xff] %vm12101_vm3, %v12715_v28  ;;  %v12593_v30 = vmax.f32 %v12455_v53, %v12519_v46  ;;  %v12453_v57 = vld [vmem:[#allocation2 + $0x2a0] ss:$2 sm:$0xff]  ;;  %v12517_v49 = vld [vmem:[#allocation2 + $0x2a1] ss:$2 sm:$0xff]  ;;  %v11567_v2 = vpop.f32.mrb[93].mxu0 }
 0x644   : > { %12879 = vst.msk [vmem:[#allocation4 + $0x170] sm:$0xff] %vm12101_vm3, %v12860_v50  ;;  %v12592_v39 = vmax.f32 %v12453_v57, %v12517_v49  ;;  %12191 = vst.msk [vmem:[#allocation2 + $0x2c8] sm:$0xff] %vm12101_vm3, %v12062_v15  ;;  %v19976_v62 = vadd.f32 %v11567_v2, %v24427_v4  ;;  %v19542_v35 = vpop.f32.mrb[94].mxu0  ;;  %v11939_v3 = vadd.f32 %v23573_v41, %v19975_v47  ;;  %v24433_v26 = vld [vmem:[#allocation56_spill] sm:$0xff]  ;;  %v24434_v47 = vld [vmem:[#allocation57_spill] sm:$0xff] }
 0x645   : > { %v12625_v29 = vmax.f32 %v12561_v44, %v12593_v30  ;;  %v19977_v9 = vadd.f32 %v19542_v35, %v24428_v31  ;;  %v11570_v10 = vpop.f32.mrb[95].mxu0 }
 0x646   : > { %v12624_v38 = vmax.f32 %v12560_v54, %v12592_v39  ;;  %v11937_v6 = vadd.f32 %v23573_v41, %v19976_v62  ;;  %v19978_v37 = vadd.f32 %v11570_v10, %v24429_v20  ;;  %v12067_v12 = vmax.f32 %v11939_v3, 0.0  ;;  %v24435_v62 = vld [vmem:[#allocation58_spill] sm:$0xff] }
 0x647   : > { %12658 = vst.msk [vmem:[#allocation3 + $0x111] sm:$0xff] %vm12101_vm3, %v12625_v29  ;;  %v11940_v45 = vadd.f32 %v23573_v41, %v19977_v9  ;;  %v24436_v9 = vld [vmem:[#allocation59_spill] sm:$0xff] }
 0x648   : > { %12657 = vst.msk [vmem:[#allocation3 + $0x109] sm:$0xff] %vm12101_vm3, %v12624_v38  ;;  %v12065_v32 = vmax.f32 %v11937_v6, 0.0  ;;  %v11938_v58 = vadd.f32 %v23573_v41, %v19978_v37  ;;  %12196 = vst.msk [vmem:[#allocation2 + $0x2f0] sm:$0xff] %vm12101_vm3, %v12067_v12  ;;  %v24437_v37 = vld [vmem:[#allocation60_spill] sm:$0xff] }
 0x649   : > { %v12068_v48 = vmax.f32 %v11940_v45, 0.0  ;;  %v12915_v40 = vld [vmem:[#allocation4 + $0xe0] sm:$0xff]  ;;  %v19545_v19 = vpop.f32.mrb[96].mxu0  ;;  %v12814_v45 = vld [vmem:[#allocation3 + $0x2] sm:$0xff] }
 0x64a   : > { %12194 = vst.msk [vmem:[#allocation2 + $0x2e0] sm:$0xff] %vm12101_vm3, %v12065_v32  ;;  %v12066_v42 = vmax.f32 %v11938_v58, 0.0  ;;  %19597 = vmatprep.mubr.msk.bf16.mxu1 %vm12101_vm3, %v12915_v40  ;;  %v19979_v60 = vadd.f32 %v19545_v19, %v24430_v25  ;;  %v11583_v34 = vpop.f32.mrb[97].mxu0  ;;  %v12331_v18 = vld [vmem:[#allocation2 + $0x2d0] ss:$2 sm:$0xff] }
 0x64b   : > { %12197 = vst.msk [vmem:[#allocation2 + $0x2f8] sm:$0xff] %vm12101_vm3, %v12068_v48  ;;  %v19980_v21 = vadd.f32 %v11583_v34, %v24431_v22  ;;  %v19546_v24 = vpop.f32.mrb[98].mxu0  ;;  %v12395_v0 = vld [vmem:[#allocation2 + $0x2d1] ss:$2 sm:$0xff]  ;;  %v12329_v51 = vld [vmem:[#allocation2 + $0x2c0] ss:$2 sm:$0xff] }
 0x64c   : > { %12195 = vst.msk [vmem:[#allocation2 + $0x2e8] sm:$0xff] %vm12101_vm3, %v12066_v42  ;;  %v11943_v63 = vadd.f32 %v23573_v41, %v19979_v60  ;;  %v19981_v11 = vadd.f32 %v19546_v24, %v24432_v14  ;;  %v11586_v5 = vpop.f32.mrb[99].mxu0  ;;  %v12393_v8 = vld [vmem:[#allocation2 + $0x2c1] ss:$2 sm:$0xff]  ;;  %v12563_v30 = vmax.f32 %v12331_v18, %v12395_v0 }
 0x64d   : > { %v11941_v13 = vadd.f32 %v23573_v41, %v19980_v21  ;;  %v19982_v1 = vadd.f32 %v11586_v5, %v24433_v26  ;;  %v12562_v39 = vmax.f32 %v12329_v51, %v12393_v8  ;;  %v12815_v32 = vld [vmem:[#allocation3 + $0xa] sm:$0xff]  ;;  %v24438_v21 = vld [vmem:[#allocation61_spill] sm:$0xff]  ;;  %v24439_v14 = vld [vmem:[#allocation62_spill] sm:$0xff] }
 0x64e   : > { %v12764_v17 = vld [vmem:[#allocation3 + $0x111] sm:$0xff]  ;;  %v12071_v16 = vmax.f32 %v11943_v63, 0.0  ;;  %v11944_v7 = vadd.f32 %v23573_v41, %v19981_v11  ;;  %v12850_v40 = vpack.c.bf16 %v12815_v32, %v12814_v45  ;;  %v24440_v26 = vld [vmem:[#allocation63_spill] sm:$0xff] }
 0x64f   : > { %v12837_v52 = vld [vmem:[#allocation3 + $0x112] sm:$0xff]  ;;  %v12763_v36 = vld [vmem:[#allocation3 + $0x109] sm:$0xff]  ;;  %v12069_v61 = vmax.f32 %v11941_v13, 0.0  ;;  %v11942_v59 = vadd.f32 %v23573_v41, %v19982_v1 }
 0x650   : > { %v12691_v56 = vld [vmem:[#allocation3 + $0x108] sm:$0xff]  ;;  %v12692_v23 = vld [vmem:[#allocation3 + $0x110] sm:$0xff]  ;;  %v12788_v28 = vpack.c.bf16 %v12764_v17, %v12763_v36  ;;  %12200 = vst.msk [vmem:[#allocation2 + $0x310] sm:$0xff] %vm12101_vm3, %v12071_v16  ;;  %v12072_v50 = vmax.f32 %v11944_v7, 0.0  ;;  %12869 = vst.msk [vmem:[#allocation4 + $0x120] sm:$0xff] %vm12101_vm3, %v12850_v40 }
 0x651   : > { %v12716_v43 = vpack.c.bf16 %v12692_v23, %v12691_v56  ;;  %v12836_v33 = vld [vmem:[#allocation3 + $0x10a] sm:$0xff]  ;;  %12198 = vst.msk [vmem:[#allocation2 + $0x300] sm:$0xff] %vm12101_vm3, %v12069_v61  ;;  %v12070_v55 = vmax.f32 %v11942_v59, 0.0  ;;  %v19549_v44 = vpop.f32.mrb[100].mxu0 }
 0x652   : > { %v12861_v53 = vpack.c.bf16 %v12837_v52, %v12836_v33  ;;  %v12459_v46 = vld [vmem:[#allocation2 + $0x2f0] ss:$2 sm:$0xff]  ;;  %v12523_v15 = vld [vmem:[#allocation2 + $0x2f1] ss:$2 sm:$0xff]  ;;  %12807 = vst.msk [vmem:[#allocation4 + $0xe8] sm:$0xff] %vm12101_vm3, %v12788_v28  ;;  %12201 = vst.msk [vmem:[#allocation2 + $0x318] sm:$0xff] %vm12101_vm3, %v12072_v50  ;;  %v19983_v2 = vadd.f32 %v19549_v44, %v24434_v47 }
 0x653   : > { %12734 = vst.msk [vmem:[#allocation4 + $0x58] sm:$0xff] %vm12101_vm3, %v12716_v43  ;;  %v12595_v57 = vmax.f32 %v12459_v46, %v12523_v15  ;;  %v12457_v49 = vld [vmem:[#allocation2 + $0x2e0] ss:$2 sm:$0xff]  ;;  %v12521_v27 = vld [vmem:[#allocation2 + $0x2e1] ss:$2 sm:$0xff]  ;;  %v11599_v54 = vpop.f32.mrb[101].mxu0 }
 0x654   : > { %12880 = vst.msk [vmem:[#allocation4 + $0x178] sm:$0xff] %vm12101_vm3, %v12861_v53  ;;  %v12594_v4 = vmax.f32 %v12457_v49, %v12521_v27  ;;  %12199 = vst.msk [vmem:[#allocation2 + $0x308] sm:$0xff] %vm12101_vm3, %v12070_v55  ;;  %v19984_v35 = vadd.f32 %v11599_v54, %v24435_v62  ;;  %v19550_v29 = vpop.f32.mrb[102].mxu0  ;;  %v11947_v31 = vadd.f32 %v23573_v41, %v19983_v2  ;;  %v24441_v16 = vld [vmem:[#allocation64_spill] sm:$0xff] }
 0x655   : > { %v12627_v3 = vmax.f32 %v12563_v30, %v12595_v57  ;;  %v19985_v10 = vadd.f32 %v19550_v29, %v24436_v9  ;;  %v11602_v38 = vpop.f32.mrb[103].mxu0 }
 0x656   : > { %v12626_v6 = vmax.f32 %v12562_v39, %v12594_v4  ;;  %v11945_v20 = vadd.f32 %v23573_v41, %v19984_v35  ;;  %v19986_v12 = vadd.f32 %v11602_v38, %v24437_v37  ;;  %v12075_v58 = vmax.f32 %v11947_v31, 0.0  ;;  %v24442_v4 = vld [vmem:[#allocation65_spill] sm:$0xff]  ;;  %v24443_v31 = vld [vmem:[#allocation66_spill] sm:$0xff] }
 0x657   : > { %12660 = vst.msk [vmem:[#allocation3 + $0x129] sm:$0xff] %vm12101_vm3, %v12627_v3  ;;  %v11948_v48 = vadd.f32 %v23573_v41, %v19985_v10 }
 0x658   : > { %12659 = vst.msk [vmem:[#allocation3 + $0x121] sm:$0xff] %vm12101_vm3, %v12626_v6  ;;  %v12073_v42 = vmax.f32 %v11945_v20, 0.0  ;;  %v11946_v19 = vadd.f32 %v23573_v41, %v19986_v12  ;;  %12204 = vst.msk [vmem:[#allocation2 + $0x330] sm:$0xff] %vm12101_vm3, %v12075_v58  ;;  %v24444_v20 = vld [vmem:[#allocation67_spill] sm:$0xff]  ;;  %v24445_v58 = vld [vmem:[#allocation68_spill] sm:$0xff] }
 0x659   : > { %v12076_v25 = vmax.f32 %v11948_v48, 0.0  ;;  %v23738_v60 = vld [vmem:[#allocation4 + $0xe8] sm:$0xff]  ;;  %v19553_v22 = vpop.f32.mrb[104].mxu0 }
 0x65a   : > { %12202 = vst.msk [vmem:[#allocation2 + $0x320] sm:$0xff] %vm12101_vm3, %v12073_v42  ;;  %v12074_v34 = vmax.f32 %v11946_v19, 0.0  ;;  %19598 = vmatmul.mubr.msk.bf16.gmra.mrb[148].mxu1 %vm12101_vm3, %v23738_v60  ;;  %v19987_v24 = vadd.f32 %v19553_v22, %v24438_v21  ;;  %v11615_v63 = vpop.f32.mrb[105].mxu0  ;;  %v12335_v28 = vld [vmem:[#allocation2 + $0x310] ss:$2 sm:$0xff] }
 0x65b   : > { %12205 = vst.msk [vmem:[#allocation2 + $0x338] sm:$0xff] %vm12101_vm3, %v12076_v25  ;;  %v19988_v11 = vadd.f32 %v11615_v63, %v24439_v14  ;;  %v19554_v5 = vpop.f32.mrb[106].mxu0  ;;  %v12399_v43 = vld [vmem:[#allocation2 + $0x311] ss:$2 sm:$0xff]  ;;  %v12333_v46 = vld [vmem:[#allocation2 + $0x300] ss:$2 sm:$0xff] }
 0x65c   : > { %12203 = vst.msk [vmem:[#allocation2 + $0x328] sm:$0xff] %vm12101_vm3, %v12074_v34  ;;  %v11951_v13 = vadd.f32 %v23573_v41, %v19987_v24  ;;  %v19989_v1 = vadd.f32 %v19554_v5, %v24440_v26  ;;  %v11618_v17 = vpop.f32.mrb[107].mxu0  ;;  %v12397_v15 = vld [vmem:[#allocation2 + $0x301] ss:$2 sm:$0xff]  ;;  %v12565_v47 = vmax.f32 %v12335_v28, %v12399_v43  ;;  %v24446_v63 = vld [vmem:[#allocation69_spill] sm:$0xff] }
 0x65d   : > { %v11949_v52 = vadd.f32 %v23573_v41, %v19988_v11  ;;  %v19990_v7 = vadd.f32 %v11618_v17, %v24441_v16  ;;  %v12564_v29 = vmax.f32 %v12333_v46, %v12397_v15  ;;  %v24447_v5 = vld [vmem:[#allocation70_spill] sm:$0xff]  ;;  %v24448_v17 = vld [vmem:[#allocation71_spill] sm:$0xff] }
 0x65e   : > { %v12766_v36 = vld [vmem:[#allocation3 + $0x129] sm:$0xff]  ;;  %v12079_v23 = vmax.f32 %v11951_v13, 0.0  ;;  %v11952_v18 = vadd.f32 %v23573_v41, %v19989_v1 }
 0x65f   : > { %v12839_v56 = vld [vmem:[#allocation3 + $0x12a] sm:$0xff]  ;;  %v12765_v0 = vld [vmem:[#allocation3 + $0x121] sm:$0xff]  ;;  %v12077_v33 = vmax.f32 %v11949_v52, 0.0  ;;  %v11950_v51 = vadd.f32 %v23573_v41, %v19990_v7 }
 0x660   : > { %v12693_v61 = vld [vmem:[#allocation3 + $0x120] sm:$0xff]  ;;  %v12694_v59 = vld [vmem:[#allocation3 + $0x128] sm:$0xff]  ;;  %v12789_v8 = vpack.c.bf16 %v12766_v36, %v12765_v0  ;;  %12208 = vst.msk [vmem:[#allocation2 + $0x350] sm:$0xff] %vm12101_vm3, %v12079_v23  ;;  %v12080_v55 = vmax.f32 %v11952_v18, 0.0  ;;  %v24449_v36 = vld [vmem:[#allocation72_spill] sm:$0xff] }
 0x661   : > { %v12717_v50 = vpack.c.bf16 %v12694_v59, %v12693_v61  ;;  %v12838_v53 = vld [vmem:[#allocation3 + $0x122] sm:$0xff]  ;;  %12206 = vst.msk [vmem:[#allocation2 + $0x340] sm:$0xff] %vm12101_vm3, %v12077_v33  ;;  %v12078_v49 = vmax.f32 %v11950_v51, 0.0  ;;  %v19557_v27 = vpop.f32.mrb[108].mxu0 }
 0x662   : > { %v12862_v44 = vpack.c.bf16 %v12839_v56, %v12838_v53  ;;  %v12463_v30 = vld [vmem:[#allocation2 + $0x330] ss:$2 sm:$0xff]  ;;  %v12527_v57 = vld [vmem:[#allocation2 + $0x331] ss:$2 sm:$0xff]  ;;  %12808 = vst.msk [vmem:[#allocation4 + $0xf0] sm:$0xff] %vm12101_vm3, %v12789_v8  ;;  %12209 = vst.msk [vmem:[#allocation2 + $0x358] sm:$0xff] %vm12101_vm3, %v12080_v55  ;;  %v19991_v62 = vadd.f32 %v19557_v27, %v24442_v4 }
 0x663   : > { %12735 = vst.msk [vmem:[#allocation4 + $0x60] sm:$0xff] %vm12101_vm3, %v12717_v50  ;;  %v12597_v2 = vmax.f32 %v12463_v30, %v12527_v57  ;;  %v12461_v54 = vld [vmem:[#allocation2 + $0x320] ss:$2 sm:$0xff]  ;;  %v12525_v39 = vld [vmem:[#allocation2 + $0x321] ss:$2 sm:$0xff]  ;;  %v11631_v35 = vpop.f32.mrb[109].mxu0 }
 0x664   : > { %12881 = vst.msk [vmem:[#allocation4 + $0x180] sm:$0xff] %vm12101_vm3, %v12862_v44  ;;  %v12596_v3 = vmax.f32 %v12461_v54, %v12525_v39  ;;  %12207 = vst.msk [vmem:[#allocation2 + $0x348] sm:$0xff] %vm12101_vm3, %v12078_v49  ;;  %v19992_v9 = vadd.f32 %v11631_v35, %v24443_v31  ;;  %v19558_v10 = vpop.f32.mrb[110].mxu0  ;;  %v11955_v6 = vadd.f32 %v23573_v41, %v19991_v62  ;;  %v24450_v35 = vld [vmem:[#allocation73_spill] sm:$0xff] }
 0x665   : > { %v12629_v38 = vmax.f32 %v12565_v47, %v12597_v2  ;;  %v19993_v37 = vadd.f32 %v19558_v10, %v24444_v20  ;;  %v11634_v12 = vpop.f32.mrb[111].mxu0  ;;  %v24451_v10 = vld [vmem:[#allocation74_spill] sm:$0xff] }
 0x666   : > { %v12628_v45 = vmax.f32 %v12564_v29, %v12596_v3  ;;  %v11953_v32 = vadd.f32 %v23573_v41, %v19992_v9  ;;  %v19994_v48 = vadd.f32 %v11634_v12, %v24445_v58  ;;  %v12083_v40 = vmax.f32 %v11955_v6, 0.0  ;;  %v24452_v12 = vld [vmem:[#allocation75_spill] sm:$0xff] }
 0x667   : > { %12662 = vst.msk [vmem:[#allocation3 + $0x141] sm:$0xff] %vm12101_vm3, %v12629_v38  ;;  %v11956_v42 = vadd.f32 %v23573_v41, %v19993_v37 }
 0x668   : > { %12661 = vst.msk [vmem:[#allocation3 + $0x139] sm:$0xff] %vm12101_vm3, %v12628_v45  ;;  %v12081_v19 = vmax.f32 %v11953_v32, 0.0  ;;  %v11954_v25 = vadd.f32 %v23573_v41, %v19994_v48  ;;  %12212 = vst.msk [vmem:[#allocation2 + $0x370] sm:$0xff] %vm12101_vm3, %v12083_v40  ;;  %v24453_v40 = vld [vmem:[#allocation76_spill] sm:$0xff] }
 0x669   : > { %v12084_v34 = vmax.f32 %v11956_v42, 0.0  ;;  %v23772_v22 = vld [vmem:[#allocation4 + $0xf0] sm:$0xff]  ;;  %v19561_v24 = vpop.f32.mrb[112].mxu0  ;;  %v12339_v33 = vld [vmem:[#allocation2 + $0x350] ss:$2 sm:$0xff] }
 0x66a   : > { %12210 = vst.msk [vmem:[#allocation2 + $0x360] sm:$0xff] %vm12101_vm3, %v12081_v19  ;;  %v12082_v21 = vmax.f32 %v11954_v25, 0.0  ;;  %19601 = vmatprep.mubr.msk.bf16.mxu1 %vm12101_vm3, %v23772_v22  ;;  %v19995_v14 = vadd.f32 %v19561_v24, %v24446_v63  ;;  %v11647_v11 = vpop.f32.mrb[113].mxu0  ;;  %v12403_v51 = vld [vmem:[#allocation2 + $0x351] ss:$2 sm:$0xff] }
 0x66b   : > { %12213 = vst.msk [vmem:[#allocation2 + $0x378] sm:$0xff] %vm12101_vm3, %v12084_v34  ;;  %v19996_v13 = vadd.f32 %v11647_v11, %v24447_v5  ;;  %v19562_v26 = vpop.f32.mrb[114].mxu0  ;;  %v12337_v55 = vld [vmem:[#allocation2 + $0x340] ss:$2 sm:$0xff]  ;;  %v12401_v44 = vld [vmem:[#allocation2 + $0x341] ss:$2 sm:$0xff]  ;;  %v12567_v54 = vmax.f32 %v12339_v33, %v12403_v51 }
 0x66c   : > { %12211 = vst.msk [vmem:[#allocation2 + $0x368] sm:$0xff] %vm12101_vm3, %v12082_v21  ;;  %v11959_v1 = vadd.f32 %v23573_v41, %v19995_v14  ;;  %v19997_v52 = vadd.f32 %v19562_v26, %v24448_v17  ;;  %v11650_v16 = vpop.f32.mrb[115].mxu0  ;;  %v12566_v31 = vmax.f32 %v12337_v55, %v12401_v44  ;;  %v24454_v5 = vld [vmem:[#allocation77_spill] sm:$0xff] }
 0x66d   : > { %v11957_v7 = vadd.f32 %v23573_v41, %v19996_v13  ;;  %v19998_v56 = vadd.f32 %v11650_v16, %v24449_v36 }
 0x66e   : > { %v12768_v23 = vld [vmem:[#allocation3 + $0x141] sm:$0xff]  ;;  %v12087_v0 = vmax.f32 %v11959_v1, 0.0  ;;  %v11960_v61 = vadd.f32 %v23573_v41, %v19997_v52  ;;  %v21760_v52 = vld [vmem:[%s24300_s2] ss:$0 sm:$0xff] }
 0x66f   : > { %v12841_v18 = vld [vmem:[#allocation3 + $0x142] sm:$0xff]  ;;  %v12767_v59 = vld [vmem:[#allocation3 + $0x139] sm:$0xff]  ;;  %v12085_v8 = vmax.f32 %v11957_v7, 0.0  ;;  %v11958_v50 = vadd.f32 %v23573_v41, %v19998_v56 }
 0x670   : > { %v12695_v28 = vld [vmem:[#allocation3 + $0x138] sm:$0xff]  ;;  %v12696_v43 = vld [vmem:[#allocation3 + $0x140] sm:$0xff]  ;;  %v12790_v53 = vpack.c.bf16 %v12768_v23, %v12767_v59  ;;  %12216 = vst.msk [vmem:[#allocation2 + $0x390] sm:$0xff] %vm12101_vm3, %v12087_v0  ;;  %v12088_v30 = vmax.f32 %v11960_v61, 0.0  ;;  %v24456_v7 = vld [vmem:[#allocation79_spill] sm:$0xff] }
 0x671   : > { %v12718_v46 = vpack.c.bf16 %v12696_v43, %v12695_v28  ;;  %v12840_v15 = vld [vmem:[#allocation3 + $0x13a] sm:$0xff]  ;;  %12214 = vst.msk [vmem:[#allocation2 + $0x380] sm:$0xff] %vm12101_vm3, %v12085_v8  ;;  %v12086_v47 = vmax.f32 %v11958_v50, 0.0  ;;  %v19565_v2 = vpop.f32.mrb[116].mxu0 }
 0x672   : > { %v12863_v57 = vpack.c.bf16 %v12841_v18, %v12840_v15  ;;  %v12467_v49 = vld [vmem:[#allocation2 + $0x370] ss:$2 sm:$0xff]  ;;  %v12531_v27 = vld [vmem:[#allocation2 + $0x371] ss:$2 sm:$0xff]  ;;  %12809 = vst.msk [vmem:[#allocation4 + $0xf8] sm:$0xff] %vm12101_vm3, %v12790_v53  ;;  %12217 = vst.msk [vmem:[#allocation2 + $0x398] sm:$0xff] %vm12101_vm3, %v12088_v30  ;;  %v19999_v29 = vadd.f32 %v19565_v2, %v24450_v35 }
 0x673   : > { %12736 = vst.msk [vmem:[#allocation4 + $0x68] sm:$0xff] %vm12101_vm3, %v12718_v46  ;;  %v12599_v39 = vmax.f32 %v12467_v49, %v12531_v27  ;;  %v12465_v4 = vld [vmem:[#allocation2 + $0x360] ss:$2 sm:$0xff]  ;;  %v12529_v62 = vld [vmem:[#allocation2 + $0x361] ss:$2 sm:$0xff]  ;;  %v11663_v3 = vpop.f32.mrb[117].mxu0 }
 0x674   : > { %12882 = vst.msk [vmem:[#allocation4 + $0x188] sm:$0xff] %vm12101_vm3, %v12863_v57  ;;  %v12598_v9 = vmax.f32 %v12465_v4, %v12529_v62  ;;  %12215 = vst.msk [vmem:[#allocation2 + $0x388] sm:$0xff] %vm12101_vm3, %v12086_v47  ;;  %v20000_v38 = vadd.f32 %v11663_v3, %v24451_v10  ;;  %v19566_v6 = vpop.f32.mrb[118].mxu0  ;;  %v11963_v37 = vadd.f32 %v23573_v41, %v19999_v29  ;;  %v24457_v18 = vld [vmem:[#allocation80_spill] sm:$0xff] }
 0x675   : > { %v12631_v20 = vmax.f32 %v12567_v54, %v12599_v39  ;;  %v20001_v45 = vadd.f32 %v19566_v6, %v24452_v12  ;;  %v11666_v32 = vpop.f32.mrb[119].mxu0 }
 0x676   : > { %v12630_v58 = vmax.f32 %v12566_v31, %v12598_v9  ;;  %v11961_v48 = vadd.f32 %v23573_v41, %v20000_v38  ;;  %v20002_v42 = vadd.f32 %v11666_v32, %v24453_v40  ;;  %v12091_v19 = vmax.f32 %v11963_v37, 0.0  ;;  %v24458_v31 = vld [vmem:[#allocation81_spill] sm:$0xff] }
 0x677   : > { %12664 = vst.msk [vmem:[#allocation3 + $0x159] sm:$0xff] %vm12101_vm3, %v12631_v20  ;;  %v11964_v25 = vadd.f32 %v23573_v41, %v20001_v45  ;;  %v24459_v20 = vld [vmem:[#allocation82_spill] sm:$0xff] }
 0x678   : > { %12663 = vst.msk [vmem:[#allocation3 + $0x151] sm:$0xff] %vm12101_vm3, %v12630_v58  ;;  %v12089_v34 = vmax.f32 %v11961_v48, 0.0  ;;  %v11962_v21 = vadd.f32 %v23573_v41, %v20002_v42  ;;  %12220 = vst.msk [vmem:[#allocation2 + $0x3b0] sm:$0xff] %vm12101_vm3, %v12091_v19  ;;  %v24455_v41 = vld [vmem:[#allocation78_spill] sm:$0xff]  ;;  %v24460_v58 = vld [vmem:[#allocation83_spill] sm:$0xff] }
 0x679   : > { %v12092_v24 = vmax.f32 %v11964_v25, 0.0  ;;  %v23805_v63 = vld [vmem:[#allocation4 + $0xf8] sm:$0xff]  ;;  %v19569_v11 = vpop.f32.mrb[120].mxu0  ;;  %v12343_v50 = vld [vmem:[#allocation2 + $0x390] ss:$2 sm:$0xff] }
 0x67a   : > { %12218 = vst.msk [vmem:[#allocation2 + $0x3a0] sm:$0xff] %vm12101_vm3, %v12089_v34  ;;  %v12090_v14 = vmax.f32 %v11962_v21, 0.0  ;;  %19602 = vmatmul.mubr.msk.bf16.gmra.mrb[152].mxu1 %vm12101_vm3, %v23805_v63  ;;  %v20003_v13 = vadd.f32 %v19569_v11, %v24454_v5  ;;  %v11679_v26 = vpop.f32.mrb[121].mxu0  ;;  %v12407_v53 = vld [vmem:[#allocation2 + $0x391] ss:$2 sm:$0xff] }
 0x67b   : > { %12221 = vst.msk [vmem:[#allocation2 + $0x3b8] sm:$0xff] %vm12101_vm3, %v12092_v24  ;;  %v20004_v1 = vadd.f32 %v11679_v26, %v24455_v41  ;;  %v19570_v17 = vpop.f32.mrb[122].mxu0  ;;  %v12341_v57 = vld [vmem:[#allocation2 + $0x380] ss:$2 sm:$0xff]  ;;  %v12405_v49 = vld [vmem:[#allocation2 + $0x381] ss:$2 sm:$0xff]  ;;  %v12569_v62 = vmax.f32 %v12343_v50, %v12407_v53 }
 0x67c   : > { %12219 = vst.msk [vmem:[#allocation2 + $0x3a8] sm:$0xff] %vm12101_vm3, %v12090_v14  ;;  %v11967_v16 = vadd.f32 %v21760_v52, %v20003_v13  ;;  %v20005_v36 = vadd.f32 %v19570_v17, %v24456_v7  ;;  %v11682_v56 = vpop.f32.mrb[123].mxu0  ;;  %v12568_v38 = vmax.f32 %v12341_v57, %v12405_v49  ;;  %v24461_v25 = vld [vmem:[#allocation84_spill] sm:$0xff] }
 0x67d   : > { %v11965_v23 = vadd.f32 %v21760_v52, %v20004_v1  ;;  %v20006_v0 = vadd.f32 %v11682_v56, %v24457_v18 }
 0x67e   : > { %v12770_v61 = vld [vmem:[#allocation3 + $0x159] sm:$0xff]  ;;  %v12095_v28 = vmax.f32 %v11967_v16, 0.0  ;;  %v11968_v43 = vadd.f32 %v21760_v52, %v20005_v36 }
 0x67f   : > { %v12843_v59 = vld [vmem:[#allocation3 + $0x15a] sm:$0xff]  ;;  %v12769_v33 = vld [vmem:[#allocation3 + $0x151] sm:$0xff]  ;;  %v12093_v46 = vmax.f32 %v11965_v23, 0.0  ;;  %v11966_v15 = vadd.f32 %v21760_v52, %v20006_v0 }
 0x680   : > { %v12697_v51 = vld [vmem:[#allocation3 + $0x150] sm:$0xff]  ;;  %v12698_v8 = vld [vmem:[#allocation3 + $0x158] sm:$0xff]  ;;  %v12791_v55 = vpack.c.bf16 %v12770_v61, %v12769_v33  ;;  %12224 = vst.msk [vmem:[#allocation2 + $0x3d0] sm:$0xff] %vm12101_vm3, %v12095_v28  ;;  %v12096_v27 = vmax.f32 %v11968_v43, 0.0 }
 0x681   : > { %v12719_v44 = vpack.c.bf16 %v12698_v8, %v12697_v51  ;;  %v12842_v30 = vld [vmem:[#allocation3 + $0x152] sm:$0xff]  ;;  %12222 = vst.msk [vmem:[#allocation2 + $0x3c0] sm:$0xff] %vm12101_vm3, %v12093_v46  ;;  %v12094_v39 = vmax.f32 %v11966_v15, 0.0  ;;  %v19573_v4 = vpop.f32.mrb[124].mxu0 }
 0x682   : > { %v12864_v47 = vpack.c.bf16 %v12843_v59, %v12842_v30  ;;  %v12471_v2 = vld [vmem:[#allocation2 + $0x3b0] ss:$2 sm:$0xff]  ;;  %v12535_v54 = vld [vmem:[#allocation2 + $0x3b1] ss:$2 sm:$0xff]  ;;  %12810 = vst.msk [vmem:[#allocation4 + $0x100] sm:$0xff] %vm12101_vm3, %v12791_v55  ;;  %12225 = vst.msk [vmem:[#allocation2 + $0x3d8] sm:$0xff] %vm12101_vm3, %v12096_v27  ;;  %v20007_v9 = vadd.f32 %v19573_v4, %v24458_v31 }
 0x683   : > { %12737 = vst.msk [vmem:[#allocation4 + $0x70] sm:$0xff] %vm12101_vm3, %v12719_v44  ;;  %v12601_v35 = vmax.f32 %v12471_v2, %v12535_v54  ;;  %v12469_v29 = vld [vmem:[#allocation2 + $0x3a0] ss:$2 sm:$0xff]  ;;  %v12533_v3 = vld [vmem:[#allocation2 + $0x3a1] ss:$2 sm:$0xff]  ;;  %v11695_v10 = vpop.f32.mrb[125].mxu0 }
 0x684   : > { %12883 = vst.msk [vmem:[#allocation4 + $0x190] sm:$0xff] %vm12101_vm3, %v12864_v47  ;;  %v12600_v6 = vmax.f32 %v12469_v29, %v12533_v3  ;;  %12223 = vst.msk [vmem:[#allocation2 + $0x3c8] sm:$0xff] %vm12101_vm3, %v12094_v39  ;;  %v20008_v37 = vadd.f32 %v11695_v10, %v24459_v20  ;;  %v19574_v12 = vpop.f32.mrb[126].mxu0  ;;  %v11971_v32 = vadd.f32 %v21760_v52, %v20007_v9  ;;  %v12887_v44 = vld [vmem:[#allocation4] sm:$0xff]  ;;  %v21753_v54 = vld [vmem:[%s24301_s3 + $0x18] sm:$0xff]  }
 0x685   : > { %v12633_v45 = vmax.f32 %v12569_v62, %v12601_v35  ;;  %v20009_v48 = vadd.f32 %v19574_v12, %v24460_v58  ;;  %v11698_v40 = vpop.f32.mrb[127].mxu0  ;;  %v23853_v35 = vld [vmem:[#allocation4 + $0x8] sm:$0xff]  ;;  %v23857_v3 = vld [vmem:[#allocation4 + $0x10] sm:$0xff]  ;;  %v21761_v31 = vld [vmem:[%s24301_s3 + $0x10] sm:$0xff]  }
 0x686   : > { %v12632_v42 = vmax.f32 %v12568_v38, %v12600_v6  ;;  %v11969_v19 = vadd.f32 %v21760_v52, %v20008_v37  ;;  %v20010_v34 = vadd.f32 %v11698_v40, %v24461_v25  ;;  %v12099_v21 = vmax.f32 %v11971_v32, 0.0  ;;  %v23867_v9 = vld [vmem:[#allocation4 + $0x18] sm:$0xff]  ;;  %v23871_v10 = vld [vmem:[#allocation4 + $0x20] sm:$0xff]  ;;  %v23875_v38 = vld [vmem:[#allocation4 + $0x28] sm:$0xff] }
 0x687   : > { %12666 = vst.msk [vmem:[#allocation3 + $0x171] sm:$0xff] %vm12101_vm3, %v12633_v45  ;;  %v11972_v24 = vadd.f32 %v21760_v52, %v20009_v48  ;;  %v23879_v6 = vld [vmem:[#allocation4 + $0x30] sm:$0xff]  ;;  %v23883_v20 = vld [vmem:[#allocation4 + $0x38] sm:$0xff]  ;;  %v23887_v37 = vld [vmem:[#allocation4 + $0x40] sm:$0xff] }
 0x688   : > { %12665 = vst.msk [vmem:[#allocation3 + $0x169] sm:$0xff] %vm12101_vm3, %v12632_v42  ;;  %v12097_v14 = vmax.f32 %v11969_v19, 0.0  ;;  %v11970_v11 = vadd.f32 %v21760_v52, %v20010_v34  ;;  %12228 = vst.msk [vmem:[#allocation2 + $0x3f0] sm:$0xff] %vm12101_vm3, %v12099_v21  ;;  %v23891_v12 = vld [vmem:[#allocation4 + $0x48] sm:$0xff]  ;;  %v23895_v45 = vld [vmem:[#allocation4 + $0x50] sm:$0xff] }
 0x689   : > { %v12100_v5 = vmax.f32 %v11972_v24, 0.0  ;;  %v23833_v13 = vld [vmem:[#allocation4 + $0x100] sm:$0xff]  ;;  %v23899_v32 = vld [vmem:[#allocation4 + $0x58] sm:$0xff]  ;;  %v23907_v48 = vld [vmem:[#allocation4 + $0x68] sm:$0xff] }
 0x68a   : > { %12226 = vst.msk [vmem:[#allocation2 + $0x3e0] sm:$0xff] %vm12101_vm3, %v12097_v14  ;;  %v12098_v26 = vmax.f32 %v11970_v11, 0.0  ;;  %19605 = vmatprep.mubr.msk.bf16.mxu1 %vm12101_vm3, %v23833_v13  ;;  %v12347_v7 = vld [vmem:[#allocation2 + $0x3d0] ss:$2 sm:$0xff]  ;;  %v12411_v36 = vld [vmem:[#allocation2 + $0x3d1] ss:$2 sm:$0xff] }
 0x68b   : > { %12229 = vst.msk [vmem:[#allocation2 + $0x3f8] sm:$0xff] %vm12101_vm3, %v12100_v5  ;;  %v12345_v0 = vld [vmem:[#allocation2 + $0x3c0] ss:$2 sm:$0xff]  ;;  %v12409_v61 = vld [vmem:[#allocation2 + $0x3c1] ss:$2 sm:$0xff]  ;;  %v12571_v33 = vmax.f32 %v12347_v7, %v12411_v36  ;;  %v23903_v58 = vld [vmem:[#allocation4 + $0x60] sm:$0xff] }
 0x68c   : > { %12227 = vst.msk [vmem:[#allocation2 + $0x3e8] sm:$0xff] %vm12101_vm3, %v12098_v26  ;;  %v12570_v53 = vmax.f32 %v12345_v0, %v12409_v61  ;;  %v23911_v40 = vld [vmem:[#allocation4 + $0x70] sm:$0xff]  ;;  %v13354_v42 = vld [vmem:[#allocation4 + $0x120] sm:$0xff]  ;;  %v23923_v34 = vld [vmem:[#allocation4 + $0x128] sm:$0xff] }
 0x68d   : > { %v21754_v25 = vld [vmem:[%s24301_s3 + $0x20] sm:$0xff]   ;;  %v23931_v24 = vld [vmem:[#allocation4 + $0x138] sm:$0xff]  ;;  %v23935_v14 = vld [vmem:[#allocation4 + $0x140] sm:$0xff] }
 0x68e   : > { %v12772_v41 = vld [vmem:[#allocation3 + $0x171] sm:$0xff]  ;;  %v23927_v21 = vld [vmem:[#allocation4 + $0x130] sm:$0xff]  ;;  %v23947_v26 = vld [vmem:[#allocation4 + $0x158] sm:$0xff] }
 0x68f   : > { %v12845_v1 = vld [vmem:[#allocation3 + $0x172] sm:$0xff]  ;;  %v12771_v17 = vld [vmem:[#allocation3 + $0x169] sm:$0xff]  ;;  %v23943_v5 = vld [vmem:[#allocation4 + $0x150] sm:$0xff] }
 0x690   : > { %v12699_v16 = vld [vmem:[#allocation3 + $0x168] sm:$0xff]  ;;  %v12700_v52 = vld [vmem:[#allocation3 + $0x170] sm:$0xff]  ;;  %v12792_v56 = vpack.c.bf16 %v12772_v41, %v12771_v17  ;;  %v23939_v11 = vld [vmem:[#allocation4 + $0x148] sm:$0xff] }
 0x691   : > { %v12720_v23 = vpack.c.bf16 %v12700_v52, %v12699_v16  ;;  %v12844_v18 = vld [vmem:[#allocation3 + $0x16a] sm:$0xff]  ;;  %v23959_v17 = vld [vmem:[#allocation4 + $0x170] sm:$0xff]  ;;  %v23971_v7 = vld [vmem:[#allocation4 + $0x188] sm:$0xff] }
 0x692   : > { %v12865_v59 = vpack.c.bf16 %v12845_v1, %v12844_v18  ;;  %v12475_v28 = vld [vmem:[#allocation2 + $0x3f0] ss:$2 sm:$0xff]  ;;  %v12539_v43 = vld [vmem:[#allocation2 + $0x3f1] ss:$2 sm:$0xff]  ;;  %12811 = vst.msk [vmem:[#allocation4 + $0x108] sm:$0xff] %vm12101_vm3, %v12792_v56  ;;  %v23963_v16 = vld [vmem:[#allocation4 + $0x178] sm:$0xff] }
 0x693   : > { %12738 = vst.msk [vmem:[#allocation4 + $0x78] sm:$0xff] %vm12101_vm3, %v12720_v23  ;;  %v12603_v51 = vmax.f32 %v12475_v28, %v12539_v43  ;;  %v12473_v8 = vld [vmem:[#allocation2 + $0x3e0] ss:$2 sm:$0xff]  ;;  %v12537_v50 = vld [vmem:[#allocation2 + $0x3e1] ss:$2 sm:$0xff]  ;;  %v23951_v41 = vld [vmem:[#allocation4 + $0x160] sm:$0xff] }
 0x694   : > { %12884 = vst.msk [vmem:[#allocation4 + $0x198] sm:$0xff] %vm12101_vm3, %v12865_v59  ;;  %v12602_v46 = vmax.f32 %v12473_v8, %v12537_v50  ;;  %v23955_v1 = vld [vmem:[#allocation4 + $0x168] sm:$0xff]  ;;  %v23967_v52 = vld [vmem:[#allocation4 + $0x180] sm:$0xff]  ;;  %v23975_v36 = vld [vmem:[#allocation4 + $0x190] sm:$0xff] }
 0x695   : > { %v12635_v15 = vmax.f32 %v12571_v33, %v12603_v51  ;;  %v21755_v23 = vld [vmem:[%s24301_s3 + $0x28] sm:$0xff]   ;;  %v21756_v61 = vld [vmem:[%s24301_s3 + $0x30] sm:$0xff]   ;;  %v24028_v28 = vld [vmem:[#allocation4 + $0xa8] sm:$0xff] }
 0x696   : > { %v12634_v55 = vmax.f32 %v12570_v53, %v12602_v46  ;;  %v13886_v0 = vld [vmem:[#allocation4 + $0x98] sm:$0xff]  ;;  %v24024_v59 = vld [vmem:[#allocation4 + $0xa0] sm:$0xff]  ;;  %v24032_v43 = vld [vmem:[#allocation4 + $0xb0] sm:$0xff] }
 0x697   : > { %12668 = vst.msk [vmem:[#allocation3 + $0x189] sm:$0xff] %vm12101_vm3, %v12635_v15  ;;  %v24036_v33 = vld [vmem:[#allocation4 + $0xb8] sm:$0xff]  ;;  %v24040_v51 = vld [vmem:[#allocation4 + $0xc0] sm:$0xff]  ;;  %v24044_v8 = vld [vmem:[#allocation4 + $0xc8] sm:$0xff] }
 0x698   : > { %12667 = vst.msk [vmem:[#allocation3 + $0x181] sm:$0xff] %vm12101_vm3, %v12634_v55  ;;  %v24048_v50 = vld [vmem:[#allocation4 + $0xd0] sm:$0xff]  ;;  %v24052_v53 = vld [vmem:[#allocation4 + $0xd8] sm:$0xff]  ;;  %v24056_v46 = vld [vmem:[#allocation4 + $0xe0] sm:$0xff] }
 0x699   : > { %v23845_v30 = vld [vmem:[#allocation4 + $0x108] sm:$0xff]  ;;  %v12704_v55 = vld [vmem:[#allocation3 + $0x1a0] sm:$0xff] }
 0x69a   : > { %19606 = vmatmul.mubr.msk.bf16.gmra.mrb[156].mxu1 %vm12101_vm3, %v23845_v30  ;;  %v23915_v19 = vld [vmem:[#allocation4 + $0x78] sm:$0xff]  ;;  %v12703_v15 = vld [vmem:[#allocation3 + $0x198] sm:$0xff] }
 0x69b   : > { %19611 = vmatprep.mubr.msk.bf16.mxu1 %vm12101_vm3, %v12887_v44  ;;  %v23979_v56 = vld [vmem:[#allocation4 + $0x198] sm:$0xff]  ;;  %v12722_v44 = vpack.c.bf16 %v12704_v55, %v12703_v15 }
 0x69d   : > { %12740 = vst.msk [vmem:[#allocation4 + $0x88] sm:$0xff] %vm12101_vm3, %v12722_v44 }
 0x69e   : > { %v12774_v57 = vld [vmem:[#allocation3 + $0x189] sm:$0xff] }
 0x69f   : > { %v12847_v49 = vld [vmem:[#allocation3 + $0x18a] sm:$0xff]  ;;  %v12701_v27 = vld [vmem:[#allocation3 + $0x180] sm:$0xff] }
 0x6a0   : > { %v12702_v47 = vld [vmem:[#allocation3 + $0x188] sm:$0xff] }
 0x6a1   : > { %v12773_v2 = vld [vmem:[#allocation3 + $0x181] sm:$0xff]  ;;  %v12721_v39 = vpack.c.bf16 %v12702_v47, %v12701_v27 }
 0x6a2   : > { %v12793_v4 = vpack.c.bf16 %v12774_v57, %v12773_v2  ;;  %v12846_v62 = vld [vmem:[#allocation3 + $0x182] sm:$0xff]  ;;  %19612 = vmatmul.mubr.msk.bf16.vlgmr.msra.gmra.mrb[128].mxu1 %vm12101_vm3, %v23853_v35 }
 0x6a3   : > { %v12866_v29 = vpack.c.bf16 %v12847_v49, %v12846_v62  ;;  %12739 = vst.msk [vmem:[#allocation4 + $0x80] sm:$0xff] %vm12101_vm3, %v12721_v39  ;;  %19644 = vmatpush3.bf16.msra.mxu1 %v21761_v31  ;;  %19615 = vmatprep.mubr.msk.bf16.mxu1 %vm12101_vm3, %v23857_v3  ;;  %v12776_v49 = vld [vmem:[#allocation3 + $0x1a1] sm:$0xff] }
 0x6a4   : > { %12812 = vst.msk [vmem:[#allocation4 + $0x110] sm:$0xff] %vm12101_vm3, %v12793_v4  ;;  %19677 = vmatprep.subr.bf16.mxu1 %v21753_v54  ;;  %v21758_v2 = vld [vmem:[%s24301_s3 + $0x40] sm:$0xff]   ;;  %v14433_v62 = vld [vmem:[#allocation4 + $0x88] sm:$0xff] }
 0x6a5   : > { %12885 = vst.msk [vmem:[#allocation4 + $0x1a0] sm:$0xff] %vm12101_vm3, %v12866_v29  ;;  %v12849_v39 = vld [vmem:[#allocation3 + $0x1a2] sm:$0xff] }
 0x6a6   : > { %v14694_v29 = vld [vmem:[#allocation4 + $0xf0] sm:$0xff] }
 0x6aa   : > { %19616 = vmatmul.mubr.msk.bf16.gmra.mrb[132].mxu1 %vm12101_vm3, %v23867_v9  ;;  %v24016_v18 = vld [vmem:[#allocation4 + $0x80] sm:$0xff] }
 0x6ab   : > { %19619 = vmatprep.mubr.msk.bf16.mxu1 %vm12101_vm3, %v23871_v10  ;;  %v24071_v57 = vld [vmem:[#allocation4 + $0x110] sm:$0xff] }
 0x6ac   : > { %v14167_v47 = vld [vmem:[#allocation4 + $0x1a0] sm:$0xff] }
 0x6b2   : > { %19620 = vmatmul.mubr.msk.bf16.gmra.mrb[136].mxu1 %vm12101_vm3, %v23875_v38 }
 0x6b3   : > { %19623 = vmatprep.mubr.msk.bf16.mxu1 %vm12101_vm3, %v23879_v6 }
 0x6ba   : > { %19624 = vmatmul.mubr.msk.bf16.gmra.mrb[140].mxu1 %vm12101_vm3, %v23883_v20 }
 0x6bb   : > { %19627 = vmatprep.mubr.msk.bf16.mxu1 %vm12101_vm3, %v23887_v37 }
 0x6c2   : > { %19628 = vmatmul.mubr.msk.bf16.gmra.mrb[144].mxu1 %vm12101_vm3, %v23891_v12 }
 0x6c3   : > { %19631 = vmatprep.mubr.msk.bf16.mxu1 %vm12101_vm3, %v23895_v45 }
 0x6ca   : > { %19632 = vmatmul.mubr.msk.bf16.gmra.mrb[148].mxu1 %vm12101_vm3, %v23899_v32 }
 0x6cb   : > { %19635 = vmatprep.mubr.msk.bf16.mxu1 %vm12101_vm3, %v23903_v58 }
 0x6d2   : > { %19636 = vmatmul.mubr.msk.bf16.gmra.mrb[152].mxu1 %vm12101_vm3, %v23907_v48 }
 0x6d3   : > { %19639 = vmatprep.mubr.msk.bf16.mxu1 %vm12101_vm3, %v23911_v40 }
 0x6da   : > { %19640 = vmatmul.mubr.msk.bf16.gmra.mrb[156].mxu1 %vm12101_vm3, %v23915_v19 }
 0x6db   : > { %19645 = vmatprep.mubr.msk.bf16.mxu1 %vm12101_vm3, %v13354_v42 }
 0x6e2   : > { %19646 = vmatmul.mubr.msk.bf16.vlgmr.msra.gmra.mrb[128].mxu1 %vm12101_vm3, %v23923_v34 }
 0x6e3   : > { %19678 = vmatpush3.bf16.msra.mxu1 %v21753_v54  ;;  %19649 = vmatprep.mubr.msk.bf16.mxu1 %vm12101_vm3, %v23927_v21  ;;  %v12848_v54 = vld [vmem:[#allocation3 + $0x19a] sm:$0xff] }
 0x6e4   : > { %19711 = vmatprep.subr.bf16.mxu1 %v21754_v25  ;;  %v12867_v4 = vpack.c.bf16 %v12849_v39, %v12848_v54 }
 0x6e6   : > { %12886 = vst.msk [vmem:[#allocation4 + $0x1a8] sm:$0xff] %vm12101_vm3, %v12867_v4 }
 0x6ea   : > { %19650 = vmatmul.mubr.msk.bf16.gmra.mrb[132].mxu1 %vm12101_vm3, %v23931_v24 }
 0x6eb   : > { %19653 = vmatprep.mubr.msk.bf16.mxu1 %vm12101_vm3, %v23935_v14 }
 0x6f2   : > { %19654 = vmatmul.mubr.msk.bf16.gmra.mrb[136].mxu1 %vm12101_vm3, %v23939_v11 }
 0x6f3   : > { %19657 = vmatprep.mubr.msk.bf16.mxu1 %vm12101_vm3, %v23943_v5 }
 0x6fa   : > { %19658 = vmatmul.mubr.msk.bf16.gmra.mrb[140].mxu1 %vm12101_vm3, %v23947_v26 }
 0x6fb   : > { %19661 = vmatprep.mubr.msk.bf16.mxu1 %vm12101_vm3, %v23951_v41 }
 0x702   : > { %19662 = vmatmul.mubr.msk.bf16.gmra.mrb[144].mxu1 %vm12101_vm3, %v23955_v1 }
 0x703   : > { %19665 = vmatprep.mubr.msk.bf16.mxu1 %vm12101_vm3, %v23959_v17 }
 0x70a   : > { %19666 = vmatmul.mubr.msk.bf16.gmra.mrb[148].mxu1 %vm12101_vm3, %v23963_v16 }
 0x70b   : > { %19669 = vmatprep.mubr.msk.bf16.mxu1 %vm12101_vm3, %v23967_v52 }
 0x712   : > { %19670 = vmatmul.mubr.msk.bf16.gmra.mrb[152].mxu1 %vm12101_vm3, %v23971_v7 }
 0x713   : > { %19673 = vmatprep.mubr.msk.bf16.mxu1 %vm12101_vm3, %v23975_v36 }
 0x71a   : > { %19674 = vmatmul.mubr.msk.bf16.gmra.mrb[156].mxu1 %vm12101_vm3, %v23979_v56 }
 0x71b   : > { %19679 = vmatprep.mubr.msk.bf16.mxu1 %vm12101_vm3, %v23853_v35  ;;  %v14693_v35 = vld [vmem:[#allocation4 + $0xe8] sm:$0xff] }
 0x722   : > { %19680 = vmatmul.mubr.msk.bf16.vlgmr.msra.gmra.mrb[128].mxu1 %vm12101_vm3, %v23857_v3 }
 0x723   : > { %19712 = vmatpush3.bf16.msra.mxu1 %v21754_v25  ;;  %19683 = vmatprep.mubr.msk.bf16.mxu1 %vm12101_vm3, %v23867_v9 }
 0x724   : > { %19745 = vmatprep.subr.bf16.mxu1 %v21755_v23 }
 0x72a   : > { %19684 = vmatmul.mubr.msk.bf16.gmra.mrb[132].mxu1 %vm12101_vm3, %v23871_v10 }
 0x72b   : > { %19687 = vmatprep.mubr.msk.bf16.mxu1 %vm12101_vm3, %v23875_v38 }
 0x732   : > { %19688 = vmatmul.mubr.msk.bf16.gmra.mrb[136].mxu1 %vm12101_vm3, %v23879_v6 }
 0x733   : > { %19691 = vmatprep.mubr.msk.bf16.mxu1 %vm12101_vm3, %v23883_v20 }
 0x73a   : > { %19692 = vmatmul.mubr.msk.bf16.gmra.mrb[140].mxu1 %vm12101_vm3, %v23887_v37 }
 0x73b   : > { %19695 = vmatprep.mubr.msk.bf16.mxu1 %vm12101_vm3, %v23891_v12 }
 0x742   : > { %19696 = vmatmul.mubr.msk.bf16.gmra.mrb[144].mxu1 %vm12101_vm3, %v23895_v45 }
 0x743   : > { %19699 = vmatprep.mubr.msk.bf16.mxu1 %vm12101_vm3, %v23899_v32 }
 0x74a   : > { %19700 = vmatmul.mubr.msk.bf16.gmra.mrb[148].mxu1 %vm12101_vm3, %v23903_v58 }
 0x74b   : > { %19703 = vmatprep.mubr.msk.bf16.mxu1 %vm12101_vm3, %v23907_v48 }
 0x752   : > { %19704 = vmatmul.mubr.msk.bf16.gmra.mrb[152].mxu1 %vm12101_vm3, %v23911_v40 }
 0x753   : > { %19707 = vmatprep.mubr.msk.bf16.mxu1 %vm12101_vm3, %v23915_v19 }
 0x75a   : > { %19708 = vmatmul.mubr.msk.bf16.gmra.mrb[156].mxu1 %vm12101_vm3, %v24016_v18 }
 0x75b   : > { %19713 = vmatprep.mubr.msk.bf16.mxu1 %vm12101_vm3, %v13886_v0 }
 0x762   : > { %19714 = vmatmul.mubr.msk.bf16.vlgmr.msra.gmra.mrb[128].mxu1 %vm12101_vm3, %v24024_v59 }
 0x763   : > { %19746 = vmatpush3.bf16.msra.mxu1 %v21755_v23  ;;  %19717 = vmatprep.mubr.msk.bf16.mxu1 %vm12101_vm3, %v24028_v28 }
 0x764   : > { %19779 = vmatprep.subr.bf16.mxu1 %v21756_v61 }
 0x76a   : > { %19718 = vmatmul.mubr.msk.bf16.gmra.mrb[132].mxu1 %vm12101_vm3, %v24032_v43 }
 0x76b   : > { %19721 = vmatprep.mubr.msk.bf16.mxu1 %vm12101_vm3, %v24036_v33 }
 0x772   : > { %19722 = vmatmul.mubr.msk.bf16.gmra.mrb[136].mxu1 %vm12101_vm3, %v24040_v51 }
 0x773   : > { %19725 = vmatprep.mubr.msk.bf16.mxu1 %vm12101_vm3, %v24044_v8 }
 0x77a   : > { %19726 = vmatmul.mubr.msk.bf16.gmra.mrb[140].mxu1 %vm12101_vm3, %v24048_v50 }
 0x77b   : > { %19729 = vmatprep.mubr.msk.bf16.mxu1 %vm12101_vm3, %v24052_v53 }
 0x782   : > { %19730 = vmatmul.mubr.msk.bf16.gmra.mrb[144].mxu1 %vm12101_vm3, %v24056_v46 }
 0x783   : > { %19733 = vmatprep.mubr.msk.bf16.mxu1 %vm12101_vm3, %v23738_v60  ;;  %v21757_v60 = vld [vmem:[%s24301_s3 + $0x38] sm:$0xff]  }
 0x78a   : > { %19734 = vmatmul.mubr.msk.bf16.gmra.mrb[148].mxu1 %vm12101_vm3, %v23772_v22  ;;  %v12775_v22 = vld [vmem:[#allocation3 + $0x199] sm:$0xff] }
 0x78b   : > { %19737 = vmatprep.mubr.msk.bf16.mxu1 %vm12101_vm3, %v23805_v63  ;;  %v12794_v27 = vpack.c.bf16 %v12776_v49, %v12775_v22 }
 0x78d   : > { %12813 = vst.msk [vmem:[#allocation4 + $0x118] sm:$0xff] %vm12101_vm3, %v12794_v27 }
 0x792   : > { %19738 = vmatmul.mubr.msk.bf16.gmra.mrb[152].mxu1 %vm12101_vm3, %v23833_v13 }
 0x793   : > { %19741 = vmatprep.mubr.msk.bf16.mxu1 %vm12101_vm3, %v23845_v30 }
 0x79a   : > { %19742 = vmatmul.mubr.msk.bf16.gmra.mrb[156].mxu1 %vm12101_vm3, %v24071_v57 }
 0x79b   : > { %19747 = vmatprep.mubr.msk.bf16.mxu1 %vm12101_vm3, %v23923_v34 }
 0x7a2   : > { %19748 = vmatmul.mubr.msk.bf16.vlgmr.msra.gmra.mrb[128].mxu1 %vm12101_vm3, %v23927_v21 }
 0x7a3   : > { %19780 = vmatpush3.bf16.msra.mxu1 %v21756_v61  ;;  %19751 = vmatprep.mubr.msk.bf16.mxu1 %vm12101_vm3, %v23931_v24 }
 0x7a4   : > { %19813 = vmatprep.subr.bf16.mxu1 %v21757_v60 }
 0x7aa   : > { %19752 = vmatmul.mubr.msk.bf16.gmra.mrb[132].mxu1 %vm12101_vm3, %v23935_v14 }
 0x7ab   : > { %19755 = vmatprep.mubr.msk.bf16.mxu1 %vm12101_vm3, %v23939_v11 }
 0x7b2   : > { %19756 = vmatmul.mubr.msk.bf16.gmra.mrb[136].mxu1 %vm12101_vm3, %v23943_v5 }
 0x7b3   : > { %19759 = vmatprep.mubr.msk.bf16.mxu1 %vm12101_vm3, %v23947_v26 }
 0x7ba   : > { %19760 = vmatmul.mubr.msk.bf16.gmra.mrb[140].mxu1 %vm12101_vm3, %v23951_v41 }
 0x7bb   : > { %19763 = vmatprep.mubr.msk.bf16.mxu1 %vm12101_vm3, %v23955_v1 }
 0x7c2   : > { %19764 = vmatmul.mubr.msk.bf16.gmra.mrb[144].mxu1 %vm12101_vm3, %v23959_v17 }
 0x7c3   : > { %19767 = vmatprep.mubr.msk.bf16.mxu1 %vm12101_vm3, %v23963_v16 }
 0x7ca   : > { %19768 = vmatmul.mubr.msk.bf16.gmra.mrb[148].mxu1 %vm12101_vm3, %v23967_v52 }
 0x7cb   : > { %19771 = vmatprep.mubr.msk.bf16.mxu1 %vm12101_vm3, %v23971_v7 }
 0x7d2   : > { %19772 = vmatmul.mubr.msk.bf16.gmra.mrb[152].mxu1 %vm12101_vm3, %v23975_v36 }
 0x7d3   : > { %19775 = vmatprep.mubr.msk.bf16.mxu1 %vm12101_vm3, %v23979_v56 }
 0x7da   : > { %19776 = vmatmul.mubr.msk.bf16.gmra.mrb[156].mxu1 %vm12101_vm3, %v14167_v47 }
 0x7db   : > { %19781 = vmatprep.mubr.msk.bf16.mxu1 %vm12101_vm3, %v23857_v3  ;;  %v14699_v3 = vld [vmem:[#allocation4 + $0x118] sm:$0xff] }
 0x7e2   : > { %19782 = vmatmul.mubr.msk.bf16.vlgmr.msra.gmra.mrb[128].mxu1 %vm12101_vm3, %v23867_v9 }
 0x7e3   : > { %19814 = vmatpush3.bf16.msra.mxu1 %v21757_v60  ;;  %19785 = vmatprep.mubr.msk.bf16.mxu1 %vm12101_vm3, %v23871_v10 }
 0x7e4   : > { %19847 = vmatprep.subr.bf16.mxu1 %v21758_v2 }
 0x7ea   : > { %19786 = vmatmul.mubr.msk.bf16.gmra.mrb[132].mxu1 %vm12101_vm3, %v23875_v38 }
 0x7eb   : > { %19789 = vmatprep.mubr.msk.bf16.mxu1 %vm12101_vm3, %v23879_v6 }
 0x7f2   : > { %19790 = vmatmul.mubr.msk.bf16.gmra.mrb[136].mxu1 %vm12101_vm3, %v23883_v20 }
 0x7f3   : > { %19793 = vmatprep.mubr.msk.bf16.mxu1 %vm12101_vm3, %v23887_v37 }
 0x7fa   : > { %19794 = vmatmul.mubr.msk.bf16.gmra.mrb[140].mxu1 %vm12101_vm3, %v23891_v12 }
 0x7fb   : > { %19797 = vmatprep.mubr.msk.bf16.mxu1 %vm12101_vm3, %v23895_v45 }
 0x802   : > { %19798 = vmatmul.mubr.msk.bf16.gmra.mrb[144].mxu1 %vm12101_vm3, %v23899_v32 }
 0x803   : > { %19801 = vmatprep.mubr.msk.bf16.mxu1 %vm12101_vm3, %v23903_v58 }
 0x80a   : > { %19802 = vmatmul.mubr.msk.bf16.gmra.mrb[148].mxu1 %vm12101_vm3, %v23907_v48 }
 0x80b   : > { %19805 = vmatprep.mubr.msk.bf16.mxu1 %vm12101_vm3, %v23911_v40 }
 0x812   : > { %19806 = vmatmul.mubr.msk.bf16.gmra.mrb[152].mxu1 %vm12101_vm3, %v23915_v19 }
 0x813   : > { %19809 = vmatprep.mubr.msk.bf16.mxu1 %vm12101_vm3, %v24016_v18 }
 0x81a   : > { %19810 = vmatmul.mubr.msk.bf16.gmra.mrb[156].mxu1 %vm12101_vm3, %v14433_v62 }
 0x81b   : > { %19815 = vmatprep.mubr.msk.bf16.mxu1 %vm12101_vm3, %v24024_v59 }
 0x822   : > { %19816 = vmatmul.mubr.msk.bf16.vlgmr.msra.gmra.mrb[128].mxu1 %vm12101_vm3, %v24028_v28 }
 0x823   : > { %19848 = vmatpush3.bf16.msra.mxu1 %v21758_v2  ;;  %19819 = vmatprep.mubr.msk.bf16.mxu1 %vm12101_vm3, %v24032_v43 }
 0x82a   : > { %19820 = vmatmul.mubr.msk.bf16.gmra.mrb[132].mxu1 %vm12101_vm3, %v24036_v33 }
 0x82b   : > { %19823 = vmatprep.mubr.msk.bf16.mxu1 %vm12101_vm3, %v24040_v51 }
 0x832   : > { %19824 = vmatmul.mubr.msk.bf16.gmra.mrb[136].mxu1 %vm12101_vm3, %v24044_v8 }
 0x833   : > { %19827 = vmatprep.mubr.msk.bf16.mxu1 %vm12101_vm3, %v24048_v50 }
 0x83a   : > { %19828 = vmatmul.mubr.msk.bf16.gmra.mrb[140].mxu1 %vm12101_vm3, %v24052_v53 }
 0x83b   : > { %19831 = vmatprep.mubr.msk.bf16.mxu1 %vm12101_vm3, %v24056_v46 }
 0x842   : > { %19832 = vmatmul.mubr.msk.bf16.gmra.mrb[144].mxu1 %vm12101_vm3, %v14693_v35 }
 0x843   : > { %19835 = vmatprep.mubr.msk.bf16.mxu1 %vm12101_vm3, %v14694_v29 }
 0x84a   : > { %19836 = vmatmul.mubr.msk.bf16.gmra.mrb[148].mxu1 %vm12101_vm3, %v23805_v63  ;;  %v14965_v63 = vld [vmem:[#allocation4 + $0x1a8] sm:$0xff] }
 0x84b   : > { %19839 = vmatprep.mubr.msk.bf16.mxu1 %vm12101_vm3, %v23833_v13  ;;  %v24207_v13 = vld [vmem:[%s24302_s4] ss:$0 sm:$0xff] }
 0x852   : > { %19840 = vmatmul.mubr.msk.bf16.gmra.mrb[152].mxu1 %vm12101_vm3, %v23845_v30 }
 0x853   : > { %19843 = vmatprep.mubr.msk.bf16.mxu1 %vm12101_vm3, %v24071_v57 }
 0x85a   : > { %19844 = vmatmul.mubr.msk.bf16.gmra.mrb[156].mxu1 %vm12101_vm3, %v14699_v3 }
 0x85b   : > { %19849 = vmatprep.mubr.msk.bf16.mxu1 %vm12101_vm3, %v23927_v21 }
 0x862   : > { %19850 = vmatmul.mubr.msk.bf16.vlgmr.msra.gmra.mrb[128].mxu1 %vm12101_vm3, %v23931_v24 }
 0x863   : > { %19853 = vmatprep.mubr.msk.bf16.mxu1 %vm12101_vm3, %v23935_v14 }
 0x86a   : > { %19854 = vmatmul.mubr.msk.bf16.gmra.mrb[132].mxu1 %vm12101_vm3, %v23939_v11 }
 0x86b   : > { %19857 = vmatprep.mubr.msk.bf16.mxu1 %vm12101_vm3, %v23943_v5 }
 0x872   : > { %19858 = vmatmul.mubr.msk.bf16.gmra.mrb[136].mxu1 %vm12101_vm3, %v23947_v26 }
 0x873   : > { %19861 = vmatprep.mubr.msk.bf16.mxu1 %vm12101_vm3, %v23951_v41 }
 0x87a   : > { %19862 = vmatmul.mubr.msk.bf16.gmra.mrb[140].mxu1 %vm12101_vm3, %v23955_v1 }
 0x87b   : > { %19865 = vmatprep.mubr.msk.bf16.mxu1 %vm12101_vm3, %v23959_v17 }
 0x882   : > { %19866 = vmatmul.mubr.msk.bf16.gmra.mrb[144].mxu1 %vm12101_vm3, %v23963_v16 }
 0x883   : > { %19869 = vmatprep.mubr.msk.bf16.mxu1 %vm12101_vm3, %v23967_v52 }
 0x88a   : > { %19870 = vmatmul.mubr.msk.bf16.gmra.mrb[148].mxu1 %vm12101_vm3, %v23971_v7 }
 0x88b   : > { %19873 = vmatprep.mubr.msk.bf16.mxu1 %vm12101_vm3, %v23975_v36 }
 0x892   : > { %19874 = vmatmul.mubr.msk.bf16.gmra.mrb[152].mxu1 %vm12101_vm3, %v23979_v56 }
 0x893   : > { %19877 = vmatprep.mubr.msk.bf16.mxu1 %vm12101_vm3, %v14167_v47 }
 0x89a   : > { %19878 = vmatmul.mubr.msk.bf16.gmra.mrb[156].mxu1 %vm12101_vm3, %v14965_v63 }
 0x935   : > { %v19851_v30 = vpop.f32.mrb[128].mxu1 }
 0x936   : > { %v15225_v31 = vadd.f32 %v19851_v30, %v24207_v13  ;;  %v15057_v9 = vpop.f32.mrb[129].mxu1 }
 0x937   : > { %v15223_v10 = vadd.f32 %v24207_v13, %v15057_v9  ;;  %v19852_v38 = vpop.f32.mrb[130].mxu1 }
 0x938   : > { %v15257_v6 = vmax.f32 %v15225_v31, 0.0  ;;  %v15226_v20 = vadd.f32 %v19852_v38, %v24207_v13  ;;  %v15060_v37 = vpop.f32.mrb[131].mxu1 }
 0x939   : > { %v15255_v12 = vmax.f32 %v15223_v10, 0.0  ;;  %v15224_v45 = vadd.f32 %v24207_v13, %v15060_v37 }
 0x93a   : > { %15290 = vst.msk [vmem:[#allocation5 + $0x10] sm:$0xff] %vm15287_vm5, %v15257_v6  ;;  %v15258_v32 = vmax.f32 %v15226_v20, 0.0 }
 0x93b   : > { %15288 = vst.msk [vmem:[#allocation5] sm:$0xff] %vm15287_vm5, %v15255_v12  ;;  %v15256_v58 = vmax.f32 %v15224_v45, 0.0 }
 0x93c   : > { %15291 = vst.msk [vmem:[#allocation5 + $0x18] sm:$0xff] %vm15287_vm5, %v15258_v32 }
 0x93d   : > { %15289 = vst.msk [vmem:[#allocation5 + $0x8] sm:$0xff] %vm15287_vm5, %v15256_v58  ;;  %v19855_v48 = vpop.f32.mrb[132].mxu1 }
 0x93e   : > { %v15229_v40 = vadd.f32 %v19855_v48, %v24207_v13  ;;  %v15073_v42 = vpop.f32.mrb[133].mxu1 }
 0x93f   : > { %v15227_v19 = vadd.f32 %v24207_v13, %v15073_v42  ;;  %v19856_v25 = vpop.f32.mrb[134].mxu1 }
 0x940   : > { %v15261_v34 = vmax.f32 %v15229_v40, 0.0  ;;  %v15230_v21 = vadd.f32 %v19856_v25, %v24207_v13  ;;  %v15076_v24 = vpop.f32.mrb[135].mxu1 }
 0x941   : > { %v15259_v14 = vmax.f32 %v15227_v19, 0.0  ;;  %v15228_v11 = vadd.f32 %v24207_v13, %v15076_v24 }
 0x942   : > { %15294 = vst.msk [vmem:[#allocation5 + $0x30] sm:$0xff] %vm15287_vm5, %v15261_v34  ;;  %v15262_v5 = vmax.f32 %v15230_v21, 0.0 }
 0x943   : > { %v15352_v26 = vld [vmem:[#allocation5 + $0x10] ss:$2 sm:$0xff]  ;;  %v15368_v41 = vld [vmem:[#allocation5 + $0x11] ss:$2 sm:$0xff]  ;;  %15292 = vst.msk [vmem:[#allocation5 + $0x20] sm:$0xff] %vm15287_vm5, %v15259_v14  ;;  %v15260_v1 = vmax.f32 %v15228_v11, 0.0 }
 0x944   : > { %v15391_v17 = vmax.f32 %v15352_v26, %v15368_v41  ;;  %v15320_v16 = vld [vmem:[#allocation5] ss:$2 sm:$0xff]  ;;  %v15336_v52 = vld [vmem:[#allocation5 + $0x1] ss:$2 sm:$0xff]  ;;  %15295 = vst.msk [vmem:[#allocation5 + $0x38] sm:$0xff] %vm15287_vm5, %v15262_v5 }
 0x945   : > { %v15383_v7 = vmax.f32 %v15320_v16, %v15336_v52  ;;  %15293 = vst.msk [vmem:[#allocation5 + $0x28] sm:$0xff] %vm15287_vm5, %v15260_v1  ;;  %v19859_v36 = vpop.f32.mrb[136].mxu1 }
 0x946   : > { %v15233_v56 = vadd.f32 %v19859_v36, %v24207_v13  ;;  %v15089_v23 = vpop.f32.mrb[137].mxu1 }
 0x947   : > { %v15399_v18 = vmax.f32 %v15383_v7, %v15391_v17  ;;  %v15231_v0 = vadd.f32 %v24207_v13, %v15089_v23  ;;  %v19860_v61 = vpop.f32.mrb[138].mxu1 }
 0x948   : > { %v15265_v59 = vmax.f32 %v15233_v56, 0.0  ;;  %v15234_v28 = vadd.f32 %v19860_v61, %v24207_v13  ;;  %v15092_v43 = vpop.f32.mrb[139].mxu1 }
 0x949   : > { %v15407_v33 = vpack.c.bf16 %v15399_v18, %v15399_v18  ;;  %v15263_v51 = vmax.f32 %v15231_v0, 0.0  ;;  %v15232_v8 = vadd.f32 %v24207_v13, %v15092_v43 }
 0x94a   : > { %15298 = vst.msk [vmem:[#allocation5 + $0x50] sm:$0xff] %vm15287_vm5, %v15265_v59  ;;  %v15266_v50 = vmax.f32 %v15234_v28, 0.0 }
 0x94b   : > { %15416 = vst.msk [vmem:[%s24231_s27] sm:$0xf] %vm15415_vm6, %v15407_v33  ;;  %v15354_v53 = vld [vmem:[#allocation5 + $0x30] ss:$2 sm:$0xff]  ;;  %v15370_v46 = vld [vmem:[#allocation5 + $0x31] ss:$2 sm:$0xff] }
 0x94c   : > { %15296 = vst.msk [vmem:[#allocation5 + $0x40] sm:$0xff] %vm15287_vm5, %v15263_v51  ;;  %v15264_v15 = vmax.f32 %v15232_v8, 0.0  ;;  %v15392_v55 = vmax.f32 %v15354_v53, %v15370_v46  ;;  %v15322_v44 = vld [vmem:[#allocation5 + $0x20] ss:$2 sm:$0xff]  ;;  %v15338_v57 = vld [vmem:[#allocation5 + $0x21] ss:$2 sm:$0xff] }
 0x94d   : > { %15299 = vst.msk [vmem:[#allocation5 + $0x58] sm:$0xff] %vm15287_vm5, %v15266_v50  ;;  %v15384_v60 = vmax.f32 %v15322_v44, %v15338_v57  ;;  %v19863_v22 = vpop.f32.mrb[140].mxu1 }
 0x94e   : > { %15297 = vst.msk [vmem:[#allocation5 + $0x48] sm:$0xff] %vm15287_vm5, %v15264_v15  ;;  %v15237_v49 = vadd.f32 %v19863_v22, %v24207_v13  ;;  %v15105_v27 = vpop.f32.mrb[141].mxu1 }
 0x94f   : > { %v15400_v47 = vmax.f32 %v15384_v60, %v15392_v55  ;;  %v15235_v2 = vadd.f32 %v24207_v13, %v15105_v27  ;;  %v19864_v54 = vpop.f32.mrb[142].mxu1 }
 0x950   : > { %v15269_v39 = vmax.f32 %v15237_v49, 0.0  ;;  %v15238_v4 = vadd.f32 %v19864_v54, %v24207_v13  ;;  %v15108_v62 = vpop.f32.mrb[143].mxu1 }
 0x951   : > { %v15408_v35 = vpack.c.bf16 %v15400_v47, %v15400_v47  ;;  %v15267_v29 = vmax.f32 %v15235_v2, 0.0  ;;  %v15236_v3 = vadd.f32 %v24207_v13, %v15108_v62 }
 0x952   : > { %15302 = vst.msk [vmem:[#allocation5 + $0x70] sm:$0xff] %vm15287_vm5, %v15269_v39  ;;  %v15270_v63 = vmax.f32 %v15238_v4, 0.0 }
 0x953   : > { %15417 = vst.msk [vmem:[%s24231_s27 + $0x4] sm:$0xf] %vm15415_vm6, %v15408_v35  ;;  %v15268_v9 = vmax.f32 %v15236_v3, 0.0 }
 0x954   : > { %v15356_v30 = vld [vmem:[#allocation5 + $0x50] ss:$2 sm:$0xff]  ;;  %v15372_v31 = vld [vmem:[#allocation5 + $0x51] ss:$2 sm:$0xff]  ;;  %15300 = vst.msk [vmem:[#allocation5 + $0x60] sm:$0xff] %vm15287_vm5, %v15267_v29  ;;  %15303 = vst.msk [vmem:[#allocation5 + $0x78] sm:$0xff] %vm15287_vm5, %v15270_v63 }
 0x955   : > { %v15393_v10 = vmax.f32 %v15356_v30, %v15372_v31  ;;  %v15324_v38 = vld [vmem:[#allocation5 + $0x40] ss:$2 sm:$0xff]  ;;  %v15340_v6 = vld [vmem:[#allocation5 + $0x41] ss:$2 sm:$0xff]  ;;  %15301 = vst.msk [vmem:[#allocation5 + $0x68] sm:$0xff] %vm15287_vm5, %v15268_v9  ;;  %v19867_v37 = vpop.f32.mrb[144].mxu1 }
 0x956   : > { %v15385_v20 = vmax.f32 %v15324_v38, %v15340_v6  ;;  %v15241_v12 = vadd.f32 %v19867_v37, %v24207_v13  ;;  %v15121_v45 = vpop.f32.mrb[145].mxu1 }
 0x957   : > { %v15239_v58 = vadd.f32 %v24207_v13, %v15121_v45  ;;  %v19868_v48 = vpop.f32.mrb[146].mxu1 }
 0x958   : > { %v15401_v32 = vmax.f32 %v15385_v20, %v15393_v10  ;;  %v15273_v40 = vmax.f32 %v15241_v12, 0.0  ;;  %v15242_v42 = vadd.f32 %v19868_v48, %v24207_v13  ;;  %v15124_v19 = vpop.f32.mrb[147].mxu1 }
 0x959   : > { %v15271_v34 = vmax.f32 %v15239_v58, 0.0  ;;  %v15240_v21 = vadd.f32 %v24207_v13, %v15124_v19 }
 0x95a   : > { %v15409_v25 = vpack.c.bf16 %v15401_v32, %v15401_v32  ;;  %15306 = vst.msk [vmem:[#allocation5 + $0x90] sm:$0xff] %vm15287_vm5, %v15273_v40  ;;  %v15274_v24 = vmax.f32 %v15242_v42, 0.0 }
 0x95b   : > { %v15358_v14 = vld [vmem:[#allocation5 + $0x70] ss:$2 sm:$0xff]  ;;  %v15374_v11 = vld [vmem:[#allocation5 + $0x71] ss:$2 sm:$0xff]  ;;  %15304 = vst.msk [vmem:[#allocation5 + $0x80] sm:$0xff] %vm15287_vm5, %v15271_v34  ;;  %v15272_v5 = vmax.f32 %v15240_v21, 0.0 }
 0x95c   : > { %15418 = vst.msk [vmem:[%s24231_s27 + $0x8] sm:$0xf] %vm15415_vm6, %v15409_v25  ;;  %v15394_v26 = vmax.f32 %v15358_v14, %v15374_v11  ;;  %v15326_v41 = vld [vmem:[#allocation5 + $0x60] ss:$2 sm:$0xff]  ;;  %v15342_v1 = vld [vmem:[#allocation5 + $0x61] ss:$2 sm:$0xff] }
 0x95d   : > { %15307 = vst.msk [vmem:[#allocation5 + $0x98] sm:$0xff] %vm15287_vm5, %v15274_v24  ;;  %v15386_v17 = vmax.f32 %v15326_v41, %v15342_v1  ;;  %15305 = vst.msk [vmem:[#allocation5 + $0x88] sm:$0xff] %vm15287_vm5, %v15272_v5  ;;  %v19871_v16 = vpop.f32.mrb[148].mxu1 }
 0x95e   : > { %v15245_v52 = vadd.f32 %v19871_v16, %v24207_v13  ;;  %v15137_v7 = vpop.f32.mrb[149].mxu1 }
 0x95f   : > { %v15402_v36 = vmax.f32 %v15386_v17, %v15394_v26  ;;  %v15243_v56 = vadd.f32 %v24207_v13, %v15137_v7  ;;  %v19872_v23 = vpop.f32.mrb[150].mxu1 }
 0x960   : > { %v15277_v18 = vmax.f32 %v15245_v52, 0.0  ;;  %v15246_v0 = vadd.f32 %v19872_v23, %v24207_v13  ;;  %v15140_v61 = vpop.f32.mrb[151].mxu1 }
 0x961   : > { %v15410_v59 = vpack.c.bf16 %v15402_v36, %v15402_v36  ;;  %v15275_v28 = vmax.f32 %v15243_v56, 0.0  ;;  %v15244_v43 = vadd.f32 %v24207_v13, %v15140_v61 }
 0x962   : > { %15310 = vst.msk [vmem:[#allocation5 + $0xb0] sm:$0xff] %vm15287_vm5, %v15277_v18  ;;  %v15278_v33 = vmax.f32 %v15246_v0, 0.0 }
 0x963   : > { %15419 = vst.msk [vmem:[%s24231_s27 + $0xc] sm:$0xf] %vm15415_vm6, %v15410_v59  ;;  %v15276_v50 = vmax.f32 %v15244_v43, 0.0 }
 0x964   : > { %v15360_v51 = vld [vmem:[#allocation5 + $0x90] ss:$2 sm:$0xff]  ;;  %v15376_v8 = vld [vmem:[#allocation5 + $0x91] ss:$2 sm:$0xff]  ;;  %15308 = vst.msk [vmem:[#allocation5 + $0xa0] sm:$0xff] %vm15287_vm5, %v15275_v28  ;;  %15311 = vst.msk [vmem:[#allocation5 + $0xb8] sm:$0xff] %vm15287_vm5, %v15278_v33 }
 0x965   : > { %v15395_v53 = vmax.f32 %v15360_v51, %v15376_v8  ;;  %v15328_v46 = vld [vmem:[#allocation5 + $0x80] ss:$2 sm:$0xff]  ;;  %v15344_v15 = vld [vmem:[#allocation5 + $0x81] ss:$2 sm:$0xff]  ;;  %15309 = vst.msk [vmem:[#allocation5 + $0xa8] sm:$0xff] %vm15287_vm5, %v15276_v50  ;;  %v19875_v44 = vpop.f32.mrb[152].mxu1 }
 0x966   : > { %v15387_v55 = vmax.f32 %v15328_v46, %v15344_v15  ;;  %v15249_v57 = vadd.f32 %v19875_v44, %v24207_v13  ;;  %v15153_v60 = vpop.f32.mrb[153].mxu1 }
 0x967   : > { %v15247_v49 = vadd.f32 %v24207_v13, %v15153_v60  ;;  %v19876_v27 = vpop.f32.mrb[154].mxu1 }
 0x968   : > { %v15403_v22 = vmax.f32 %v15387_v55, %v15395_v53  ;;  %v15281_v47 = vmax.f32 %v15249_v57, 0.0  ;;  %v15250_v2 = vadd.f32 %v19876_v27, %v24207_v13  ;;  %v15156_v54 = vpop.f32.mrb[155].mxu1 }
 0x969   : > { %v15279_v4 = vmax.f32 %v15247_v49, 0.0  ;;  %v15248_v62 = vadd.f32 %v24207_v13, %v15156_v54 }
 0x96a   : > { %v15411_v39 = vpack.c.bf16 %v15403_v22, %v15403_v22  ;;  %15314 = vst.msk [vmem:[#allocation5 + $0xd0] sm:$0xff] %vm15287_vm5, %v15281_v47  ;;  %v15282_v35 = vmax.f32 %v15250_v2, 0.0 }
 0x96b   : > { %v15362_v29 = vld [vmem:[#allocation5 + $0xb0] ss:$2 sm:$0xff]  ;;  %v15378_v3 = vld [vmem:[#allocation5 + $0xb1] ss:$2 sm:$0xff]  ;;  %15312 = vst.msk [vmem:[#allocation5 + $0xc0] sm:$0xff] %vm15287_vm5, %v15279_v4  ;;  %v15280_v63 = vmax.f32 %v15248_v62, 0.0 }
 0x96c   : > { %15420 = vst.msk [vmem:[%s24231_s27 + $0x10] sm:$0xf] %vm15415_vm6, %v15411_v39  ;;  %v15396_v30 = vmax.f32 %v15362_v29, %v15378_v3  ;;  %v15330_v31 = vld [vmem:[#allocation5 + $0xa0] ss:$2 sm:$0xff]  ;;  %v15346_v9 = vld [vmem:[#allocation5 + $0xa1] ss:$2 sm:$0xff] }
 0x96d   : > { %15315 = vst.msk [vmem:[#allocation5 + $0xd8] sm:$0xff] %vm15287_vm5, %v15282_v35  ;;  %v15388_v10 = vmax.f32 %v15330_v31, %v15346_v9  ;;  %15313 = vst.msk [vmem:[#allocation5 + $0xc8] sm:$0xff] %vm15287_vm5, %v15280_v63  ;;  %v19879_v38 = vpop.f32.mrb[156].mxu1 }
 0x96e   : > { %v15253_v6 = vadd.f32 %v19879_v38, %v24207_v13  ;;  %v15169_v20 = vpop.f32.mrb[157].mxu1 }
 0x96f   : > { %v15404_v37 = vmax.f32 %v15388_v10, %v15396_v30  ;;  %v15251_v12 = vadd.f32 %v24207_v13, %v15169_v20  ;;  %v19880_v45 = vpop.f32.mrb[158].mxu1 }
 0x970   : > { %v15285_v32 = vmax.f32 %v15253_v6, 0.0  ;;  %v15254_v58 = vadd.f32 %v19880_v45, %v24207_v13  ;;  %v15172_v48 = vpop.f32.mrb[159].mxu1 }
 0x971   : > { %v15412_v40 = vpack.c.bf16 %v15404_v37, %v15404_v37  ;;  %v15283_v42 = vmax.f32 %v15251_v12, 0.0  ;;  %v15252_v19 = vadd.f32 %v24207_v13, %v15172_v48 }
 0x972   : > { %15318 = vst.msk [vmem:[#allocation5 + $0xf0] sm:$0xff] %vm15287_vm5, %v15285_v32  ;;  %v15286_v25 = vmax.f32 %v15254_v58, 0.0 }
 0x973   : > { %15421 = vst.msk [vmem:[%s24231_s27 + $0x14] sm:$0xf] %vm15415_vm6, %v15412_v40  ;;  %v15284_v24 = vmax.f32 %v15252_v19, 0.0 }
 0x974   : > { %v15364_v34 = vld [vmem:[#allocation5 + $0xd0] ss:$2 sm:$0xff]  ;;  %v15380_v21 = vld [vmem:[#allocation5 + $0xd1] ss:$2 sm:$0xff]  ;;  %15316 = vst.msk [vmem:[#allocation5 + $0xe0] sm:$0xff] %vm15287_vm5, %v15283_v42  ;;  %15319 = vst.msk [vmem:[#allocation5 + $0xf8] sm:$0xff] %vm15287_vm5, %v15286_v25 }
 0x975   : > { %v15397_v14 = vmax.f32 %v15364_v34, %v15380_v21  ;;  %v15332_v11 = vld [vmem:[#allocation5 + $0xc0] ss:$2 sm:$0xff]  ;;  %v15348_v5 = vld [vmem:[#allocation5 + $0xc1] ss:$2 sm:$0xff]  ;;  %15317 = vst.msk [vmem:[#allocation5 + $0xe8] sm:$0xff] %vm15287_vm5, %v15284_v24 }
 0x976   : > { %v15389_v26 = vmax.f32 %v15332_v11, %v15348_v5 }
 0x978   : > { %v15405_v13 = vmax.f32 %v15389_v26, %v15397_v14 }
 0x97a   : > { %v15413_v41 = vpack.c.bf16 %v15405_v13, %v15405_v13 }
 0x97b   : > { %v15366_v1 = vld [vmem:[#allocation5 + $0xf0] ss:$2 sm:$0xff]  ;;  %v15382_v17 = vld [vmem:[#allocation5 + $0xf1] ss:$2 sm:$0xff] }
 0x97c   : > { %15422 = vst.msk [vmem:[%s24231_s27 + $0x18] sm:$0xf] %vm15415_vm6, %v15413_v41  ;;  %v15398_v16 = vmax.f32 %v15366_v1, %v15382_v17  ;;  %v15334_v52 = vld [vmem:[#allocation5 + $0xe0] ss:$2 sm:$0xff]  ;;  %v15350_v7 = vld [vmem:[#allocation5 + $0xe1] ss:$2 sm:$0xff] }
 0x97d   : > { %v15390_v36 = vmax.f32 %v15334_v52, %v15350_v7 }
 0x97f   : > { %v15406_v56 = vmax.f32 %v15390_v36, %v15398_v16 }
 0x981   : > { %v15414_v23 = vpack.c.bf16 %v15406_v56, %v15406_v56 }
 0x983   : > { %15423 = vst.msk [vmem:[%s24231_s27 + $0x1c] sm:$0xf] %vm15415_vm6, %v15414_v23 }
 0x984 PF: > { %s15_s18 = sadd.s32 1, %s21768_s18  }
 0x985   : > { %p12_p4 = scmp.ge.s32.totalorder %s15_s18, 4  }
 0x987   :  { %14 = sbr.rel (!%p12_p4) target bundleno = 1 (0x1), region = 249 }

</bundles_post_ra>
